<compile_context>
chip_gen: v6e
topology: v6e:2x2x1
jax: 0.10.0
libtpu: 0.0.40
codegen_flags: <defaults>
</compile_context>

<pallas_src>
import functools

import jax
import jax.numpy as jnp
from jax.experimental import pallas as pl
from jax.experimental.pallas import tpu as pltpu


# ---------------------------------------------------------------------------
# Pallas kernels
# ---------------------------------------------------------------------------
def _conv3d_kernel(x_ref, w_ref, b_ref, o_ref, *, k, hw, wstep, relu, pool):
    """Implicit-GEMM 'same' 3D conv for one (batch, output-depth) grid cell.

    x_ref : (1, Dp, Hp*W, k*Cin)  bf16  padded activation; the k W-axis taps are
                                        pre-gathered into the channel axis.
    w_ref : (k, k, k*Cin, Cout)   bf16  conv weight with BN scale folded in.
    b_ref : (1, Cout)             f32   conv bias + BN shift folded in.
    o_ref : (1, 1, H*W, Cout)     bf16  if not pool
            (1, 1, Cout)          f32   if pool (global max over D,H,W fused)
    """
    z = pl.program_id(1)
    cout = w_ref.shape[-1]
    acc = jnp.zeros((hw, cout), jnp.float32)
    for dz in range(k):
        plane = x_ref[0, z + dz]                        # (Hp*W, k*Cin), dynamic outer idx
        for dy in range(k):
            a = plane[dy * wstep:dy * wstep + hw, :]    # (H*W, k*Cin)
            acc = acc + jnp.dot(a, w_ref[dz, dy],
                                preferred_element_type=jnp.float32)
    y = acc + b_ref[...]
    if relu:
        y = jnp.maximum(y, 0.0)
    if pool:
        local = jnp.max(y, axis=0, keepdims=True)       # (1, Cout)

        @pl.when(z == 0)
        def _():
            o_ref[0] = local

        @pl.when(z > 0)
        def _():
            o_ref[0] = jnp.maximum(o_ref[0], local)
    else:
        o_ref[0, 0] = y.astype(o_ref.dtype)


def _head_kernel(feat_ref, xm_ref, rw_ref, rb_ref,
                 w1_ref, b1_ref, w2_ref, b2_ref, w3_ref, b3_ref, o_ref):
    """Residual add + full classifier (fc1/fc2/fc3) in one kernel.

    Residual branch collapsed algebraically:
        AdaptiveAvgPool3d(Conv3d_1x1(x)) == mean(x) * w_res + b_res.
    Eval-mode BatchNorm1d layers are folded into the following Linear weights,
    so the chain is Linear -> ReLU -> Linear' -> ReLU -> Linear'.
    """
    res = xm_ref[...] * rw_ref[...] + rb_ref[...]                        # (B, 256)
    z = feat_ref[...] + res
    h = jnp.dot(z, w1_ref[...], preferred_element_type=jnp.float32) + b1_ref[...]
    h = jnp.maximum(h, 0.0)
    h = jnp.dot(h, w2_ref[...], preferred_element_type=jnp.float32) + b2_ref[...]
    h = jnp.maximum(h, 0.0)
    o_ref[...] = jnp.dot(h, w3_ref[...],
                         preferred_element_type=jnp.float32) + b3_ref[...]


# ---------------------------------------------------------------------------
# Layer wrappers (thin XLA glue around the kernels)
# ---------------------------------------------------------------------------
def conv3d_bn_relu(x, w, b, *, pool=False):
    """'same' Conv3d + folded eval-BN + ReLU (+ optional fused global max pool).

    x: (B, D, H, W, Cin);  w: (k, k, k, Cin, Cout) with BN scale folded in;
    b: (1, Cout) with conv bias + BN shift folded in.
    """
    k = w.shape[0]
    cin, cout = w.shape[3], w.shape[4]
    B, D, H, W, _ = x.shape
    p = (k - 1) // 2
    Dp, Hp = D + 2 * p, H + 2 * p

    xp = jnp.pad(x, ((0, 0), (p, p), (p, p), (p, p), (0, 0)))
    # Partial im2col: only the W-axis taps are gathered into the channel axis
    # (k*Cin-wide contraction); D/H taps stay implicit in-kernel -> no k^3 HBM blow-up.
    xw = jnp.concatenate([xp[:, :, :, dx:dx + W, :] for dx in range(k)], axis=-1)
    xw = xw.reshape(B, Dp, Hp * W, k * cin).astype(jnp.bfloat16)
    wg = w.reshape(k, k, k * cin, cout).astype(jnp.bfloat16)

    kern = functools.partial(_conv3d_kernel, k=k, hw=H * W, wstep=W,
                             relu=True, pool=pool)
    if pool:
        out_shape = jax.ShapeDtypeStruct((B, 1, cout), jnp.float32)
        out_spec = pl.BlockSpec((1, 1, cout), lambda bb, zz: (bb, 0, 0))
        dims = ("parallel", "arbitrary")   # z reduces (max) into the resident output
    else:
        out_shape = jax.ShapeDtypeStruct((B, D, H * W, cout), jnp.bfloat16)
        out_spec = pl.BlockSpec((1, 1, H * W, cout), lambda bb, zz: (bb, zz, 0, 0))
        dims = ("parallel", "parallel")

    out = pl.pallas_call(
        kern,
        out_shape=out_shape,
        grid=(B, D),
        in_specs=[
            pl.BlockSpec((1, Dp, Hp * W, k * cin), lambda bb, zz: (bb, 0, 0, 0)),
            pl.BlockSpec((k, k, k * cin, cout), lambda bb, zz: (0, 0, 0, 0)),
            pl.BlockSpec((1, cout), lambda bb, zz: (0, 0)),
        ],
        out_specs=out_spec,
        compiler_params=pltpu.CompilerParams(dimension_semantics=dims),
    )(xw, wg, b)

    if pool:
        return out.reshape(B, cout)                 # (B, Cout) f32
    return out.reshape(B, D, H, W, cout)            # (B, D, H, W, Cout) bf16


def maxpool3d_2(x):
    # TODO(synk): MaxPool3d(2) stays as an XLA reshape+max (tiny, not the hot path).
    B, D, H, W, C = x.shape
    x = x.reshape(B, D // 2, 2, H // 2, 2, W // 2, 2, C)
    return x.max(axis=(2, 4, 6))


def classifier_head(feat, xmean, params):
    rw = params["res_conv"]["w"].reshape(1, -1).astype(jnp.float32)   # (1, 256)
    rb = params["res_conv"]["b"].reshape(1, -1).astype(jnp.float32)
    w1, b1, w2, b2, w3, b3 = _fold_classifier(params)
    return pl.pallas_call(
        _head_kernel,
        out_shape=jax.ShapeDtypeStruct((feat.shape[0], w3.shape[1]), jnp.float32),
    )(feat.astype(jnp.float32), xmean, rw, rb, w1, b1, w2, b2, w3, b3)


# ---------------------------------------------------------------------------
# Parameter folding (eval-mode BN -> affine folded into weights/bias)
# ---------------------------------------------------------------------------
def _fold_conv_bn(conv, bn, eps=1e-5):
    s = bn["gamma"] * jax.lax.rsqrt(bn["var"] + eps)
    w = conv["w"] * s                                   # scale output channels
    b = bn["beta"] + (conv["b"] - bn["mean"]) * s
    return w.astype(jnp.float32), b.reshape(1, -1).astype(jnp.float32)


def _fold_classifier(params, eps=1e-5):
    """Linear -> ReLU -> BN1d(eval) -> [Dropout] -> Linear ...:
    fold each BN affine into the *following* Linear layer."""
    bn1, bn2 = params["bnf1"], params["bnf2"]
    s1 = bn1["gamma"] * jax.lax.rsqrt(bn1["var"] + eps)
    t1 = bn1["beta"] - bn1["mean"] * s1
    s2 = bn2["gamma"] * jax.lax.rsqrt(bn2["var"] + eps)
    t2 = bn2["beta"] - bn2["mean"] * s2
    w1, b1 = params["fc1"]["w"], params["fc1"]["b"]
    w2 = params["fc2"]["w"] * s1[:, None]
    b2 = params["fc2"]["b"] + t1 @ params["fc2"]["w"]
    w3 = params["fc3"]["w"] * s2[:, None]
    b3 = params["fc3"]["b"] + t2 @ params["fc3"]["w"]
    return (w1.astype(jnp.float32), b1.reshape(1, -1).astype(jnp.float32),
            w2.astype(jnp.float32), b2.reshape(1, -1).astype(jnp.float32),
            w3.astype(jnp.float32), b3.reshape(1, -1).astype(jnp.float32))


# ---------------------------------------------------------------------------
# Full forward pass (inference semantics: eval-mode BN, dropout = identity)
# ---------------------------------------------------------------------------
def forward(x_ncdhw, params):
    x = jnp.transpose(x_ncdhw, (0, 2, 3, 4, 1)).astype(jnp.float32)   # NDHWC
    B = x.shape[0]

    # Residual branch collapsed: AvgPool3d(Conv1x1(x)) == Conv1x1(mean(x)).
    xmean = jnp.mean(x, axis=(1, 2, 3, 4)).reshape(B, 1)

    w1, b1 = _fold_conv_bn(params["conv1"], params["bn1"])
    w2, b2 = _fold_conv_bn(params["conv2"], params["bn2"])
    w3, b3 = _fold_conv_bn(params["conv3"], params["bn3"])
    w4, b4 = _fold_conv_bn(params["conv4"], params["bn4"])

    h = conv3d_bn_relu(x, w1, b1)                   # (B,8,8,8,32)  bf16
    h = conv3d_bn_relu(h, w2, b2)                   # (B,8,8,8,64)  bf16
    h = maxpool3d_2(h)                              # (B,4,4,4,64)
    h = conv3d_bn_relu(h, w3, b3)                   # (B,4,4,4,128) bf16
    feat = conv3d_bn_relu(h, w4, b4, pool=True)     # (B,256) f32, AdaptiveMaxPool fused
    return classifier_head(feat, xmean, params)     # (B,2) f32


# ---------------------------------------------------------------------------
# Deterministic parameter init (synthetic -- no checkpoint)
# ---------------------------------------------------------------------------
def _conv_init(key, k, cin, cout):
    kw, kb = jax.random.split(key)
    return {"w": 0.05 * jax.random.normal(kw, (k, k, k, cin, cout), jnp.float32),
            "b": 0.05 * jax.random.normal(kb, (cout,), jnp.float32)}


def _bn_init(key, c):
    k1, k2, k3, k4 = jax.random.split(key, 4)
    return {"gamma": 1.0 + 0.1 * jax.random.normal(k1, (c,), jnp.float32),
            "beta": 0.1 * jax.random.normal(k2, (c,), jnp.float32),
            "mean": 0.1 * jax.random.normal(k3, (c,), jnp.float32),
            "var": 0.8 + 0.4 * jax.random.uniform(k4, (c,), jnp.float32)}


def _fc_init(key, cin, cout):
    kw, kb = jax.random.split(key)
    return {"w": 0.05 * jax.random.normal(kw, (cin, cout), jnp.float32),
            "b": 0.05 * jax.random.normal(kb, (cout,), jnp.float32)}


def init_params(key):
    ks = jax.random.split(key, 14)
    return {
        "conv1": _conv_init(ks[0], 3, 1, 32),    "bn1": _bn_init(ks[1], 32),
        "conv2": _conv_init(ks[2], 5, 32, 64),   "bn2": _bn_init(ks[3], 64),
        "conv3": _conv_init(ks[4], 3, 64, 128),  "bn3": _bn_init(ks[5], 128),
        "conv4": _conv_init(ks[6], 3, 128, 256), "bn4": _bn_init(ks[7], 256),
        "res_conv": _conv_init(ks[8], 1, 1, 256),
        "fc1": _fc_init(ks[9], 256, 128),        "bnf1": _bn_init(ks[10], 128),
        "fc2": _fc_init(ks[11], 128, 64),        "bnf2": _bn_init(ks[12], 64),
        "fc3": _fc_init(ks[13], 64, 2),
    }


if __name__ == "__main__":
    key = jax.random.PRNGKey(0)
    pkey, xkey = jax.random.split(key)
    params = init_params(pkey)

    # Small input consistent with the module: (batch=2, channels=1, 8x8x8 volume)
    x = jax.random.normal(xkey, (2, 1, 8, 8, 8), dtype=jnp.float32)

    fwd = jax.jit(forward)
    out = jax.block_until_ready(fwd(x, params))
    assert out.shape == (2, 2), out.shape
    assert bool(jnp.all(jnp.isfinite(out)))
    print("KERNEL_OK")
</pallas_src>

<mosaic_0001>
module attributes {stable_mosaic.version = 11 : i64} {
  func.func @_conv3d_kernel(%arg0: i32, %arg1: i32, %arg2: memref<1x10x80x3xbf16, #tpu.memory_space<vmem>>, %arg3: memref<3x3x3x32xbf16, #tpu.memory_space<vmem>>, %arg4: memref<1x32xf32, #tpu.memory_space<vmem>>, %arg5: memref<1x1x64x32xbf16, #tpu.memory_space<vmem>>) attributes {dimension_semantics = [#tpu.dimension_semantics<parallel>, #tpu.dimension_semantics<parallel>], iteration_bounds = array<i64: 2, 8>, scalar_prefetch = 0 : i64, scratch_operands = 0 : i64, tpu.core_type = #tpu.core_type<tc>, window_params = [{transform_indices = @transform_0, window_bounds = array<i64: 1, 10, 80, 3>}, {pipeline_mode = #tpu.pipeline_mode<synchronous>, transform_indices = @transform_1, window_bounds = array<i64: 3, 3, 3, 32>}, {pipeline_mode = #tpu.pipeline_mode<synchronous>, transform_indices = @transform_2, window_bounds = array<i64: 1, 32>}, {transform_indices = @transform_3, window_bounds = array<i64: 1, 1, 64, 32>}]} {
    %cst = arith.constant 0.000000e+00 : f32
    %0 = vector.broadcast %cst : f32 to vector<64x32xf32>
    %c0_i32 = arith.constant 0 : i32
    %1 = arith.addi %arg1, %c0_i32 : i32
    %c0 = arith.constant 0 : index
    %2 = arith.index_cast %1 : i32 to index
    %c0_0 = arith.constant 0 : index
    %c0_1 = arith.constant 0 : index
    %3 = vector.load %arg2[%c0, %2, %c0_0, %c0_1] : memref<1x10x80x3xbf16, #tpu.memory_space<vmem>>, vector<1x1x80x3xbf16>
    %4 = vector.shape_cast %3 : vector<1x1x80x3xbf16> to vector<80x3xbf16>
    %5 = vector.extract_strided_slice %4 {offsets = [0, 0], sizes = [64, 3], strides = [1, 1]} : vector<80x3xbf16> to vector<64x3xbf16>
    %c0_2 = arith.constant 0 : index
    %c0_3 = arith.constant 0 : index
    %c0_4 = arith.constant 0 : index
    %c0_5 = arith.constant 0 : index
    %6 = vector.load %arg3[%c0_2, %c0_3, %c0_4, %c0_5] : memref<3x3x3x32xbf16, #tpu.memory_space<vmem>>, vector<1x1x3x32xbf16>
    %7 = vector.shape_cast %6 : vector<1x1x3x32xbf16> to vector<3x32xbf16>
    %cst_6 = arith.constant dense<0.000000e+00> : vector<64x32xf32>
    %8 = tpu.matmul %5, %7, %cst_6 {dimension_numbers = #tpu.dot_dimension_numbers<[1], [0], [0], [1], [0, 0, 1, 1], [], []>} : vector<64x3xbf16>, vector<3x32xbf16>, vector<64x32xf32> -> vector<64x32xf32>
    %9 = arith.addf %0, %8 : vector<64x32xf32>
    %10 = vector.extract_strided_slice %4 {offsets = [8, 0], sizes = [64, 3], strides = [1, 1]} : vector<80x3xbf16> to vector<64x3xbf16>
    %c0_7 = arith.constant 0 : index
    %c1 = arith.constant 1 : index
    %c0_8 = arith.constant 0 : index
    %c0_9 = arith.constant 0 : index
    %11 = vector.load %arg3[%c0_7, %c1, %c0_8, %c0_9] : memref<3x3x3x32xbf16, #tpu.memory_space<vmem>>, vector<1x1x3x32xbf16>
    %12 = vector.shape_cast %11 : vector<1x1x3x32xbf16> to vector<3x32xbf16>
    %cst_10 = arith.constant dense<0.000000e+00> : vector<64x32xf32>
    %13 = tpu.matmul %10, %12, %cst_10 {dimension_numbers = #tpu.dot_dimension_numbers<[1], [0], [0], [1], [0, 0, 1, 1], [], []>} : vector<64x3xbf16>, vector<3x32xbf16>, vector<64x32xf32> -> vector<64x32xf32>
    %14 = arith.addf %9, %13 : vector<64x32xf32>
    %15 = vector.extract_strided_slice %4 {offsets = [16, 0], sizes = [64, 3], strides = [1, 1]} : vector<80x3xbf16> to vector<64x3xbf16>
    %c0_11 = arith.constant 0 : index
    %c2 = arith.constant 2 : index
    %c0_12 = arith.constant 0 : index
    %c0_13 = arith.constant 0 : index
    %16 = vector.load %arg3[%c0_11, %c2, %c0_12, %c0_13] : memref<3x3x3x32xbf16, #tpu.memory_space<vmem>>, vector<1x1x3x32xbf16>
    %17 = vector.shape_cast %16 : vector<1x1x3x32xbf16> to vector<3x32xbf16>
    %cst_14 = arith.constant dense<0.000000e+00> : vector<64x32xf32>
    %18 = tpu.matmul %15, %17, %cst_14 {dimension_numbers = #tpu.dot_dimension_numbers<[1], [0], [0], [1], [0, 0, 1, 1], [], []>} : vector<64x3xbf16>, vector<3x32xbf16>, vector<64x32xf32> -> vector<64x32xf32>
    %19 = arith.addf %14, %18 : vector<64x32xf32>
    %c1_i32 = arith.constant 1 : i32
    %20 = arith.addi %arg1, %c1_i32 : i32
    %c0_15 = arith.constant 0 : index
    %21 = arith.index_cast %20 : i32 to index
    %c0_16 = arith.constant 0 : index
    %c0_17 = arith.constant 0 : index
    %22 = vector.load %arg2[%c0_15, %21, %c0_16, %c0_17] : memref<1x10x80x3xbf16, #tpu.memory_space<vmem>>, vector<1x1x80x3xbf16>
    %23 = vector.shape_cast %22 : vector<1x1x80x3xbf16> to vector<80x3xbf16>
    %24 = vector.extract_strided_slice %23 {offsets = [0, 0], sizes = [64, 3], strides = [1, 1]} : vector<80x3xbf16> to vector<64x3xbf16>
    %c1_18 = arith.constant 1 : index
    %c0_19 = arith.constant 0 : index
    %c0_20 = arith.constant 0 : index
    %c0_21 = arith.constant 0 : index
    %25 = vector.load %arg3[%c1_18, %c0_19, %c0_20, %c0_21] : memref<3x3x3x32xbf16, #tpu.memory_space<vmem>>, vector<1x1x3x32xbf16>
    %26 = vector.shape_cast %25 : vector<1x1x3x32xbf16> to vector<3x32xbf16>
    %cst_22 = arith.constant dense<0.000000e+00> : vector<64x32xf32>
    %27 = tpu.matmul %24, %26, %cst_22 {dimension_numbers = #tpu.dot_dimension_numbers<[1], [0], [0], [1], [0, 0, 1, 1], [], []>} : vector<64x3xbf16>, vector<3x32xbf16>, vector<64x32xf32> -> vector<64x32xf32>
    %28 = arith.addf %19, %27 : vector<64x32xf32>
    %29 = vector.extract_strided_slice %23 {offsets = [8, 0], sizes = [64, 3], strides = [1, 1]} : vector<80x3xbf16> to vector<64x3xbf16>
    %c1_23 = arith.constant 1 : index
    %c1_24 = arith.constant 1 : index
    %c0_25 = arith.constant 0 : index
    %c0_26 = arith.constant 0 : index
    %30 = vector.load %arg3[%c1_23, %c1_24, %c0_25, %c0_26] : memref<3x3x3x32xbf16, #tpu.memory_space<vmem>>, vector<1x1x3x32xbf16>
    %31 = vector.shape_cast %30 : vector<1x1x3x32xbf16> to vector<3x32xbf16>
    %cst_27 = arith.constant dense<0.000000e+00> : vector<64x32xf32>
    %32 = tpu.matmul %29, %31, %cst_27 {dimension_numbers = #tpu.dot_dimension_numbers<[1], [0], [0], [1], [0, 0, 1, 1], [], []>} : vector<64x3xbf16>, vector<3x32xbf16>, vector<64x32xf32> -> vector<64x32xf32>
    %33 = arith.addf %28, %32 : vector<64x32xf32>
    %34 = vector.extract_strided_slice %23 {offsets = [16, 0], sizes = [64, 3], strides = [1, 1]} : vector<80x3xbf16> to vector<64x3xbf16>
    %c1_28 = arith.constant 1 : index
    %c2_29 = arith.constant 2 : index
    %c0_30 = arith.constant 0 : index
    %c0_31 = arith.constant 0 : index
    %35 = vector.load %arg3[%c1_28, %c2_29, %c0_30, %c0_31] : memref<3x3x3x32xbf16, #tpu.memory_space<vmem>>, vector<1x1x3x32xbf16>
    %36 = vector.shape_cast %35 : vector<1x1x3x32xbf16> to vector<3x32xbf16>
    %cst_32 = arith.constant dense<0.000000e+00> : vector<64x32xf32>
    %37 = tpu.matmul %34, %36, %cst_32 {dimension_numbers = #tpu.dot_dimension_numbers<[1], [0], [0], [1], [0, 0, 1, 1], [], []>} : vector<64x3xbf16>, vector<3x32xbf16>, vector<64x32xf32> -> vector<64x32xf32>
    %38 = arith.addf %33, %37 : vector<64x32xf32>
    %c2_i32 = arith.constant 2 : i32
    %39 = arith.addi %arg1, %c2_i32 : i32
    %c0_33 = arith.constant 0 : index
    %40 = arith.index_cast %39 : i32 to index
    %c0_34 = arith.constant 0 : index
    %c0_35 = arith.constant 0 : index
    %41 = vector.load %arg2[%c0_33, %40, %c0_34, %c0_35] : memref<1x10x80x3xbf16, #tpu.memory_space<vmem>>, vector<1x1x80x3xbf16>
    %42 = vector.shape_cast %41 : vector<1x1x80x3xbf16> to vector<80x3xbf16>
    %43 = vector.extract_strided_slice %42 {offsets = [0, 0], sizes = [64, 3], strides = [1, 1]} : vector<80x3xbf16> to vector<64x3xbf16>
    %c2_36 = arith.constant 2 : index
    %c0_37 = arith.constant 0 : index
    %c0_38 = arith.constant 0 : index
    %c0_39 = arith.constant 0 : index
    %44 = vector.load %arg3[%c2_36, %c0_37, %c0_38, %c0_39] : memref<3x3x3x32xbf16, #tpu.memory_space<vmem>>, vector<1x1x3x32xbf16>
    %45 = vector.shape_cast %44 : vector<1x1x3x32xbf16> to vector<3x32xbf16>
    %cst_40 = arith.constant dense<0.000000e+00> : vector<64x32xf32>
    %46 = tpu.matmul %43, %45, %cst_40 {dimension_numbers = #tpu.dot_dimension_numbers<[1], [0], [0], [1], [0, 0, 1, 1], [], []>} : vector<64x3xbf16>, vector<3x32xbf16>, vector<64x32xf32> -> vector<64x32xf32>
    %47 = arith.addf %38, %46 : vector<64x32xf32>
    %48 = vector.extract_strided_slice %42 {offsets = [8, 0], sizes = [64, 3], strides = [1, 1]} : vector<80x3xbf16> to vector<64x3xbf16>
    %c2_41 = arith.constant 2 : index
    %c1_42 = arith.constant 1 : index
    %c0_43 = arith.constant 0 : index
    %c0_44 = arith.constant 0 : index
    %49 = vector.load %arg3[%c2_41, %c1_42, %c0_43, %c0_44] : memref<3x3x3x32xbf16, #tpu.memory_space<vmem>>, vector<1x1x3x32xbf16>
    %50 = vector.shape_cast %49 : vector<1x1x3x32xbf16> to vector<3x32xbf16>
    %cst_45 = arith.constant dense<0.000000e+00> : vector<64x32xf32>
    %51 = tpu.matmul %48, %50, %cst_45 {dimension_numbers = #tpu.dot_dimension_numbers<[1], [0], [0], [1], [0, 0, 1, 1], [], []>} : vector<64x3xbf16>, vector<3x32xbf16>, vector<64x32xf32> -> vector<64x32xf32>
    %52 = arith.addf %47, %51 : vector<64x32xf32>
    %53 = vector.extract_strided_slice %42 {offsets = [16, 0], sizes = [64, 3], strides = [1, 1]} : vector<80x3xbf16> to vector<64x3xbf16>
    %c2_46 = arith.constant 2 : index
    %c2_47 = arith.constant 2 : index
    %c0_48 = arith.constant 0 : index
    %c0_49 = arith.constant 0 : index
    %54 = vector.load %arg3[%c2_46, %c2_47, %c0_48, %c0_49] : memref<3x3x3x32xbf16, #tpu.memory_space<vmem>>, vector<1x1x3x32xbf16>
    %55 = vector.shape_cast %54 : vector<1x1x3x32xbf16> to vector<3x32xbf16>
    %cst_50 = arith.constant dense<0.000000e+00> : vector<64x32xf32>
    %56 = tpu.matmul %53, %55, %cst_50 {dimension_numbers = #tpu.dot_dimension_numbers<[1], [0], [0], [1], [0, 0, 1, 1], [], []>} : vector<64x3xbf16>, vector<3x32xbf16>, vector<64x32xf32> -> vector<64x32xf32>
    %57 = arith.addf %52, %56 : vector<64x32xf32>
    %c0_51 = arith.constant 0 : index
    %c0_52 = arith.constant 0 : index
    %58 = vector.load %arg4[%c0_51, %c0_52] : memref<1x32xf32, #tpu.memory_space<vmem>>, vector<1x32xf32>
    %59 = vector.broadcast %58 : vector<1x32xf32> to vector<64x32xf32>
    %60 = arith.addf %57, %59 : vector<64x32xf32>
    %cst_53 = arith.constant 0.000000e+00 : f32
    %61 = vector.broadcast %cst_53 : f32 to vector<64x32xf32>
    %62 = arith.maximumf %60, %61 : vector<64x32xf32>
    %63 = arith.truncf %62 : vector<64x32xf32> to vector<64x32xbf16>
    %c0_54 = arith.constant 0 : index
    %c0_55 = arith.constant 0 : index
    %c0_56 = arith.constant 0 : index
    %c0_57 = arith.constant 0 : index
    %64 = vector.load %arg5[%c0_54, %c0_55, %c0_56, %c0_57] : memref<1x1x64x32xbf16, #tpu.memory_space<vmem>>, vector<1x1x64x32xbf16>
    %65 = vector.shape_cast %64 : vector<1x1x64x32xbf16> to vector<64x32xbf16>
    %66 = vector.shape_cast %63 : vector<64x32xbf16> to vector<1x1x64x32xbf16>
    tpu.vector_store %arg5[%c0_54, %c0_55, %c0_56, %c0_57], %66 {strides = array<i32>} : memref<1x1x64x32xbf16, #tpu.memory_space<vmem>>, vector<1x1x64x32xbf16>,
    return
  }
  func.func @transform_0(%arg0: i32, %arg1: i32) -> (i32, i32, i32, i32) {
    %c0_i32 = arith.constant 0 : i32
    %c0_i32_0 = arith.constant 0 : i32
    %c0_i32_1 = arith.constant 0 : i32
    %c0_i32_2 = arith.constant 0 : i32
    return %arg0, %c0_i32, %c0_i32_0, %c0_i32_1 : i32, i32, i32, i32
  }
  func.func @transform_1(%arg0: i32, %arg1: i32) -> (i32, i32, i32, i32) {
    %c0_i32 = arith.constant 0 : i32
    %c0_i32_0 = arith.constant 0 : i32
    %c0_i32_1 = arith.constant 0 : i32
    %c0_i32_2 = arith.constant 0 : i32
    %c0_i32_3 = arith.constant 0 : i32
    return %c0_i32, %c0_i32_0, %c0_i32_1, %c0_i32_2 : i32, i32, i32, i32
  }
  func.func @transform_2(%arg0: i32, %arg1: i32) -> (i32, i32) {
    %c0_i32 = arith.constant 0 : i32
    %c0_i32_0 = arith.constant 0 : i32
    %c0_i32_1 = arith.constant 0 : i32
    return %c0_i32, %c0_i32_0 : i32, i32
  }
  func.func @transform_3(%arg0: i32, %arg1: i32) -> (i32, i32, i32, i32) {
    %c0_i32 = arith.constant 0 : i32
    %c0_i32_0 = arith.constant 0 : i32
    %c0_i32_1 = arith.constant 0 : i32
    return %arg0, %arg1, %c0_i32, %c0_i32_0 : i32, i32, i32, i32
  }
}

module attributes {stable_mosaic.version = 11 : i64} {
  func.func @_conv3d_kernel(%arg0: i32, %arg1: i32, %arg2: memref<1x12x96x160xbf16, #tpu.memory_space<vmem>>, %arg3: memref<5x5x160x64xbf16, #tpu.memory_space<vmem>>, %arg4: memref<1x64xf32, #tpu.memory_space<vmem>>, %arg5: memref<1x1x64x64xbf16, #tpu.memory_space<vmem>>) attributes {dimension_semantics = [#tpu.dimension_semantics<parallel>, #tpu.dimension_semantics<parallel>], iteration_bounds = array<i64: 2, 8>, scalar_prefetch = 0 : i64, scratch_operands = 0 : i64, tpu.core_type = #tpu.core_type<tc>, window_params = [{transform_indices = @transform_0, window_bounds = array<i64: 1, 12, 96, 160>}, {pipeline_mode = #tpu.pipeline_mode<synchronous>, transform_indices = @transform_1, window_bounds = array<i64: 5, 5, 160, 64>}, {pipeline_mode = #tpu.pipeline_mode<synchronous>, transform_indices = @transform_2, window_bounds = array<i64: 1, 64>}, {transform_indices = @transform_3, window_bounds = array<i64: 1, 1, 64, 64>}]} {
    %cst = arith.constant 0.000000e+00 : f32
    %0 = vector.broadcast %cst : f32 to vector<64x64xf32>
    %c0_i32 = arith.constant 0 : i32
    %1 = arith.addi %arg1, %c0_i32 : i32
    %c0 = arith.constant 0 : index
    %2 = arith.index_cast %1 : i32 to index
    %c0_0 = arith.constant 0 : index
    %c0_1 = arith.constant 0 : index
    %3 = vector.load %arg2[%c0, %2, %c0_0, %c0_1] : memref<1x12x96x160xbf16, #tpu.memory_space<vmem>>, vector<1x1x96x160xbf16>
    %4 = vector.shape_cast %3 : vector<1x1x96x160xbf16> to vector<96x160xbf16>
    %5 = vector.extract_strided_slice %4 {offsets = [0, 0], sizes = [64, 160], strides = [1, 1]} : vector<96x160xbf16> to vector<64x160xbf16>
    %c0_2 = arith.constant 0 : index
    %c0_3 = arith.constant 0 : index
    %c0_4 = arith.constant 0 : index
    %c0_5 = arith.constant 0 : index
    %6 = vector.load %arg3[%c0_2, %c0_3, %c0_4, %c0_5] : memref<5x5x160x64xbf16, #tpu.memory_space<vmem>>, vector<1x1x160x64xbf16>
    %7 = vector.shape_cast %6 : vector<1x1x160x64xbf16> to vector<160x64xbf16>
    %cst_6 = arith.constant dense<0.000000e+00> : vector<64x64xf32>
    %8 = tpu.matmul %5, %7, %cst_6 {dimension_numbers = #tpu.dot_dimension_numbers<[1], [0], [0], [1], [0, 0, 1, 1], [], []>} : vector<64x160xbf16>, vector<160x64xbf16>, vector<64x64xf32> -> vector<64x64xf32>
    %9 = arith.addf %0, %8 : vector<64x64xf32>
    %10 = vector.extract_strided_slice %4 {offsets = [8, 0], sizes = [64, 160], strides = [1, 1]} : vector<96x160xbf16> to vector<64x160xbf16>
    %c0_7 = arith.constant 0 : index
    %c1 = arith.constant 1 : index
    %c0_8 = arith.constant 0 : index
    %c0_9 = arith.constant 0 : index
    %11 = vector.load %arg3[%c0_7, %c1, %c0_8, %c0_9] : memref<5x5x160x64xbf16, #tpu.memory_space<vmem>>, vector<1x1x160x64xbf16>
    %12 = vector.shape_cast %11 : vector<1x1x160x64xbf16> to vector<160x64xbf16>
    %cst_10 = arith.constant dense<0.000000e+00> : vector<64x64xf32>
    %13 = tpu.matmul %10, %12, %cst_10 {dimension_numbers = #tpu.dot_dimension_numbers<[1], [0], [0], [1], [0, 0, 1, 1], [], []>} : vector<64x160xbf16>, vector<160x64xbf16>, vector<64x64xf32> -> vector<64x64xf32>
    %14 = arith.addf %9, %13 : vector<64x64xf32>
    %15 = vector.extract_strided_slice %4 {offsets = [16, 0], sizes = [64, 160], strides = [1, 1]} : vector<96x160xbf16> to vector<64x160xbf16>
    %c0_11 = arith.constant 0 : index
    %c2 = arith.constant 2 : index
    %c0_12 = arith.constant 0 : index
    %c0_13 = arith.constant 0 : index
    %16 = vector.load %arg3[%c0_11, %c2, %c0_12, %c0_13] : memref<5x5x160x64xbf16, #tpu.memory_space<vmem>>, vector<1x1x160x64xbf16>
    %17 = vector.shape_cast %16 : vector<1x1x160x64xbf16> to vector<160x64xbf16>
    %cst_14 = arith.constant dense<0.000000e+00> : vector<64x64xf32>
    %18 = tpu.matmul %15, %17, %cst_14 {dimension_numbers = #tpu.dot_dimension_numbers<[1], [0], [0], [1], [0, 0, 1, 1], [], []>} : vector<64x160xbf16>, vector<160x64xbf16>, vector<64x64xf32> -> vector<64x64xf32>
    %19 = arith.addf %14, %18 : vector<64x64xf32>
    %20 = vector.extract_strided_slice %4 {offsets = [24, 0], sizes = [64, 160], strides = [1, 1]} : vector<96x160xbf16> to vector<64x160xbf16>
    %c0_15 = arith.constant 0 : index
    %c3 = arith.constant 3 : index
    %c0_16 = arith.constant 0 : index
    %c0_17 = arith.constant 0 : index
    %21 = vector.load %arg3[%c0_15, %c3, %c0_16, %c0_17] : memref<5x5x160x64xbf16, #tpu.memory_space<vmem>>, vector<1x1x160x64xbf16>
    %22 = vector.shape_cast %21 : vector<1x1x160x64xbf16> to vector<160x64xbf16>
    %cst_18 = arith.constant dense<0.000000e+00> : vector<64x64xf32>
    %23 = tpu.matmul %20, %22, %cst_18 {dimension_numbers = #tpu.dot_dimension_numbers<[1], [0], [0], [1], [0, 0, 1, 1], [], []>} : vector<64x160xbf16>, vector<160x64xbf16>, vector<64x64xf32> -> vector<64x64xf32>
    %24 = arith.addf %19, %23 : vector<64x64xf32>
    %25 = vector.extract_strided_slice %4 {offsets = [32, 0], sizes = [64, 160], strides = [1, 1]} : vector<96x160xbf16> to vector<64x160xbf16>
    %c0_19 = arith.constant 0 : index
    %c4 = arith.constant 4 : index
    %c0_20 = arith.constant 0 : index
    %c0_21 = arith.constant 0 : index
    %26 = vector.load %arg3[%c0_19, %c4, %c0_20, %c0_21] : memref<5x5x160x64xbf16, #tpu.memory_space<vmem>>, vector<1x1x160x64xbf16>
    %27 = vector.shape_cast %26 : vector<1x1x160x64xbf16> to vector<160x64xbf16>
    %cst_22 = arith.constant dense<0.000000e+00> : vector<64x64xf32>
    %28 = tpu.matmul %25, %27, %cst_22 {dimension_numbers = #tpu.dot_dimension_numbers<[1], [0], [0], [1], [0, 0, 1, 1], [], []>} : vector<64x160xbf16>, vector<160x64xbf16>, vector<64x64xf32> -> vector<64x64xf32>
    %29 = arith.addf %24, %28 : vector<64x64xf32>
    %c1_i32 = arith.constant 1 : i32
    %30 = arith.addi %arg1, %c1_i32 : i32
    %c0_23 = arith.constant 0 : index
    %31 = arith.index_cast %30 : i32 to index
    %c0_24 = arith.constant 0 : index
    %c0_25 = arith.constant 0 : index
    %32 = vector.load %arg2[%c0_23, %31, %c0_24, %c0_25] : memref<1x12x96x160xbf16, #tpu.memory_space<vmem>>, vector<1x1x96x160xbf16>
    %33 = vector.shape_cast %32 : vector<1x1x96x160xbf16> to vector<96x160xbf16>
    %34 = vector.extract_strided_slice %33 {offsets = [0, 0], sizes = [64, 160], strides = [1, 1]} : vector<96x160xbf16> to vector<64x160xbf16>
    %c1_26 = arith.constant 1 : index
    %c0_27 = arith.constant 0 : index
    %c0_28 = arith.constant 0 : index
    %c0_29 = arith.constant 0 : index
    %35 = vector.load %arg3[%c1_26, %c0_27, %c0_28, %c0_29] : memref<5x5x160x64xbf16, #tpu.memory_space<vmem>>, vector<1x1x160x64xbf16>
    %36 = vector.shape_cast %35 : vector<1x1x160x64xbf16> to vector<160x64xbf16>
    %cst_30 = arith.constant dense<0.000000e+00> : vector<64x64xf32>
    %37 = tpu.matmul %34, %36, %cst_30 {dimension_numbers = #tpu.dot_dimension_numbers<[1], [0], [0], [1], [0, 0, 1, 1], [], []>} : vector<64x160xbf16>, vector<160x64xbf16>, vector<64x64xf32> -> vector<64x64xf32>
    %38 = arith.addf %29, %37 : vector<64x64xf32>
    %39 = vector.extract_strided_slice %33 {offsets = [8, 0], sizes = [64, 160], strides = [1, 1]} : vector<96x160xbf16> to vector<64x160xbf16>
    %c1_31 = arith.constant 1 : index
    %c1_32 = arith.constant 1 : index
    %c0_33 = arith.constant 0 : index
    %c0_34 = arith.constant 0 : index
    %40 = vector.load %arg3[%c1_31, %c1_32, %c0_33, %c0_34] : memref<5x5x160x64xbf16, #tpu.memory_space<vmem>>, vector<1x1x160x64xbf16>
    %41 = vector.shape_cast %40 : vector<1x1x160x64xbf16> to vector<160x64xbf16>
    %cst_35 = arith.constant dense<0.000000e+00> : vector<64x64xf32>
    %42 = tpu.matmul %39, %41, %cst_35 {dimension_numbers = #tpu.dot_dimension_numbers<[1], [0], [0], [1], [0, 0, 1, 1], [], []>} : vector<64x160xbf16>, vector<160x64xbf16>, vector<64x64xf32> -> vector<64x64xf32>
    %43 = arith.addf %38, %42 : vector<64x64xf32>
    %44 = vector.extract_strided_slice %33 {offsets = [16, 0], sizes = [64, 160], strides = [1, 1]} : vector<96x160xbf16> to vector<64x160xbf16>
    %c1_36 = arith.constant 1 : index
    %c2_37 = arith.constant 2 : index
    %c0_38 = arith.constant 0 : index
    %c0_39 = arith.constant 0 : index
    %45 = vector.load %arg3[%c1_36, %c2_37, %c0_38, %c0_39] : memref<5x5x160x64xbf16, #tpu.memory_space<vmem>>, vector<1x1x160x64xbf16>
    %46 = vector.shape_cast %45 : vector<1x1x160x64xbf16> to vector<160x64xbf16>
    %cst_40 = arith.constant dense<0.000000e+00> : vector<64x64xf32>
    %47 = tpu.matmul %44, %46, %cst_40 {dimension_numbers = #tpu.dot_dimension_numbers<[1], [0], [0], [1], [0, 0, 1, 1], [], []>} : vector<64x160xbf16>, vector<160x64xbf16>, vector<64x64xf32> -> vector<64x64xf32>
    %48 = arith.addf %43, %47 : vector<64x64xf32>
    %49 = vector.extract_strided_slice %33 {offsets = [24, 0], sizes = [64, 160], strides = [1, 1]} : vector<96x160xbf16> to vector<64x160xbf16>
    %c1_41 = arith.constant 1 : index
    %c3_42 = arith.constant 3 : index
    %c0_43 = arith.constant 0 : index
    %c0_44 = arith.constant 0 : index
    %50 = vector.load %arg3[%c1_41, %c3_42, %c0_43, %c0_44] : memref<5x5x160x64xbf16, #tpu.memory_space<vmem>>, vector<1x1x160x64xbf16>
    %51 = vector.shape_cast %50 : vector<1x1x160x64xbf16> to vector<160x64xbf16>
    %cst_45 = arith.constant dense<0.000000e+00> : vector<64x64xf32>
    %52 = tpu.matmul %49, %51, %cst_45 {dimension_numbers = #tpu.dot_dimension_numbers<[1], [0], [0], [1], [0, 0, 1, 1], [], []>} : vector<64x160xbf16>, vector<160x64xbf16>, vector<64x64xf32> -> vector<64x64xf32>
    %53 = arith.addf %48, %52 : vector<64x64xf32>
    %54 = vector.extract_strided_slice %33 {offsets = [32, 0], sizes = [64, 160], strides = [1, 1]} : vector<96x160xbf16> to vector<64x160xbf16>
    %c1_46 = arith.constant 1 : index
    %c4_47 = arith.constant 4 : index
    %c0_48 = arith.constant 0 : index
    %c0_49 = arith.constant 0 : index
    %55 = vector.load %arg3[%c1_46, %c4_47, %c0_48, %c0_49] : memref<5x5x160x64xbf16, #tpu.memory_space<vmem>>, vector<1x1x160x64xbf16>
    %56 = vector.shape_cast %55 : vector<1x1x160x64xbf16> to vector<160x64xbf16>
    %cst_50 = arith.constant dense<0.000000e+00> : vector<64x64xf32>
    %57 = tpu.matmul %54, %56, %cst_50 {dimension_numbers = #tpu.dot_dimension_numbers<[1], [0], [0], [1], [0, 0, 1, 1], [], []>} : vector<64x160xbf16>, vector<160x64xbf16>, vector<64x64xf32> -> vector<64x64xf32>
    %58 = arith.addf %53, %57 : vector<64x64xf32>
    %c2_i32 = arith.constant 2 : i32
    %59 = arith.addi %arg1, %c2_i32 : i32
    %c0_51 = arith.constant 0 : index
    %60 = arith.index_cast %59 : i32 to index
    %c0_52 = arith.constant 0 : index
    %c0_53 = arith.constant 0 : index
    %61 = vector.load %arg2[%c0_51, %60, %c0_52, %c0_53] : memref<1x12x96x160xbf16, #tpu.memory_space<vmem>>, vector<1x1x96x160xbf16>
    %62 = vector.shape_cast %61 : vector<1x1x96x160xbf16> to vector<96x160xbf16>
    %63 = vector.extract_strided_slice %62 {offsets = [0, 0], sizes = [64, 160], strides = [1, 1]} : vector<96x160xbf16> to vector<64x160xbf16>
    %c2_54 = arith.constant 2 : index
    %c0_55 = arith.constant 0 : index
    %c0_56 = arith.constant 0 : index
    %c0_57 = arith.constant 0 : index
    %64 = vector.load %arg3[%c2_54, %c0_55, %c0_56, %c0_57] : memref<5x5x160x64xbf16, #tpu.memory_space<vmem>>, vector<1x1x160x64xbf16>
    %65 = vector.shape_cast %64 : vector<1x1x160x64xbf16> to vector<160x64xbf16>
    %cst_58 = arith.constant dense<0.000000e+00> : vector<64x64xf32>
    %66 = tpu.matmul %63, %65, %cst_58 {dimension_numbers = #tpu.dot_dimension_numbers<[1], [0], [0], [1], [0, 0, 1, 1], [], []>} : vector<64x160xbf16>, vector<160x64xbf16>, vector<64x64xf32> -> vector<64x64xf32>
    %67 = arith.addf %58, %66 : vector<64x64xf32>
    %68 = vector.extract_strided_slice %62 {offsets = [8, 0], sizes = [64, 160], strides = [1, 1]} : vector<96x160xbf16> to vector<64x160xbf16>
    %c2_59 = arith.constant 2 : index
    %c1_60 = arith.constant 1 : index
    %c0_61 = arith.constant 0 : index
    %c0_62 = arith.constant 0 : index
    %69 = vector.load %arg3[%c2_59, %c1_60, %c0_61, %c0_62] : memref<5x5x160x64xbf16, #tpu.memory_space<vmem>>, vector<1x1x160x64xbf16>
    %70 = vector.shape_cast %69 : vector<1x1x160x64xbf16> to vector<160x64xbf16>
    %cst_63 = arith.constant dense<0.000000e+00> : vector<64x64xf32>
    %71 = tpu.matmul %68, %70, %cst_63 {dimension_numbers = #tpu.dot_dimension_numbers<[1], [0], [0], [1], [0, 0, 1, 1], [], []>} : vector<64x160xbf16>, vector<160x64xbf16>, vector<64x64xf32> -> vector<64x64xf32>
    %72 = arith.addf %67, %71 : vector<64x64xf32>
    %73 = vector.extract_strided_slice %62 {offsets = [16, 0], sizes = [64, 160], strides = [1, 1]} : vector<96x160xbf16> to vector<64x160xbf16>
    %c2_64 = arith.constant 2 : index
    %c2_65 = arith.constant 2 : index
    %c0_66 = arith.constant 0 : index
    %c0_67 = arith.constant 0 : index
    %74 = vector.load %arg3[%c2_64, %c2_65, %c0_66, %c0_67] : memref<5x5x160x64xbf16, #tpu.memory_space<vmem>>, vector<1x1x160x64xbf16>
    %75 = vector.shape_cast %74 : vector<1x1x160x64xbf16> to vector<160x64xbf16>
    %cst_68 = arith.constant dense<0.000000e+00> : vector<64x64xf32>
    %76 = tpu.matmul %73, %75, %cst_68 {dimension_numbers = #tpu.dot_dimension_numbers<[1], [0], [0], [1], [0, 0, 1, 1], [], []>} : vector<64x160xbf16>, vector<160x64xbf16>, vector<64x64xf32> -> vector<64x64xf32>
    %77 = arith.addf %72, %76 : vector<64x64xf32>
    %78 = vector.extract_strided_slice %62 {offsets = [24, 0], sizes = [64, 160], strides = [1, 1]} : vector<96x160xbf16> to vector<64x160xbf16>
    %c2_69 = arith.constant 2 : index
    %c3_70 = arith.constant 3 : index
    %c0_71 = arith.constant 0 : index
    %c0_72 = arith.constant 0 : index
    %79 = vector.load %arg3[%c2_69, %c3_70, %c0_71, %c0_72] : memref<5x5x160x64xbf16, #tpu.memory_space<vmem>>, vector<1x1x160x64xbf16>
    %80 = vector.shape_cast %79 : vector<1x1x160x64xbf16> to vector<160x64xbf16>
    %cst_73 = arith.constant dense<0.000000e+00> : vector<64x64xf32>
    %81 = tpu.matmul %78, %80, %cst_73 {dimension_numbers = #tpu.dot_dimension_numbers<[1], [0], [0], [1], [0, 0, 1, 1], [], []>} : vector<64x160xbf16>, vector<160x64xbf16>, vector<64x64xf32> -> vector<64x64xf32>
    %82 = arith.addf %77, %81 : vector<64x64xf32>
    %83 = vector.extract_strided_slice %62 {offsets = [32, 0], sizes = [64, 160], strides = [1, 1]} : vector<96x160xbf16> to vector<64x160xbf16>
    %c2_74 = arith.constant 2 : index
    %c4_75 = arith.constant 4 : index
    %c0_76 = arith.constant 0 : index
    %c0_77 = arith.constant 0 : index
    %84 = vector.load %arg3[%c2_74, %c4_75, %c0_76, %c0_77] : memref<5x5x160x64xbf16, #tpu.memory_space<vmem>>, vector<1x1x160x64xbf16>
    %85 = vector.shape_cast %84 : vector<1x1x160x64xbf16> to vector<160x64xbf16>
    %cst_78 = arith.constant dense<0.000000e+00> : vector<64x64xf32>
    %86 = tpu.matmul %83, %85, %cst_78 {dimension_numbers = #tpu.dot_dimension_numbers<[1], [0], [0], [1], [0, 0, 1, 1], [], []>} : vector<64x160xbf16>, vector<160x64xbf16>, vector<64x64xf32> -> vector<64x64xf32>
    %87 = arith.addf %82, %86 : vector<64x64xf32>
    %c3_i32 = arith.constant 3 : i32
    %88 = arith.addi %arg1, %c3_i32 : i32
    %c0_79 = arith.constant 0 : index
    %89 = arith.index_cast %88 : i32 to index
    %c0_80 = arith.constant 0 : index
    %c0_81 = arith.constant 0 : index
    %90 = vector.load %arg2[%c0_79, %89, %c0_80, %c0_81] : memref<1x12x96x160xbf16, #tpu.memory_space<vmem>>, vector<1x1x96x160xbf16>
    %91 = vector.shape_cast %90 : vector<1x1x96x160xbf16> to vector<96x160xbf16>
    %92 = vector.extract_strided_slice %91 {offsets = [0, 0], sizes = [64, 160], strides = [1, 1]} : vector<96x160xbf16> to vector<64x160xbf16>
    %c3_82 = arith.constant 3 : index
    %c0_83 = arith.constant 0 : index
    %c0_84 = arith.constant 0 : index
    %c0_85 = arith.constant 0 : index
    %93 = vector.load %arg3[%c3_82, %c0_83, %c0_84, %c0_85] : memref<5x5x160x64xbf16, #tpu.memory_space<vmem>>, vector<1x1x160x64xbf16>
    %94 = vector.shape_cast %93 : vector<1x1x160x64xbf16> to vector<160x64xbf16>
    %cst_86 = arith.constant dense<0.000000e+00> : vector<64x64xf32>
    %95 = tpu.matmul %92, %94, %cst_86 {dimension_numbers = #tpu.dot_dimension_numbers<[1], [0], [0], [1], [0, 0, 1, 1], [], []>} : vector<64x160xbf16>, vector<160x64xbf16>, vector<64x64xf32> -> vector<64x64xf32>
    %96 = arith.addf %87, %95 : vector<64x64xf32>
    %97 = vector.extract_strided_slice %91 {offsets = [8, 0], sizes = [64, 160], strides = [1, 1]} : vector<96x160xbf16> to vector<64x160xbf16>
    %c3_87 = arith.constant 3 : index
    %c1_88 = arith.constant 1 : index
    %c0_89 = arith.constant 0 : index
    %c0_90 = arith.constant 0 : index
    %98 = vector.load %arg3[%c3_87, %c1_88, %c0_89, %c0_90] : memref<5x5x160x64xbf16, #tpu.memory_space<vmem>>, vector<1x1x160x64xbf16>
    %99 = vector.shape_cast %98 : vector<1x1x160x64xbf16> to vector<160x64xbf16>
    %cst_91 = arith.constant dense<0.000000e+00> : vector<64x64xf32>
    %100 = tpu.matmul %97, %99, %cst_91 {dimension_numbers = #tpu.dot_dimension_numbers<[1], [0], [0], [1], [0, 0, 1, 1], [], []>} : vector<64x160xbf16>, vector<160x64xbf16>, vector<64x64xf32> -> vector<64x64xf32>
    %101 = arith.addf %96, %100 : vector<64x64xf32>
    %102 = vector.extract_strided_slice %91 {offsets = [16, 0], sizes = [64, 160], strides = [1, 1]} : vector<96x160xbf16> to vector<64x160xbf16>
    %c3_92 = arith.constant 3 : index
    %c2_93 = arith.constant 2 : index
    %c0_94 = arith.constant 0 : index
    %c0_95 = arith.constant 0 : index
    %103 = vector.load %arg3[%c3_92, %c2_93, %c0_94, %c0_95] : memref<5x5x160x64xbf16, #tpu.memory_space<vmem>>, vector<1x1x160x64xbf16>
    %104 = vector.shape_cast %103 : vector<1x1x160x64xbf16> to vector<160x64xbf16>
    %cst_96 = arith.constant dense<0.000000e+00> : vector<64x64xf32>
    %105 = tpu.matmul %102, %104, %cst_96 {dimension_numbers = #tpu.dot_dimension_numbers<[1], [0], [0], [1], [0, 0, 1, 1], [], []>} : vector<64x160xbf16>, vector<160x64xbf16>, vector<64x64xf32> -> vector<64x64xf32>
    %106 = arith.addf %101, %105 : vector<64x64xf32>
    %107 = vector.extract_strided_slice %91 {offsets = [24, 0], sizes = [64, 160], strides = [1, 1]} : vector<96x160xbf16> to vector<64x160xbf16>
    %c3_97 = arith.constant 3 : index
    %c3_98 = arith.constant 3 : index
    %c0_99 = arith.constant 0 : index
    %c0_100 = arith.constant 0 : index
    %108 = vector.load %arg3[%c3_97, %c3_98, %c0_99, %c0_100] : memref<5x5x160x64xbf16, #tpu.memory_space<vmem>>, vector<1x1x160x64xbf16>
    %109 = vector.shape_cast %108 : vector<1x1x160x64xbf16> to vector<160x64xbf16>
    %cst_101 = arith.constant dense<0.000000e+00> : vector<64x64xf32>
    %110 = tpu.matmul %107, %109, %cst_101 {dimension_numbers = #tpu.dot_dimension_numbers<[1], [0], [0], [1], [0, 0, 1, 1], [], []>} : vector<64x160xbf16>, vector<160x64xbf16>, vector<64x64xf32> -> vector<64x64xf32>
    %111 = arith.addf %106, %110 : vector<64x64xf32>
    %112 = vector.extract_strided_slice %91 {offsets = [32, 0], sizes = [64, 160], strides = [1, 1]} : vector<96x160xbf16> to vector<64x160xbf16>
    %c3_102 = arith.constant 3 : index
    %c4_103 = arith.constant 4 : index
    %c0_104 = arith.constant 0 : index
    %c0_105 = arith.constant 0 : index
    %113 = vector.load %arg3[%c3_102, %c4_103, %c0_104, %c0_105] : memref<5x5x160x64xbf16, #tpu.memory_space<vmem>>, vector<1x1x160x64xbf16>
    %114 = vector.shape_cast %113 : vector<1x1x160x64xbf16> to vector<160x64xbf16>
    %cst_106 = arith.constant dense<0.000000e+00> : vector<64x64xf32>
    %115 = tpu.matmul %112, %114, %cst_106 {dimension_numbers = #tpu.dot_dimension_numbers<[1], [0], [0], [1], [0, 0, 1, 1], [], []>} : vector<64x160xbf16>, vector<160x64xbf16>, vector<64x64xf32> -> vector<64x64xf32>
    %116 = arith.addf %111, %115 : vector<64x64xf32>
    %c4_i32 = arith.constant 4 : i32
    %117 = arith.addi %arg1, %c4_i32 : i32
    %c0_107 = arith.constant 0 : index
    %118 = arith.index_cast %117 : i32 to index
    %c0_108 = arith.constant 0 : index
    %c0_109 = arith.constant 0 : index
    %119 = vector.load %arg2[%c0_107, %118, %c0_108, %c0_109] : memref<1x12x96x160xbf16, #tpu.memory_space<vmem>>, vector<1x1x96x160xbf16>
    %120 = vector.shape_cast %119 : vector<1x1x96x160xbf16> to vector<96x160xbf16>
    %121 = vector.extract_strided_slice %120 {offsets = [0, 0], sizes = [64, 160], strides = [1, 1]} : vector<96x160xbf16> to vector<64x160xbf16>
    %c4_110 = arith.constant 4 : index
    %c0_111 = arith.constant 0 : index
    %c0_112 = arith.constant 0 : index
    %c0_113 = arith.constant 0 : index
    %122 = vector.load %arg3[%c4_110, %c0_111, %c0_112, %c0_113] : memref<5x5x160x64xbf16, #tpu.memory_space<vmem>>, vector<1x1x160x64xbf16>
    %123 = vector.shape_cast %122 : vector<1x1x160x64xbf16> to vector<160x64xbf16>
    %cst_114 = arith.constant dense<0.000000e+00> : vector<64x64xf32>
    %124 = tpu.matmul %121, %123, %cst_114 {dimension_numbers = #tpu.dot_dimension_numbers<[1], [0], [0], [1], [0, 0, 1, 1], [], []>} : vector<64x160xbf16>, vector<160x64xbf16>, vector<64x64xf32> -> vector<64x64xf32>
    %125 = arith.addf %116, %124 : vector<64x64xf32>
    %126 = vector.extract_strided_slice %120 {offsets = [8, 0], sizes = [64, 160], strides = [1, 1]} : vector<96x160xbf16> to vector<64x160xbf16>
    %c4_115 = arith.constant 4 : index
    %c1_116 = arith.constant 1 : index
    %c0_117 = arith.constant 0 : index
    %c0_118 = arith.constant 0 : index
    %127 = vector.load %arg3[%c4_115, %c1_116, %c0_117, %c0_118] : memref<5x5x160x64xbf16, #tpu.memory_space<vmem>>, vector<1x1x160x64xbf16>
    %128 = vector.shape_cast %127 : vector<1x1x160x64xbf16> to vector<160x64xbf16>
    %cst_119 = arith.constant dense<0.000000e+00> : vector<64x64xf32>
    %129 = tpu.matmul %126, %128, %cst_119 {dimension_numbers = #tpu.dot_dimension_numbers<[1], [0], [0], [1], [0, 0, 1, 1], [], []>} : vector<64x160xbf16>, vector<160x64xbf16>, vector<64x64xf32> -> vector<64x64xf32>
    %130 = arith.addf %125, %129 : vector<64x64xf32>
    %131 = vector.extract_strided_slice %120 {offsets = [16, 0], sizes = [64, 160], strides = [1, 1]} : vector<96x160xbf16> to vector<64x160xbf16>
    %c4_120 = arith.constant 4 : index
    %c2_121 = arith.constant 2 : index
    %c0_122 = arith.constant 0 : index
    %c0_123 = arith.constant 0 : index
    %132 = vector.load %arg3[%c4_120, %c2_121, %c0_122, %c0_123] : memref<5x5x160x64xbf16, #tpu.memory_space<vmem>>, vector<1x1x160x64xbf16>
    %133 = vector.shape_cast %132 : vector<1x1x160x64xbf16> to vector<160x64xbf16>
    %cst_124 = arith.constant dense<0.000000e+00> : vector<64x64xf32>
    %134 = tpu.matmul %131, %133, %cst_124 {dimension_numbers = #tpu.dot_dimension_numbers<[1], [0], [0], [1], [0, 0, 1, 1], [], []>} : vector<64x160xbf16>, vector<160x64xbf16>, vector<64x64xf32> -> vector<64x64xf32>
    %135 = arith.addf %130, %134 : vector<64x64xf32>
    %136 = vector.extract_strided_slice %120 {offsets = [24, 0], sizes = [64, 160], strides = [1, 1]} : vector<96x160xbf16> to vector<64x160xbf16>
    %c4_125 = arith.constant 4 : index
    %c3_126 = arith.constant 3 : index
    %c0_127 = arith.constant 0 : index
    %c0_128 = arith.constant 0 : index
    %137 = vector.load %arg3[%c4_125, %c3_126, %c0_127, %c0_128] : memref<5x5x160x64xbf16, #tpu.memory_space<vmem>>, vector<1x1x160x64xbf16>
    %138 = vector.shape_cast %137 : vector<1x1x160x64xbf16> to vector<160x64xbf16>
    %cst_129 = arith.constant dense<0.000000e+00> : vector<64x64xf32>
    %139 = tpu.matmul %136, %138, %cst_129 {dimension_numbers = #tpu.dot_dimension_numbers<[1], [0], [0], [1], [0, 0, 1, 1], [], []>} : vector<64x160xbf16>, vector<160x64xbf16>, vector<64x64xf32> -> vector<64x64xf32>
    %140 = arith.addf %135, %139 : vector<64x64xf32>
    %141 = vector.extract_strided_slice %120 {offsets = [32, 0], sizes = [64, 160], strides = [1, 1]} : vector<96x160xbf16> to vector<64x160xbf16>
    %c4_130 = arith.constant 4 : index
    %c4_131 = arith.constant 4 : index
    %c0_132 = arith.constant 0 : index
    %c0_133 = arith.constant 0 : index
    %142 = vector.load %arg3[%c4_130, %c4_131, %c0_132, %c0_133] : memref<5x5x160x64xbf16, #tpu.memory_space<vmem>>, vector<1x1x160x64xbf16>
    %143 = vector.shape_cast %142 : vector<1x1x160x64xbf16> to vector<160x64xbf16>
    %cst_134 = arith.constant dense<0.000000e+00> : vector<64x64xf32>
    %144 = tpu.matmul %141, %143, %cst_134 {dimension_numbers = #tpu.dot_dimension_numbers<[1], [0], [0], [1], [0, 0, 1, 1], [], []>} : vector<64x160xbf16>, vector<160x64xbf16>, vector<64x64xf32> -> vector<64x64xf32>
    %145 = arith.addf %140, %144 : vector<64x64xf32>
    %c0_135 = arith.constant 0 : index
    %c0_136 = arith.constant 0 : index
    %146 = vector.load %arg4[%c0_135, %c0_136] : memref<1x64xf32, #tpu.memory_space<vmem>>, vector<1x64xf32>
    %147 = vector.broadcast %146 : vector<1x64xf32> to vector<64x64xf32>
    %148 = arith.addf %145, %147 : vector<64x64xf32>
    %cst_137 = arith.constant 0.000000e+00 : f32
    %149 = vector.broadcast %cst_137 : f32 to vector<64x64xf32>
    %150 = arith.maximumf %148, %149 : vector<64x64xf32>
    %151 = arith.truncf %150 : vector<64x64xf32> to vector<64x64xbf16>
    %c0_138 = arith.constant 0 : index
    %c0_139 = arith.constant 0 : index
    %c0_140 = arith.constant 0 : index
    %c0_141 = arith.constant 0 : index
    %152 = vector.load %arg5[%c0_138, %c0_139, %c0_140, %c0_141] : memref<1x1x64x64xbf16, #tpu.memory_space<vmem>>, vector<1x1x64x64xbf16>
    %153 = vector.shape_cast %152 : vector<1x1x64x64xbf16> to vector<64x64xbf16>
    %154 = vector.shape_cast %151 : vector<64x64xbf16> to vector<1x1x64x64xbf16>
    tpu.vector_store %arg5[%c0_138, %c0_139, %c0_140, %c0_141], %154 {strides = array<i32>} : memref<1x1x64x64xbf16, #tpu.memory_space<vmem>>, vector<1x1x64x64xbf16>,
    return
  }
  func.func @transform_0(%arg0: i32, %arg1: i32) -> (i32, i32, i32, i32) {
    %c0_i32 = arith.constant 0 : i32
    %c0_i32_0 = arith.constant 0 : i32
    %c0_i32_1 = arith.constant 0 : i32
    %c0_i32_2 = arith.constant 0 : i32
    return %arg0, %c0_i32, %c0_i32_0, %c0_i32_1 : i32, i32, i32, i32
  }
  func.func @transform_1(%arg0: i32, %arg1: i32) -> (i32, i32, i32, i32) {
    %c0_i32 = arith.constant 0 : i32
    %c0_i32_0 = arith.constant 0 : i32
    %c0_i32_1 = arith.constant 0 : i32
    %c0_i32_2 = arith.constant 0 : i32
    %c0_i32_3 = arith.constant 0 : i32
    return %c0_i32, %c0_i32_0, %c0_i32_1, %c0_i32_2 : i32, i32, i32, i32
  }
  func.func @transform_2(%arg0: i32, %arg1: i32) -> (i32, i32) {
    %c0_i32 = arith.constant 0 : i32
    %c0_i32_0 = arith.constant 0 : i32
    %c0_i32_1 = arith.constant 0 : i32
    return %c0_i32, %c0_i32_0 : i32, i32
  }
  func.func @transform_3(%arg0: i32, %arg1: i32) -> (i32, i32, i32, i32) {
    %c0_i32 = arith.constant 0 : i32
    %c0_i32_0 = arith.constant 0 : i32
    %c0_i32_1 = arith.constant 0 : i32
    return %arg0, %arg1, %c0_i32, %c0_i32_0 : i32, i32, i32, i32
  }
}

module attributes {stable_mosaic.version = 11 : i64} {
  func.func @_conv3d_kernel(%arg0: i32, %arg1: i32, %arg2: memref<1x6x24x192xbf16, #tpu.memory_space<vmem>>, %arg3: memref<3x3x192x128xbf16, #tpu.memory_space<vmem>>, %arg4: memref<1x128xf32, #tpu.memory_space<vmem>>, %arg5: memref<1x1x16x128xbf16, #tpu.memory_space<vmem>>) attributes {dimension_semantics = [#tpu.dimension_semantics<parallel>, #tpu.dimension_semantics<parallel>], iteration_bounds = array<i64: 2, 4>, scalar_prefetch = 0 : i64, scratch_operands = 0 : i64, tpu.core_type = #tpu.core_type<tc>, window_params = [{transform_indices = @transform_0, window_bounds = array<i64: 1, 6, 24, 192>}, {pipeline_mode = #tpu.pipeline_mode<synchronous>, transform_indices = @transform_1, window_bounds = array<i64: 3, 3, 192, 128>}, {pipeline_mode = #tpu.pipeline_mode<synchronous>, transform_indices = @transform_2, window_bounds = array<i64: 1, 128>}, {transform_indices = @transform_3, window_bounds = array<i64: 1, 1, 16, 128>}]} {
    %cst = arith.constant 0.000000e+00 : f32
    %0 = vector.broadcast %cst : f32 to vector<16x128xf32>
    %c0_i32 = arith.constant 0 : i32
    %1 = arith.addi %arg1, %c0_i32 : i32
    %c0 = arith.constant 0 : index
    %2 = arith.index_cast %1 : i32 to index
    %c0_0 = arith.constant 0 : index
    %c0_1 = arith.constant 0 : index
    %3 = vector.load %arg2[%c0, %2, %c0_0, %c0_1] : memref<1x6x24x192xbf16, #tpu.memory_space<vmem>>, vector<1x1x24x192xbf16>
    %4 = vector.shape_cast %3 : vector<1x1x24x192xbf16> to vector<24x192xbf16>
    %5 = vector.extract_strided_slice %4 {offsets = [0, 0], sizes = [16, 192], strides = [1, 1]} : vector<24x192xbf16> to vector<16x192xbf16>
    %c0_2 = arith.constant 0 : index
    %c0_3 = arith.constant 0 : index
    %c0_4 = arith.constant 0 : index
    %c0_5 = arith.constant 0 : index
    %6 = vector.load %arg3[%c0_2, %c0_3, %c0_4, %c0_5] : memref<3x3x192x128xbf16, #tpu.memory_space<vmem>>, vector<1x1x192x128xbf16>
    %7 = vector.shape_cast %6 : vector<1x1x192x128xbf16> to vector<192x128xbf16>
    %cst_6 = arith.constant dense<0.000000e+00> : vector<16x128xf32>
    %8 = tpu.matmul %5, %7, %cst_6 {dimension_numbers = #tpu.dot_dimension_numbers<[1], [0], [0], [1], [0, 0, 1, 1], [], []>} : vector<16x192xbf16>, vector<192x128xbf16>, vector<16x128xf32> -> vector<16x128xf32>
    %9 = arith.addf %0, %8 : vector<16x128xf32>
    %10 = vector.extract_strided_slice %4 {offsets = [4, 0], sizes = [16, 192], strides = [1, 1]} : vector<24x192xbf16> to vector<16x192xbf16>
    %c0_7 = arith.constant 0 : index
    %c1 = arith.constant 1 : index
    %c0_8 = arith.constant 0 : index
    %c0_9 = arith.constant 0 : index
    %11 = vector.load %arg3[%c0_7, %c1, %c0_8, %c0_9] : memref<3x3x192x128xbf16, #tpu.memory_space<vmem>>, vector<1x1x192x128xbf16>
    %12 = vector.shape_cast %11 : vector<1x1x192x128xbf16> to vector<192x128xbf16>
    %cst_10 = arith.constant dense<0.000000e+00> : vector<16x128xf32>
    %13 = tpu.matmul %10, %12, %cst_10 {dimension_numbers = #tpu.dot_dimension_numbers<[1], [0], [0], [1], [0, 0, 1, 1], [], []>} : vector<16x192xbf16>, vector<192x128xbf16>, vector<16x128xf32> -> vector<16x128xf32>
    %14 = arith.addf %9, %13 : vector<16x128xf32>
    %15 = vector.extract_strided_slice %4 {offsets = [8, 0], sizes = [16, 192], strides = [1, 1]} : vector<24x192xbf16> to vector<16x192xbf16>
    %c0_11 = arith.constant 0 : index
    %c2 = arith.constant 2 : index
    %c0_12 = arith.constant 0 : index
    %c0_13 = arith.constant 0 : index
    %16 = vector.load %arg3[%c0_11, %c2, %c0_12, %c0_13] : memref<3x3x192x128xbf16, #tpu.memory_space<vmem>>, vector<1x1x192x128xbf16>
    %17 = vector.shape_cast %16 : vector<1x1x192x128xbf16> to vector<192x128xbf16>
    %cst_14 = arith.constant dense<0.000000e+00> : vector<16x128xf32>
    %18 = tpu.matmul %15, %17, %cst_14 {dimension_numbers = #tpu.dot_dimension_numbers<[1], [0], [0], [1], [0, 0, 1, 1], [], []>} : vector<16x192xbf16>, vector<192x128xbf16>, vector<16x128xf32> -> vector<16x128xf32>
    %19 = arith.addf %14, %18 : vector<16x128xf32>
    %c1_i32 = arith.constant 1 : i32
    %20 = arith.addi %arg1, %c1_i32 : i32
    %c0_15 = arith.constant 0 : index
    %21 = arith.index_cast %20 : i32 to index
    %c0_16 = arith.constant 0 : index
    %c0_17 = arith.constant 0 : index
    %22 = vector.load %arg2[%c0_15, %21, %c0_16, %c0_17] : memref<1x6x24x192xbf16, #tpu.memory_space<vmem>>, vector<1x1x24x192xbf16>
    %23 = vector.shape_cast %22 : vector<1x1x24x192xbf16> to vector<24x192xbf16>
    %24 = vector.extract_strided_slice %23 {offsets = [0, 0], sizes = [16, 192], strides = [1, 1]} : vector<24x192xbf16> to vector<16x192xbf16>
    %c1_18 = arith.constant 1 : index
    %c0_19 = arith.constant 0 : index
    %c0_20 = arith.constant 0 : index
    %c0_21 = arith.constant 0 : index
    %25 = vector.load %arg3[%c1_18, %c0_19, %c0_20, %c0_21] : memref<3x3x192x128xbf16, #tpu.memory_space<vmem>>, vector<1x1x192x128xbf16>
    %26 = vector.shape_cast %25 : vector<1x1x192x128xbf16> to vector<192x128xbf16>
    %cst_22 = arith.constant dense<0.000000e+00> : vector<16x128xf32>
    %27 = tpu.matmul %24, %26, %cst_22 {dimension_numbers = #tpu.dot_dimension_numbers<[1], [0], [0], [1], [0, 0, 1, 1], [], []>} : vector<16x192xbf16>, vector<192x128xbf16>, vector<16x128xf32> -> vector<16x128xf32>
    %28 = arith.addf %19, %27 : vector<16x128xf32>
    %29 = vector.extract_strided_slice %23 {offsets = [4, 0], sizes = [16, 192], strides = [1, 1]} : vector<24x192xbf16> to vector<16x192xbf16>
    %c1_23 = arith.constant 1 : index
    %c1_24 = arith.constant 1 : index
    %c0_25 = arith.constant 0 : index
    %c0_26 = arith.constant 0 : index
    %30 = vector.load %arg3[%c1_23, %c1_24, %c0_25, %c0_26] : memref<3x3x192x128xbf16, #tpu.memory_space<vmem>>, vector<1x1x192x128xbf16>
    %31 = vector.shape_cast %30 : vector<1x1x192x128xbf16> to vector<192x128xbf16>
    %cst_27 = arith.constant dense<0.000000e+00> : vector<16x128xf32>
    %32 = tpu.matmul %29, %31, %cst_27 {dimension_numbers = #tpu.dot_dimension_numbers<[1], [0], [0], [1], [0, 0, 1, 1], [], []>} : vector<16x192xbf16>, vector<192x128xbf16>, vector<16x128xf32> -> vector<16x128xf32>
    %33 = arith.addf %28, %32 : vector<16x128xf32>
    %34 = vector.extract_strided_slice %23 {offsets = [8, 0], sizes = [16, 192], strides = [1, 1]} : vector<24x192xbf16> to vector<16x192xbf16>
    %c1_28 = arith.constant 1 : index
    %c2_29 = arith.constant 2 : index
    %c0_30 = arith.constant 0 : index
    %c0_31 = arith.constant 0 : index
    %35 = vector.load %arg3[%c1_28, %c2_29, %c0_30, %c0_31] : memref<3x3x192x128xbf16, #tpu.memory_space<vmem>>, vector<1x1x192x128xbf16>
    %36 = vector.shape_cast %35 : vector<1x1x192x128xbf16> to vector<192x128xbf16>
    %cst_32 = arith.constant dense<0.000000e+00> : vector<16x128xf32>
    %37 = tpu.matmul %34, %36, %cst_32 {dimension_numbers = #tpu.dot_dimension_numbers<[1], [0], [0], [1], [0, 0, 1, 1], [], []>} : vector<16x192xbf16>, vector<192x128xbf16>, vector<16x128xf32> -> vector<16x128xf32>
    %38 = arith.addf %33, %37 : vector<16x128xf32>
    %c2_i32 = arith.constant 2 : i32
    %39 = arith.addi %arg1, %c2_i32 : i32
    %c0_33 = arith.constant 0 : index
    %40 = arith.index_cast %39 : i32 to index
    %c0_34 = arith.constant 0 : index
    %c0_35 = arith.constant 0 : index
    %41 = vector.load %arg2[%c0_33, %40, %c0_34, %c0_35] : memref<1x6x24x192xbf16, #tpu.memory_space<vmem>>, vector<1x1x24x192xbf16>
    %42 = vector.shape_cast %41 : vector<1x1x24x192xbf16> to vector<24x192xbf16>
    %43 = vector.extract_strided_slice %42 {offsets = [0, 0], sizes = [16, 192], strides = [1, 1]} : vector<24x192xbf16> to vector<16x192xbf16>
    %c2_36 = arith.constant 2 : index
    %c0_37 = arith.constant 0 : index
    %c0_38 = arith.constant 0 : index
    %c0_39 = arith.constant 0 : index
    %44 = vector.load %arg3[%c2_36, %c0_37, %c0_38, %c0_39] : memref<3x3x192x128xbf16, #tpu.memory_space<vmem>>, vector<1x1x192x128xbf16>
    %45 = vector.shape_cast %44 : vector<1x1x192x128xbf16> to vector<192x128xbf16>
    %cst_40 = arith.constant dense<0.000000e+00> : vector<16x128xf32>
    %46 = tpu.matmul %43, %45, %cst_40 {dimension_numbers = #tpu.dot_dimension_numbers<[1], [0], [0], [1], [0, 0, 1, 1], [], []>} : vector<16x192xbf16>, vector<192x128xbf16>, vector<16x128xf32> -> vector<16x128xf32>
    %47 = arith.addf %38, %46 : vector<16x128xf32>
    %48 = vector.extract_strided_slice %42 {offsets = [4, 0], sizes = [16, 192], strides = [1, 1]} : vector<24x192xbf16> to vector<16x192xbf16>
    %c2_41 = arith.constant 2 : index
    %c1_42 = arith.constant 1 : index
    %c0_43 = arith.constant 0 : index
    %c0_44 = arith.constant 0 : index
    %49 = vector.load %arg3[%c2_41, %c1_42, %c0_43, %c0_44] : memref<3x3x192x128xbf16, #tpu.memory_space<vmem>>, vector<1x1x192x128xbf16>
    %50 = vector.shape_cast %49 : vector<1x1x192x128xbf16> to vector<192x128xbf16>
    %cst_45 = arith.constant dense<0.000000e+00> : vector<16x128xf32>
    %51 = tpu.matmul %48, %50, %cst_45 {dimension_numbers = #tpu.dot_dimension_numbers<[1], [0], [0], [1], [0, 0, 1, 1], [], []>} : vector<16x192xbf16>, vector<192x128xbf16>, vector<16x128xf32> -> vector<16x128xf32>
    %52 = arith.addf %47, %51 : vector<16x128xf32>
    %53 = vector.extract_strided_slice %42 {offsets = [8, 0], sizes = [16, 192], strides = [1, 1]} : vector<24x192xbf16> to vector<16x192xbf16>
    %c2_46 = arith.constant 2 : index
    %c2_47 = arith.constant 2 : index
    %c0_48 = arith.constant 0 : index
    %c0_49 = arith.constant 0 : index
    %54 = vector.load %arg3[%c2_46, %c2_47, %c0_48, %c0_49] : memref<3x3x192x128xbf16, #tpu.memory_space<vmem>>, vector<1x1x192x128xbf16>
    %55 = vector.shape_cast %54 : vector<1x1x192x128xbf16> to vector<192x128xbf16>
    %cst_50 = arith.constant dense<0.000000e+00> : vector<16x128xf32>
    %56 = tpu.matmul %53, %55, %cst_50 {dimension_numbers = #tpu.dot_dimension_numbers<[1], [0], [0], [1], [0, 0, 1, 1], [], []>} : vector<16x192xbf16>, vector<192x128xbf16>, vector<16x128xf32> -> vector<16x128xf32>
    %57 = arith.addf %52, %56 : vector<16x128xf32>
    %c0_51 = arith.constant 0 : index
    %c0_52 = arith.constant 0 : index
    %58 = vector.load %arg4[%c0_51, %c0_52] : memref<1x128xf32, #tpu.memory_space<vmem>>, vector<1x128xf32>
    %59 = vector.broadcast %58 : vector<1x128xf32> to vector<16x128xf32>
    %60 = arith.addf %57, %59 : vector<16x128xf32>
    %cst_53 = arith.constant 0.000000e+00 : f32
    %61 = vector.broadcast %cst_53 : f32 to vector<16x128xf32>
    %62 = arith.maximumf %60, %61 : vector<16x128xf32>
    %63 = arith.truncf %62 : vector<16x128xf32> to vector<16x128xbf16>
    %c0_54 = arith.constant 0 : index
    %c0_55 = arith.constant 0 : index
    %c0_56 = arith.constant 0 : index
    %c0_57 = arith.constant 0 : index
    %64 = vector.load %arg5[%c0_54, %c0_55, %c0_56, %c0_57] : memref<1x1x16x128xbf16, #tpu.memory_space<vmem>>, vector<1x1x16x128xbf16>
    %65 = vector.shape_cast %64 : vector<1x1x16x128xbf16> to vector<16x128xbf16>
    %66 = vector.shape_cast %63 : vector<16x128xbf16> to vector<1x1x16x128xbf16>
    tpu.vector_store %arg5[%c0_54, %c0_55, %c0_56, %c0_57], %66 {strides = array<i32>} : memref<1x1x16x128xbf16, #tpu.memory_space<vmem>>, vector<1x1x16x128xbf16>,
    return
  }
  func.func @transform_0(%arg0: i32, %arg1: i32) -> (i32, i32, i32, i32) {
    %c0_i32 = arith.constant 0 : i32
    %c0_i32_0 = arith.constant 0 : i32
    %c0_i32_1 = arith.constant 0 : i32
    %c0_i32_2 = arith.constant 0 : i32
    return %arg0, %c0_i32, %c0_i32_0, %c0_i32_1 : i32, i32, i32, i32
  }
  func.func @transform_1(%arg0: i32, %arg1: i32) -> (i32, i32, i32, i32) {
    %c0_i32 = arith.constant 0 : i32
    %c0_i32_0 = arith.constant 0 : i32
    %c0_i32_1 = arith.constant 0 : i32
    %c0_i32_2 = arith.constant 0 : i32
    %c0_i32_3 = arith.constant 0 : i32
    return %c0_i32, %c0_i32_0, %c0_i32_1, %c0_i32_2 : i32, i32, i32, i32
  }
  func.func @transform_2(%arg0: i32, %arg1: i32) -> (i32, i32) {
    %c0_i32 = arith.constant 0 : i32
    %c0_i32_0 = arith.constant 0 : i32
    %c0_i32_1 = arith.constant 0 : i32
    return %c0_i32, %c0_i32_0 : i32, i32
  }
  func.func @transform_3(%arg0: i32, %arg1: i32) -> (i32, i32, i32, i32) {
    %c0_i32 = arith.constant 0 : i32
    %c0_i32_0 = arith.constant 0 : i32
    %c0_i32_1 = arith.constant 0 : i32
    return %arg0, %arg1, %c0_i32, %c0_i32_0 : i32, i32, i32, i32
  }
}

module attributes {stable_mosaic.version = 11 : i64} {
  func.func @_conv3d_kernel(%arg0: i32, %arg1: i32, %arg2: memref<1x6x24x384xbf16, #tpu.memory_space<vmem>>, %arg3: memref<3x3x384x256xbf16, #tpu.memory_space<vmem>>, %arg4: memref<1x256xf32, #tpu.memory_space<vmem>>, %arg5: memref<1x1x256xf32, #tpu.memory_space<vmem>>) attributes {dimension_semantics = [#tpu.dimension_semantics<parallel>, #tpu.dimension_semantics<arbitrary>], iteration_bounds = array<i64: 2, 4>, scalar_prefetch = 0 : i64, scratch_operands = 0 : i64, tpu.core_type = #tpu.core_type<tc>, window_params = [{transform_indices = @transform_0, window_bounds = array<i64: 1, 6, 24, 384>}, {pipeline_mode = #tpu.pipeline_mode<synchronous>, transform_indices = @transform_1, window_bounds = array<i64: 3, 3, 384, 256>}, {pipeline_mode = #tpu.pipeline_mode<synchronous>, transform_indices = @transform_2, window_bounds = array<i64: 1, 256>}, {transform_indices = @transform_3, window_bounds = array<i64: 1, 1, 256>}]} {
    %cst = arith.constant 0.000000e+00 : f32
    %0 = vector.broadcast %cst : f32 to vector<16x256xf32>
    %c0_i32 = arith.constant 0 : i32
    %1 = arith.addi %arg1, %c0_i32 : i32
    %c0 = arith.constant 0 : index
    %2 = arith.index_cast %1 : i32 to index
    %c0_0 = arith.constant 0 : index
    %c0_1 = arith.constant 0 : index
    %3 = vector.load %arg2[%c0, %2, %c0_0, %c0_1] : memref<1x6x24x384xbf16, #tpu.memory_space<vmem>>, vector<1x1x24x384xbf16>
    %4 = vector.shape_cast %3 : vector<1x1x24x384xbf16> to vector<24x384xbf16>
    %5 = vector.extract_strided_slice %4 {offsets = [0, 0], sizes = [16, 384], strides = [1, 1]} : vector<24x384xbf16> to vector<16x384xbf16>
    %c0_2 = arith.constant 0 : index
    %c0_3 = arith.constant 0 : index
    %c0_4 = arith.constant 0 : index
    %c0_5 = arith.constant 0 : index
    %6 = vector.load %arg3[%c0_2, %c0_3, %c0_4, %c0_5] : memref<3x3x384x256xbf16, #tpu.memory_space<vmem>>, vector<1x1x384x256xbf16>
    %7 = vector.shape_cast %6 : vector<1x1x384x256xbf16> to vector<384x256xbf16>
    %cst_6 = arith.constant dense<0.000000e+00> : vector<16x256xf32>
    %8 = tpu.matmul %5, %7, %cst_6 {dimension_numbers = #tpu.dot_dimension_numbers<[1], [0], [0], [1], [0, 0, 1, 1], [], []>} : vector<16x384xbf16>, vector<384x256xbf16>, vector<16x256xf32> -> vector<16x256xf32>
    %9 = arith.addf %0, %8 : vector<16x256xf32>
    %10 = vector.extract_strided_slice %4 {offsets = [4, 0], sizes = [16, 384], strides = [1, 1]} : vector<24x384xbf16> to vector<16x384xbf16>
    %c0_7 = arith.constant 0 : index
    %c1 = arith.constant 1 : index
    %c0_8 = arith.constant 0 : index
    %c0_9 = arith.constant 0 : index
    %11 = vector.load %arg3[%c0_7, %c1, %c0_8, %c0_9] : memref<3x3x384x256xbf16, #tpu.memory_space<vmem>>, vector<1x1x384x256xbf16>
    %12 = vector.shape_cast %11 : vector<1x1x384x256xbf16> to vector<384x256xbf16>
    %cst_10 = arith.constant dense<0.000000e+00> : vector<16x256xf32>
    %13 = tpu.matmul %10, %12, %cst_10 {dimension_numbers = #tpu.dot_dimension_numbers<[1], [0], [0], [1], [0, 0, 1, 1], [], []>} : vector<16x384xbf16>, vector<384x256xbf16>, vector<16x256xf32> -> vector<16x256xf32>
    %14 = arith.addf %9, %13 : vector<16x256xf32>
    %15 = vector.extract_strided_slice %4 {offsets = [8, 0], sizes = [16, 384], strides = [1, 1]} : vector<24x384xbf16> to vector<16x384xbf16>
    %c0_11 = arith.constant 0 : index
    %c2 = arith.constant 2 : index
    %c0_12 = arith.constant 0 : index
    %c0_13 = arith.constant 0 : index
    %16 = vector.load %arg3[%c0_11, %c2, %c0_12, %c0_13] : memref<3x3x384x256xbf16, #tpu.memory_space<vmem>>, vector<1x1x384x256xbf16>
    %17 = vector.shape_cast %16 : vector<1x1x384x256xbf16> to vector<384x256xbf16>
    %cst_14 = arith.constant dense<0.000000e+00> : vector<16x256xf32>
    %18 = tpu.matmul %15, %17, %cst_14 {dimension_numbers = #tpu.dot_dimension_numbers<[1], [0], [0], [1], [0, 0, 1, 1], [], []>} : vector<16x384xbf16>, vector<384x256xbf16>, vector<16x256xf32> -> vector<16x256xf32>
    %19 = arith.addf %14, %18 : vector<16x256xf32>
    %c1_i32 = arith.constant 1 : i32
    %20 = arith.addi %arg1, %c1_i32 : i32
    %c0_15 = arith.constant 0 : index
    %21 = arith.index_cast %20 : i32 to index
    %c0_16 = arith.constant 0 : index
    %c0_17 = arith.constant 0 : index
    %22 = vector.load %arg2[%c0_15, %21, %c0_16, %c0_17] : memref<1x6x24x384xbf16, #tpu.memory_space<vmem>>, vector<1x1x24x384xbf16>
    %23 = vector.shape_cast %22 : vector<1x1x24x384xbf16> to vector<24x384xbf16>
    %24 = vector.extract_strided_slice %23 {offsets = [0, 0], sizes = [16, 384], strides = [1, 1]} : vector<24x384xbf16> to vector<16x384xbf16>
    %c1_18 = arith.constant 1 : index
    %c0_19 = arith.constant 0 : index
    %c0_20 = arith.constant 0 : index
    %c0_21 = arith.constant 0 : index
    %25 = vector.load %arg3[%c1_18, %c0_19, %c0_20, %c0_21] : memref<3x3x384x256xbf16, #tpu.memory_space<vmem>>, vector<1x1x384x256xbf16>
    %26 = vector.shape_cast %25 : vector<1x1x384x256xbf16> to vector<384x256xbf16>
    %cst_22 = arith.constant dense<0.000000e+00> : vector<16x256xf32>
    %27 = tpu.matmul %24, %26, %cst_22 {dimension_numbers = #tpu.dot_dimension_numbers<[1], [0], [0], [1], [0, 0, 1, 1], [], []>} : vector<16x384xbf16>, vector<384x256xbf16>, vector<16x256xf32> -> vector<16x256xf32>
    %28 = arith.addf %19, %27 : vector<16x256xf32>
    %29 = vector.extract_strided_slice %23 {offsets = [4, 0], sizes = [16, 384], strides = [1, 1]} : vector<24x384xbf16> to vector<16x384xbf16>
    %c1_23 = arith.constant 1 : index
    %c1_24 = arith.constant 1 : index
    %c0_25 = arith.constant 0 : index
    %c0_26 = arith.constant 0 : index
    %30 = vector.load %arg3[%c1_23, %c1_24, %c0_25, %c0_26] : memref<3x3x384x256xbf16, #tpu.memory_space<vmem>>, vector<1x1x384x256xbf16>
    %31 = vector.shape_cast %30 : vector<1x1x384x256xbf16> to vector<384x256xbf16>
    %cst_27 = arith.constant dense<0.000000e+00> : vector<16x256xf32>
    %32 = tpu.matmul %29, %31, %cst_27 {dimension_numbers = #tpu.dot_dimension_numbers<[1], [0], [0], [1], [0, 0, 1, 1], [], []>} : vector<16x384xbf16>, vector<384x256xbf16>, vector<16x256xf32> -> vector<16x256xf32>
    %33 = arith.addf %28, %32 : vector<16x256xf32>
    %34 = vector.extract_strided_slice %23 {offsets = [8, 0], sizes = [16, 384], strides = [1, 1]} : vector<24x384xbf16> to vector<16x384xbf16>
    %c1_28 = arith.constant 1 : index
    %c2_29 = arith.constant 2 : index
    %c0_30 = arith.constant 0 : index
    %c0_31 = arith.constant 0 : index
    %35 = vector.load %arg3[%c1_28, %c2_29, %c0_30, %c0_31] : memref<3x3x384x256xbf16, #tpu.memory_space<vmem>>, vector<1x1x384x256xbf16>
    %36 = vector.shape_cast %35 : vector<1x1x384x256xbf16> to vector<384x256xbf16>
    %cst_32 = arith.constant dense<0.000000e+00> : vector<16x256xf32>
    %37 = tpu.matmul %34, %36, %cst_32 {dimension_numbers = #tpu.dot_dimension_numbers<[1], [0], [0], [1], [0, 0, 1, 1], [], []>} : vector<16x384xbf16>, vector<384x256xbf16>, vector<16x256xf32> -> vector<16x256xf32>
    %38 = arith.addf %33, %37 : vector<16x256xf32>
    %c2_i32 = arith.constant 2 : i32
    %39 = arith.addi %arg1, %c2_i32 : i32
    %c0_33 = arith.constant 0 : index
    %40 = arith.index_cast %39 : i32 to index
    %c0_34 = arith.constant 0 : index
    %c0_35 = arith.constant 0 : index
    %41 = vector.load %arg2[%c0_33, %40, %c0_34, %c0_35] : memref<1x6x24x384xbf16, #tpu.memory_space<vmem>>, vector<1x1x24x384xbf16>
    %42 = vector.shape_cast %41 : vector<1x1x24x384xbf16> to vector<24x384xbf16>
    %43 = vector.extract_strided_slice %42 {offsets = [0, 0], sizes = [16, 384], strides = [1, 1]} : vector<24x384xbf16> to vector<16x384xbf16>
    %c2_36 = arith.constant 2 : index
    %c0_37 = arith.constant 0 : index
    %c0_38 = arith.constant 0 : index
    %c0_39 = arith.constant 0 : index
    %44 = vector.load %arg3[%c2_36, %c0_37, %c0_38, %c0_39] : memref<3x3x384x256xbf16, #tpu.memory_space<vmem>>, vector<1x1x384x256xbf16>
    %45 = vector.shape_cast %44 : vector<1x1x384x256xbf16> to vector<384x256xbf16>
    %cst_40 = arith.constant dense<0.000000e+00> : vector<16x256xf32>
    %46 = tpu.matmul %43, %45, %cst_40 {dimension_numbers = #tpu.dot_dimension_numbers<[1], [0], [0], [1], [0, 0, 1, 1], [], []>} : vector<16x384xbf16>, vector<384x256xbf16>, vector<16x256xf32> -> vector<16x256xf32>
    %47 = arith.addf %38, %46 : vector<16x256xf32>
    %48 = vector.extract_strided_slice %42 {offsets = [4, 0], sizes = [16, 384], strides = [1, 1]} : vector<24x384xbf16> to vector<16x384xbf16>
    %c2_41 = arith.constant 2 : index
    %c1_42 = arith.constant 1 : index
    %c0_43 = arith.constant 0 : index
    %c0_44 = arith.constant 0 : index
    %49 = vector.load %arg3[%c2_41, %c1_42, %c0_43, %c0_44] : memref<3x3x384x256xbf16, #tpu.memory_space<vmem>>, vector<1x1x384x256xbf16>
    %50 = vector.shape_cast %49 : vector<1x1x384x256xbf16> to vector<384x256xbf16>
    %cst_45 = arith.constant dense<0.000000e+00> : vector<16x256xf32>
    %51 = tpu.matmul %48, %50, %cst_45 {dimension_numbers = #tpu.dot_dimension_numbers<[1], [0], [0], [1], [0, 0, 1, 1], [], []>} : vector<16x384xbf16>, vector<384x256xbf16>, vector<16x256xf32> -> vector<16x256xf32>
    %52 = arith.addf %47, %51 : vector<16x256xf32>
    %53 = vector.extract_strided_slice %42 {offsets = [8, 0], sizes = [16, 384], strides = [1, 1]} : vector<24x384xbf16> to vector<16x384xbf16>
    %c2_46 = arith.constant 2 : index
    %c2_47 = arith.constant 2 : index
    %c0_48 = arith.constant 0 : index
    %c0_49 = arith.constant 0 : index
    %54 = vector.load %arg3[%c2_46, %c2_47, %c0_48, %c0_49] : memref<3x3x384x256xbf16, #tpu.memory_space<vmem>>, vector<1x1x384x256xbf16>
    %55 = vector.shape_cast %54 : vector<1x1x384x256xbf16> to vector<384x256xbf16>
    %cst_50 = arith.constant dense<0.000000e+00> : vector<16x256xf32>
    %56 = tpu.matmul %53, %55, %cst_50 {dimension_numbers = #tpu.dot_dimension_numbers<[1], [0], [0], [1], [0, 0, 1, 1], [], []>} : vector<16x384xbf16>, vector<384x256xbf16>, vector<16x256xf32> -> vector<16x256xf32>
    %57 = arith.addf %52, %56 : vector<16x256xf32>
    %c0_51 = arith.constant 0 : index
    %c0_52 = arith.constant 0 : index
    %58 = vector.load %arg4[%c0_51, %c0_52] : memref<1x256xf32, #tpu.memory_space<vmem>>, vector<1x256xf32>
    %59 = vector.broadcast %58 : vector<1x256xf32> to vector<16x256xf32>
    %60 = arith.addf %57, %59 : vector<16x256xf32>
    %cst_53 = arith.constant 0.000000e+00 : f32
    %61 = vector.broadcast %cst_53 : f32 to vector<16x256xf32>
    %62 = arith.maximumf %60, %61 : vector<16x256xf32>
    %cst_54 = arith.constant dense<0xFF800000> : vector<256xf32>
    %63 = vector.multi_reduction <maximumf>, %62, %cst_54 [0] : vector<16x256xf32> to vector<256xf32>
    %64 = vector.shape_cast %63 : vector<256xf32> to vector<1x256xf32>
    %c0_i32_55 = arith.constant 0 : i32
    %65 = arith.cmpi eq, %arg1, %c0_i32_55 : i32
    %66 = arith.extui %65 : i1 to i32
    %c0_i32_56 = arith.constant 0 : i32
    %67 = arith.cmpi ne, %66, %c0_i32_56 : i32
    scf.if %67 {
      %c0_59 = arith.constant 0 : index
      %c0_60 = arith.constant 0 : index
      %c0_61 = arith.constant 0 : index
      %71 = vector.load %arg5[%c0_59, %c0_60, %c0_61] : memref<1x1x256xf32, #tpu.memory_space<vmem>>, vector<1x1x256xf32>
      %72 = vector.shape_cast %71 : vector<1x1x256xf32> to vector<1x256xf32>
      %73 = vector.shape_cast %64 : vector<1x256xf32> to vector<1x1x256xf32>
      tpu.vector_store %arg5[%c0_59, %c0_60, %c0_61], %73 {strides = array<i32>} : memref<1x1x256xf32, #tpu.memory_space<vmem>>, vector<1x1x256xf32>,
    } else {
    }
    %c0_i32_57 = arith.constant 0 : i32
    %68 = arith.cmpi sgt, %arg1, %c0_i32_57 : i32
    %69 = arith.extui %68 : i1 to i32
    %c0_i32_58 = arith.constant 0 : i32
    %70 = arith.cmpi ne, %69, %c0_i32_58 : i32
    scf.if %70 {
      %c0_59 = arith.constant 0 : index
      %c0_60 = arith.constant 0 : index
      %c0_61 = arith.constant 0 : index
      %71 = vector.load %arg5[%c0_59, %c0_60, %c0_61] : memref<1x1x256xf32, #tpu.memory_space<vmem>>, vector<1x1x256xf32>
      %72 = vector.shape_cast %71 : vector<1x1x256xf32> to vector<1x256xf32>
      %73 = arith.maximumf %72, %64 : vector<1x256xf32>
      %c0_62 = arith.constant 0 : index
      %c0_63 = arith.constant 0 : index
      %c0_64 = arith.constant 0 : index
      %74 = vector.load %arg5[%c0_62, %c0_63, %c0_64] : memref<1x1x256xf32, #tpu.memory_space<vmem>>, vector<1x1x256xf32>
      %75 = vector.shape_cast %74 : vector<1x1x256xf32> to vector<1x256xf32>
      %76 = vector.shape_cast %73 : vector<1x256xf32> to vector<1x1x256xf32>
      tpu.vector_store %arg5[%c0_62, %c0_63, %c0_64], %76 {strides = array<i32>} : memref<1x1x256xf32, #tpu.memory_space<vmem>>, vector<1x1x256xf32>,
    } else {
    }
    return
  }
  func.func @transform_0(%arg0: i32, %arg1: i32) -> (i32, i32, i32, i32) {
    %c0_i32 = arith.constant 0 : i32
    %c0_i32_0 = arith.constant 0 : i32
    %c0_i32_1 = arith.constant 0 : i32
    %c0_i32_2 = arith.constant 0 : i32
    return %arg0, %c0_i32, %c0_i32_0, %c0_i32_1 : i32, i32, i32, i32
  }
  func.func @transform_1(%arg0: i32, %arg1: i32) -> (i32, i32, i32, i32) {
    %c0_i32 = arith.constant 0 : i32
    %c0_i32_0 = arith.constant 0 : i32
    %c0_i32_1 = arith.constant 0 : i32
    %c0_i32_2 = arith.constant 0 : i32
    %c0_i32_3 = arith.constant 0 : i32
    return %c0_i32, %c0_i32_0, %c0_i32_1, %c0_i32_2 : i32, i32, i32, i32
  }
  func.func @transform_2(%arg0: i32, %arg1: i32) -> (i32, i32) {
    %c0_i32 = arith.constant 0 : i32
    %c0_i32_0 = arith.constant 0 : i32
    %c0_i32_1 = arith.constant 0 : i32
    return %c0_i32, %c0_i32_0 : i32, i32
  }
  func.func @transform_3(%arg0: i32, %arg1: i32) -> (i32, i32, i32) {
    %c0_i32 = arith.constant 0 : i32
    %c0_i32_0 = arith.constant 0 : i32
    %c0_i32_1 = arith.constant 0 : i32
    return %arg0, %c0_i32, %c0_i32_0 : i32, i32, i32
  }
}

module attributes {stable_mosaic.version = 11 : i64} {
  func.func @_head_kernel(%arg0: memref<2x256xf32, #tpu.memory_space<vmem>>, %arg1: memref<2x1xf32, #tpu.memory_space<vmem>>, %arg2: memref<1x256xf32, #tpu.memory_space<vmem>>, %arg3: memref<1x256xf32, #tpu.memory_space<vmem>>, %arg4: memref<256x128xf32, #tpu.memory_space<vmem>>, %arg5: memref<1x128xf32, #tpu.memory_space<vmem>>, %arg6: memref<128x64xf32, #tpu.memory_space<vmem>>, %arg7: memref<1x64xf32, #tpu.memory_space<vmem>>, %arg8: memref<64x2xf32, #tpu.memory_space<vmem>>, %arg9: memref<1x2xf32, #tpu.memory_space<vmem>>, %arg10: memref<2x2xf32, #tpu.memory_space<vmem>>) attributes {dimension_semantics = [], scalar_prefetch = 0 : i64, scratch_operands = 0 : i64, tpu.core_type = #tpu.core_type<tc>} {
    %c0 = arith.constant 0 : index
    %c0_0 = arith.constant 0 : index
    %0 = vector.load %arg1[%c0, %c0_0] : memref<2x1xf32, #tpu.memory_space<vmem>>, vector<2x1xf32>
    %c0_1 = arith.constant 0 : index
    %c0_2 = arith.constant 0 : index
    %1 = vector.load %arg2[%c0_1, %c0_2] : memref<1x256xf32, #tpu.memory_space<vmem>>, vector<1x256xf32>
    %2 = vector.broadcast %0 : vector<2x1xf32> to vector<2x256xf32>
    %3 = vector.broadcast %1 : vector<1x256xf32> to vector<2x256xf32>
    %4 = arith.mulf %2, %3 : vector<2x256xf32>
    %c0_3 = arith.constant 0 : index
    %c0_4 = arith.constant 0 : index
    %5 = vector.load %arg3[%c0_3, %c0_4] : memref<1x256xf32, #tpu.memory_space<vmem>>, vector<1x256xf32>
    %6 = vector.broadcast %5 : vector<1x256xf32> to vector<2x256xf32>
    %7 = arith.addf %4, %6 : vector<2x256xf32>
    %c0_5 = arith.constant 0 : index
    %c0_6 = arith.constant 0 : index
    %8 = vector.load %arg0[%c0_5, %c0_6] : memref<2x256xf32, #tpu.memory_space<vmem>>, vector<2x256xf32>
    %9 = arith.addf %8, %7 : vector<2x256xf32>
    %c0_7 = arith.constant 0 : index
    %c0_8 = arith.constant 0 : index
    %10 = vector.load %arg4[%c0_7, %c0_8] : memref<256x128xf32, #tpu.memory_space<vmem>>, vector<256x128xf32>
    %cst = arith.constant dense<0.000000e+00> : vector<2x128xf32>
    %11 = tpu.matmul %9, %10, %cst {dimension_numbers = #tpu.dot_dimension_numbers<[1], [0], [0], [1], [0, 0, 1, 1], [], []>} : vector<2x256xf32>, vector<256x128xf32>, vector<2x128xf32> -> vector<2x128xf32>
    %c0_9 = arith.constant 0 : index
    %c0_10 = arith.constant 0 : index
    %12 = vector.load %arg5[%c0_9, %c0_10] : memref<1x128xf32, #tpu.memory_space<vmem>>, vector<1x128xf32>
    %13 = vector.broadcast %12 : vector<1x128xf32> to vector<2x128xf32>
    %14 = arith.addf %11, %13 : vector<2x128xf32>
    %cst_11 = arith.constant 0.000000e+00 : f32
    %15 = vector.broadcast %cst_11 : f32 to vector<2x128xf32>
    %16 = arith.maximumf %14, %15 : vector<2x128xf32>
    %c0_12 = arith.constant 0 : index
    %c0_13 = arith.constant 0 : index
    %17 = vector.load %arg6[%c0_12, %c0_13] : memref<128x64xf32, #tpu.memory_space<vmem>>, vector<128x64xf32>
    %cst_14 = arith.constant dense<0.000000e+00> : vector<2x64xf32>
    %18 = tpu.matmul %16, %17, %cst_14 {dimension_numbers = #tpu.dot_dimension_numbers<[1], [0], [0], [1], [0, 0, 1, 1], [], []>} : vector<2x128xf32>, vector<128x64xf32>, vector<2x64xf32> -> vector<2x64xf32>
    %c0_15 = arith.constant 0 : index
    %c0_16 = arith.constant 0 : index
    %19 = vector.load %arg7[%c0_15, %c0_16] : memref<1x64xf32, #tpu.memory_space<vmem>>, vector<1x64xf32>
    %20 = vector.broadcast %19 : vector<1x64xf32> to vector<2x64xf32>
    %21 = arith.addf %18, %20 : vector<2x64xf32>
    %cst_17 = arith.constant 0.000000e+00 : f32
    %22 = vector.broadcast %cst_17 : f32 to vector<2x64xf32>
    %23 = arith.maximumf %21, %22 : vector<2x64xf32>
    %c0_18 = arith.constant 0 : index
    %c0_19 = arith.constant 0 : index
    %24 = vector.load %arg8[%c0_18, %c0_19] : memref<64x2xf32, #tpu.memory_space<vmem>>, vector<64x2xf32>
    %cst_20 = arith.constant dense<0.000000e+00> : vector<2x2xf32>
    %25 = tpu.matmul %23, %24, %cst_20 {dimension_numbers = #tpu.dot_dimension_numbers<[1], [0], [0], [1], [0, 0, 1, 1], [], []>} : vector<2x64xf32>, vector<64x2xf32>, vector<2x2xf32> -> vector<2x2xf32>
    %c0_21 = arith.constant 0 : index
    %c0_22 = arith.constant 0 : index
    %26 = vector.load %arg9[%c0_21, %c0_22] : memref<1x2xf32, #tpu.memory_space<vmem>>, vector<1x2xf32>
    %27 = vector.broadcast %26 : vector<1x2xf32> to vector<2x2xf32>
    %28 = arith.addf %25, %27 : vector<2x2xf32>
    %c0_23 = arith.constant 0 : index
    %c0_24 = arith.constant 0 : index
    %29 = vector.load %arg10[%c0_23, %c0_24] : memref<2x2xf32, #tpu.memory_space<vmem>>, vector<2x2xf32>
    tpu.vector_store %arg10[%c0_23, %c0_24], %28 {strides = array<i32>} : memref<2x2xf32, #tpu.memory_space<vmem>>, vector<2x2xf32>,
    return
  }
}

</mosaic_0001>

<bundles_post_ra>
// kernel: forward.5
= control target key start
LH: loop header
LB: loop body
LE: loop exit
PB: predicated region body
PF: predicated region fallthrough
CT: control target
= control target key end

     0   :  { %s1639_s12 = smov 0   ;;  %s1641_s13 = smov 0   ;;  %s1874_s0 = inlined_call_operand.vmem [shape: bf16[2,10,80,3], index: 0, kind: input, shape index: {}]   ;;  %s1875_s1 = inlined_call_operand.vmem [shape: bf16[3,3,3,32], index: 1, kind: input, shape index: {}]   ;;  %s1876_s2 = inlined_call_operand.vmem [shape: f32[1,32], index: 2, kind: input, shape index: {}]   ;;  %s1877_s3 = inlined_call_operand.vmem [shape: bf16[2,8,64,32], index: 3, kind: output, shape index: {}]  }
   0x1   :  { %s1643_s14 = smov 0   ;;  %s1645_s15 = smov 0  }
   0x2   :  { %s1647_s16 = smov 0  }
   0x3 LB: > { %s22_s17 = sadd.s32 1, %s1608_s14  ;;  %s25_s18 = sadd.s32 1, %s1612_s15  ;;  %s1616_s16 = sphi %s1647_s16, %s13_s16   ;;  %s1612_s15 = sphi %s1645_s15, %s1881_s15   ;;  %s1608_s14 = sphi %s1643_s14, %s1880_s14   ;;  %s1604_s13 = sphi %s1641_s13, %s1879_s13   ;;  %s1600_s12 = sphi %s1639_s12, %s1878_s12  }
   0x4   : > { %p23_p0 = scmp.ge.s32.totalorder %s22_s17, 8  ;;  %p1255_p1 = scmp.ge.s32.totalorder %s1616_s16, 1 }
   0x5   : > { %p151_p2 = scmp.lt.s32.totalorder %s1616_s16, 17 }
   0x6   : > { %s1883_s17 = smov (%p23_p0, %s22_s17), 0  ;;  %s1885_s18 = smov (!%p23_p0, %s25_s18), %s1612_s15 }
   0x7   : > { %p152_p3 = pnand %p1255_p1, %p151_p2  ;;  %p27_p4 = scmp.ge.s32.totalorder %s1885_s18, 2 }
   0x8   : > { %p179_p5 = scmp.lt.s32.totalorder (!%p152_p3), %s1604_s13, 1  ;;  %s1363_s25 = smul.u32 (!%p152_p3), 40, %s1600_s12 }
   0x9   : > { %s1887_s18 = smov (%p27_p4, %s1885_s18), 0  ;;  %155 = sbr.rel (%p152_p3) target bundleno = 299 (0x12b), region = 32 }
   0xa   : > { %p186_p6 = scmp.lt.s32.totalorder (!%p152_p3), %s1600_s12, 7 }
   0xe   : > { %v1261_v0 = vld [vmem:[%s1875_s1 + $0x2] sm:$0x3]  ;;  %vm243_vm0 = vcmask 1040384   ;;  %vm244_vm1 = vcmask 1041408   ;;  %v1618_v1 = vmov 65535   ;;  %s1889_s13 = smov (!%p179_p5, %s1604_s13), 1 }
   0xf   : > { %v245_v2 = vsel %vm243_vm0, 4294967295, %v1618_v1  ;;  %v207_v3 = vld [vmem:[%s1875_s1] sm:$0x3]  ;;  %v1278_v5 = vld [vmem:[%s1875_s1 + $0x4] sm:$0x3]  ;;  %s1509_s26 = smul.u32 400, %s1889_s13 }
  0x10   : > { %v1677_v4 = vsel %vm244_vm1, %v245_v2, 0  ;;  %vm230_vm2 = vcmask 23552   ;;  %v1294_v9 = vld [vmem:[%s1875_s1 + $0x6] sm:$0x3]  ;;  %v1303_v10 = vld [vmem:[%s1875_s1 + $0x8] sm:$0x3] }
  0x11   : > { %v248_v6 = vand.u32 %v1261_v0, %v1677_v4  ;;  %v334_v7 = vand.u32 %v1677_v4, %v207_v3  ;;  %v410_v8 = vand.u32 %v1278_v5, %v1677_v4  ;;  %s183_s29 = scalar_lea.vmem %s1874_s0, %s1509_s26  ;;  %v534_v26 = vand.u32 %v1294_v9, %v1677_v4  ;;  %v1328_v28 = vld [vmem:[%s1875_s1 + $0xc] sm:$0x3]  ;;  %v1312_v31 = vld [vmem:[%s1875_s1 + $0xa] sm:$0x3]  ;;  %v1346_v45 = vld [vmem:[%s1875_s1 + $0x10] sm:$0x3] }
  0x12   : > { %s1692_s30 = scalar_lea.vmem %s183_s29, %s1363_s25  ;;  %v630_v27 = vand.u32 %v1303_v10, %v1677_v4  ;;  %v838_v32 = vand.u32 %v1328_v28, %v1677_v4  ;;  %v714_v33 = vand.u32 %v1312_v31, %v1677_v4  ;;  %v1337_v48 = vld [vmem:[%s1875_s1 + $0xe] sm:$0x3]  ;;  %v1018_v50 = vand.u32 %v1346_v45, %v1677_v4  ;;  %s1891_s12 = smov (!%p186_p6, %s1600_s12), 7 }
  0x13   : > { %1507 = vmatprep.subr.bf16.mxu1 %v248_v6  ;;  %1417 = vmatprep.subr.bf16.mxu0 %v248_v6  ;;  %v197_v11 = vld [vmem:[%s1692_s30] sm:$0xf]  ;;  %v198_v12 = vld [vmem:[%s1692_s30 + $0x4] sm:$0xf]  ;;  %v199_v13 = vld [vmem:[%s1692_s30 + $0x8] sm:$0xf]  ;;  %v934_v52 = vand.u32 %v1337_v48, %v1677_v4 }
  0x14   : > { %1508 = vmatpush3.bf16.msra.mxu1 %v248_v6  ;;  %1418 = vmatpush3.bf16.msra.mxu0 %v248_v6  ;;  %v200_v14 = vld [vmem:[%s1692_s30 + $0xc] sm:$0xf]  ;;  %v1262_v15 = vcombine.low %v198_v12, %v199_v13  ;;  %v201_v16 = vld [vmem:[%s1692_s30 + $0x10] sm:$0xf]  ;;  %v202_v17 = vld [vmem:[%s1692_s30 + $0x14] sm:$0xf]  ;;  %v1270_v23 = vcombine.low %v197_v11, %v198_v12 }
  0x15   : > { %1427 = vmatprep.subr.bf16.mxu1 %v334_v7  ;;  %1437 = vmatprep.subr.bf16.mxu0 %v410_v8  ;;  %v1271_v18 = vcombine.low %v199_v13, %v200_v14  ;;  %v203_v19 = vld [vmem:[%s1692_s30 + $0x18] sm:$0xf]  ;;  %v204_v20 = vld [vmem:[%s1692_s30 + $0x1c] sm:$0xf]  ;;  %v205_v21 = vld [vmem:[%s1692_s30 + $0x20] sm:$0xf]  ;;  %v1263_v22 = vcombine.low %v200_v14, %v201_v16  ;;  %v1272_v29 = vcombine.low %v201_v16, %v202_v17 }
  0x16   : > { %1419 = vmatprep.mubr.msk.bf16.mxu0 %vm230_vm2, %v1262_v15  ;;  %v1264_v24 = vcombine.low %v202_v17, %v203_v19  ;;  %v1265_v25 = vcombine.low %v204_v20, %v205_v21  ;;  %v1273_v30 = vcombine.low %v203_v19, %v204_v20  ;;  %v206_v34 = vld [vmem:[%s1692_s30 + $0x24] sm:$0xf]  ;;  %v1285_v35 = vld [vmem:[%s1692_s30 + $0x2c] sm:$0xf]  ;;  %v1286_v36 = vld [vmem:[%s1692_s30 + $0x30] sm:$0xf] }
  0x17   : > { %1420 = vmatmul.mubr.msk.bf16.vlgmr.msra.gmra.mxu0 %vm230_vm2, %v1263_v22  ;;  %v1279_v37 = vcombine.low %v205_v21, %v206_v34  ;;  %v1284_v38 = vld [vmem:[%s1692_s30 + $0x28] sm:$0xf]  ;;  %v1304_v39 = vcombine.low %v1285_v35, %v1286_v36  ;;  %v1287_v41 = vld [vmem:[%s1692_s30 + $0x34] sm:$0xf]  ;;  %v1288_v42 = vld [vmem:[%s1692_s30 + $0x38] sm:$0xf] }
  0x18   : > { %1423 = vmatprep.mubr.msk.bf16.mxu1 %vm230_vm2, %v1264_v24  ;;  %1438 = vmatpush3.bf16.msra.mxu0 %v410_v8  ;;  %v1295_v40 = vcombine.low %v1284_v38, %v1285_v35  ;;  %v1289_v43 = vld [vmem:[%s1692_s30 + $0x3c] sm:$0xf]  ;;  %v1290_v44 = vld [vmem:[%s1692_s30 + $0x40] sm:$0xf]  ;;  %v1305_v46 = vcombine.low %v1287_v41, %v1288_v42  ;;  %v1296_v49 = vcombine.low %v1286_v36, %v1287_v41  ;;  %v1291_v53 = vld [vmem:[%s1692_s30 + $0x44] sm:$0xf] }
  0x19   : > { %1424 = vmatmul.mubr.msk.bf16.vlgmr.msra.gmra.mxu1 %vm230_vm2, %v1265_v25  ;;  %1439 = vmatprep.mubr.msk.bf16.mxu0 %vm230_vm2, %v1271_v18  ;;  %v1306_v47 = vcombine.low %v1289_v43, %v1290_v44  ;;  %v1297_v51 = vcombine.low %v1288_v42, %v1289_v43  ;;  %v1292_v54 = vld [vmem:[%s1692_s30 + $0x48] sm:$0xf]  ;;  %v1318_v55 = vld [vmem:[%s1692_s30 + $0x50] sm:$0xf]  ;;  %v1319_v56 = vld [vmem:[%s1692_s30 + $0x54] sm:$0xf]  ;;  %v1298_v59 = vcombine.low %v1290_v44, %v1291_v53 }
  0x1a   : > { %1428 = vmatpush3.bf16.msra.mxu1 %v334_v7  ;;  %1429 = vmatprep.mubr.msk.bf16.mxu1 %vm230_vm2, %v1270_v23  ;;  %v1307_v57 = vcombine.low %v1291_v53, %v1292_v54  ;;  %v1329_v58 = vcombine.low %v1318_v55, %v1319_v56  ;;  %v1320_v60 = vld [vmem:[%s1692_s30 + $0x58] sm:$0xf]  ;;  %v1321_v61 = vld [vmem:[%s1692_s30 + $0x5c] sm:$0xf]  ;;  %v1322_v62 = vld [vmem:[%s1692_s30 + $0x60] sm:$0xf] }
  0x1b   : > { %1447 = vmatprep.subr.bf16.mxu1 %v534_v26  ;;  %1457 = vmatprep.subr.bf16.mxu0 %v630_v27  ;;  %v1323_v63 = vld [vmem:[%s1692_s30 + $0x64] sm:$0xf]  ;;  %v1330_v0 = vcombine.low %v1320_v60, %v1321_v61  ;;  %v1324_v2 = vld [vmem:[%s1692_s30 + $0x68] sm:$0xf]  ;;  %v1325_v3 = vld [vmem:[%s1692_s30 + $0x6c] sm:$0xf]  ;;  %v1338_v7 = vcombine.low %v1319_v56, %v1320_v60  ;;  %v1339_v8 = vcombine.low %v1321_v61, %v1322_v62 }
  0x1c   : > { %v1331_v1 = vcombine.low %v1322_v62, %v1323_v63  ;;  %v1293_v4 = vld [vmem:[%s1692_s30 + $0x4c] sm:$0xf]  ;;  %v1332_v5 = vcombine.low %v1324_v2, %v1325_v3  ;;  %v1340_v9 = vcombine.low %v1323_v63, %v1324_v2  ;;  %v1326_v10 = vld [vmem:[%s1692_s30 + $0x70] sm:$0xf]  ;;  %v1327_v11 = vld [vmem:[%s1692_s30 + $0x74] sm:$0xf] }
  0x1d   : > { %v1313_v6 = vcombine.low %v1292_v54, %v1293_v4  ;;  %v1347_v12 = vcombine.low %v1326_v10, %v1327_v11  ;;  %v1341_v13 = vcombine.low %v1325_v3, %v1326_v10  ;;  %s1257_s23 = sshll.u32 %s1891_s12, 3  ;;  %s1258_s24 = sshll.u32 %s1889_s13, 6  ;;  %vm1148_vm3 = vcmask 257024  }
  0x1e   : > { %s1816_s25 = sadd.s32 %s1258_s24, %s1257_s23 }
  0x1f   : > { %1440 = vmatmul.mubr.msk.bf16.vlgmr.msra.gmra.mxu0 %vm230_vm2, %v1272_v29  ;;  %s1259_s12 = sshll.u32 %s1816_s25, 2 }
  0x20   : > { %1458 = vmatpush3.bf16.msra.mxu0 %v630_v27  ;;  %1443 = vmatprep.mubr.msk.bf16.mxu0 %vm230_vm2, %v1273_v30  ;;  %s1833_s29 = scalar_lea.vmem %s1877_s3, %s1259_s12 }
  0x21   : > { %1430 = vmatmul.mubr.msk.bf16.vlgmr.msra.gmra.mxu1 %vm230_vm2, %v1271_v18  ;;  %1477 = vmatprep.subr.bf16.mxu0 %v838_v32 }
  0x22   : > { %1448 = vmatpush3.bf16.msra.mxu1 %v534_v26  ;;  %1433 = vmatprep.mubr.msk.bf16.mxu1 %vm230_vm2, %v1272_v29 }
  0x23   : > { %1467 = vmatprep.subr.bf16.mxu1 %v714_v33 }
  0x27   : > { %1444 = vmatmul.mubr.msk.bf16.gmra.mxu0 %vm230_vm2, %v1279_v37 }
  0x28   : > { %1459 = vmatprep.mubr.msk.bf16.mxu0 %vm230_vm2, %v1304_v39 }
  0x29   : > { %1434 = vmatmul.mubr.msk.bf16.gmra.mxu1 %vm230_vm2, %v1273_v30 }
  0x2a   : > { %1449 = vmatprep.mubr.msk.bf16.mxu1 %vm230_vm2, %v1295_v40 }
  0x2f   : > { %1460 = vmatmul.mubr.msk.bf16.vlgmr.msra.gmra.mxu0 %vm230_vm2, %v1305_v46 }
  0x30   : > { %1478 = vmatpush3.bf16.msra.mxu0 %v838_v32  ;;  %1463 = vmatprep.mubr.msk.bf16.mxu0 %vm230_vm2, %v1306_v47 }
  0x31   : > { %1450 = vmatmul.mubr.msk.bf16.vlgmr.msra.gmra.mxu1 %vm230_vm2, %v1296_v49  ;;  %1497 = vmatprep.subr.bf16.mxu0 %v1018_v50 }
  0x32   : > { %1468 = vmatpush3.bf16.msra.mxu1 %v714_v33  ;;  %1453 = vmatprep.mubr.msk.bf16.mxu1 %vm230_vm2, %v1297_v51 }
  0x33   : > { %1487 = vmatprep.subr.bf16.mxu1 %v934_v52 }
  0x37   : > { %1464 = vmatmul.mubr.msk.bf16.gmra.mxu0 %vm230_vm2, %v1307_v57 }
  0x38   : > { %1479 = vmatprep.mubr.msk.bf16.mxu0 %vm230_vm2, %v1329_v58 }
  0x39   : > { %1454 = vmatmul.mubr.msk.bf16.gmra.mxu1 %vm230_vm2, %v1298_v59 }
  0x3a   : > { %1469 = vmatprep.mubr.msk.bf16.mxu1 %vm230_vm2, %v1296_v49 }
  0x3f   : > { %1480 = vmatmul.mubr.msk.bf16.vlgmr.msra.gmra.mxu0 %vm230_vm2, %v1330_v0 }
  0x40   : > { %1498 = vmatpush3.bf16.msra.mxu0 %v1018_v50  ;;  %1483 = vmatprep.mubr.msk.bf16.mxu0 %vm230_vm2, %v1331_v1 }
  0x41   : > { %1470 = vmatmul.mubr.msk.bf16.vlgmr.msra.gmra.mxu1 %vm230_vm2, %v1297_v51 }
  0x42   : > { %1488 = vmatpush3.bf16.msra.mxu1 %v934_v52  ;;  %1473 = vmatprep.mubr.msk.bf16.mxu1 %vm230_vm2, %v1298_v59 }
  0x47   : > { %1484 = vmatmul.mubr.msk.bf16.gmra.mxu0 %vm230_vm2, %v1332_v5 }
  0x48   : > { %1499 = vmatprep.mubr.msk.bf16.mxu0 %vm230_vm2, %v1330_v0 }
  0x49   : > { %1474 = vmatmul.mubr.msk.bf16.gmra.mxu1 %vm230_vm2, %v1313_v6 }
  0x4a   : > { %1489 = vmatprep.mubr.msk.bf16.mxu1 %vm230_vm2, %v1338_v7 }
  0x4f   : > { %1500 = vmatmul.mubr.msk.bf16.vlgmr.msra.gmra.mxu0 %vm230_vm2, %v1331_v1 }
  0x50   : > { %1503 = vmatprep.mubr.msk.bf16.mxu0 %vm230_vm2, %v1332_v5 }
  0x51   : > { %1490 = vmatmul.mubr.msk.bf16.vlgmr.msra.gmra.mxu1 %vm230_vm2, %v1339_v8 }
  0x52   : > { %1493 = vmatprep.mubr.msk.bf16.mxu1 %vm230_vm2, %v1340_v9 }
  0x57   : > { %1504 = vmatmul.mubr.msk.bf16.gmra.mxu0 %vm230_vm2, %v1347_v12 }
  0x59   : > { %1494 = vmatmul.mubr.msk.bf16.gmra.mxu1 %vm230_vm2, %v1341_v13 }
  0xd7   : > { %v1421_v14 = vpop.f32.mrf.mxu0 }
  0xd9   : > { %v1425_v15 = vpop.f32.mrf.mxu1  ;;  %v284_v16 = vpop.f32.mrf.mxu0 }
  0xdb   : > { %v300_v17 = vpop.f32.mrf.mxu1  ;;  %v1422_v18 = vpop.f32.mrf.mxu0 }
  0xdd   : > { %v1426_v19 = vpop.f32.mrf.mxu1  ;;  %v287_v20 = vpop.f32.mrf.mxu0 }
  0xdf   : > { %v1784_v21 = vpop.f32.mrf.mxu1  ;;  %v1441_v22 = vpop.f32.mrf.mxu0 }
  0xe1   : > { %v1431_v23 = vpop.f32.mrf.mxu1  ;;  %v446_v24 = vpop.f32.mrf.mxu0 }
  0xe2   : > { %v379_v55 = vadd.f32 %v1431_v23, %v1421_v14 }
  0xe3   : > { %v370_v25 = vpop.f32.mrf.mxu1  ;;  %v1442_v26 = vpop.f32.mrf.mxu0 }
  0xe4   : > { %v371_v58 = vadd.f32 %v370_v25, %v284_v16  ;;  %v479_v61 = vadd.f32 %v1441_v22, %v379_v55 }
  0xe5   : > { %v1432_v27 = vpop.f32.mrf.mxu1  ;;  %v449_v28 = vpop.f32.mrf.mxu0 }
  0xe6   : > { %v382_v62 = vadd.f32 %v1432_v27, %v1422_v18  ;;  %v477_v1 = vadd.f32 %v446_v24, %v371_v58 }
  0xe7   : > { %v373_v29 = vpop.f32.mrf.mxu1  ;;  %v1445_v30 = vpop.f32.mrf.mxu0 }
  0xe8   : > { %v374_v2 = vadd.f32 %v373_v29, %v287_v20  ;;  %v480_v6 = vadd.f32 %v1442_v26, %v382_v62 }
  0xe9   : > { %v1435_v31 = vpop.f32.mrf.mxu1  ;;  %v462_v32 = vpop.f32.mrf.mxu0 }
  0xea   : > { %v395_v8 = vadd.f32 %v1435_v31, %v1425_v15  ;;  %v478_v12 = vadd.f32 %v449_v28, %v374_v2 }
  0xeb   : > { %v386_v33 = vpop.f32.mrf.mxu1  ;;  %v1446_v34 = vpop.f32.mrf.mxu0 }
  0xec   : > { %v387_v9 = vadd.f32 %v386_v33, %v300_v17  ;;  %v483_v25 = vadd.f32 %v1445_v30, %v395_v8 }
  0xed   : > { %v1436_v35 = vpop.f32.mrf.mxu1  ;;  %v1786_v36 = vpop.f32.mrf.mxu0 }
  0xee   : > { %v398_v16 = vadd.f32 %v1436_v35, %v1426_v19  ;;  %v481_v15 = vadd.f32 %v462_v32, %v387_v9 }
  0xef   : > { %v389_v37 = vpop.f32.mrf.mxu1  ;;  %v1461_v38 = vpop.f32.mrf.mxu0 }
  0xf0   : > { %v390_v17 = vadd.f32 %v389_v37, %v1784_v21  ;;  %v484_v29 = vadd.f32 %v1446_v34, %v398_v16 }
  0xf1   : > { %v1451_v39 = vpop.f32.mrf.mxu1  ;;  %v666_v40 = vpop.f32.mrf.mxu0 }
  0xf2   : > { %v603_v3 = vadd.f32 %v1451_v39, %v479_v61  ;;  %v482_v30 = vadd.f32 %v1786_v36, %v390_v17 }
  0xf3   : > { %v570_v41 = vpop.f32.mrf.mxu1  ;;  %v1462_v42 = vpop.f32.mrf.mxu0 }
  0xf4   : > { %v601_v7 = vadd.f32 %v570_v41, %v477_v1  ;;  %v699_v13 = vadd.f32 %v1461_v38, %v603_v3 }
  0xf5   : > { %v1452_v43 = vpop.f32.mrf.mxu1  ;;  %v669_v44 = vpop.f32.mrf.mxu0 }
  0xf6   : > { %v604_v14 = vadd.f32 %v1452_v43, %v480_v6  ;;  %v697_v22 = vadd.f32 %v666_v40, %v601_v7 }
  0xf7   : > { %v573_v45 = vpop.f32.mrf.mxu1  ;;  %v1788_v46 = vpop.f32.mrf.mxu0 }
  0xf8   : > { %v602_v23 = vadd.f32 %v573_v45, %v478_v12  ;;  %v700_v28 = vadd.f32 %v1462_v42, %v604_v14 }
  0xf9   : > { %v1455_v47 = vpop.f32.mrf.mxu1  ;;  %v1790_v48 = vpop.f32.mrf.mxu0 }
  0xfa   : > { %v607_v31 = vadd.f32 %v1455_v47, %v483_v25  ;;  %v698_v39 = vadd.f32 %v669_v44, %v602_v23  ;;  %v1821_v44 = vld [vmem:[%s1876_s2] ss:$0 sm:$0xff] }
  0xfb   : > { %v586_v49 = vpop.f32.mrf.mxu1  ;;  %v1792_v50 = vpop.f32.mrf.mxu0 }
  0xfc   : > { %v605_v33 = vadd.f32 %v586_v49, %v481_v15  ;;  %v703_v42 = vadd.f32 %v1788_v46, %v607_v31 }
  0xfd   : > { %v1456_v51 = vpop.f32.mrf.mxu1  ;;  %v1794_v52 = vpop.f32.mrf.mxu0 }
  0xfe   : > { %v608_v32 = vadd.f32 %v1456_v51, %v484_v29  ;;  %v701_v34 = vadd.f32 %v1790_v48, %v605_v33 }
  0xff   : > { %v589_v53 = vpop.f32.mrf.mxu1  ;;  %v1481_v54 = vpop.f32.mrf.mxu0 }
 0x100   : > { %v606_v47 = vadd.f32 %v589_v53, %v482_v30 }
 0x101   : > { %v1471_v56 = vpop.f32.mrf.mxu1  ;;  %v874_v57 = vpop.f32.mrf.mxu0 }
 0x102   : > { %v783_v24 = vadd.f32 %v1471_v56, %v699_v13  ;;  %v702_v1 = vadd.f32 %v1794_v52, %v606_v47 }
 0x103   : > { %v750_v59 = vpop.f32.mrf.mxu1  ;;  %v1482_v60 = vpop.f32.mrf.mxu0 }
 0x104   : > { %v781_v19 = vadd.f32 %v750_v59, %v697_v22  ;;  %v907_v40 = vadd.f32 %v1481_v54, %v783_v24 }
 0x105   : > { %v1472_v63 = vpop.f32.mrf.mxu1  ;;  %v877_v0 = vpop.f32.mrf.mxu0 }
 0x106   : > { %v784_v41 = vadd.f32 %v1472_v63, %v700_v28  ;;  %v905_v37 = vadd.f32 %v874_v57, %v781_v19  ;;  %v704_v57 = vadd.f32 %v1792_v50, %v608_v32 }
 0x107   : > { %v753_v4 = vpop.f32.mrf.mxu1  ;;  %v1796_v5 = vpop.f32.mrf.mxu0 }
 0x108   : > { %v782_v45 = vadd.f32 %v753_v4, %v698_v39  ;;  %v908_v51 = vadd.f32 %v1482_v60, %v784_v41 }
 0x109   : > { %v1475_v10 = vpop.f32.mrf.mxu1  ;;  %v1799_v11 = vpop.f32.mrf.mxu0 }
 0x10a   : > { %v787_v58 = vadd.f32 %v1475_v10, %v703_v42  ;;  %v906_v53 = vadd.f32 %v877_v0, %v782_v45 }
 0x10b   : > { %v766_v18 = vpop.f32.mrf.mxu1  ;;  %v1801_v20 = vpop.f32.mrf.mxu0 }
 0x10c   : > { %v785_v46 = vadd.f32 %v766_v18, %v701_v34  ;;  %v911_v8 = vadd.f32 %v1796_v5, %v787_v58 }
 0x10d   : > { %v1476_v26 = vpop.f32.mrf.mxu1  ;;  %v1809_v27 = vpop.f32.mrf.mxu0 }
 0x10e   : > { %v788_v2 = vadd.f32 %v1476_v26, %v704_v57  ;;  %v909_v9 = vadd.f32 %v1799_v11, %v785_v46 }
 0x10f   : > { %v769_v35 = vpop.f32.mrf.mxu1  ;;  %v1501_v38 = vpop.f32.mrf.mxu0 }
 0x110   : > { %v786_v0 = vadd.f32 %v769_v35, %v702_v1  ;;  %v912_v5 = vadd.f32 %v1801_v20, %v788_v2 }
 0x111   : > { %v1491_v43 = vpop.f32.mrf.mxu1  ;;  %v1054_v21 = vpop.f32.mrf.mxu0 }
 0x112   : > { %v1003_v55 = vadd.f32 %v1491_v43, %v907_v40  ;;  %v910_v15 = vadd.f32 %v1809_v27, %v786_v0 }
 0x113   : > { %v970_v36 = vpop.f32.mrf.mxu1  ;;  %v1502_v49 = vpop.f32.mrf.mxu0 }
 0x114   : > { %v1087_v54 = vadd.f32 %v1501_v38, %v1003_v55  ;;  %v1001_v56 = vadd.f32 %v970_v36, %v905_v37 }
 0x115   : > { %v1492_v59 = vpop.f32.mrf.mxu1  ;;  %v1057_v48 = vpop.f32.mrf.mxu0 }
 0x116   : > { %v1102_v61 = vadd.f32 %v1821_v44, %v1087_v54  ;;  %v1085_v62 = vadd.f32 %v1054_v21, %v1001_v56  ;;  %v1004_v63 = vadd.f32 %v1492_v59, %v908_v51 }
 0x117   : > { %v973_v3 = vpop.f32.mrf.mxu1  ;;  %v1505_v4 = vpop.f32.mrf.mxu0 }
 0x118   : > { %v1110_v60 = vmax.f32 %v1102_v61, 0.0  ;;  %v1100_v6 = vadd.f32 %v1821_v44, %v1085_v62  ;;  %v1088_v7 = vadd.f32 %v1502_v49, %v1004_v63  ;;  %v1002_v50 = vadd.f32 %v973_v3, %v906_v53 }
 0x119   : > { %v1495_v52 = vpop.f32.mrf.mxu1  ;;  %v1070_v10 = vpop.f32.mrf.mxu0 }
 0x11a   : > { %v1366_v12 = vpack.c.bf16 %v1110_v60, %v1110_v60  ;;  %v1108_v13 = vmax.f32 %v1100_v6, 0.0  ;;  %v1103_v14 = vadd.f32 %v1821_v44, %v1088_v7  ;;  %v1086_v16 = vadd.f32 %v1057_v48, %v1002_v50 }
 0x11b   : > { %v1007_v18 = vadd.f32 %v1495_v52, %v911_v8  ;;  %v986_v11 = vpop.f32.mrf.mxu1  ;;  %v1506_v28 = vpop.f32.mrf.mxu0 }
 0x11c   : > { %1151 = vst.msk [vmem:[%s1833_s29 + $0x8] sm:$0xf] %vm1148_vm3, %v1366_v12  ;;  %v1364_v22 = vpack.c.bf16 %v1108_v13, %v1108_v13  ;;  %v1111_v23 = vmax.f32 %v1103_v14, 0.0  ;;  %v1101_v24 = vadd.f32 %v1821_v44, %v1086_v16  ;;  %v1005_v25 = vadd.f32 %v986_v11, %v909_v9 }
 0x11d   : > { %v1091_v17 = vadd.f32 %v1505_v4, %v1007_v18  ;;  %v1496_v26 = vpop.f32.mrf.mxu1  ;;  %v1073_v30 = vpop.f32.mrf.mxu0 }
 0x11e   : > { %1149 = vst.msk [vmem:[%s1833_s29] sm:$0xf] %vm1148_vm3, %v1364_v22  ;;  %v1367_v19 = vpack.c.bf16 %v1111_v23, %v1111_v23  ;;  %v1109_v20 = vmax.f32 %v1101_v24, 0.0  ;;  %v1089_v29 = vadd.f32 %v1070_v10, %v1005_v25  ;;  %v1008_v31 = vadd.f32 %v1496_v26, %v912_v5 }
 0x11f   : > { %v1106_v33 = vadd.f32 %v1821_v44, %v1091_v17  ;;  %v989_v35 = vpop.f32.mrf.mxu1 }
 0x120   : > { %1152 = vst.msk [vmem:[%s1833_s29 + $0xc] sm:$0xf] %vm1148_vm3, %v1367_v19  ;;  %v1365_v38 = vpack.c.bf16 %v1109_v20, %v1109_v20  ;;  %v1104_v27 = vadd.f32 %v1821_v44, %v1089_v29  ;;  %v1092_v39 = vadd.f32 %v1506_v28, %v1008_v31  ;;  %v1006_v40 = vadd.f32 %v989_v35, %v910_v15 }
 0x121   : > { %v1114_v41 = vmax.f32 %v1106_v33, 0.0 }
 0x122   : > { %1150 = vst.msk [vmem:[%s1833_s29 + $0x4] sm:$0xf] %vm1148_vm3, %v1365_v38  ;;  %v1112_v32 = vmax.f32 %v1104_v27, 0.0  ;;  %v1107_v43 = vadd.f32 %v1821_v44, %v1092_v39  ;;  %v1090_v21 = vadd.f32 %v1073_v30, %v1006_v40 }
 0x123   : > { %v1370_v37 = vpack.c.bf16 %v1114_v41, %v1114_v41 }
 0x124   : > { %v1368_v45 = vpack.c.bf16 %v1112_v32, %v1112_v32  ;;  %v1115_v55 = vmax.f32 %v1107_v43, 0.0  ;;  %v1105_v42 = vadd.f32 %v1821_v44, %v1090_v21 }
 0x125   : > { %1155 = vst.msk [vmem:[%s1833_s29 + $0x18] sm:$0xf] %vm1148_vm3, %v1370_v37 }
 0x126   : > { %1153 = vst.msk [vmem:[%s1833_s29 + $0x10] sm:$0xf] %vm1148_vm3, %v1368_v45  ;;  %v1371_v34 = vpack.c.bf16 %v1115_v55, %v1115_v55  ;;  %v1113_v47 = vmax.f32 %v1105_v42, 0.0 }
 0x128   : > { %1156 = vst.msk [vmem:[%s1833_s29 + $0x1c] sm:$0xf] %vm1148_vm3, %v1371_v34  ;;  %v1369_v36 = vpack.c.bf16 %v1113_v47, %v1113_v47 }
 0x12a   : > { %1154 = vst.msk [vmem:[%s1833_s29 + $0x14] sm:$0xf] %vm1148_vm3, %v1369_v36 }
 0x12b PF: > { %s13_s16 = sadd.s32 1, %s1616_s16   ;;  %s1878_s12 = smov %s1608_s14 }
 0x12c   : > { %p10_p7 = scmp.ge.s32.totalorder %s13_s16, 18   ;;  %s1879_s13 = smov %s1612_s15 }
 0x12d   : > { %s1880_s14 = smov %s1883_s17  ;;  %s1881_s15 = smov %s1887_s18 }
 0x12e   :  { %12 = sbr.rel (!%p10_p7) target bundleno = 3 (0x3), region = 73 }

// kernel: forward.6
= control target key start
LH: loop header
LB: loop body
LE: loop exit
PB: predicated region body
PF: predicated region fallthrough
CT: control target
= control target key end

     0   :  { %s6282_s12 = smov 0   ;;  %s6284_s13 = smov 0   ;;  %s8198_s0 = inlined_call_operand.vmem [shape: bf16[2,12,96,160], index: 0, kind: input, shape index: {}]   ;;  %s8199_s1 = inlined_call_operand.vmem [shape: bf16[5,5,160,64], index: 1, kind: input, shape index: {}]   ;;  %s8200_s2 = inlined_call_operand.vmem [shape: f32[1,64], index: 2, kind: input, shape index: {}]   ;;  %s8201_s3 = inlined_call_operand.vmem [shape: bf16[2,8,64,64], index: 3, kind: output, shape index: {}]  }
   0x1   :  { %s6286_s14 = smov 0   ;;  %s6288_s15 = smov 0  }
   0x2   :  { %s6290_s16 = smov 0  }
   0x3 LB: > { %s22_s17 = sadd.s32 1, %s6251_s14  ;;  %s25_s18 = sadd.s32 1, %s6255_s15  ;;  %s6259_s16 = sphi %s6290_s16, %s13_s16   ;;  %s6255_s15 = sphi %s6288_s15, %s8205_s15   ;;  %s6251_s14 = sphi %s6286_s14, %s8204_s14   ;;  %s6247_s13 = sphi %s6284_s13, %s8203_s13   ;;  %s6243_s12 = sphi %s6282_s12, %s8202_s12  }
   0x4   : > { %p23_p0 = scmp.ge.s32.totalorder %s22_s17, 8  ;;  %p4785_p1 = scmp.ge.s32.totalorder %s6259_s16, 1 }
   0x5   : > { %p151_p2 = scmp.lt.s32.totalorder %s6259_s16, 17 }
   0x6   : > { %s8207_s17 = smov (%p23_p0, %s22_s17), 0  ;;  %s8209_s18 = smov (!%p23_p0, %s25_s18), %s6255_s15 }
   0x7   : > { %p152_p3 = pnand %p4785_p1, %p151_p2  ;;  %p27_p4 = scmp.ge.s32.totalorder %s8209_s18, 2 }
   0x8   : > { %p179_p5 = scmp.lt.s32.totalorder (!%p152_p3), %s6247_s13, 1  ;;  %s5790_s9 = smul.u32 (!%p152_p3), 96, %s6243_s12 }
   0x9   : > { %s8211_s18 = smov (%p27_p4, %s8209_s18), 0  ;;  %155 = sbr.rel (%p152_p3) target bundleno = 749 (0x2ed), region = 32 }
   0xa   : > { %p186_p6 = scmp.lt.s32.totalorder (!%p152_p3), %s6243_s12, 7 }
   0xe   : > { %v5861_v0 = vld [vmem:[%s8199_s1 + $0x88] sm:$0xff]   ;;  %v6261_v1 = vmov 0   ;;  %v5862_v2 = vld [vmem:[%s8199_s1 + $0x38] sm:$0xff]   ;;  %v5863_v3 = vld [vmem:[%s8199_s1 + $0x80] sm:$0xff]   ;;  %s8213_s13 = smov (!%p179_p5, %s6247_s13), 1  ;;  %vm346_vm0 = vcmask 261120  }
   0xf   : > { %359 = vmatprep.subr.bf16.mxu0 %v6261_v1  ;;  %511 = vmatprep.subr.bf16.mxu1 %v6261_v1  ;;  %v5864_v4 = vld [vmem:[%s8199_s1 + $0x30] sm:$0xff]   ;;  %v5865_v5 = vld [vmem:[%s8199_s1 + $0x78] sm:$0xff]   ;;  %v5866_v6 = vld [vmem:[%s8199_s1 + $0x28] sm:$0xff]   ;;  %s5819_s6 = smul.u32 1152, %s8213_s13  ;;  %s8215_s12 = smov (!%p186_p6, %s6243_s12), 7  ;;  %vm4672_vm1 = vcmask 519168  }
  0x10   : > { %360 = vmatpush1.bf16.msra.mxu0 %v5861_v0  ;;  %512 = vmatpush1.bf16.msra.mxu1 %v5862_v2  ;;  %v5867_v7 = vld [vmem:[%s8199_s1 + $0x70] sm:$0xff]   ;;  %v5868_v8 = vld [vmem:[%s8199_s1 + $0x20] sm:$0xff]   ;;  %v5869_v9 = vld [vmem:[%s8199_s1 + $0x68] sm:$0xff]   ;;  %s4788_s30 = sshll.u32 %s8213_s13, 6 }
  0x11   : > { %361 = vmatprep.subr.bf16.mxu0 %v6261_v1  ;;  %513 = vmatprep.subr.bf16.mxu1 %v6261_v1  ;;  %s183_s21 = scalar_lea.vmem %s8198_s0, %s5819_s6  ;;  %v5870_v10 = vld [vmem:[%s8199_s1 + $0x18] sm:$0xff]   ;;  %v5871_v11 = vld [vmem:[%s8199_s1 + $0x60] sm:$0xff]   ;;  %v5872_v12 = vld [vmem:[%s8199_s1 + $0x10] sm:$0xff]  }
  0x12   : > { %s6361_s24 = scalar_lea.vmem %s183_s21, %s5790_s9  ;;  %v5873_v18 = vld [vmem:[%s8199_s1 + $0x58] sm:$0xff]   ;;  %v5874_v19 = vld [vmem:[%s8199_s1 + $0x8] sm:$0xff]   ;;  %v5875_v20 = vld [vmem:[%s8199_s1 + $0x50] sm:$0xff]  }
  0x13   : > { %v198_v13 = vld [vmem:[%s6361_s24 + $0x8] sm:$0xff]  ;;  %v199_v14 = vld [vmem:[%s6361_s24 + $0x10] sm:$0xff]  ;;  %v197_v15 = vld [vmem:[%s6361_s24] sm:$0xff] }
  0x14   : > { %362 = vmatpush1.bf16.msra.mxu0 %v5863_v3  ;;  %514 = vmatpush1.bf16.msra.mxu1 %v5864_v4  ;;  %v4812_v16 = vcombine.high %v198_v13, %v199_v14  ;;  %v4834_v17 = vcombine.high %v197_v15, %v198_v13  ;;  %v5876_v21 = vld [vmem:[%s8199_s1] sm:$0xff]   ;;  %v5877_v22 = vld [vmem:[%s8199_s1 + $0x98] sm:$0xff]   ;;  %v5878_v23 = vld [vmem:[%s8199_s1 + $0x48] sm:$0xff]   ;;  %v4811_v27 = vcombine.low %v198_v13, %v199_v14 }
  0x15   : > { %363 = vmatprep.subr.bf16.mxu0 %v6261_v1  ;;  %515 = vmatprep.subr.bf16.mxu1 %v6261_v1  ;;  %v5879_v24 = vld [vmem:[%s8199_s1 + $0x90] sm:$0xff]   ;;  %v5880_v25 = vld [vmem:[%s8199_s1 + $0x40] sm:$0xff]   ;;  %v200_v26 = vld [vmem:[%s6361_s24 + $0x18] sm:$0xff]  ;;  %v4833_v29 = vcombine.low %v197_v15, %v198_v13 }
  0x16   : > { %4829 = vmatprep.mubr.msk.bf16.mxu0 %vm346_vm0, %v4812_v16  ;;  %4851 = vmatprep.mubr.msk.bf16.mxu1 %vm346_vm0, %v4834_v17  ;;  %v201_v28 = vld [vmem:[%s6361_s24 + $0x20] sm:$0xff]  ;;  %v5885_v30 = vld [vmem:[%s8199_s1 + $0xd8] sm:$0xff]   ;;  %v5886_v31 = vld [vmem:[%s8199_s1 + $0x128] sm:$0xff]   ;;  %v6420_v33 = vcombine.high %v199_v14, %v200_v26  ;;  %v6441_v40 = vcombine.low %v199_v14, %v200_v26 }
  0x17   : > { %v6418_v32 = vcombine.high %v200_v26, %v201_v28  ;;  %v5887_v34 = vld [vmem:[%s8199_s1 + $0xd0] sm:$0xff]   ;;  %v5888_v35 = vld [vmem:[%s8199_s1 + $0x120] sm:$0xff]   ;;  %v202_v36 = vld [vmem:[%s6361_s24 + $0x28] sm:$0xff]  ;;  %v6435_v37 = vcombine.low %v200_v26, %v201_v28 }
  0x18   : > { %364 = vmatpush1.bf16.msra.mxu0 %v5865_v5  ;;  %516 = vmatpush1.bf16.msra.mxu1 %v5866_v6  ;;  %v203_v38 = vld [vmem:[%s6361_s24 + $0x30] sm:$0xff]  ;;  %v5889_v39 = vld [vmem:[%s8199_s1 + $0xc8] sm:$0xff]   ;;  %v5890_v41 = vld [vmem:[%s8199_s1 + $0x118] sm:$0xff]   ;;  %v6451_v43 = vcombine.high %v201_v28, %v202_v36  ;;  %v6475_v50 = vcombine.low %v201_v28, %v202_v36 }
  0x19   : > { %365 = vmatprep.subr.bf16.mxu0 %v6261_v1  ;;  %517 = vmatprep.subr.bf16.mxu1 %v6261_v1  ;;  %v6448_v42 = vcombine.high %v202_v36, %v203_v38  ;;  %v5895_v44 = vld [vmem:[%s8199_s1 + $0xc0] sm:$0xff]   ;;  %v5896_v45 = vld [vmem:[%s8199_s1 + $0x110] sm:$0xff]   ;;  %v204_v46 = vld [vmem:[%s6361_s24 + $0x38] sm:$0xff]  ;;  %v6467_v47 = vcombine.low %v202_v36, %v203_v38 }
  0x1a   : > { %v6470_v48 = vld [vmem:[%s6361_s24 + $0x40] sm:$0xff]  ;;  %v5897_v49 = vld [vmem:[%s8199_s1 + $0xb8] sm:$0xff]   ;;  %v5898_v51 = vld [vmem:[%s8199_s1 + $0x108] sm:$0xff]   ;;  %v6486_v53 = vcombine.high %v203_v38, %v204_v46  ;;  %v6507_v58 = vcombine.low %v203_v38, %v204_v46 }
  0x1b   : > { %v6483_v52 = vcombine.high %v204_v46, %v6470_v48  ;;  %v5903_v54 = vld [vmem:[%s8199_s1 + $0xb0] sm:$0xff]   ;;  %v5904_v55 = vld [vmem:[%s8199_s1 + $0x100] sm:$0xff]   ;;  %v6502_v56 = vcombine.low %v204_v46, %v6470_v48  ;;  %v5905_v57 = vld [vmem:[%s8199_s1 + $0xa8] sm:$0xff]  }
  0x1c   : > { %366 = vmatpush1.bf16.msra.mxu0 %v5867_v7  ;;  %518 = vmatpush1.bf16.msra.mxu1 %v5868_v8  ;;  %v5906_v59 = vld [vmem:[%s8199_s1 + $0xf8] sm:$0xff]   ;;  %v5911_v60 = vld [vmem:[%s8199_s1 + $0xa0] sm:$0xff]   ;;  %v5912_v61 = vld [vmem:[%s8199_s1 + $0xf0] sm:$0xff]  }
  0x1d   : > { %367 = vmatprep.subr.bf16.mxu0 %v6261_v1  ;;  %519 = vmatprep.subr.bf16.mxu1 %v6261_v1  ;;  %v5913_v62 = vld [vmem:[%s8199_s1 + $0xe8] sm:$0xff]   ;;  %v5914_v63 = vld [vmem:[%s8199_s1 + $0x138] sm:$0xff]   ;;  %v5915_v0 = vld [vmem:[%s8199_s1 + $0xe0] sm:$0xff]  }
  0x1e   : > { %v5916_v2 = vld [vmem:[%s8199_s1 + $0x130] sm:$0xff]   ;;  %v5917_v3 = vld [vmem:[%s8199_s1 + $0x178] sm:$0xff]   ;;  %v5918_v4 = vld [vmem:[%s8199_s1 + $0x1c8] sm:$0xff]  }
  0x1f   : > { %v5919_v5 = vld [vmem:[%s8199_s1 + $0x170] sm:$0xff]   ;;  %v5920_v6 = vld [vmem:[%s8199_s1 + $0x1c0] sm:$0xff]   ;;  %v5921_v7 = vld [vmem:[%s8199_s1 + $0x168] sm:$0xff]  }
  0x20   : > { %368 = vmatpush1.bf16.msra.mxu0 %v5869_v9  ;;  %520 = vmatpush1.bf16.msra.mxu1 %v5870_v10  ;;  %v5922_v8 = vld [vmem:[%s8199_s1 + $0x1b8] sm:$0xff]   ;;  %v5923_v9 = vld [vmem:[%s8199_s1 + $0x160] sm:$0xff]   ;;  %v5924_v10 = vld [vmem:[%s8199_s1 + $0x1b0] sm:$0xff]  }
  0x21   : > { %369 = vmatprep.subr.bf16.mxu0 %v6261_v1  ;;  %521 = vmatprep.subr.bf16.mxu1 %v6261_v1  ;;  %v6593_v13 = vld [vmem:[%s6361_s24 + $0x50] sm:$0xff]  ;;  %v5926_v14 = vld [vmem:[%s8199_s1 + $0x1a8] sm:$0xff]   ;;  %v5935_v26 = vld [vmem:[%s8199_s1 + $0x140] sm:$0xff]  }
  0x22   : > { %v5927_v17 = vld [vmem:[%s8199_s1 + $0x150] sm:$0xff]   ;;  %v5937_v28 = vld [vmem:[%s8199_s1 + $0x188] sm:$0xff]   ;;  %v5951_v46 = vld [vmem:[%s8199_s1 + $0x200] sm:$0xff]  }
  0x23   : > { %v5944_v36 = vld [vmem:[%s8199_s1 + $0x268] sm:$0xff]   ;;  %v5945_v38 = vld [vmem:[%s8199_s1 + $0x210] sm:$0xff]  }
  0x24   : > { %370 = vmatpush1.bf16.msra.mxu0 %v5871_v11  ;;  %522 = vmatpush1.bf16.msra.mxu1 %v5872_v12  ;;  %v5925_v11 = vld [vmem:[%s8199_s1 + $0x158] sm:$0xff]   ;;  %v206_v12 = vld [vmem:[%s6361_s24 + $0x48] sm:$0xff] }
  0x25   : > { %371 = vmatprep.subr.bf16.mxu0 %v6261_v1  ;;  %523 = vmatprep.subr.bf16.mxu1 %v6261_v1  ;;  %v6601_v15 = vcombine.high %v6470_v48, %v206_v12  ;;  %v4912_v16 = vcombine.high %v206_v12, %v6593_v13 }
  0x28   : > { %372 = vmatpush1.bf16.msra.mxu0 %v5873_v18  ;;  %524 = vmatpush1.bf16.msra.mxu1 %v5874_v19  ;;  %v5928_v18 = vld [vmem:[%s8199_s1 + $0x1a0] sm:$0xff]   ;;  %v5932_v19 = vld [vmem:[%s8199_s1 + $0x148] sm:$0xff]  }
  0x29   : > { %373 = vmatprep.subr.bf16.mxu0 %v6261_v1  ;;  %525 = vmatprep.subr.bf16.mxu1 %v6261_v1 }
  0x2c   : > { %374 = vmatpush1.bf16.msra.mxu0 %v5875_v20  ;;  %526 = vmatpush1.bf16.msra.mxu1 %v5876_v21  ;;  %v6620_v20 = vcombine.low %v6470_v48, %v206_v12  ;;  %v4963_v21 = vld [vmem:[%s6361_s24 + $0x60] sm:$0xff]  ;;  %v5954_v48 = vld [vmem:[%s8199_s1 + $0x1f8] sm:$0xff]  }
  0x2d   : > { %387 = vmatprep.subr.bf16.mxu0 %v6261_v1  ;;  %539 = vmatprep.subr.bf16.mxu1 %v6261_v1 }
  0x30   : > { %388 = vmatpush2.bf16.msra.mxu0 %v5877_v22  ;;  %540 = vmatpush2.bf16.msra.mxu1 %v5878_v23  ;;  %v4911_v22 = vcombine.low %v206_v12, %v6593_v13  ;;  %v6626_v23 = vld [vmem:[%s6361_s24 + $0x68] sm:$0xff] }
  0x31   : > { %389 = vmatprep.subr.bf16.mxu0 %v6261_v1  ;;  %541 = vmatprep.subr.bf16.mxu1 %v6261_v1 }
  0x34   : > { %390 = vmatpush2.bf16.msra.mxu0 %v5879_v24  ;;  %542 = vmatpush2.bf16.msra.mxu1 %v5880_v25  ;;  %v5933_v24 = vld [vmem:[%s8199_s1 + $0x198] sm:$0xff]   ;;  %v4996_v25 = vcombine.high %v4963_v21, %v6626_v23 }
  0x35   : > { %666 = vmatprep.subr.bf16.mxu0 %v6261_v1  ;;  %829 = vmatprep.subr.bf16.mxu1 %v6261_v1 }
  0x37   : > { %392 = vmatmul.mubr.bf16.vlgmr.msra.gmra.mxu0 %v4811_v27  ;;  %544 = vmatmul.mubr.bf16.vlgmr.msra.gmra.mxu1 %v4833_v29  ;;  %v5936_v27 = vld [vmem:[%s8199_s1 + $0x190] sm:$0xff]   ;;  %v5938_v29 = vld [vmem:[%s8199_s1 + $0x1d8] sm:$0xff]  }
  0x38   : > { %667 = vmatpush1.bf16.msra.mxu0 %v5885_v30  ;;  %830 = vmatpush1.bf16.msra.mxu1 %v5886_v31  ;;  %v5939_v30 = vld [vmem:[%s8199_s1 + $0x180] sm:$0xff]   ;;  %v5940_v31 = vld [vmem:[%s8199_s1 + $0x1d0] sm:$0xff]  }
  0x39   : > { %668 = vmatprep.subr.bf16.mxu0 %v6261_v1  ;;  %831 = vmatprep.subr.bf16.mxu1 %v6261_v1 }
  0x3a   : > { %4830 = vmatprep.mubr.msk.bf16.mxu0 %vm346_vm0, %v6418_v32  ;;  %4852 = vmatprep.mubr.msk.bf16.mxu1 %vm346_vm0, %v6420_v33 }
  0x3c   : > { %669 = vmatpush1.bf16.msra.mxu0 %v5887_v34  ;;  %832 = vmatpush1.bf16.msra.mxu1 %v5888_v35  ;;  %v4995_v34 = vcombine.low %v4963_v21, %v6626_v23  ;;  %v6670_v35 = vld [vmem:[%s6361_s24 + $0x78] sm:$0xff]  ;;  %v4971_v21 = vld [vmem:[%s6361_s24 + $0xa0] sm:$0xff] }
  0x3d   : > { %670 = vmatprep.subr.bf16.mxu0 %v6261_v1  ;;  %833 = vmatprep.subr.bf16.mxu1 %v6261_v1 }
  0x3f   : > { %400 = vmatmul.mubr.bf16.gmra.mxu0 %v6435_v37  ;;  %552 = vmatmul.mubr.bf16.gmra.mxu1 %v6441_v40 }
  0x40   : > { %671 = vmatpush1.bf16.msra.mxu0 %v5889_v39  ;;  %834 = vmatpush1.bf16.msra.mxu1 %v5890_v41  ;;  %v5946_v39 = vld [vmem:[%s8199_s1 + $0x260] sm:$0xff]  }
  0x41   : > { %672 = vmatprep.subr.bf16.mxu0 %v6261_v1  ;;  %835 = vmatprep.subr.bf16.mxu1 %v6261_v1  ;;  %v6698_v41 = vld [vmem:[%s6361_s24 + $0x80] sm:$0xff] }
  0x42   : > { %4831 = vmatprep.mubr.msk.bf16.mxu0 %vm346_vm0, %v6448_v42  ;;  %4853 = vmatprep.mubr.msk.bf16.mxu1 %vm346_vm0, %v6451_v43  ;;  %v6837_v12 = vcombine.low %v6670_v35, %v6698_v41 }
  0x44   : > { %673 = vmatpush1.bf16.msra.mxu0 %v5895_v44  ;;  %836 = vmatpush1.bf16.msra.mxu1 %v5896_v45  ;;  %v5949_v44 = vld [vmem:[%s8199_s1 + $0x258] sm:$0xff]  }
  0x45   : > { %674 = vmatprep.subr.bf16.mxu0 %v6261_v1  ;;  %837 = vmatprep.subr.bf16.mxu1 %v6261_v1 }
  0x47   : > { %408 = vmatmul.mubr.bf16.gmra.mxu0 %v6467_v47  ;;  %560 = vmatmul.mubr.bf16.gmra.mxu1 %v6475_v50 }
  0x48   : > { %675 = vmatpush1.bf16.msra.mxu0 %v5897_v49  ;;  %838 = vmatpush1.bf16.msra.mxu1 %v5898_v51  ;;  %v208_v49 = vld [vmem:[%s6361_s24 + $0x58] sm:$0xff] }
  0x49   : > { %676 = vmatprep.subr.bf16.mxu0 %v6261_v1  ;;  %839 = vmatprep.subr.bf16.mxu1 %v6261_v1 }
  0x4a   : > { %4832 = vmatprep.mubr.msk.bf16.mxu0 %vm346_vm0, %v6483_v52  ;;  %4854 = vmatprep.mubr.msk.bf16.mxu1 %vm346_vm0, %v6486_v53 }
  0x4c   : > { %677 = vmatpush1.bf16.msra.mxu0 %v5903_v54  ;;  %840 = vmatpush1.bf16.msra.mxu1 %v5904_v55  ;;  %v4948_v54 = vcombine.high %v6593_v13, %v208_v49 }
  0x4d   : > { %678 = vmatprep.subr.bf16.mxu0 %v6261_v1  ;;  %841 = vmatprep.subr.bf16.mxu1 %v6261_v1 }
  0x4f   : > { %416 = vmatmul.mubr.bf16.gmra.mxu0 %v6502_v56  ;;  %568 = vmatmul.mubr.bf16.gmra.mxu1 %v6507_v58 }
  0x50   : > { %679 = vmatpush1.bf16.msra.mxu0 %v5905_v57  ;;  %842 = vmatpush1.bf16.msra.mxu1 %v5906_v59  ;;  %v5958_v57 = vld [vmem:[%s8199_s1 + $0x240] sm:$0xff]   ;;  %v5962_v59 = vld [vmem:[%s8199_s1 + $0x1e8] sm:$0xff]  }
  0x51   : > { %680 = vmatprep.subr.bf16.mxu0 %v6261_v1  ;;  %843 = vmatprep.subr.bf16.mxu1 %v6261_v1 }
  0x52   : > { %4887 = vmatprep.mubr.msk.bf16.mxu0 %vm346_vm0, %v6420_v33  ;;  %4923 = vmatprep.mubr.msk.bf16.mxu1 %vm346_vm0, %v6418_v32  ;;  %v5943_v32 = vld [vmem:[%s8199_s1 + $0x218] sm:$0xff]   ;;  %v6666_v33 = vld [vmem:[%s6361_s24 + $0x70] sm:$0xff] }
  0x54   : > { %681 = vmatpush1.bf16.msra.mxu0 %v5911_v60  ;;  %844 = vmatpush1.bf16.msra.mxu1 %v5912_v61  ;;  %v5963_v61 = vld [vmem:[%s8199_s1 + $0x238] sm:$0xff]  }
  0x55   : > { %694 = vmatprep.subr.bf16.mxu0 %v6261_v1  ;;  %857 = vmatprep.subr.bf16.mxu1 %v6261_v1 }
  0x58   : > { %695 = vmatpush2.bf16.msra.mxu0 %v5913_v62  ;;  %858 = vmatpush2.bf16.msra.mxu1 %v5914_v63  ;;  %v5038_v62 = vcombine.high %v6626_v23, %v6666_v33  ;;  %v5965_v63 = vld [vmem:[%s8199_s1 + $0x1e0] sm:$0xff]  }
  0x59   : > { %696 = vmatprep.subr.bf16.mxu0 %v6261_v1  ;;  %859 = vmatprep.subr.bf16.mxu1 %v6261_v1 }
  0x5c   : > { %697 = vmatpush2.bf16.msra.mxu0 %v5915_v0  ;;  %860 = vmatpush2.bf16.msra.mxu1 %v5916_v2  ;;  %v5966_v0 = vld [vmem:[%s8199_s1 + $0x230] sm:$0xff]   ;;  %v5967_v2 = vld [vmem:[%s8199_s1 + $0x228] sm:$0xff]  }
  0x5d   : > { %992 = vmatprep.subr.bf16.mxu0 %v6261_v1  ;;  %1210 = vmatprep.subr.bf16.mxu1 %v6261_v1 }
  0x5f   : > { %699 = vmatmul.mubr.bf16.vlgmr.msra.gmra.mxu0 %v6441_v40  ;;  %862 = vmatmul.mubr.bf16.vlgmr.msra.gmra.mxu1 %v6435_v37  ;;  %v6680_v37 = vcombine.high %v6666_v33, %v6670_v35  ;;  %v5948_v40 = vld [vmem:[%s8199_s1 + $0x208] sm:$0xff]  }
  0x60   : > { %993 = vmatpush1.bf16.msra.mxu0 %v5917_v3  ;;  %1211 = vmatpush1.bf16.msra.mxu1 %v5918_v4  ;;  %v5968_v3 = vld [vmem:[%s8199_s1 + $0x278] sm:$0xff]   ;;  %v5969_v4 = vld [vmem:[%s8199_s1 + $0x220] sm:$0xff]  }
  0x61   : > { %994 = vmatprep.subr.bf16.mxu0 %v6261_v1  ;;  %1212 = vmatprep.subr.bf16.mxu1 %v6261_v1 }
  0x62   : > { %4888 = vmatprep.mubr.msk.bf16.mxu0 %vm346_vm0, %v6451_v43  ;;  %4924 = vmatprep.mubr.msk.bf16.mxu1 %vm346_vm0, %v6448_v42  ;;  %v6702_v42 = vcombine.low %v6666_v33, %v6670_v35 }
  0x64   : > { %995 = vmatpush1.bf16.msra.mxu0 %v5919_v5  ;;  %1213 = vmatpush1.bf16.msra.mxu1 %v5920_v6  ;;  %v5970_v5 = vld [vmem:[%s8199_s1 + $0x270] sm:$0xff]   ;;  %v5037_v6 = vcombine.low %v6626_v23, %v6666_v33  ;;  %v5997_v33 = vld [vmem:[%s8199_s1 + $0x2c8] sm:$0xff]  }
  0x65   : > { %996 = vmatprep.subr.bf16.mxu0 %v6261_v1  ;;  %1214 = vmatprep.subr.bf16.mxu1 %v6261_v1 }
  0x67   : > { %707 = vmatmul.mubr.bf16.gmra.mxu0 %v6475_v50  ;;  %870 = vmatmul.mubr.bf16.gmra.mxu1 %v6467_v47  ;;  %v5952_v47 = vld [vmem:[%s8199_s1 + $0x250] sm:$0xff]  }
  0x68   : > { %997 = vmatpush1.bf16.msra.mxu0 %v5921_v7  ;;  %1215 = vmatpush1.bf16.msra.mxu1 %v5922_v8  ;;  %v5973_v7 = vld [vmem:[%s8199_s1 + $0x2b8] sm:$0xff]   ;;  %v5974_v8 = vld [vmem:[%s8199_s1 + $0x308] sm:$0xff]  }
  0x69   : > { %998 = vmatprep.subr.bf16.mxu0 %v6261_v1  ;;  %1216 = vmatprep.subr.bf16.mxu1 %v6261_v1 }
  0x6a   : > { %4889 = vmatprep.mubr.msk.bf16.mxu0 %vm346_vm0, %v6486_v53  ;;  %4925 = vmatprep.mubr.msk.bf16.mxu1 %vm346_vm0, %v6483_v52  ;;  %v6742_v52 = vld [vmem:[%s6361_s24 + $0x98] sm:$0xff] }
  0x6b   : > { %v6884_v23 = vcombine.high %v6742_v52, %v4971_v21 }
  0x6c   : > { %999 = vmatpush1.bf16.msra.mxu0 %v5923_v9  ;;  %1217 = vmatpush1.bf16.msra.mxu1 %v5924_v10  ;;  %v6822_v9 = vcombine.high %v6670_v35, %v6698_v41  ;;  %v5975_v10 = vld [vmem:[%s8199_s1 + $0x2b0] sm:$0xff]   ;;  %v5999_v35 = vld [vmem:[%s8199_s1 + $0x2c0] sm:$0xff]  }
  0x6d   : > { %1000 = vmatprep.subr.bf16.mxu0 %v6261_v1  ;;  %1218 = vmatprep.subr.bf16.mxu1 %v6261_v1 }
  0x6f   : > { %715 = vmatmul.mubr.bf16.gmra.mxu0 %v6507_v58  ;;  %878 = vmatmul.mubr.bf16.gmra.mxu1 %v6502_v56  ;;  %v5957_v56 = vld [vmem:[%s8199_s1 + $0x1f0] sm:$0xff]  }
  0x70   : > { %1001 = vmatpush1.bf16.msra.mxu0 %v5925_v11  ;;  %1219 = vmatpush1.bf16.msra.mxu1 %v5926_v14  ;;  %v5976_v11 = vld [vmem:[%s8199_s1 + $0x300] sm:$0xff]   ;;  %v5980_v14 = vld [vmem:[%s8199_s1 + $0x2f8] sm:$0xff]  }
  0x71   : > { %1002 = vmatprep.subr.bf16.mxu0 %v6261_v1  ;;  %1220 = vmatprep.subr.bf16.mxu1 %v6261_v1 }
  0x72   : > { %4890 = vmatprep.mubr.msk.bf16.mxu0 %vm346_vm0, %v6601_v15  ;;  %4926 = vmatprep.mubr.msk.bf16.mxu1 %vm346_vm0, %v4912_v16  ;;  %v5981_v16 = vld [vmem:[%s8199_s1 + $0x2a0] sm:$0xff]  }
  0x74   : > { %1003 = vmatpush1.bf16.msra.mxu0 %v5927_v17  ;;  %1221 = vmatpush1.bf16.msra.mxu1 %v5928_v18  ;;  %v5982_v17 = vld [vmem:[%s8199_s1 + $0x2f0] sm:$0xff]   ;;  %v5985_v18 = vld [vmem:[%s8199_s1 + $0x298] sm:$0xff]  }
  0x75   : > { %1004 = vmatprep.subr.bf16.mxu0 %v6261_v1  ;;  %1222 = vmatprep.subr.bf16.mxu1 %v6261_v1 }
  0x77   : > { %723 = vmatmul.mubr.bf16.gmra.mxu0 %v6620_v20  ;;  %886 = vmatmul.mubr.bf16.gmra.mxu1 %v4911_v22  ;;  %v6879_v22 = vld [vmem:[%s6361_s24 + $0xa8] sm:$0xff] }
  0x78   : > { %1005 = vmatpush1.bf16.msra.mxu0 %v5932_v19  ;;  %1223 = vmatpush1.bf16.msra.mxu1 %v5933_v24  ;;  %v5987_v24 = vld [vmem:[%s8199_s1 + $0x290] sm:$0xff]  }
  0x79   : > { %1006 = vmatprep.subr.bf16.mxu0 %v6261_v1  ;;  %1224 = vmatprep.subr.bf16.mxu1 %v6261_v1 }
  0x7a   : > { %4959 = vmatprep.mubr.msk.bf16.mxu0 %vm346_vm0, %v6451_v43  ;;  %5013 = vmatprep.mubr.msk.bf16.mxu1 %vm346_vm0, %v4996_v25  ;;  %v6705_v43 = vld [vmem:[%s6361_s24 + $0x88] sm:$0xff]  ;;  %v5988_v25 = vld [vmem:[%s8199_s1 + $0x2e0] sm:$0xff]  }
  0x7b   : > { %v6715_v45 = vcombine.high %v6698_v41, %v6705_v43  ;;  %v6739_v51 = vcombine.low %v6698_v41, %v6705_v43  ;;  %v6005_v41 = vld [vmem:[%s8199_s1 + $0x348] sm:$0xff]  }
  0x7c   : > { %1007 = vmatpush1.bf16.msra.mxu0 %v5935_v26  ;;  %1225 = vmatpush1.bf16.msra.mxu1 %v5936_v27  ;;  %v6894_v26 = vcombine.high %v4971_v21, %v6879_v22  ;;  %v5992_v27 = vld [vmem:[%s8199_s1 + $0x288] sm:$0xff]  }
  0x7d   : > { %1020 = vmatprep.subr.bf16.mxu0 %v6261_v1  ;;  %1238 = vmatprep.subr.bf16.mxu1 %v6261_v1 }
  0x80   : > { %1021 = vmatpush2.bf16.msra.mxu0 %v5937_v28  ;;  %1239 = vmatpush2.bf16.msra.mxu1 %v5938_v29  ;;  %v6905_v28 = vcombine.low %v6742_v52, %v4971_v21  ;;  %v5993_v29 = vld [vmem:[%s8199_s1 + $0x2d8] sm:$0xff]  }
  0x81   : > { %1022 = vmatprep.subr.bf16.mxu0 %v6261_v1  ;;  %1240 = vmatprep.subr.bf16.mxu1 %v6261_v1 }
  0x84   : > { %1023 = vmatpush2.bf16.msra.mxu0 %v5939_v30  ;;  %1241 = vmatpush2.bf16.msra.mxu1 %v5940_v31  ;;  %v6913_v30 = vcombine.low %v4971_v21, %v6879_v22  ;;  %v5995_v31 = vld [vmem:[%s8199_s1 + $0x280] sm:$0xff]  }
  0x85   : > { %1391 = vmatprep.subr.bf16.mxu0 %v6261_v1  ;;  %1554 = vmatprep.subr.bf16.mxu1 %v6261_v1 }
  0x87   : > { %1025 = vmatmul.mubr.bf16.vlgmr.msra.gmra.mxu0 %v6475_v50  ;;  %1243 = vmatmul.mubr.bf16.vlgmr.msra.gmra.mxu1 %v4995_v34  ;;  %v6735_v50 = vld [vmem:[%s6361_s24 + $0x90] sm:$0xff]  ;;  %v5998_v34 = vld [vmem:[%s8199_s1 + $0x318] sm:$0xff]  }
  0x88   : > { %1392 = vmatpush1.bf16.msra.mxu0 %v5943_v32  ;;  %1555 = vmatpush1.bf16.msra.mxu1 %v5944_v36  ;;  %v6753_v55 = vcombine.high %v6735_v50, %v6742_v52  ;;  %v6773_v60 = vcombine.low %v6735_v50, %v6742_v52  ;;  %v6870_v19 = vcombine.low %v6705_v43, %v6735_v50  ;;  %v5996_v32 = vld [vmem:[%s8199_s1 + $0x2d0] sm:$0xff]  }
  0x89   : > { %1393 = vmatprep.subr.bf16.mxu0 %v6261_v1  ;;  %1556 = vmatprep.subr.bf16.mxu1 %v6261_v1  ;;  %v6000_v36 = vld [vmem:[%s8199_s1 + $0x310] sm:$0xff]  }
  0x8a   : > { %4960 = vmatprep.mubr.msk.bf16.mxu0 %vm346_vm0, %v6486_v53  ;;  %5014 = vmatprep.mubr.msk.bf16.mxu1 %vm346_vm0, %v6680_v37  ;;  %v5955_v53 = vld [vmem:[%s8199_s1 + $0x248] sm:$0xff]  }
  0x8c   : > { %1394 = vmatpush1.bf16.msra.mxu0 %v5945_v38  ;;  %1557 = vmatpush1.bf16.msra.mxu1 %v5946_v39  ;;  %v6002_v38 = vld [vmem:[%s8199_s1 + $0x3a8] sm:$0xff]   ;;  %v6003_v39 = vld [vmem:[%s8199_s1 + $0x350] sm:$0xff]  }
  0x8d   : > { %1395 = vmatprep.subr.bf16.mxu0 %v6261_v1  ;;  %1558 = vmatprep.subr.bf16.mxu1 %v6261_v1 }
  0x8f   : > { %1033 = vmatmul.mubr.bf16.gmra.mxu0 %v6507_v58  ;;  %1251 = vmatmul.mubr.bf16.gmra.mxu1 %v6702_v42  ;;  %v4947_v58 = vcombine.low %v6593_v13, %v208_v49  ;;  %v5979_v13 = vld [vmem:[%s8199_s1 + $0x2a8] sm:$0xff]  }
  0x90   : > { %1396 = vmatpush1.bf16.msra.mxu0 %v5948_v40  ;;  %1559 = vmatpush1.bf16.msra.mxu1 %v5949_v44  ;;  %v6004_v40 = vld [vmem:[%s8199_s1 + $0x3a0] sm:$0xff]   ;;  %v6008_v44 = vld [vmem:[%s8199_s1 + $0x390] sm:$0xff]  }
  0x91   : > { %1397 = vmatprep.subr.bf16.mxu0 %v6261_v1  ;;  %1560 = vmatprep.subr.bf16.mxu1 %v6261_v1 }
  0x92   : > { %4961 = vmatprep.mubr.msk.bf16.mxu0 %vm346_vm0, %v6601_v15  ;;  %5015 = vmatprep.mubr.msk.bf16.mxu1 %vm346_vm0, %v6715_v45  ;;  %v6851_v15 = vcombine.high %v6705_v43, %v6735_v50  ;;  %v6007_v43 = vld [vmem:[%s8199_s1 + $0x340] sm:$0xff]   ;;  %v6011_v50 = vld [vmem:[%s8199_s1 + $0x330] sm:$0xff]  }
  0x94   : > { %1398 = vmatpush1.bf16.msra.mxu0 %v5951_v46  ;;  %1561 = vmatpush1.bf16.msra.mxu1 %v5952_v47  ;;  %v6010_v46 = vld [vmem:[%s8199_s1 + $0x388] sm:$0xff]   ;;  %v4973_v47 = vld [vmem:[%s6361_s24 + $0xb0] sm:$0xff] }
  0x95   : > { %1399 = vmatprep.subr.bf16.mxu0 %v6261_v1  ;;  %1562 = vmatprep.subr.bf16.mxu1 %v6261_v1  ;;  %v5116_v49 = vcombine.high %v6879_v22, %v4973_v47 }
  0x97   : > { %1041 = vmatmul.mubr.bf16.gmra.mxu0 %v6620_v20  ;;  %1259 = vmatmul.mubr.bf16.gmra.mxu1 %v6739_v51  ;;  %v5986_v20 = vld [vmem:[%s8199_s1 + $0x2e8] sm:$0xff]  }
  0x98   : > { %1400 = vmatpush1.bf16.msra.mxu0 %v5954_v48  ;;  %1563 = vmatpush1.bf16.msra.mxu1 %v5955_v53  ;;  %v4974_v48 = vld [vmem:[%s6361_s24 + $0xb8] sm:$0xff]  ;;  %v5167_v53 = vld [vmem:[%s6361_s24 + $0xc0] sm:$0xff] }
  0x99   : > { %1401 = vmatprep.subr.bf16.mxu0 %v6261_v1  ;;  %1564 = vmatprep.subr.bf16.mxu1 %v6261_v1  ;;  %v5152_v52 = vcombine.high %v4973_v47, %v4974_v48 }
  0x9a   : > { %4962 = vmatprep.mubr.msk.bf16.mxu0 %vm346_vm0, %v4948_v54  ;;  %5016 = vmatprep.mubr.msk.bf16.mxu1 %vm346_vm0, %v6753_v55  ;;  %v6016_v54 = vld [vmem:[%s8199_s1 + $0x328] sm:$0xff]  }
  0x9c   : > { %1402 = vmatpush1.bf16.msra.mxu0 %v5957_v56  ;;  %1565 = vmatpush1.bf16.msra.mxu1 %v5958_v57  ;;  %v5115_v56 = vcombine.low %v6879_v22, %v4973_v47  ;;  %v6017_v57 = vld [vmem:[%s8199_s1 + $0x378] sm:$0xff]  }
  0x9d   : > { %1403 = vmatprep.subr.bf16.mxu0 %v6261_v1  ;;  %1566 = vmatprep.subr.bf16.mxu1 %v6261_v1 }
  0x9f   : > { %1049 = vmatmul.mubr.bf16.gmra.mxu0 %v4947_v58  ;;  %1267 = vmatmul.mubr.bf16.gmra.mxu1 %v6773_v60  ;;  %v7024_v58 = vld [vmem:[%s6361_s24 + $0xd0] sm:$0xff] }
  0xa0   : > { %1404 = vmatpush1.bf16.msra.mxu0 %v5962_v59  ;;  %1567 = vmatpush1.bf16.msra.mxu1 %v5963_v61  ;;  %v5151_v59 = vcombine.low %v4973_v47, %v4974_v48  ;;  %v6019_v61 = vld [vmem:[%s8199_s1 + $0x320] sm:$0xff]   ;;  %v6040_v48 = vld [vmem:[%s8199_s1 + $0x430] sm:$0xff]  }
  0xa1   : > { %1405 = vmatprep.subr.bf16.mxu0 %v6261_v1  ;;  %1568 = vmatprep.subr.bf16.mxu1 %v6261_v1 }
  0xa2   : > { %5055 = vmatprep.mubr.msk.bf16.mxu0 %vm346_vm0, %v5038_v62  ;;  %5091 = vmatprep.mubr.msk.bf16.mxu1 %vm346_vm0, %v6680_v37  ;;  %v6001_v37 = vld [vmem:[%s8199_s1 + $0x358] sm:$0xff]   ;;  %v6020_v62 = vld [vmem:[%s8199_s1 + $0x370] sm:$0xff]  }
  0xa4   : > { %1406 = vmatpush1.bf16.msra.mxu0 %v5965_v63  ;;  %1569 = vmatpush1.bf16.msra.mxu1 %v5966_v0  ;;  %v6021_v0 = vld [vmem:[%s8199_s1 + $0x368] sm:$0xff]  }
  0xa5   : > { %1419 = vmatprep.subr.bf16.mxu0 %v6261_v1  ;;  %1582 = vmatprep.subr.bf16.mxu1 %v6261_v1 }
  0xa8   : > { %1420 = vmatpush2.bf16.msra.mxu0 %v5967_v2  ;;  %1583 = vmatpush2.bf16.msra.mxu1 %v5968_v3  ;;  %v6022_v2 = vld [vmem:[%s8199_s1 + $0x3b8] sm:$0xff]  }
  0xa9   : > { %1421 = vmatprep.subr.bf16.mxu0 %v6261_v1  ;;  %1584 = vmatprep.subr.bf16.mxu1 %v6261_v1 }
  0xac   : > { %1422 = vmatpush2.bf16.msra.mxu0 %v5969_v4  ;;  %1585 = vmatpush2.bf16.msra.mxu1 %v5970_v5  ;;  %v6023_v4 = vld [vmem:[%s8199_s1 + $0x360] sm:$0xff]   ;;  %v6024_v5 = vld [vmem:[%s8199_s1 + $0x3b0] sm:$0xff]  }
  0xad   : > { %1717 = vmatprep.subr.bf16.mxu0 %v6261_v1  ;;  %1880 = vmatprep.subr.bf16.mxu1 %v6261_v1 }
  0xaf   : > { %1424 = vmatmul.mubr.bf16.vlgmr.msra.gmra.mxu0 %v5037_v6  ;;  %1587 = vmatmul.mubr.bf16.vlgmr.msra.gmra.mxu1 %v6702_v42  ;;  %v6006_v42 = vld [vmem:[%s8199_s1 + $0x398] sm:$0xff]  }
  0xb0   : > { %1718 = vmatpush1.bf16.msra.mxu0 %v5973_v7  ;;  %1881 = vmatpush1.bf16.msra.mxu1 %v5974_v8 }
  0xb1   : > { %1719 = vmatprep.subr.bf16.mxu0 %v6261_v1  ;;  %1882 = vmatprep.subr.bf16.mxu1 %v6261_v1 }
  0xb2   : > { %5056 = vmatprep.mubr.msk.bf16.mxu0 %vm346_vm0, %v6822_v9  ;;  %5092 = vmatprep.mubr.msk.bf16.mxu1 %vm346_vm0, %v6715_v45 }
  0xb4   : > { %1720 = vmatpush1.bf16.msra.mxu0 %v5975_v10  ;;  %1883 = vmatpush1.bf16.msra.mxu1 %v5976_v11  ;;  %v6029_v10 = vld [vmem:[%s8199_s1 + $0x3f8] sm:$0xff]  }
  0xb5   : > { %1721 = vmatprep.subr.bf16.mxu0 %v6261_v1  ;;  %1884 = vmatprep.subr.bf16.mxu1 %v6261_v1 }
  0xb7   : > { %1432 = vmatmul.mubr.bf16.gmra.mxu0 %v6837_v12  ;;  %1595 = vmatmul.mubr.bf16.gmra.mxu1 %v6739_v51 }
  0xb8   : > { %1722 = vmatpush1.bf16.msra.mxu0 %v5979_v13  ;;  %1885 = vmatpush1.bf16.msra.mxu1 %v5980_v14  ;;  %v6030_v13 = vld [vmem:[%s8199_s1 + $0x448] sm:$0xff]   ;;  %v5170_v14 = vld [vmem:[%s6361_s24 + $0xd8] sm:$0xff] }
  0xb9   : > { %1723 = vmatprep.subr.bf16.mxu0 %v6261_v1  ;;  %1886 = vmatprep.subr.bf16.mxu1 %v6261_v1  ;;  %v7071_v21 = vcombine.high %v7024_v58, %v5170_v14 }
  0xba   : > { %5057 = vmatprep.mubr.msk.bf16.mxu0 %vm346_vm0, %v6851_v15  ;;  %5093 = vmatprep.mubr.msk.bf16.mxu1 %vm346_vm0, %v6753_v55 }
  0xbc   : > { %1724 = vmatpush1.bf16.msra.mxu0 %v5981_v16  ;;  %1887 = vmatpush1.bf16.msra.mxu1 %v5982_v17 }
  0xbd   : > { %1725 = vmatprep.subr.bf16.mxu0 %v6261_v1  ;;  %1888 = vmatprep.subr.bf16.mxu1 %v6261_v1 }
  0xbf   : > { %1440 = vmatmul.mubr.bf16.gmra.mxu0 %v6870_v19  ;;  %1603 = vmatmul.mubr.bf16.gmra.mxu1 %v6773_v60 }
  0xc0   : > { %1726 = vmatpush1.bf16.msra.mxu0 %v5985_v18  ;;  %1889 = vmatpush1.bf16.msra.mxu1 %v5986_v20 }
  0xc1   : > { %1727 = vmatprep.subr.bf16.mxu0 %v6261_v1  ;;  %1890 = vmatprep.subr.bf16.mxu1 %v6261_v1 }
  0xc2   : > { %5058 = vmatprep.mubr.msk.bf16.mxu0 %vm346_vm0, %v6884_v23  ;;  %5094 = vmatprep.mubr.msk.bf16.mxu1 %vm346_vm0, %v6894_v26 }
  0xc4   : > { %1728 = vmatpush1.bf16.msra.mxu0 %v5987_v24  ;;  %1891 = vmatpush1.bf16.msra.mxu1 %v5988_v25 }
  0xc5   : > { %1729 = vmatprep.subr.bf16.mxu0 %v6261_v1  ;;  %1892 = vmatprep.subr.bf16.mxu1 %v6261_v1 }
  0xc7   : > { %1448 = vmatmul.mubr.bf16.gmra.mxu0 %v6905_v28  ;;  %1611 = vmatmul.mubr.bf16.gmra.mxu1 %v6913_v30 }
  0xc8   : > { %1730 = vmatpush1.bf16.msra.mxu0 %v5992_v27  ;;  %1893 = vmatpush1.bf16.msra.mxu1 %v5993_v29 }
  0xc9   : > { %1731 = vmatprep.subr.bf16.mxu0 %v6261_v1  ;;  %1894 = vmatprep.subr.bf16.mxu1 %v6261_v1 }
  0xca   : > { %5127 = vmatprep.mubr.msk.bf16.mxu0 %vm346_vm0, %v6822_v9  ;;  %5163 = vmatprep.mubr.msk.bf16.mxu1 %vm346_vm0, %v6715_v45  ;;  %v6009_v45 = vld [vmem:[%s8199_s1 + $0x338] sm:$0xff]  }
  0xcc   : > { %1732 = vmatpush1.bf16.msra.mxu0 %v5995_v31  ;;  %1895 = vmatpush1.bf16.msra.mxu1 %v5996_v32  ;;  %v7088_v31 = vcombine.low %v7024_v58, %v5170_v14  ;;  %v5172_v32 = vld [vmem:[%s6361_s24 + $0xe8] sm:$0xff] }
  0xcd   : > { %1745 = vmatprep.subr.bf16.mxu0 %v6261_v1  ;;  %1908 = vmatprep.subr.bf16.mxu1 %v6261_v1 }
  0xd0   : > { %1746 = vmatpush2.bf16.msra.mxu0 %v5997_v33  ;;  %1909 = vmatpush2.bf16.msra.mxu1 %v5998_v34  ;;  %v6036_v34 = vld [vmem:[%s8199_s1 + $0x3e8] sm:$0xff]  }
  0xd1   : > { %1747 = vmatprep.subr.bf16.mxu0 %v6261_v1  ;;  %1910 = vmatprep.subr.bf16.mxu1 %v6261_v1 }
  0xd4   : > { %1748 = vmatpush2.bf16.msra.mxu0 %v5999_v35  ;;  %1911 = vmatpush2.bf16.msra.mxu1 %v6000_v36  ;;  %v5173_v36 = vld [vmem:[%s6361_s24 + $0xf0] sm:$0xff] }
  0xd5   : > { %2098 = vmatprep.subr.bf16.mxu0 %v6261_v1  ;;  %2279 = vmatprep.subr.bf16.mxu1 %v6261_v1 }
  0xd7   : > { %1750 = vmatmul.mubr.bf16.vlgmr.msra.gmra.mxu0 %v6837_v12  ;;  %1913 = vmatmul.mubr.bf16.vlgmr.msra.gmra.mxu1 %v6739_v51  ;;  %v6012_v51 = vld [vmem:[%s8199_s1 + $0x380] sm:$0xff]  }
  0xd8   : > { %2099 = vmatpush1.bf16.msra.mxu0 %v6001_v37  ;;  %2280 = vmatpush1.bf16.msra.mxu1 %v6002_v38 }
  0xd9   : > { %2100 = vmatprep.subr.bf16.mxu0 %v6261_v1  ;;  %2281 = vmatprep.subr.bf16.mxu1 %v6261_v1 }
  0xda   : > { %5128 = vmatprep.mubr.msk.bf16.mxu0 %vm346_vm0, %v6851_v15  ;;  %5164 = vmatprep.mubr.msk.bf16.mxu1 %vm346_vm0, %v6753_v55  ;;  %v5168_v55 = vld [vmem:[%s6361_s24 + $0xc8] sm:$0xff]  ;;  %v5171_v15 = vld [vmem:[%s6361_s24 + $0xe0] sm:$0xff] }
  0xdb   : > { %v5242_v63 = vcombine.high %v5168_v55, %v7024_v58  ;;  %v5199_v12 = vcombine.low %v5167_v53, %v5168_v55  ;;  %v5241_v17 = vcombine.low %v5168_v55, %v7024_v58  ;;  %v7076_v24 = vcombine.high %v5170_v14, %v5171_v15 }
  0xdc   : > { %2101 = vmatpush1.bf16.msra.mxu0 %v6003_v39  ;;  %2282 = vmatpush1.bf16.msra.mxu1 %v6004_v40  ;;  %v7096_v35 = vcombine.low %v5170_v14, %v5171_v15  ;;  %v6037_v39 = vld [vmem:[%s8199_s1 + $0x438] sm:$0xff]  }
  0xdd   : > { %2102 = vmatprep.subr.bf16.mxu0 %v6261_v1  ;;  %2283 = vmatprep.subr.bf16.mxu1 %v6261_v1 }
  0xdf   : > { %1758 = vmatmul.mubr.bf16.gmra.mxu0 %v6870_v19  ;;  %1921 = vmatmul.mubr.bf16.gmra.mxu1 %v6773_v60  ;;  %v5200_v60 = vcombine.high %v5167_v53, %v5168_v55  ;;  %v7132_v55 = vcombine.low %v5172_v32, %v5173_v36 }
  0xe0   : > { %2103 = vmatpush1.bf16.msra.mxu0 %v6005_v41  ;;  %2284 = vmatpush1.bf16.msra.mxu1 %v6006_v42  ;;  %v7106_v41 = vcombine.high %v5171_v15, %v5172_v32 }
  0xe1   : > { %2104 = vmatprep.subr.bf16.mxu0 %v6261_v1  ;;  %2285 = vmatprep.subr.bf16.mxu1 %v6261_v1 }
  0xe2   : > { %5129 = vmatprep.mubr.msk.bf16.mxu0 %vm346_vm0, %v6884_v23  ;;  %5165 = vmatprep.mubr.msk.bf16.mxu1 %vm346_vm0, %v6894_v26  ;;  %v6031_v23 = vld [vmem:[%s8199_s1 + $0x3f0] sm:$0xff]  }
  0xe4   : > { %2105 = vmatpush1.bf16.msra.mxu0 %v6007_v43  ;;  %2286 = vmatpush1.bf16.msra.mxu1 %v6008_v44  ;;  %v7109_v43 = vcombine.high %v5172_v32, %v5173_v36 }
  0xe5   : > { %2106 = vmatprep.subr.bf16.mxu0 %v6261_v1  ;;  %2287 = vmatprep.subr.bf16.mxu1 %v6261_v1 }
  0xe7   : > { %1766 = vmatmul.mubr.bf16.gmra.mxu0 %v6905_v28  ;;  %1929 = vmatmul.mubr.bf16.gmra.mxu1 %v6913_v30  ;;  %v6032_v28 = vld [vmem:[%s8199_s1 + $0x440] sm:$0xff]  }
  0xe8   : > { %2107 = vmatpush1.bf16.msra.mxu0 %v6009_v45  ;;  %2288 = vmatpush1.bf16.msra.mxu1 %v6010_v46  ;;  %v6039_v45 = vld [vmem:[%s8199_s1 + $0x3e0] sm:$0xff]  }
  0xe9   : > { %2108 = vmatprep.subr.bf16.mxu0 %v6261_v1  ;;  %2289 = vmatprep.subr.bf16.mxu1 %v6261_v1 }
  0xea   : > { %5130 = vmatprep.mubr.msk.bf16.mxu0 %vm346_vm0, %v5116_v49  ;;  %5166 = vmatprep.mubr.msk.bf16.mxu1 %vm346_vm0, %v5152_v52  ;;  %v5174_v52 = vld [vmem:[%s6361_s24 + $0xf8] sm:$0xff] }
  0xec   : > { %2109 = vmatpush1.bf16.msra.mxu0 %v6011_v50  ;;  %2290 = vmatpush1.bf16.msra.mxu1 %v6012_v51  ;;  %v7124_v51 = vcombine.low %v5171_v15, %v5172_v32  ;;  %v6053_v15 = vld [vmem:[%s8199_s1 + $0x418] sm:$0xff]  }
  0xed   : > { %2110 = vmatprep.subr.bf16.mxu0 %v6261_v1  ;;  %2291 = vmatprep.subr.bf16.mxu1 %v6261_v1 }
  0xef   : > { %1774 = vmatmul.mubr.bf16.gmra.mxu0 %v5115_v56  ;;  %1937 = vmatmul.mubr.bf16.gmra.mxu1 %v5151_v59  ;;  %v7135_v56 = vld [vmem:[%s6361_s24 + $0x100] sm:$0xff]  ;;  %v6045_v59 = vld [vmem:[%s8199_s1 + $0x428] sm:$0xff]  }
  0xf0   : > { %2111 = vmatpush1.bf16.msra.mxu0 %v6016_v54  ;;  %2292 = vmatpush1.bf16.msra.mxu1 %v6017_v57  ;;  %v6044_v54 = vld [vmem:[%s8199_s1 + $0x3d8] sm:$0xff]  }
  0xf1   : > { %2112 = vmatprep.subr.bf16.mxu0 %v6261_v1  ;;  %2293 = vmatprep.subr.bf16.mxu1 %v6261_v1 }
  0xf2   : > { %5217 = vmatprep.mubr.msk.bf16.mxu0 %vm346_vm0, %v5200_v60  ;;  %5259 = vmatprep.mubr.msk.bf16.mxu1 %vm346_vm0, %v5242_v63  ;;  %v7148_v63 = vcombine.high %v5174_v52, %v7135_v56 }
  0xf4   : > { %2113 = vmatpush1.bf16.msra.mxu0 %v6019_v61  ;;  %2294 = vmatpush1.bf16.msra.mxu1 %v6020_v62  ;;  %v7144_v61 = vcombine.high %v5173_v36, %v5174_v52 }
  0xf5   : > { %2126 = vmatprep.subr.bf16.mxu0 %v6261_v1  ;;  %2307 = vmatprep.subr.bf16.mxu1 %v6261_v1 }
  0xf7   : > { %v393_v3 = vpop.f32.mrf.mxu0  ;;  %v545_v6 = vpop.f32.mrf.mxu1 }
  0xf8   : > { %2127 = vmatpush2.bf16.msra.mxu0 %v6021_v0  ;;  %v7053_v7 = vadd.f32 %v545_v6, %v393_v3  ;;  %2308 = vmatpush2.bf16.msra.mxu1 %v6022_v2  ;;  %v6047_v2 = vld [vmem:[%s8199_s1 + $0x3d0] sm:$0xff]  }
  0xf9   : > { %v395_v8 = vpop.f32.mrf.mxu0  ;;  %2128 = vmatprep.subr.bf16.mxu0 %v6261_v1  ;;  %v547_v9 = vpop.f32.mrf.mxu1  ;;  %2309 = vmatprep.subr.bf16.mxu1 %v6261_v1 }
  0xfa   : > { %v7163_v9 = vcombine.low %v5173_v36, %v5174_v52 }
  0xfb   : > { %v396_v11 = vpop.f32.mrf.mxu0  ;;  %v548_v16 = vpop.f32.mrf.mxu1 }
  0xfc   : > { %2129 = vmatpush2.bf16.msra.mxu0 %v6023_v4  ;;  %v7066_v18 = vadd.f32 %v548_v16, %v396_v11  ;;  %2310 = vmatpush2.bf16.msra.mxu1 %v6024_v5  ;;  %v6048_v5 = vld [vmem:[%s8199_s1 + $0x420] sm:$0xff]   ;;  %v6052_v11 = vld [vmem:[%s8199_s1 + $0x3c8] sm:$0xff]  }
  0xfd   : > { %v398_v19 = vpop.f32.mrf.mxu0  ;;  %2442 = vmatprep.subr.bf16.mxu0 %v6261_v1  ;;  %v550_v20 = vpop.f32.mrf.mxu1  ;;  %2605 = vmatprep.subr.bf16.mxu1 %v6261_v1 }
  0xfe   : > { %v6056_v19 = vld [vmem:[%s8199_s1 + $0x410] sm:$0xff]   ;;  %v6057_v20 = vld [vmem:[%s8199_s1 + $0x408] sm:$0xff]  }
  0xff   : > { %2131 = vmatmul.mubr.bf16.vlgmr.msra.gmra.mxu0 %v5199_v12  ;;  %v401_v22 = vpop.f32.mrf.mxu0  ;;  %2312 = vmatmul.mubr.bf16.vlgmr.msra.gmra.mxu1 %v5241_v17  ;;  %v553_v25 = vpop.f32.mrf.mxu1  ;;  %v7171_v12 = vcombine.low %v5174_v52, %v7135_v56  ;;  %v6055_v17 = vld [vmem:[%s8199_s1 + $0x3c0] sm:$0xff]   ;;  %v6065_v52 = vld [vmem:[%s8199_s1 + $0x488] sm:$0xff]  }
 0x100   : > { %2443 = vmatpush1.bf16.msra.mxu0 %v6029_v10  ;;  %2606 = vmatpush1.bf16.msra.mxu1 %v6030_v13  ;;  %v7078_v26 = vadd.f32 %v553_v25, %v401_v22  ;;  %v6058_v22 = vld [vmem:[%s8199_s1 + $0x458] sm:$0xff]  }
 0x101   : > { %2444 = vmatprep.subr.bf16.mxu0 %v6261_v1  ;;  %v403_v27 = vpop.f32.mrf.mxu0  ;;  %2607 = vmatprep.subr.bf16.mxu1 %v6261_v1  ;;  %v555_v29 = vpop.f32.mrf.mxu1 }
 0x102   : > { %5218 = vmatprep.mubr.msk.bf16.mxu0 %vm346_vm0, %v7071_v21  ;;  %5260 = vmatprep.mubr.msk.bf16.mxu1 %vm346_vm0, %v7076_v24 }
 0x103   : > { %v404_v30 = vpop.f32.mrf.mxu0  ;;  %v556_v33 = vpop.f32.mrf.mxu1 }
 0x104   : > { %2445 = vmatpush1.bf16.msra.mxu0 %v6031_v23  ;;  %2608 = vmatpush1.bf16.msra.mxu1 %v6032_v28  ;;  %v7099_v37 = vadd.f32 %v556_v33, %v404_v30  ;;  %v6060_v28 = vld [vmem:[%s8199_s1 + $0x450] sm:$0xff]  }
 0x105   : > { %2446 = vmatprep.subr.bf16.mxu0 %v6261_v1  ;;  %v406_v38 = vpop.f32.mrf.mxu0  ;;  %2609 = vmatprep.subr.bf16.mxu1 %v6261_v1  ;;  %v558_v40 = vpop.f32.mrf.mxu1 }
 0x106   : > { %v6062_v38 = vld [vmem:[%s8199_s1 + $0x4e8] sm:$0xff]  }
 0x107   : > { %2139 = vmatmul.mubr.bf16.gmra.mxu0 %v7088_v31  ;;  %v409_v42 = vpop.f32.mrf.mxu0  ;;  %2320 = vmatmul.mubr.bf16.gmra.mxu1 %v7096_v35  ;;  %v561_v44 = vpop.f32.mrf.mxu1 }
 0x108   : > { %2447 = vmatpush1.bf16.msra.mxu0 %v6036_v34  ;;  %2610 = vmatpush1.bf16.msra.mxu1 %v6037_v39  ;;  %v7115_v46 = vadd.f32 %v561_v44, %v409_v42  ;;  %v6061_v34 = vld [vmem:[%s8199_s1 + $0x498] sm:$0xff]  }
 0x109   : > { %2448 = vmatprep.subr.bf16.mxu0 %v6261_v1  ;;  %v411_v47 = vpop.f32.mrf.mxu0  ;;  %2611 = vmatprep.subr.bf16.mxu1 %v6261_v1  ;;  %v563_v49 = vpop.f32.mrf.mxu1 }
 0x10a   : > { %5219 = vmatprep.mubr.msk.bf16.mxu0 %vm346_vm0, %v7106_v41  ;;  %5261 = vmatprep.mubr.msk.bf16.mxu1 %vm346_vm0, %v7109_v43 }
 0x10b   : > { %v412_v50 = vpop.f32.mrf.mxu0  ;;  %v564_v53 = vpop.f32.mrf.mxu1 }
 0x10c   : > { %2449 = vmatpush1.bf16.msra.mxu0 %v6039_v45  ;;  %2612 = vmatpush1.bf16.msra.mxu1 %v6040_v48  ;;  %v7137_v57 = vadd.f32 %v564_v53, %v412_v50  ;;  %v6063_v45 = vld [vmem:[%s8199_s1 + $0x490] sm:$0xff]   ;;  %v6064_v48 = vld [vmem:[%s8199_s1 + $0x4e0] sm:$0xff]  }
 0x10d   : > { %2450 = vmatprep.subr.bf16.mxu0 %v6261_v1  ;;  %v414_v58 = vpop.f32.mrf.mxu0  ;;  %2613 = vmatprep.subr.bf16.mxu1 %v6261_v1  ;;  %v566_v60 = vpop.f32.mrf.mxu1 }
 0x10f   : > { %2147 = vmatmul.mubr.bf16.gmra.mxu0 %v7124_v51  ;;  %v417_v62 = vpop.f32.mrf.mxu0  ;;  %2328 = vmatmul.mubr.bf16.gmra.mxu1 %v7132_v55  ;;  %v569_v0 = vpop.f32.mrf.mxu1 }
 0x110   : > { %2451 = vmatpush1.bf16.msra.mxu0 %v6044_v54  ;;  %2614 = vmatpush1.bf16.msra.mxu1 %v6045_v59  ;;  %v7154_v3 = vadd.f32 %v569_v0, %v417_v62  ;;  %v6066_v54 = vld [vmem:[%s8199_s1 + $0x4d8] sm:$0xff]   ;;  %v6067_v62 = vld [vmem:[%s8199_s1 + $0x480] sm:$0xff]  }
 0x111   : > { %2452 = vmatprep.subr.bf16.mxu0 %v6261_v1  ;;  %v419_v4 = vpop.f32.mrf.mxu0  ;;  %2615 = vmatprep.subr.bf16.mxu1 %v6261_v1  ;;  %v571_v6 = vpop.f32.mrf.mxu1 }
 0x112   : > { %5220 = vmatprep.mubr.msk.bf16.mxu0 %vm346_vm0, %v7144_v61  ;;  %5262 = vmatprep.mubr.msk.bf16.mxu1 %vm346_vm0, %v7148_v63 }
 0x113   : > { %v420_v8 = vpop.f32.mrf.mxu0  ;;  %v572_v10 = vpop.f32.mrf.mxu1 }
 0x114   : > { %2453 = vmatpush1.bf16.msra.mxu0 %v6047_v2  ;;  %2616 = vmatpush1.bf16.msra.mxu1 %v6048_v5  ;;  %v7173_v13 = vadd.f32 %v572_v10, %v420_v8  ;;  %v6068_v2 = vld [vmem:[%s8199_s1 + $0x4d0] sm:$0xff]   ;;  %v5176_v5 = vld [vmem:[%s6361_s24 + $0x108] sm:$0xff]  ;;  %v6069_v10 = vld [vmem:[%s8199_s1 + $0x478] sm:$0xff]  }
 0x115   : > { %2454 = vmatprep.subr.bf16.mxu0 %v6261_v1  ;;  %v422_v14 = vpop.f32.mrf.mxu0  ;;  %2617 = vmatprep.subr.bf16.mxu1 %v6261_v1  ;;  %v574_v16 = vpop.f32.mrf.mxu1 }
 0x117   : > { %2155 = vmatmul.mubr.bf16.gmra.mxu0 %v7163_v9  ;;  %2336 = vmatmul.mubr.bf16.gmra.mxu1 %v7171_v12 }
 0x118   : > { %2455 = vmatpush1.bf16.msra.mxu0 %v6052_v11  ;;  %2618 = vmatpush1.bf16.msra.mxu1 %v6053_v15  ;;  %v7275_v11 = vld [vmem:[%s6361_s24 + $0x110] sm:$0xff]  ;;  %v6070_v15 = vld [vmem:[%s8199_s1 + $0x4c8] sm:$0xff]  }
 0x119   : > { %2456 = vmatprep.subr.bf16.mxu0 %v6261_v1  ;;  %2619 = vmatprep.subr.bf16.mxu1 %v6261_v1 }
 0x11a   : > { %5295 = vmatprep.mubr.msk.bf16.mxu0 %vm346_vm0, %v7071_v21  ;;  %5331 = vmatprep.mubr.msk.bf16.mxu1 %vm346_vm0, %v7076_v24  ;;  %v6059_v24 = vld [vmem:[%s8199_s1 + $0x400] sm:$0xff]  }
 0x11c   : > { %2457 = vmatpush1.bf16.msra.mxu0 %v6055_v17  ;;  %2620 = vmatpush1.bf16.msra.mxu1 %v6056_v19  ;;  %v5320_v19 = vcombine.high %v5176_v5, %v7275_v11 }
 0x11d   : > { %2470 = vmatprep.subr.bf16.mxu0 %v6261_v1  ;;  %2633 = vmatprep.subr.bf16.mxu1 %v6261_v1 }
 0x11f   : > { %v700_v23 = vpop.f32.mrf.mxu0  ;;  %v863_v25 = vpop.f32.mrf.mxu1 }
 0x120   : > { %v731_v21 = vadd.f32 %v700_v23, %v7053_v7  ;;  %2471 = vmatpush2.bf16.msra.mxu0 %v6057_v20  ;;  %2634 = vmatpush2.bf16.msra.mxu1 %v6058_v22  ;;  %v6071_v23 = vld [vmem:[%s8199_s1 + $0x470] sm:$0xff]  }
 0x121   : > { %v702_v27 = vpop.f32.mrf.mxu0  ;;  %2472 = vmatprep.subr.bf16.mxu0 %v6261_v1  ;;  %v865_v30 = vpop.f32.mrf.mxu1  ;;  %2635 = vmatprep.subr.bf16.mxu1 %v6261_v1 }
 0x122   : > { %v7210_v29 = vadd.f32 %v863_v25, %v731_v21  ;;  %v6072_v25 = vld [vmem:[%s8199_s1 + $0x4c0] sm:$0xff]   ;;  %v7304_v27 = vcombine.low %v7135_v56, %v5176_v5 }
 0x123   : > { %v703_v7 = vpop.f32.mrf.mxu0  ;;  %v866_v33 = vpop.f32.mrf.mxu1 }
 0x124   : > { %v732_v32 = vadd.f32 %v703_v7, %v7066_v18  ;;  %2473 = vmatpush2.bf16.msra.mxu0 %v6059_v24  ;;  %2636 = vmatpush2.bf16.msra.mxu1 %v6060_v28  ;;  %v6076_v7 = vld [vmem:[%s8199_s1 + $0x468] sm:$0xff]  }
 0x125   : > { %v705_v36 = vpop.f32.mrf.mxu0  ;;  %2768 = vmatprep.subr.bf16.mxu0 %v6261_v1  ;;  %v868_v40 = vpop.f32.mrf.mxu1  ;;  %2986 = vmatprep.subr.bf16.mxu1 %v6261_v1 }
 0x126   : > { %v7221_v39 = vadd.f32 %v866_v33, %v732_v32  ;;  %v5319_v32 = vcombine.low %v5176_v5, %v7275_v11  ;;  %v5371_v33 = vld [vmem:[%s6361_s24 + $0x120] sm:$0xff]  ;;  %v6077_v36 = vld [vmem:[%s8199_s1 + $0x4b8] sm:$0xff]  }
 0x127   : > { %v708_v18 = vpop.f32.mrf.mxu0  ;;  %2475 = vmatmul.mubr.bf16.vlgmr.msra.gmra.mxu0 %v7088_v31  ;;  %2638 = vmatmul.mubr.bf16.vlgmr.msra.gmra.mxu1 %v7096_v35  ;;  %v871_v44 = vpop.f32.mrf.mxu1 }
 0x128   : > { %v733_v42 = vadd.f32 %v708_v18, %v7078_v26  ;;  %2769 = vmatpush1.bf16.msra.mxu0 %v6061_v34  ;;  %2987 = vmatpush1.bf16.msra.mxu1 %v6062_v38  ;;  %v7314_v34 = vld [vmem:[%s6361_s24 + $0x128] sm:$0xff]  ;;  %v6079_v18 = vld [vmem:[%s8199_s1 + $0x460] sm:$0xff]  }
 0x129   : > { %v710_v47 = vpop.f32.mrf.mxu0  ;;  %2770 = vmatprep.subr.bf16.mxu0 %v6261_v1  ;;  %v873_v31 = vpop.f32.mrf.mxu1  ;;  %2988 = vmatprep.subr.bf16.mxu1 %v6261_v1  ;;  %v5404_v40 = vcombine.high %v5371_v33, %v7314_v34 }
 0x12a   : > { %v7234_v49 = vadd.f32 %v871_v44, %v733_v42  ;;  %5296 = vmatprep.mubr.msk.bf16.mxu0 %vm346_vm0, %v7106_v41  ;;  %5332 = vmatprep.mubr.msk.bf16.mxu1 %vm346_vm0, %v7109_v43  ;;  %v6080_v42 = vld [vmem:[%s8199_s1 + $0x4b0] sm:$0xff]   ;;  %v6081_v44 = vld [vmem:[%s8199_s1 + $0x4a8] sm:$0xff]   ;;  %v6083_v31 = vld [vmem:[%s8199_s1 + $0x4a0] sm:$0xff]  }
 0x12b   : > { %v711_v26 = vpop.f32.mrf.mxu0  ;;  %v874_v50 = vpop.f32.mrf.mxu1 }
 0x12c   : > { %v734_v35 = vadd.f32 %v711_v26, %v7099_v37  ;;  %2771 = vmatpush1.bf16.msra.mxu0 %v6063_v45  ;;  %2989 = vmatpush1.bf16.msra.mxu1 %v6064_v48  ;;  %v6082_v45 = vld [vmem:[%s8199_s1 + $0x4f8] sm:$0xff]  }
 0x12d   : > { %v713_v53 = vpop.f32.mrf.mxu0  ;;  %2772 = vmatprep.subr.bf16.mxu0 %v6261_v1  ;;  %v876_v59 = vpop.f32.mrf.mxu1  ;;  %2990 = vmatprep.subr.bf16.mxu1 %v6261_v1 }
 0x12e   : > { %v7249_v58 = vadd.f32 %v874_v50, %v734_v35  ;;  %v6084_v35 = vld [vmem:[%s8199_s1 + $0x4f0] sm:$0xff]   ;;  %v5403_v59 = vcombine.low %v5371_v33, %v7314_v34 }
 0x12f   : > { %v716_v37 = vpop.f32.mrf.mxu0  ;;  %2483 = vmatmul.mubr.bf16.gmra.mxu0 %v7124_v51  ;;  %v879_v60 = vpop.f32.mrf.mxu1  ;;  %2646 = vmatmul.mubr.bf16.gmra.mxu1 %v7132_v55 }
 0x130   : > { %v735_v43 = vadd.f32 %v716_v37, %v7115_v46  ;;  %2773 = vmatpush1.bf16.msra.mxu0 %v6065_v52  ;;  %2991 = vmatpush1.bf16.msra.mxu1 %v6066_v54  ;;  %v6087_v37 = vld [vmem:[%s8199_s1 + $0x538] sm:$0xff]  }
 0x131   : > { %v718_v0 = vpop.f32.mrf.mxu0  ;;  %2774 = vmatprep.subr.bf16.mxu0 %v6261_v1  ;;  %v881_v46 = vpop.f32.mrf.mxu1  ;;  %2992 = vmatprep.subr.bf16.mxu1 %v6261_v1 }
 0x132   : > { %v7262_v4 = vadd.f32 %v879_v60, %v735_v43  ;;  %5297 = vmatprep.mubr.msk.bf16.mxu0 %vm346_vm0, %v7144_v61  ;;  %5333 = vmatprep.mubr.msk.bf16.mxu1 %vm346_vm0, %v7148_v63  ;;  %v7361_v43 = vld [vmem:[%s6361_s24 + $0x130] sm:$0xff]  ;;  %v7364_v60 = vld [vmem:[%s6361_s24 + $0x138] sm:$0xff] }
 0x133   : > { %v719_v55 = vpop.f32.mrf.mxu0  ;;  %v882_v8 = vpop.f32.mrf.mxu1 }
 0x134   : > { %v736_v6 = vadd.f32 %v719_v55, %v7137_v57  ;;  %2775 = vmatpush1.bf16.msra.mxu0 %v6067_v62  ;;  %2993 = vmatpush1.bf16.msra.mxu1 %v6068_v2  ;;  %v7285_v57 = vcombine.high %v7135_v56, %v5176_v5  ;;  %v7376_v55 = vcombine.high %v7361_v43, %v7364_v60 }
 0x135   : > { %v721_v14 = vpop.f32.mrf.mxu0  ;;  %2776 = vmatprep.subr.bf16.mxu0 %v6261_v1  ;;  %v884_v16 = vpop.f32.mrf.mxu1  ;;  %2994 = vmatprep.subr.bf16.mxu1 %v6261_v1 }
 0x136   : > { %v7281_v63 = vadd.f32 %v882_v8, %v736_v6  ;;  %v6089_v8 = vld [vmem:[%s8199_s1 + $0x530] sm:$0xff]  }
 0x137   : > { %v724_v17 = vpop.f32.mrf.mxu0  ;;  %2491 = vmatmul.mubr.bf16.gmra.mxu0 %v7163_v9  ;;  %v887_v22 = vpop.f32.mrf.mxu1  ;;  %2654 = vmatmul.mubr.bf16.gmra.mxu1 %v7171_v12 }
 0x138   : > { %v737_v20 = vadd.f32 %v724_v17, %v7154_v3  ;;  %2777 = vmatpush1.bf16.msra.mxu0 %v6069_v10  ;;  %2995 = vmatpush1.bf16.msra.mxu1 %v6070_v15 }
 0x139   : > { %v726_v21 = vpop.f32.mrf.mxu0  ;;  %2778 = vmatprep.subr.bf16.mxu0 %v6261_v1  ;;  %v889_v3 = vpop.f32.mrf.mxu1  ;;  %2996 = vmatprep.subr.bf16.mxu1 %v6261_v1 }
 0x13a   : > { %v7298_v24 = vadd.f32 %v887_v22, %v737_v20  ;;  %5298 = vmatprep.mubr.msk.bf16.mxu0 %vm346_vm0, %v7285_v57  ;;  %5334 = vmatprep.mubr.msk.bf16.mxu1 %vm346_vm0, %v5320_v19  ;;  %v6093_v19 = vld [vmem:[%s8199_s1 + $0x528] sm:$0xff]   ;;  %v7399_v20 = vcombine.low %v7361_v43, %v7364_v60  ;;  %v7402_v22 = vld [vmem:[%s6361_s24 + $0x140] sm:$0xff] }
 0x13b   : > { %v727_v12 = vpop.f32.mrf.mxu0  ;;  %v890_v30 = vpop.f32.mrf.mxu1 }
 0x13c   : > { %v738_v28 = vadd.f32 %v727_v12, %v7173_v13  ;;  %2779 = vmatpush1.bf16.msra.mxu0 %v6071_v23  ;;  %2997 = vmatpush1.bf16.msra.mxu1 %v6072_v25  ;;  %v7405_v23 = vld [vmem:[%s6361_s24 + $0x148] sm:$0xff] }
 0x13d   : > { %2780 = vmatprep.subr.bf16.mxu0 %v6261_v1  ;;  %v729_v56 = vpop.f32.mrf.mxu0  ;;  %2998 = vmatprep.subr.bf16.mxu1 %v6261_v1  ;;  %v892_v38 = vpop.f32.mrf.mxu1  ;;  %v7417_v12 = vcombine.high %v7402_v22, %v7405_v23 }
 0x13e   : > { %v7320_v13 = vadd.f32 %v890_v30, %v738_v28 }
 0x13f   : > { %2499 = vmatmul.mubr.bf16.gmra.mxu0 %v7304_v27  ;;  %2662 = vmatmul.mubr.bf16.gmra.mxu1 %v5319_v32 }
 0x140   : > { %2781 = vmatpush1.bf16.msra.mxu0 %v6076_v7  ;;  %2999 = vmatpush1.bf16.msra.mxu1 %v6077_v36  ;;  %v6096_v7 = vld [vmem:[%s8199_s1 + $0x520] sm:$0xff]   ;;  %v5178_v36 = vld [vmem:[%s6361_s24 + $0x118] sm:$0xff] }
 0x141   : > { %2782 = vmatprep.subr.bf16.mxu0 %v6261_v1  ;;  %3000 = vmatprep.subr.bf16.mxu1 %v6261_v1 }
 0x142   : > { %5367 = vmatprep.mubr.msk.bf16.mxu0 %vm346_vm0, %v7106_v41  ;;  %5421 = vmatprep.mubr.msk.bf16.mxu1 %vm346_vm0, %v5404_v40 }
 0x144   : > { %2783 = vmatpush1.bf16.msra.mxu0 %v6079_v18  ;;  %3001 = vmatpush1.bf16.msra.mxu1 %v6080_v42  ;;  %v6099_v18 = vld [vmem:[%s8199_s1 + $0x518] sm:$0xff]   ;;  %v7442_v42 = vcombine.low %v7402_v22, %v7405_v23 }
 0x145   : > { %2796 = vmatprep.subr.bf16.mxu0 %v6261_v1  ;;  %3014 = vmatprep.subr.bf16.mxu1 %v6261_v1 }
 0x147   : > { %v1026_v47 = vpop.f32.mrf.mxu0  ;;  %v1244_v41 = vpop.f32.mrf.mxu1 }
 0x148   : > { %v1057_v48 = vadd.f32 %v1026_v47, %v7210_v29  ;;  %2797 = vmatpush2.bf16.msra.mxu0 %v6081_v44  ;;  %3015 = vmatpush2.bf16.msra.mxu1 %v6082_v45  ;;  %v7445_v44 = vld [vmem:[%s6361_s24 + $0x150] sm:$0xff] }
 0x149   : > { %v1028_v26 = vpop.f32.mrf.mxu0  ;;  %2798 = vmatprep.subr.bf16.mxu0 %v6261_v1  ;;  %v1246_v52 = vpop.f32.mrf.mxu1  ;;  %3016 = vmatprep.subr.bf16.mxu1 %v6261_v1 }
 0x14a   : > { %v7352_v50 = vadd.f32 %v1244_v41, %v1057_v48  ;;  %v5356_v41 = vcombine.high %v7275_v11, %v5178_v36 }
 0x14b   : > { %v1029_v29 = vpop.f32.mrf.mxu0  ;;  %v1247_v54 = vpop.f32.mrf.mxu1 }
 0x14c   : > { %v1058_v53 = vadd.f32 %v1029_v29, %v7221_v39  ;;  %2799 = vmatpush2.bf16.msra.mxu0 %v6083_v31  ;;  %3017 = vmatpush2.bf16.msra.mxu1 %v6084_v35  ;;  %v6088_v39 = vld [vmem:[%s8199_s1 + $0x588] sm:$0xff]   ;;  %v6102_v29 = vld [vmem:[%s8199_s1 + $0x510] sm:$0xff]  }
 0x14d   : > { %v1031_v62 = vpop.f32.mrf.mxu0  ;;  %3167 = vmatprep.subr.bf16.mxu0 %v6261_v1  ;;  %v1249_v2 = vpop.f32.mrf.mxu1  ;;  %3330 = vmatprep.subr.bf16.mxu1 %v6261_v1 }
 0x14e   : > { %v7370_v0 = vadd.f32 %v1247_v54, %v1058_v53  ;;  %v6107_v2 = vld [vmem:[%s8199_s1 + $0x508] sm:$0xff]  }
 0x14f   : > { %v1034_v46 = vpop.f32.mrf.mxu0  ;;  %2801 = vmatmul.mubr.bf16.vlgmr.msra.gmra.mxu0 %v7124_v51  ;;  %3019 = vmatmul.mubr.bf16.vlgmr.msra.gmra.mxu1 %v5403_v59  ;;  %v1252_v6 = vpop.f32.mrf.mxu1  ;;  %v6090_v51 = vld [vmem:[%s8199_s1 + $0x580] sm:$0xff]  }
 0x150   : > { %v1059_v5 = vadd.f32 %v1034_v46, %v7234_v49  ;;  %3168 = vmatpush1.bf16.msra.mxu0 %v6087_v37  ;;  %3331 = vmatpush1.bf16.msra.mxu1 %v6088_v39  ;;  %v5355_v37 = vcombine.low %v7275_v11, %v5178_v36  ;;  %v6108_v11 = vld [vmem:[%s8199_s1 + $0x558] sm:$0xff]  }
 0x151   : > { %v1036_v10 = vpop.f32.mrf.mxu0  ;;  %3169 = vmatprep.subr.bf16.mxu0 %v6261_v1  ;;  %v1254_v49 = vpop.f32.mrf.mxu1  ;;  %3332 = vmatprep.subr.bf16.mxu1 %v6261_v1 }
 0x152   : > { %v7386_v14 = vadd.f32 %v1252_v6, %v1059_v5  ;;  %5368 = vmatprep.mubr.msk.bf16.mxu0 %vm346_vm0, %v7144_v61  ;;  %5422 = vmatprep.mubr.msk.bf16.mxu1 %vm346_vm0, %v7376_v55  ;;  %v6110_v10 = vld [vmem:[%s8199_s1 + $0x500] sm:$0xff]   ;;  %v6112_v49 = vld [vmem:[%s8199_s1 + $0x548] sm:$0xff]  }
 0x153   : > { %v1037_v15 = vpop.f32.mrf.mxu0  ;;  %v1255_v17 = vpop.f32.mrf.mxu1 }
 0x154   : > { %v1060_v16 = vadd.f32 %v1037_v15, %v7249_v58  ;;  %3170 = vmatpush1.bf16.msra.mxu0 %v6089_v8  ;;  %3333 = vmatpush1.bf16.msra.mxu1 %v6090_v51  ;;  %v6094_v58 = vld [vmem:[%s8199_s1 + $0x578] sm:$0xff]   ;;  %v5446_v8 = vcombine.high %v7314_v34, %v7361_v43  ;;  %v6111_v51 = vld [vmem:[%s8199_s1 + $0x550] sm:$0xff]  }
 0x155   : > { %v1039_v61 = vpop.f32.mrf.mxu0  ;;  %3171 = vmatprep.subr.bf16.mxu0 %v6261_v1  ;;  %v1257_v25 = vpop.f32.mrf.mxu1  ;;  %3334 = vmatprep.subr.bf16.mxu1 %v6261_v1  ;;  %v6113_v15 = vld [vmem:[%s8199_s1 + $0x598] sm:$0xff]  }
 0x156   : > { %v7411_v21 = vadd.f32 %v1255_v17, %v1060_v16 }
 0x157   : > { %v1042_v3 = vpop.f32.mrf.mxu0  ;;  %2809 = vmatmul.mubr.bf16.gmra.mxu0 %v7163_v9  ;;  %v1260_v30 = vpop.f32.mrf.mxu1  ;;  %3027 = vmatmul.mubr.bf16.gmra.mxu1 %v7399_v20  ;;  %v6097_v9 = vld [vmem:[%s8199_s1 + $0x570] sm:$0xff]  }
 0x158   : > { %v1061_v28 = vadd.f32 %v1042_v3, %v7262_v4  ;;  %3172 = vmatpush1.bf16.msra.mxu0 %v6093_v19  ;;  %3335 = vmatpush1.bf16.msra.mxu1 %v6094_v58  ;;  %v6115_v58 = vld [vmem:[%s8199_s1 + $0x590] sm:$0xff]  }
 0x159   : > { %v1044_v32 = vpop.f32.mrf.mxu0  ;;  %3173 = vmatprep.subr.bf16.mxu0 %v6261_v1  ;;  %v1262_v4 = vpop.f32.mrf.mxu1  ;;  %3336 = vmatprep.subr.bf16.mxu1 %v6261_v1 }
 0x15a   : > { %v7428_v33 = vadd.f32 %v1260_v30, %v1061_v28  ;;  %5369 = vmatprep.mubr.msk.bf16.mxu0 %vm346_vm0, %v7285_v57  ;;  %5423 = vmatprep.mubr.msk.bf16.mxu1 %vm346_vm0, %v7417_v12  ;;  %v7448_v57 = vld [vmem:[%s6361_s24 + $0x158] sm:$0xff]  ;;  %v6118_v4 = vld [vmem:[%s8199_s1 + $0x628] sm:$0xff]  }
 0x15b   : > { %v1045_v56 = vpop.f32.mrf.mxu0  ;;  %v1263_v40 = vpop.f32.mrf.mxu1  ;;  %v7461_v26 = vcombine.high %v7445_v44, %v7448_v57  ;;  %v7485_v46 = vcombine.low %v7445_v44, %v7448_v57  ;;  %v6117_v32 = vld [vmem:[%s8199_s1 + $0x5d8] sm:$0xff]  }
 0x15c   : > { %v1062_v38 = vadd.f32 %v1045_v56, %v7281_v63  ;;  %3174 = vmatpush1.bf16.msra.mxu0 %v6096_v7  ;;  %3337 = vmatpush1.bf16.msra.mxu1 %v6097_v9  ;;  %v6100_v63 = vld [vmem:[%s8199_s1 + $0x568] sm:$0xff]  }
 0x15d   : > { %v1047_v45 = vpop.f32.mrf.mxu0  ;;  %3175 = vmatprep.subr.bf16.mxu0 %v6261_v1  ;;  %v1265_v48 = vpop.f32.mrf.mxu1  ;;  %3338 = vmatprep.subr.bf16.mxu1 %v6261_v1 }
 0x15e   : > { %v7454_v47 = vadd.f32 %v1263_v40, %v1062_v38  ;;  %v6119_v40 = vld [vmem:[%s8199_s1 + $0x5d0] sm:$0xff]   ;;  %v6120_v45 = vld [vmem:[%s8199_s1 + $0x620] sm:$0xff]  }
 0x15f   : > { %v1050_v31 = vpop.f32.mrf.mxu0  ;;  %2817 = vmatmul.mubr.bf16.gmra.mxu0 %v7304_v27  ;;  %v1268_v52 = vpop.f32.mrf.mxu1  ;;  %3035 = vmatmul.mubr.bf16.gmra.mxu1 %v7442_v42  ;;  %v6103_v27 = vld [vmem:[%s8199_s1 + $0x560] sm:$0xff]  }
 0x160   : > { %v1063_v35 = vadd.f32 %v1050_v31, %v7298_v24  ;;  %3176 = vmatpush1.bf16.msra.mxu0 %v6099_v18  ;;  %3339 = vmatpush1.bf16.msra.mxu1 %v6100_v63 }
 0x161   : > { %v1052_v53 = vpop.f32.mrf.mxu0  ;;  %3177 = vmatprep.subr.bf16.mxu0 %v6261_v1  ;;  %v1270_v59 = vpop.f32.mrf.mxu1  ;;  %3340 = vmatprep.subr.bf16.mxu1 %v6261_v1 }
 0x162   : > { %v7472_v54 = vadd.f32 %v1268_v52, %v1063_v35  ;;  %5370 = vmatprep.mubr.msk.bf16.mxu0 %vm346_vm0, %v5356_v41  ;;  %5424 = vmatprep.mubr.msk.bf16.mxu1 %vm346_vm0, %v7461_v26  ;;  %v6123_v35 = vld [vmem:[%s8199_s1 + $0x5c8] sm:$0xff]  }
 0x163   : > { %v1053_v24 = vpop.f32.mrf.mxu0  ;;  %v1271_v39 = vpop.f32.mrf.mxu1 }
 0x164   : > { %v1064_v62 = vadd.f32 %v1053_v24, %v7320_v13  ;;  %3178 = vmatpush1.bf16.msra.mxu0 %v6102_v29  ;;  %3341 = vmatpush1.bf16.msra.mxu1 %v6103_v27  ;;  %v6125_v24 = vld [vmem:[%s8199_s1 + $0x5c0] sm:$0xff]  }
 0x165   : > { %3179 = vmatprep.subr.bf16.mxu0 %v6261_v1  ;;  %v1055_v5 = vpop.f32.mrf.mxu0  ;;  %3342 = vmatprep.subr.bf16.mxu1 %v6261_v1  ;;  %v1273_v13 = vpop.f32.mrf.mxu1 }
 0x166   : > { %v7491_v6 = vadd.f32 %v1271_v39, %v1064_v62  ;;  %v6126_v62 = vld [vmem:[%s8199_s1 + $0x610] sm:$0xff]   ;;  %v7596_v5 = vcombine.low %v7405_v23, %v7445_v44 }
 0x167   : > { %2825 = vmatmul.mubr.bf16.gmra.mxu0 %v5355_v37  ;;  %3043 = vmatmul.mubr.bf16.gmra.mxu1 %v7485_v46 }
 0x168   : > { %3180 = vmatpush1.bf16.msra.mxu0 %v6107_v2  ;;  %3343 = vmatpush1.bf16.msra.mxu1 %v6108_v11  ;;  %v5379_v11 = vld [vmem:[%s6361_s24 + $0x160] sm:$0xff] }
 0x169   : > { %3181 = vmatprep.subr.bf16.mxu0 %v6261_v1  ;;  %3344 = vmatprep.subr.bf16.mxu1 %v6261_v1 }
 0x16a   : > { %5463 = vmatprep.mubr.msk.bf16.mxu0 %vm346_vm0, %v5446_v8  ;;  %5499 = vmatprep.mubr.msk.bf16.mxu1 %vm346_vm0, %v7376_v55  ;;  %v6114_v55 = vld [vmem:[%s8199_s1 + $0x540] sm:$0xff]  }
 0x16c   : > { %3182 = vmatpush1.bf16.msra.mxu0 %v6110_v10  ;;  %3345 = vmatpush1.bf16.msra.mxu1 %v6111_v51  ;;  %v6129_v10 = vld [vmem:[%s8199_s1 + $0x5b8] sm:$0xff]   ;;  %v7606_v51 = vld [vmem:[%s6361_s24 + $0x168] sm:$0xff] }
 0x16d   : > { %3195 = vmatprep.subr.bf16.mxu0 %v6261_v1  ;;  %3358 = vmatprep.subr.bf16.mxu1 %v6261_v1 }
 0x16f   : > { %v1425_v16 = vpop.f32.mrf.mxu0  ;;  %v1588_v19 = vpop.f32.mrf.mxu1 }
 0x170   : > { %v1456_v17 = vadd.f32 %v1425_v16, %v7352_v50  ;;  %3196 = vmatpush2.bf16.msra.mxu0 %v6112_v49  ;;  %3359 = vmatpush2.bf16.msra.mxu1 %v6113_v15  ;;  %v5445_v50 = vcombine.low %v7314_v34, %v7361_v43  ;;  %v7542_v43 = vcombine.high %v7364_v60, %v7402_v22 }
 0x171   : > { %v1427_v61 = vpop.f32.mrf.mxu0  ;;  %3197 = vmatprep.subr.bf16.mxu0 %v6261_v1  ;;  %v1590_v3 = vpop.f32.mrf.mxu1  ;;  %3360 = vmatprep.subr.bf16.mxu1 %v6261_v1 }
 0x172   : > { %v7524_v25 = vadd.f32 %v1588_v19, %v1456_v17  ;;  %v7620_v17 = vcombine.high %v5379_v11, %v7606_v51  ;;  %v6131_v61 = vld [vmem:[%s8199_s1 + $0x5b0] sm:$0xff]   ;;  %v6132_v3 = vld [vmem:[%s8199_s1 + $0x600] sm:$0xff]  }
 0x173   : > { %v1428_v28 = vpop.f32.mrf.mxu0  ;;  %v1591_v7 = vpop.f32.mrf.mxu1 }
 0x174   : > { %v1457_v30 = vadd.f32 %v1428_v28, %v7370_v0  ;;  %3198 = vmatpush2.bf16.msra.mxu0 %v6114_v55  ;;  %3361 = vmatpush2.bf16.msra.mxu1 %v6115_v58 }
 0x175   : > { %v1430_v9 = vpop.f32.mrf.mxu0  ;;  %3493 = vmatprep.subr.bf16.mxu0 %v6261_v1  ;;  %v1593_v34 = vpop.f32.mrf.mxu1  ;;  %3656 = vmatprep.subr.bf16.mxu1 %v6261_v1 }
 0x176   : > { %v7537_v56 = vadd.f32 %v1591_v7, %v1457_v30  ;;  %v7637_v30 = vcombine.low %v7448_v57, %v5379_v11  ;;  %v6136_v9 = vld [vmem:[%s8199_s1 + $0x5a8] sm:$0xff]  }
 0x177   : > { %v1433_v0 = vpop.f32.mrf.mxu0  ;;  %3200 = vmatmul.mubr.bf16.vlgmr.msra.gmra.mxu0 %v5445_v50  ;;  %3363 = vmatmul.mubr.bf16.vlgmr.msra.gmra.mxu1 %v7399_v20  ;;  %v1596_v38 = vpop.f32.mrf.mxu1  ;;  %v7560_v20 = vcombine.low %v7364_v60, %v7402_v22  ;;  %v6124_v60 = vld [vmem:[%s8199_s1 + $0x618] sm:$0xff]  }
 0x178   : > { %v1458_v36 = vadd.f32 %v1433_v0, %v7386_v14  ;;  %3494 = vmatpush1.bf16.msra.mxu0 %v6117_v32  ;;  %3657 = vmatpush1.bf16.msra.mxu1 %v6118_v4  ;;  %v7646_v4 = vcombine.low %v5379_v11, %v7606_v51 }
 0x179   : > { %v1435_v18 = vpop.f32.mrf.mxu0  ;;  %3495 = vmatprep.subr.bf16.mxu0 %v6261_v1  ;;  %v1598_v48 = vpop.f32.mrf.mxu1  ;;  %3658 = vmatprep.subr.bf16.mxu1 %v6261_v1 }
 0x17a   : > { %v7553_v63 = vadd.f32 %v1596_v38, %v1458_v36  ;;  %5464 = vmatprep.mubr.msk.bf16.mxu0 %vm346_vm0, %v7542_v43  ;;  %5500 = vmatprep.mubr.msk.bf16.mxu1 %vm346_vm0, %v7417_v12  ;;  %v6139_v36 = vld [vmem:[%s8199_s1 + $0x5a0] sm:$0xff]   ;;  %v6140_v38 = vld [vmem:[%s8199_s1 + $0x5f0] sm:$0xff]   ;;  %v6142_v18 = vld [vmem:[%s8199_s1 + $0x638] sm:$0xff]  }
 0x17b   : > { %v1436_v14 = vpop.f32.mrf.mxu0  ;;  %v1599_v31 = vpop.f32.mrf.mxu1 }
 0x17c   : > { %v1459_v41 = vadd.f32 %v1436_v14, %v7411_v21  ;;  %3496 = vmatpush1.bf16.msra.mxu0 %v6119_v40  ;;  %3659 = vmatpush1.bf16.msra.mxu1 %v6120_v45  ;;  %v7577_v21 = vcombine.high %v7405_v23, %v7445_v44  ;;  %v6130_v23 = vld [vmem:[%s8199_s1 + $0x608] sm:$0xff]  }
 0x17d   : > { %v1438_v52 = vpop.f32.mrf.mxu0  ;;  %3497 = vmatprep.subr.bf16.mxu0 %v6261_v1  ;;  %v1601_v29 = vpop.f32.mrf.mxu1  ;;  %3660 = vmatprep.subr.bf16.mxu1 %v6261_v1  ;;  %v6141_v40 = vld [vmem:[%s8199_s1 + $0x5e8] sm:$0xff]  }
 0x17e   : > { %v7572_v22 = vadd.f32 %v1599_v31, %v1459_v41  ;;  %v6144_v41 = vld [vmem:[%s8199_s1 + $0x630] sm:$0xff]   ;;  %v6145_v29 = vld [vmem:[%s8199_s1 + $0x678] sm:$0xff]  }
 0x17f   : > { %v1441_v53 = vpop.f32.mrf.mxu0  ;;  %3208 = vmatmul.mubr.bf16.gmra.mxu0 %v7560_v20  ;;  %v1604_v59 = vpop.f32.mrf.mxu1  ;;  %3371 = vmatmul.mubr.bf16.gmra.mxu1 %v7442_v42 }
 0x180   : > { %v1460_v27 = vadd.f32 %v1441_v53, %v7428_v33  ;;  %3498 = vmatpush1.bf16.msra.mxu0 %v6123_v35  ;;  %3661 = vmatpush1.bf16.msra.mxu1 %v6124_v60 }
 0x181   : > { %v1443_v37 = vpop.f32.mrf.mxu0  ;;  %3499 = vmatprep.subr.bf16.mxu0 %v6261_v1  ;;  %v1606_v33 = vpop.f32.mrf.mxu1  ;;  %3662 = vmatprep.subr.bf16.mxu1 %v6261_v1 }
 0x182   : > { %v7589_v39 = vadd.f32 %v1604_v59, %v1460_v27  ;;  %5465 = vmatprep.mubr.msk.bf16.mxu0 %vm346_vm0, %v7577_v21  ;;  %5501 = vmatprep.mubr.msk.bf16.mxu1 %vm346_vm0, %v7461_v26  ;;  %v6146_v27 = vld [vmem:[%s8199_s1 + $0x6c8] sm:$0xff]   ;;  %v6147_v33 = vld [vmem:[%s8199_s1 + $0x670] sm:$0xff]  }
 0x183   : > { %v1444_v2 = vpop.f32.mrf.mxu0  ;;  %v1607_v8 = vpop.f32.mrf.mxu1 }
 0x184   : > { %v1461_v13 = vadd.f32 %v1444_v2, %v7454_v47  ;;  %3500 = vmatpush1.bf16.msra.mxu0 %v6125_v24  ;;  %3663 = vmatpush1.bf16.msra.mxu1 %v6126_v62  ;;  %v7616_v47 = vcombine.high %v7448_v57, %v5379_v11  ;;  %v6137_v57 = vld [vmem:[%s8199_s1 + $0x5f8] sm:$0xff]   ;;  %v6148_v11 = vld [vmem:[%s8199_s1 + $0x6c0] sm:$0xff]  }
 0x185   : > { %v1446_v49 = vpop.f32.mrf.mxu0  ;;  %3501 = vmatprep.subr.bf16.mxu0 %v6261_v1  ;;  %v1609_v15 = vpop.f32.mrf.mxu1  ;;  %3664 = vmatprep.subr.bf16.mxu1 %v6261_v1 }
 0x186   : > { %v7612_v44 = vadd.f32 %v1607_v8, %v1461_v13 }
 0x187   : > { %v1449_v16 = vpop.f32.mrf.mxu0  ;;  %3216 = vmatmul.mubr.bf16.gmra.mxu0 %v7596_v5  ;;  %v1612_v55 = vpop.f32.mrf.mxu1  ;;  %3379 = vmatmul.mubr.bf16.gmra.mxu1 %v7485_v46 }
 0x188   : > { %v1462_v19 = vadd.f32 %v1449_v16, %v7472_v54  ;;  %3502 = vmatpush1.bf16.msra.mxu0 %v6129_v10  ;;  %3665 = vmatpush1.bf16.msra.mxu1 %v6130_v23  ;;  %v6149_v10 = vld [vmem:[%s8199_s1 + $0x668] sm:$0xff]  }
 0x189   : > { %v1451_v58 = vpop.f32.mrf.mxu0  ;;  %3503 = vmatprep.subr.bf16.mxu0 %v6261_v1  ;;  %v1614_v28 = vpop.f32.mrf.mxu1  ;;  %3666 = vmatprep.subr.bf16.mxu1 %v6261_v1 }
 0x18a   : > { %v7631_v50 = vadd.f32 %v1612_v55, %v1462_v19  ;;  %5466 = vmatprep.mubr.msk.bf16.mxu0 %vm346_vm0, %v7616_v47  ;;  %5502 = vmatprep.mubr.msk.bf16.mxu1 %vm346_vm0, %v7620_v17  ;;  %v6151_v19 = vld [vmem:[%s8199_s1 + $0x660] sm:$0xff]   ;;  %v5381_v58 = vld [vmem:[%s6361_s24 + $0x170] sm:$0xff] }
 0x18b   : > { %v1452_v54 = vpop.f32.mrf.mxu0  ;;  %v1615_v32 = vpop.f32.mrf.mxu1 }
 0x18c   : > { %v1463_v7 = vadd.f32 %v1452_v54, %v7491_v6  ;;  %3504 = vmatpush1.bf16.msra.mxu0 %v6131_v61  ;;  %3667 = vmatpush1.bf16.msra.mxu1 %v6132_v3  ;;  %v6153_v54 = vld [vmem:[%s8199_s1 + $0x658] sm:$0xff]  }
 0x18d   : > { %3505 = vmatprep.subr.bf16.mxu0 %v6261_v1  ;;  %v1454_v34 = vpop.f32.mrf.mxu0  ;;  %3668 = vmatprep.subr.bf16.mxu1 %v6261_v1  ;;  %v1617_v6 = vpop.f32.mrf.mxu1 }
 0x18e   : > { %v7652_v0 = vadd.f32 %v1615_v32, %v1463_v7  ;;  %v5382_v7 = vld [vmem:[%s6361_s24 + $0x178] sm:$0xff] }
 0x18f   : > { %3224 = vmatmul.mubr.bf16.gmra.mxu0 %v7637_v30  ;;  %3387 = vmatmul.mubr.bf16.gmra.mxu1 %v7646_v4 }
 0x190   : > { %3506 = vmatpush1.bf16.msra.mxu0 %v6136_v9  ;;  %3669 = vmatpush1.bf16.msra.mxu1 %v6137_v57  ;;  %v5560_v57 = vcombine.high %v5381_v58, %v5382_v7 }
 0x191   : > { %3507 = vmatprep.subr.bf16.mxu0 %v6261_v1  ;;  %3670 = vmatprep.subr.bf16.mxu1 %v6261_v1 }
 0x192   : > { %5535 = vmatprep.mubr.msk.bf16.mxu0 %vm346_vm0, %v7542_v43  ;;  %5571 = vmatprep.mubr.msk.bf16.mxu1 %vm346_vm0, %v7417_v12  ;;  %v6143_v12 = vld [vmem:[%s8199_s1 + $0x5e0] sm:$0xff]  }
 0x194   : > { %3508 = vmatpush1.bf16.msra.mxu0 %v6139_v36  ;;  %3671 = vmatpush1.bf16.msra.mxu1 %v6140_v38  ;;  %v6155_v38 = vld [vmem:[%s8199_s1 + $0x650] sm:$0xff]  }
 0x195   : > { %3521 = vmatprep.subr.bf16.mxu0 %v6261_v1  ;;  %3684 = vmatprep.subr.bf16.mxu1 %v6261_v1 }
 0x197   : > { %v1751_v45 = vpop.f32.mrf.mxu0  ;;  %v1914_v48 = vpop.f32.mrf.mxu1 }
 0x198   : > { %v1782_v43 = vadd.f32 %v1751_v45, %v7524_v25  ;;  %3522 = vmatpush2.bf16.msra.mxu0 %v6141_v40  ;;  %3685 = vmatpush2.bf16.msra.mxu1 %v6142_v18  ;;  %v5523_v45 = vcombine.low %v7606_v51, %v5381_v58 }
 0x199   : > { %v1753_v14 = vpop.f32.mrf.mxu0  ;;  %3523 = vmatprep.subr.bf16.mxu0 %v6261_v1  ;;  %v1916_v35 = vpop.f32.mrf.mxu1  ;;  %3686 = vmatprep.subr.bf16.mxu1 %v6261_v1 }
 0x19a   : > { %v7685_v31 = vadd.f32 %v1914_v48, %v1782_v43  ;;  %v7775_v43 = vld [vmem:[%s6361_s24 + $0x180] sm:$0xff]  ;;  %v7778_v48 = vld [vmem:[%s6361_s24 + $0x188] sm:$0xff]  ;;  %v5559_v35 = vcombine.low %v5381_v58, %v5382_v7 }
 0x19b   : > { %v1754_v25 = vpop.f32.mrf.mxu0  ;;  %v1917_v60 = vpop.f32.mrf.mxu1 }
 0x19c   : > { %v1783_v52 = vadd.f32 %v1754_v25, %v7537_v56  ;;  %3524 = vmatpush2.bf16.msra.mxu0 %v6143_v12  ;;  %3687 = vmatpush2.bf16.msra.mxu1 %v6144_v41  ;;  %v6160_v41 = vld [vmem:[%s8199_s1 + $0x648] sm:$0xff]   ;;  %v7785_v25 = vld [vmem:[%s6361_s24 + $0x190] sm:$0xff] }
 0x19d   : > { %v1756_v53 = vpop.f32.mrf.mxu0  ;;  %3874 = vmatprep.subr.bf16.mxu0 %v6261_v1  ;;  %v1919_v24 = vpop.f32.mrf.mxu1  ;;  %4055 = vmatprep.subr.bf16.mxu1 %v6261_v1 }
 0x19e   : > { %v7696_v59 = vadd.f32 %v1917_v60, %v1783_v52  ;;  %v6161_v52 = vld [vmem:[%s8199_s1 + $0x698] sm:$0xff]   ;;  %v5650_v53 = vcombine.high %v7778_v48, %v7785_v25  ;;  %v6164_v24 = vld [vmem:[%s8199_s1 + $0x690] sm:$0xff]  }
 0x19f   : > { %v1759_v56 = vpop.f32.mrf.mxu0  ;;  %3526 = vmatmul.mubr.bf16.vlgmr.msra.gmra.mxu0 %v7560_v20  ;;  %3689 = vmatmul.mubr.bf16.vlgmr.msra.gmra.mxu1 %v7442_v42  ;;  %v1922_v62 = vpop.f32.mrf.mxu1 }
 0x1a0   : > { %v1784_v37 = vadd.f32 %v1759_v56, %v7553_v63  ;;  %3875 = vmatpush1.bf16.msra.mxu0 %v6145_v29  ;;  %4056 = vmatpush1.bf16.msra.mxu1 %v6146_v27  ;;  %v5608_v29 = vcombine.high %v7775_v43, %v7778_v48  ;;  %v6163_v27 = vld [vmem:[%s8199_s1 + $0x640] sm:$0xff]   ;;  %v6165_v56 = vld [vmem:[%s8199_s1 + $0x688] sm:$0xff]  }
 0x1a1   : > { %v1761_v2 = vpop.f32.mrf.mxu0  ;;  %3876 = vmatprep.subr.bf16.mxu0 %v6261_v1  ;;  %v1924_v20 = vpop.f32.mrf.mxu1  ;;  %4057 = vmatprep.subr.bf16.mxu1 %v6261_v1 }
 0x1a2   : > { %v7709_v13 = vadd.f32 %v1922_v62, %v1784_v37  ;;  %5536 = vmatprep.mubr.msk.bf16.mxu0 %vm346_vm0, %v7577_v21  ;;  %5572 = vmatprep.mubr.msk.bf16.mxu1 %vm346_vm0, %v7461_v26  ;;  %v6150_v21 = vld [vmem:[%s8199_s1 + $0x6b8] sm:$0xff]  }
 0x1a3   : > { %v1762_v42 = vpop.f32.mrf.mxu0  ;;  %v1925_v8 = vpop.f32.mrf.mxu1  ;;  %v6166_v37 = vld [vmem:[%s8199_s1 + $0x6d8] sm:$0xff]  }
 0x1a4   : > { %v1785_v63 = vadd.f32 %v1762_v42, %v7572_v22  ;;  %3877 = vmatpush1.bf16.msra.mxu0 %v6147_v33  ;;  %4058 = vmatpush1.bf16.msra.mxu1 %v6148_v11  ;;  %v6167_v11 = vld [vmem:[%s8199_s1 + $0x680] sm:$0xff]   ;;  %v6168_v42 = vld [vmem:[%s8199_s1 + $0x6d0] sm:$0xff]  }
 0x1a5   : > { %v1764_v49 = vpop.f32.mrf.mxu0  ;;  %3878 = vmatprep.subr.bf16.mxu0 %v6261_v1  ;;  %v1927_v15 = vpop.f32.mrf.mxu1  ;;  %4059 = vmatprep.subr.bf16.mxu1 %v6261_v1 }
 0x1a6   : > { %v7724_v23 = vadd.f32 %v1925_v8, %v1785_v63  ;;  %v5578_v49 = vld [vmem:[%s6361_s24 + $0x198] sm:$0xff] }
 0x1a7   : > { %v1767_v26 = vpop.f32.mrf.mxu0  ;;  %3534 = vmatmul.mubr.bf16.gmra.mxu0 %v7596_v5  ;;  %v1930_v16 = vpop.f32.mrf.mxu1  ;;  %3697 = vmatmul.mubr.bf16.gmra.mxu1 %v7485_v46  ;;  %v6152_v5 = vld [vmem:[%s8199_s1 + $0x6b0] sm:$0xff]  }
 0x1a8   : > { %v1786_v22 = vadd.f32 %v1767_v26, %v7589_v39  ;;  %3879 = vmatpush1.bf16.msra.mxu0 %v6149_v10  ;;  %4060 = vmatpush1.bf16.msra.mxu1 %v6150_v21  ;;  %v5607_v10 = vcombine.low %v7775_v43, %v7778_v48  ;;  %v5649_v26 = vcombine.low %v7778_v48, %v7785_v25 }
 0x1a9   : > { %v1769_v55 = vpop.f32.mrf.mxu0  ;;  %3880 = vmatprep.subr.bf16.mxu0 %v6261_v1  ;;  %v1932_v39 = vpop.f32.mrf.mxu1  ;;  %4061 = vmatprep.subr.bf16.mxu1 %v6261_v1 }
 0x1aa   : > { %v7737_v61 = vadd.f32 %v1930_v16, %v1786_v22  ;;  %5537 = vmatprep.mubr.msk.bf16.mxu0 %vm346_vm0, %v7616_v47  ;;  %5573 = vmatprep.mubr.msk.bf16.mxu1 %vm346_vm0, %v7620_v17  ;;  %v6154_v47 = vld [vmem:[%s8199_s1 + $0x6a8] sm:$0xff]   ;;  %v6173_v22 = vld [vmem:[%s8199_s1 + $0x718] sm:$0xff]   ;;  %v5579_v16 = vld [vmem:[%s6361_s24 + $0x1a0] sm:$0xff]  ;;  %v7845_v39 = vcombine.high %v7785_v25, %v5578_v49 }
 0x1ab   : > { %v1770_v46 = vpop.f32.mrf.mxu0  ;;  %v1933_v28 = vpop.f32.mrf.mxu1  ;;  %v6174_v55 = vld [vmem:[%s8199_s1 + $0x768] sm:$0xff]  }
 0x1ac   : > { %v1787_v3 = vadd.f32 %v1770_v46, %v7612_v44  ;;  %3881 = vmatpush1.bf16.msra.mxu0 %v6151_v19  ;;  %4062 = vmatpush1.bf16.msra.mxu1 %v6152_v5  ;;  %v5524_v44 = vcombine.high %v7606_v51, %v5381_v58  ;;  %v7847_v58 = vcombine.high %v5578_v49, %v5579_v16 }
 0x1ad   : > { %v1772_v32 = vpop.f32.mrf.mxu0  ;;  %3882 = vmatprep.subr.bf16.mxu0 %v6261_v1  ;;  %v1935_v17 = vpop.f32.mrf.mxu1  ;;  %4063 = vmatprep.subr.bf16.mxu1 %v6261_v1 }
 0x1ae   : > { %v7754_v9 = vadd.f32 %v1933_v28, %v1787_v3  ;;  %v6176_v32 = vld [vmem:[%s8199_s1 + $0x760] sm:$0xff]  }
 0x1af   : > { %v1775_v34 = vpop.f32.mrf.mxu0  ;;  %3542 = vmatmul.mubr.bf16.gmra.mxu0 %v7637_v30  ;;  %v1938_v36 = vpop.f32.mrf.mxu1  ;;  %3705 = vmatmul.mubr.bf16.gmra.mxu1 %v7646_v4  ;;  %v6156_v30 = vld [vmem:[%s8199_s1 + $0x6a0] sm:$0xff]  }
 0x1b0   : > { %v1788_v6 = vadd.f32 %v1775_v34, %v7631_v50  ;;  %3883 = vmatpush1.bf16.msra.mxu0 %v6153_v54  ;;  %4064 = vmatpush1.bf16.msra.mxu1 %v6154_v47  ;;  %v6175_v54 = vld [vmem:[%s8199_s1 + $0x710] sm:$0xff]   ;;  %v5580_v34 = vld [vmem:[%s6361_s24 + $0x1a8] sm:$0xff] }
 0x1b1   : > { %v1777_v40 = vpop.f32.mrf.mxu0  ;;  %3884 = vmatprep.subr.bf16.mxu0 %v6261_v1  ;;  %v1940_v18 = vpop.f32.mrf.mxu1  ;;  %4065 = vmatprep.subr.bf16.mxu1 %v6261_v1 }
 0x1b2   : > { %v7768_v50 = vadd.f32 %v1938_v36, %v1788_v6  ;;  %5538 = vmatprep.mubr.msk.bf16.mxu0 %vm346_vm0, %v5524_v44  ;;  %5574 = vmatprep.mubr.msk.bf16.mxu1 %vm346_vm0, %v5560_v57  ;;  %v7863_v44 = vcombine.low %v7785_v25, %v5578_v49  ;;  %v6180_v36 = vld [vmem:[%s8199_s1 + $0x708] sm:$0xff]   ;;  %v5581_v40 = vld [vmem:[%s6361_s24 + $0x1b0] sm:$0xff]  ;;  %v6181_v18 = vld [vmem:[%s8199_s1 + $0x758] sm:$0xff]  }
 0x1b3   : > { %v1778_v4 = vpop.f32.mrf.mxu0  ;;  %v1941_v14 = vpop.f32.mrf.mxu1  ;;  %v7885_v48 = vcombine.high %v5580_v34, %v5581_v40  ;;  %v6184_v25 = vld [vmem:[%s8199_s1 + $0x750] sm:$0xff]  }
 0x1b4   : > { %v1789_v12 = vadd.f32 %v1778_v4, %v7652_v0  ;;  %3885 = vmatpush1.bf16.msra.mxu0 %v6155_v38  ;;  %4066 = vmatpush1.bf16.msra.mxu1 %v6156_v30  ;;  %v7872_v38 = vcombine.low %v5578_v49, %v5579_v16 }
 0x1b5   : > { %3886 = vmatprep.subr.bf16.mxu0 %v6261_v1  ;;  %v1780_v51 = vpop.f32.mrf.mxu0  ;;  %4067 = vmatprep.subr.bf16.mxu1 %v6261_v1  ;;  %v1943_v0 = vpop.f32.mrf.mxu1 }
 0x1b6   : > { %v7791_v60 = vadd.f32 %v1941_v14, %v1789_v12  ;;  %v7901_v0 = vcombine.low %v5579_v16, %v5580_v34 }
 0x1b7   : > { %3550 = vmatmul.mubr.bf16.gmra.mxu0 %v5523_v45  ;;  %3713 = vmatmul.mubr.bf16.gmra.mxu1 %v5559_v35  ;;  %v7882_v45 = vcombine.high %v5579_v16, %v5580_v34 }
 0x1b8   : > { %3887 = vmatpush1.bf16.msra.mxu0 %v6160_v41  ;;  %4068 = vmatpush1.bf16.msra.mxu1 %v6161_v52  ;;  %v6183_v41 = vld [vmem:[%s8199_s1 + $0x700] sm:$0xff]  }
 0x1b9   : > { %3888 = vmatprep.subr.bf16.mxu0 %v6261_v1  ;;  %4069 = vmatprep.subr.bf16.mxu1 %v6261_v1 }
 0x1ba   : > { %5625 = vmatprep.mubr.msk.bf16.mxu0 %vm346_vm0, %v5608_v29  ;;  %5667 = vmatprep.mubr.msk.bf16.mxu1 %vm346_vm0, %v5650_v53  ;;  %v5582_v29 = vld [vmem:[%s6361_s24 + $0x1b8] sm:$0xff] }
 0x1bc   : > { %3889 = vmatpush1.bf16.msra.mxu0 %v6163_v27  ;;  %4070 = vmatpush1.bf16.msra.mxu1 %v6164_v24  ;;  %v6188_v24 = vld [vmem:[%s8199_s1 + $0x6f8] sm:$0xff]  }
 0x1bd   : > { %3902 = vmatprep.subr.bf16.mxu0 %v6261_v1  ;;  %4083 = vmatprep.subr.bf16.mxu1 %v6261_v1 }
 0x1bf   : > { %v2132_v62 = vpop.f32.mrf.mxu0  ;;  %v2313_v2 = vpop.f32.mrf.mxu1 }
 0x1c0   : > { %v2163_v33 = vadd.f32 %v2132_v62, %v7685_v31  ;;  %3903 = vmatpush2.bf16.msra.mxu0 %v6165_v56  ;;  %4084 = vmatpush2.bf16.msra.mxu1 %v6166_v37  ;;  %v7910_v56 = vcombine.low %v5580_v34, %v5581_v40  ;;  %v7913_v37 = vld [vmem:[%s6361_s24 + $0x1c0] sm:$0xff] }
 0x1c1   : > { %v2134_v20 = vpop.f32.mrf.mxu0  ;;  %3904 = vmatprep.subr.bf16.mxu0 %v6261_v1  ;;  %v2315_v8 = vpop.f32.mrf.mxu1  ;;  %4085 = vmatprep.subr.bf16.mxu1 %v6261_v1 }
 0x1c2   : > { %v7824_v63 = vadd.f32 %v2313_v2, %v2163_v33  ;;  %v6189_v33 = vld [vmem:[%s8199_s1 + $0x748] sm:$0xff]  }
 0x1c3   : > { %v2135_v31 = vpop.f32.mrf.mxu0  ;;  %v2316_v15 = vpop.f32.mrf.mxu1 }
 0x1c4   : > { %v2164_v21 = vadd.f32 %v2135_v31, %v7696_v59  ;;  %3905 = vmatpush2.bf16.msra.mxu0 %v6167_v11  ;;  %4086 = vmatpush2.bf16.msra.mxu1 %v6168_v42  ;;  %v7922_v11 = vcombine.high %v5581_v40, %v5582_v29  ;;  %v7926_v42 = vcombine.high %v5582_v29, %v7913_v37 }
 0x1c5   : > { %v2137_v19 = vpop.f32.mrf.mxu0  ;;  %4218 = vmatprep.subr.bf16.mxu0 %v6261_v1  ;;  %v2318_v59 = vpop.f32.mrf.mxu1  ;;  %4381 = vmatprep.subr.bf16.mxu1 %v6261_v1 }
 0x1c6   : > { %v7841_v5 = vadd.f32 %v2316_v15, %v2164_v21  ;;  %v6192_v21 = vld [vmem:[%s8199_s1 + $0x740] sm:$0xff]   ;;  %v7951_v59 = vcombine.low %v5582_v29, %v7913_v37 }
 0x1c7   : > { %v2140_v46 = vpop.f32.mrf.mxu0  ;;  %3907 = vmatmul.mubr.bf16.vlgmr.msra.gmra.mxu0 %v5607_v10  ;;  %4088 = vmatmul.mubr.bf16.vlgmr.msra.gmra.mxu1 %v5649_v26  ;;  %v2321_v28 = vpop.f32.mrf.mxu1  ;;  %v6191_v10 = vld [vmem:[%s8199_s1 + $0x6f0] sm:$0xff]  }
 0x1c8   : > { %v2165_v3 = vadd.f32 %v2140_v46, %v7709_v13  ;;  %4219 = vmatpush1.bf16.msra.mxu0 %v6173_v22  ;;  %4382 = vmatpush1.bf16.msra.mxu1 %v6174_v55  ;;  %v7942_v22 = vcombine.low %v5581_v40, %v5582_v29  ;;  %v6196_v55 = vld [vmem:[%s8199_s1 + $0x6e8] sm:$0xff]  }
 0x1c9   : > { %v2142_v7 = vpop.f32.mrf.mxu0  ;;  %4220 = vmatprep.subr.bf16.mxu0 %v6261_v1  ;;  %v2323_v13 = vpop.f32.mrf.mxu1  ;;  %4383 = vmatprep.subr.bf16.mxu1 %v6261_v1 }
 0x1ca   : > { %v7857_v47 = vadd.f32 %v2321_v28, %v2165_v3  ;;  %5626 = vmatprep.mubr.msk.bf16.mxu0 %vm346_vm0, %v7845_v39  ;;  %5668 = vmatprep.mubr.msk.bf16.mxu1 %vm346_vm0, %v7847_v58  ;;  %v6197_v3 = vld [vmem:[%s8199_s1 + $0x738] sm:$0xff]   ;;  %v6200_v7 = vld [vmem:[%s8199_s1 + $0x730] sm:$0xff]  }
 0x1cb   : > { %v2143_v17 = vpop.f32.mrf.mxu0  ;;  %v2324_v6 = vpop.f32.mrf.mxu1  ;;  %v6202_v13 = vld [vmem:[%s8199_s1 + $0x778] sm:$0xff]  }
 0x1cc   : > { %v2166_v57 = vadd.f32 %v2143_v17, %v7724_v23  ;;  %4221 = vmatpush1.bf16.msra.mxu0 %v6175_v54  ;;  %4384 = vmatpush1.bf16.msra.mxu1 %v6176_v32  ;;  %v6199_v54 = vld [vmem:[%s8199_s1 + $0x6e0] sm:$0xff]   ;;  %v6201_v32 = vld [vmem:[%s8199_s1 + $0x728] sm:$0xff]  }
 0x1cd   : > { %v2145_v30 = vpop.f32.mrf.mxu0  ;;  %4222 = vmatprep.subr.bf16.mxu0 %v6261_v1  ;;  %v2326_v23 = vpop.f32.mrf.mxu1  ;;  %4385 = vmatprep.subr.bf16.mxu1 %v6261_v1 }
 0x1ce   : > { %v7879_v4 = vadd.f32 %v2324_v6, %v2166_v57  ;;  %v6204_v6 = vld [vmem:[%s8199_s1 + $0x770] sm:$0xff]   ;;  %v6205_v23 = vld [vmem:[%s8199_s1 + $0x7b8] sm:$0xff]  }
 0x1cf   : > { %v2148_v43 = vpop.f32.mrf.mxu0  ;;  %3915 = vmatmul.mubr.bf16.gmra.mxu0 %v7863_v44  ;;  %v2329_v14 = vpop.f32.mrf.mxu1  ;;  %4096 = vmatmul.mubr.bf16.gmra.mxu1 %v7872_v38 }
 0x1d0   : > { %v2167_v12 = vadd.f32 %v2148_v43, %v7737_v61  ;;  %4223 = vmatpush1.bf16.msra.mxu0 %v6180_v36  ;;  %4386 = vmatpush1.bf16.msra.mxu1 %v6181_v18 }
 0x1d1   : > { %v2150_v35 = vpop.f32.mrf.mxu0  ;;  %4224 = vmatprep.subr.bf16.mxu0 %v6261_v1  ;;  %v2331_v61 = vpop.f32.mrf.mxu1  ;;  %4387 = vmatprep.subr.bf16.mxu1 %v6261_v1 }
 0x1d2   : > { %v7896_v51 = vadd.f32 %v2329_v14, %v2167_v12  ;;  %5627 = vmatprep.mubr.msk.bf16.mxu0 %vm346_vm0, %v7882_v45  ;;  %5669 = vmatprep.mubr.msk.bf16.mxu1 %vm346_vm0, %v7885_v48 }
 0x1d3   : > { %v2151_v52 = vpop.f32.mrf.mxu0  ;;  %v2332_v27 = vpop.f32.mrf.mxu1 }
 0x1d4   : > { %v2168_v53 = vadd.f32 %v2151_v52, %v7754_v9  ;;  %4225 = vmatpush1.bf16.msra.mxu0 %v6183_v41  ;;  %4388 = vmatpush1.bf16.msra.mxu1 %v6184_v25  ;;  %v6206_v25 = vld [vmem:[%s8199_s1 + $0x7b0] sm:$0xff]  }
 0x1d5   : > { %v2153_v62 = vpop.f32.mrf.mxu0  ;;  %4226 = vmatprep.subr.bf16.mxu0 %v6261_v1  ;;  %v2334_v9 = vpop.f32.mrf.mxu1  ;;  %4389 = vmatprep.subr.bf16.mxu1 %v6261_v1 }
 0x1d6   : > { %v7919_v2 = vadd.f32 %v2332_v27, %v2168_v53  ;;  %v6207_v53 = vld [vmem:[%s8199_s1 + $0x7a8] sm:$0xff]   ;;  %v6208_v9 = vld [vmem:[%s8199_s1 + $0x7a0] sm:$0xff]  }
 0x1d7   : > { %v2156_v20 = vpop.f32.mrf.mxu0  ;;  %3923 = vmatmul.mubr.bf16.gmra.mxu0 %v7901_v0  ;;  %v2337_v31 = vpop.f32.mrf.mxu1  ;;  %4104 = vmatmul.mubr.bf16.gmra.mxu1 %v7910_v56 }
 0x1d8   : > { %v2169_v8 = vadd.f32 %v2156_v20, %v7768_v50  ;;  %4227 = vmatpush1.bf16.msra.mxu0 %v6188_v24  ;;  %4390 = vmatpush1.bf16.msra.mxu1 %v6189_v33 }
 0x1d9   : > { %v2158_v49 = vpop.f32.mrf.mxu0  ;;  %4228 = vmatprep.subr.bf16.mxu0 %v6261_v1  ;;  %v2339_v26 = vpop.f32.mrf.mxu1  ;;  %4391 = vmatprep.subr.bf16.mxu1 %v6261_v1 }
 0x1da   : > { %v7937_v15 = vadd.f32 %v2337_v31, %v2169_v8  ;;  %5628 = vmatprep.mubr.msk.bf16.mxu0 %vm346_vm0, %v7922_v11  ;;  %5670 = vmatprep.mubr.msk.bf16.mxu1 %vm346_vm0, %v7926_v42  ;;  %v8043_v26 = vld [vmem:[%s6361_s24 + $0x1d0] sm:$0xff] }
 0x1db   : > { %v2159_v50 = vpop.f32.mrf.mxu0  ;;  %v2340_v19 = vpop.f32.mrf.mxu1 }
 0x1dc   : > { %v2170_v16 = vadd.f32 %v2159_v50, %v7791_v60  ;;  %4229 = vmatpush1.bf16.msra.mxu0 %v6191_v10  ;;  %4392 = vmatpush1.bf16.msra.mxu1 %v6192_v21  ;;  %v6209_v21 = vld [vmem:[%s8199_s1 + $0x798] sm:$0xff]  }
 0x1dd   : > { %4230 = vmatprep.subr.bf16.mxu0 %v6261_v1  ;;  %v2161_v46 = vpop.f32.mrf.mxu0  ;;  %4393 = vmatprep.subr.bf16.mxu1 %v6261_v1  ;;  %v2342_v60 = vpop.f32.mrf.mxu1 }
 0x1de   : > { %v7957_v28 = vadd.f32 %v2340_v19, %v2170_v16  ;;  %v6210_v60 = vld [vmem:[%s8199_s1 + $0x790] sm:$0xff]  }
 0x1df   : > { %3931 = vmatmul.mubr.bf16.gmra.mxu0 %v7942_v22  ;;  %4112 = vmatmul.mubr.bf16.gmra.mxu1 %v7951_v59 }
 0x1e0   : > { %4231 = vmatpush1.bf16.msra.mxu0 %v6196_v55  ;;  %4394 = vmatpush1.bf16.msra.mxu1 %v6197_v3 }
 0x1e1   : > { %4232 = vmatprep.subr.bf16.mxu0 %v6261_v1  ;;  %4395 = vmatprep.subr.bf16.mxu1 %v6261_v1 }
 0x1e2   : > { %5703 = vmatprep.mubr.msk.bf16.mxu0 %vm346_vm0, %v7845_v39  ;;  %5739 = vmatprep.mubr.msk.bf16.mxu1 %vm346_vm0, %v7847_v58  ;;  %v6203_v58 = vld [vmem:[%s8199_s1 + $0x720] sm:$0xff]  }
 0x1e4   : > { %4233 = vmatpush1.bf16.msra.mxu0 %v6199_v54  ;;  %4396 = vmatpush1.bf16.msra.mxu1 %v6200_v7 }
 0x1e5   : > { %4246 = vmatprep.subr.bf16.mxu0 %v6261_v1  ;;  %4409 = vmatprep.subr.bf16.mxu1 %v6261_v1 }
 0x1e7   : > { %v2476_v17 = vpop.f32.mrf.mxu0  ;;  %v2639_v34 = vpop.f32.mrf.mxu1 }
 0x1e8   : > { %v2507_v39 = vadd.f32 %v2476_v17, %v7824_v63  ;;  %4247 = vmatpush2.bf16.msra.mxu0 %v6201_v32  ;;  %4410 = vmatpush2.bf16.msra.mxu1 %v6202_v13 }
 0x1e9   : > { %v2478_v57 = vpop.f32.mrf.mxu0  ;;  %4248 = vmatprep.subr.bf16.mxu0 %v6261_v1  ;;  %v2641_v40 = vpop.f32.mrf.mxu1  ;;  %4411 = vmatprep.subr.bf16.mxu1 %v6261_v1 }
 0x1ea   : > { %v7990_v36 = vadd.f32 %v2639_v34, %v2507_v39  ;;  %v6214_v39 = vld [vmem:[%s8199_s1 + $0x788] sm:$0xff]  }
 0x1eb   : > { %v2479_v63 = vpop.f32.mrf.mxu0  ;;  %v2642_v18 = vpop.f32.mrf.mxu1 }
 0x1ec   : > { %v2508_v30 = vadd.f32 %v2479_v63, %v7841_v5  ;;  %4249 = vmatpush2.bf16.msra.mxu0 %v6203_v58  ;;  %4412 = vmatpush2.bf16.msra.mxu1 %v6204_v6  ;;  %v6217_v6 = vld [vmem:[%s8199_s1 + $0x7c8] sm:$0xff]  }
 0x1ed   : > { %v2481_v43 = vpop.f32.mrf.mxu0  ;;  %4544 = vmatprep.subr.bf16.mxu0 %v6261_v1  ;;  %v2644_v14 = vpop.f32.mrf.mxu1  ;;  %5799 = vmatprep.subr.bf16.mxu1 %v6261_v1 }
 0x1ee   : > { %v7998_v12 = vadd.f32 %v2642_v18, %v2508_v30  ;;  %v5586_v14 = vld [vmem:[%s6361_s24 + $0x1d8] sm:$0xff] }
 0x1ef   : > { %v2484_v41 = vpop.f32.mrf.mxu0  ;;  %4251 = vmatmul.mubr.bf16.vlgmr.msra.gmra.mxu0 %v7863_v44  ;;  %4414 = vmatmul.mubr.bf16.vlgmr.msra.gmra.mxu1 %v7872_v38  ;;  %v2647_v35 = vpop.f32.mrf.mxu1 }
 0x1f0   : > { %v2509_v5 = vadd.f32 %v2484_v41, %v7857_v47  ;;  %4545 = vmatpush1.bf16.msra.mxu0 %v6205_v23  ;;  %5809 = vmatpush1.bf16.msra.mxu1 %v6205_v23 }
 0x1f1   : > { %v2486_v61 = vpop.f32.mrf.mxu0  ;;  %4546 = vmatprep.subr.bf16.mxu0 %v6261_v1  ;;  %v2649_v29 = vpop.f32.mrf.mxu1  ;;  %5800 = vmatprep.subr.bf16.mxu1 %v6261_v1 }
 0x1f2   : > { %v8008_v52 = vadd.f32 %v2647_v35, %v2509_v5  ;;  %5704 = vmatprep.mubr.msk.bf16.mxu0 %vm346_vm0, %v7882_v45  ;;  %5740 = vmatprep.mubr.msk.bf16.mxu1 %vm346_vm0, %v7885_v48 }
 0x1f3   : > { %v2487_v47 = vpop.f32.mrf.mxu0  ;;  %v2650_v38 = vpop.f32.mrf.mxu1 }
 0x1f4   : > { %v2510_v44 = vadd.f32 %v2487_v47, %v7879_v4  ;;  %4547 = vmatpush1.bf16.msra.mxu0 %v6206_v25  ;;  %5810 = vmatpush1.bf16.msra.mxu1 %v6206_v25  ;;  %v5764_v25 = vcombine.high %v8043_v26, %v5586_v14 }
 0x1f5   : > { %v2489_v27 = vpop.f32.mrf.mxu0  ;;  %4548 = vmatprep.subr.bf16.mxu0 %v6261_v1  ;;  %v2652_v62 = vpop.f32.mrf.mxu1  ;;  %5801 = vmatprep.subr.bf16.mxu1 %v6261_v1 }
 0x1f6   : > { %v8020_v24 = vadd.f32 %v2650_v38, %v2510_v44 }
 0x1f7   : > { %v2492_v33 = vpop.f32.mrf.mxu0  ;;  %4259 = vmatmul.mubr.bf16.gmra.mxu0 %v7901_v0  ;;  %v2655_v48 = vpop.f32.mrf.mxu1  ;;  %4422 = vmatmul.mubr.bf16.gmra.mxu1 %v7910_v56  ;;  %v5584_v56 = vld [vmem:[%s6361_s24 + $0x1c8] sm:$0xff]  ;;  %s4787_s24 = sshll.u32 %s8215_s12, 3 }
 0x1f8   : > { %v2511_v4 = vadd.f32 %v2492_v33, %v7896_v51  ;;  %4549 = vmatpush1.bf16.msra.mxu0 %v6207_v53  ;;  %5811 = vmatpush1.bf16.msra.mxu1 %v6207_v53  ;;  %v5728_v55 = vcombine.high %v5584_v56, %v8043_v26  ;;  %v5691_v13 = vcombine.low %v7913_v37, %v5584_v56  ;;  %s190_s4 = sadd.s32 %s4788_s30, %s4787_s24 }
 0x1f9   : > { %v2494_v20 = vpop.f32.mrf.mxu0  ;;  %4550 = vmatprep.subr.bf16.mxu0 %v6261_v1  ;;  %v2657_v31 = vpop.f32.mrf.mxu1  ;;  %5802 = vmatprep.subr.bf16.mxu1 %v6261_v1  ;;  %v5727_v34 = vcombine.low %v5584_v56, %v8043_v26  ;;  %s4789_s12 = sshll.u32 %s190_s4, 2 }
 0x1fa   : > { %v8030_v8 = vadd.f32 %v2655_v48, %v2511_v4  ;;  %5705 = vmatprep.mubr.msk.bf16.mxu0 %vm346_vm0, %v7922_v11  ;;  %5741 = vmatprep.mubr.msk.bf16.mxu1 %vm346_vm0, %v7926_v42  ;;  %v5692_v42 = vcombine.high %v7913_v37, %v5584_v56  ;;  %v5763_v4 = vcombine.low %v8043_v26, %v5586_v14  ;;  %s8154_s8 = scalar_lea.vmem %s8201_s3, %s4789_s12 }
 0x1fb   : > { %v2495_v51 = vpop.f32.mrf.mxu0  ;;  %v2658_v49 = vpop.f32.mrf.mxu1 }
 0x1fc   : > { %v2512_v10 = vadd.f32 %v2495_v51, %v7919_v2  ;;  %4551 = vmatpush1.bf16.msra.mxu0 %v6208_v9  ;;  %5812 = vmatpush1.bf16.msra.mxu1 %v6208_v9 }
 0x1fd   : > { %v2497_v50 = vpop.f32.mrf.mxu0  ;;  %4552 = vmatprep.subr.bf16.mxu0 %v6261_v1  ;;  %v2660_v19 = vpop.f32.mrf.mxu1  ;;  %5803 = vmatprep.subr.bf16.mxu1 %v6261_v1 }
 0x1fe   : > { %v8046_v16 = vadd.f32 %v2658_v49, %v2512_v10 }
 0x1ff   : > { %v2500_v2 = vpop.f32.mrf.mxu0  ;;  %4267 = vmatmul.mubr.bf16.gmra.mxu0 %v7942_v22  ;;  %v2663_v3 = vpop.f32.mrf.mxu1  ;;  %4430 = vmatmul.mubr.bf16.gmra.mxu1 %v7951_v59 }
 0x200   : > { %v2513_v46 = vadd.f32 %v2500_v2, %v7937_v15  ;;  %4553 = vmatpush1.bf16.msra.mxu0 %v6209_v21  ;;  %5813 = vmatpush1.bf16.msra.mxu1 %v6209_v21 }
 0x201   : > { %v2502_v54 = vpop.f32.mrf.mxu0  ;;  %4554 = vmatprep.subr.bf16.mxu0 %v6261_v1  ;;  %v2665_v32 = vpop.f32.mrf.mxu1  ;;  %5804 = vmatprep.subr.bf16.mxu1 %v6261_v1 }
 0x202   : > { %v8058_v7 = vadd.f32 %v2663_v3, %v2513_v46  ;;  %5706 = vmatprep.mubr.msk.bf16.mxu0 %vm346_vm0, %v5692_v42  ;;  %5742 = vmatprep.mubr.msk.bf16.mxu1 %vm346_vm0, %v5728_v55 }
 0x203   : > { %v2503_v15 = vpop.f32.mrf.mxu0  ;;  %v2666_v17 = vpop.f32.mrf.mxu1 }
 0x204   : > { %v2514_v59 = vadd.f32 %v2503_v15, %v7957_v28  ;;  %4555 = vmatpush1.bf16.msra.mxu0 %v6210_v60  ;;  %5814 = vmatpush1.bf16.msra.mxu1 %v6210_v60  ;;  %v6216_v28 = vld [vmem:[%s8199_s1 + $0x780] sm:$0xff]  }
 0x205   : > { %4556 = vmatprep.subr.bf16.mxu0 %v6261_v1  ;;  %v2505_v58 = vpop.f32.mrf.mxu0  ;;  %5805 = vmatprep.subr.bf16.mxu1 %v6261_v1  ;;  %v2668_v37 = vpop.f32.mrf.mxu1 }
 0x206   : > { %v8070_v57 = vadd.f32 %v2666_v17, %v2514_v59 }
 0x207   : > { %4275 = vmatmul.mubr.bf16.gmra.mxu0 %v5691_v13  ;;  %4438 = vmatmul.mubr.bf16.gmra.mxu1 %v5727_v34 }
 0x208   : > { %4557 = vmatpush1.bf16.msra.mxu0 %v6214_v39  ;;  %5815 = vmatpush1.bf16.msra.mxu1 %v6214_v39 }
 0x209   : > { %4558 = vmatprep.subr.bf16.mxu0 %v6261_v1  ;;  %5806 = vmatprep.subr.bf16.mxu1 %v6261_v1 }
 0x20a   : > { %5775 = vmatprep.mubr.msk.bf16.mxu0 %vm346_vm0, %v7882_v45  ;;  %5777 = vmatprep.mubr.msk.bf16.mxu1 %vm346_vm0, %v5692_v42  ;;  %v6218_v45 = vld [vmem:[%s8199_s1 + $0x7c0] sm:$0xff]  }
 0x20c   : > { %4559 = vmatpush1.bf16.msra.mxu0 %v6216_v28  ;;  %5816 = vmatpush1.bf16.msra.mxu1 %v6216_v28 }
 0x20d   : > { %4572 = vmatprep.subr.bf16.mxu0 %v6261_v1  ;;  %5807 = vmatprep.subr.bf16.mxu1 %v6261_v1 }
 0x20f   : > { %v2802_v40 = vpop.f32.mrf.mxu0  ;;  %v3020_v30 = vpop.f32.mrf.mxu1 }
 0x210   : > { %v2833_v63 = vadd.f32 %v2802_v40, %v7990_v36  ;;  %4573 = vmatpush2.bf16.msra.mxu0 %v6217_v6  ;;  %5817 = vmatpush2.bf16.msra.mxu1 %v6217_v6 }
 0x211   : > { %v2804_v18 = vpop.f32.mrf.mxu0  ;;  %4574 = vmatprep.subr.bf16.mxu0 %v6261_v1  ;;  %v3022_v43 = vpop.f32.mrf.mxu1  ;;  %5808 = vmatprep.subr.bf16.mxu1 %v6261_v1 }
 0x212   : > { %v3051_v23 = vadd.f32 %v3020_v30, %v2833_v63 }
 0x213   : > { %v2805_v41 = vpop.f32.mrf.mxu0  ;;  %v3023_v35 = vpop.f32.mrf.mxu1 }
 0x214   : > { %v2834_v5 = vadd.f32 %v2805_v41, %v7998_v12  ;;  %4575 = vmatpush2.bf16.msra.mxu0 %v6218_v45  ;;  %5818 = vmatpush2.bf16.msra.mxu1 %v6218_v45 }
 0x215   : > { %v2807_v36 = vpop.f32.mrf.mxu0  ;;  %v3025_v29 = vpop.f32.mrf.mxu1 }
 0x216   : > { %v3052_v61 = vadd.f32 %v3023_v35, %v2834_v5 }
 0x217   : > { %v2810_v47 = vpop.f32.mrf.mxu0  ;;  %4577 = vmatmul.mubr.bf16.vlgmr.msra.gmra.mxu0 %v7901_v0  ;;  %4593 = vmatmul.mubr.bf16.vlgmr.msra.gmra.mxu1 %v5691_v13  ;;  %v3028_v38 = vpop.f32.mrf.mxu1 }
 0x218   : > { %v2835_v44 = vadd.f32 %v2810_v47, %v8008_v52  ;;  %5776 = vmatprep.mubr.msk.bf16.mxu0 %vm346_vm0, %v7922_v11  ;;  %5778 = vmatprep.mubr.msk.bf16.mxu1 %vm346_vm0, %v5764_v25 }
 0x219   : > { %v2812_v1 = vpop.f32.mrf.mxu0  ;;  %v3030_v53 = vpop.f32.mrf.mxu1 }
 0x21a   : > { %v3053_v12 = vadd.f32 %v3028_v38, %v2835_v44 }
 0x21b   : > { %v2813_v27 = vpop.f32.mrf.mxu0  ;;  %v3031_v33 = vpop.f32.mrf.mxu1 }
 0x21c   : > { %v2836_v62 = vadd.f32 %v2813_v27, %v8020_v24 }
 0x21d   : > { %v2815_v48 = vpop.f32.mrf.mxu0  ;;  %v3033_v9 = vpop.f32.mrf.mxu1 }
 0x21e   : > { %v3054_v0 = vadd.f32 %v3031_v33, %v2836_v62 }
 0x21f   : > { %v2818_v52 = vpop.f32.mrf.mxu0  ;;  %4585 = vmatmul.mubr.bf16.gmra.mxu0 %v7942_v22  ;;  %4601 = vmatmul.mubr.bf16.gmra.mxu1 %v5763_v4  ;;  %v3036_v11 = vpop.f32.mrf.mxu1 }
 0x220   : > { %v2837_v20 = vadd.f32 %v2818_v52, %v8030_v8 }
 0x221   : > { %v2820_v31 = vpop.f32.mrf.mxu0  ;;  %v3038_v56 = vpop.f32.mrf.mxu1 }
 0x222   : > { %v3055_v51 = vadd.f32 %v3036_v11, %v2837_v20 }
 0x223   : > { %v2821_v10 = vpop.f32.mrf.mxu0  ;;  %v3039_v24 = vpop.f32.mrf.mxu1 }
 0x224   : > { %v2838_v49 = vadd.f32 %v2821_v10, %v8046_v16 }
 0x225   : > { %v2823_v21 = vpop.f32.mrf.mxu0  ;;  %v3041_v26 = vpop.f32.mrf.mxu1 }
 0x226   : > { %v3056_v50 = vadd.f32 %v3039_v24, %v2838_v49 }
 0x227   : > { %v2826_v19 = vpop.f32.mrf.mxu0  ;;  %v3044_v2 = vpop.f32.mrf.mxu1 }
 0x228   : > { %v2839_v42 = vadd.f32 %v2826_v19, %v8058_v7 }
 0x229   : > { %v2828_v55 = vpop.f32.mrf.mxu0  ;;  %v3046_v46 = vpop.f32.mrf.mxu1 }
 0x22a   : > { %v3057_v22 = vadd.f32 %v3044_v2, %v2839_v42 }
 0x22b   : > { %v2829_v8 = vpop.f32.mrf.mxu0  ;;  %v3047_v60 = vpop.f32.mrf.mxu1 }
 0x22c   : > { %v2840_v3 = vadd.f32 %v2829_v8, %v8070_v57 }
 0x22d   : > { %v2831_v54 = vpop.f32.mrf.mxu0  ;;  %v3049_v15 = vpop.f32.mrf.mxu1 }
 0x22e   : > { %v3058_v32 = vadd.f32 %v3047_v60, %v2840_v3 }
 0x237   : > { %v3201_v13 = vpop.f32.mrf.mxu0  ;;  %v3364_v59 = vpop.f32.mrf.mxu1 }
 0x238   : > { %v3232_v16 = vadd.f32 %v3201_v13, %v3051_v23 }
 0x239   : > { %v3203_v17 = vpop.f32.mrf.mxu0  ;;  %v3366_v34 = vpop.f32.mrf.mxu1 }
 0x23a   : > { %v3395_v39 = vadd.f32 %v3364_v59, %v3232_v16 }
 0x23b   : > { %v3204_v58 = vpop.f32.mrf.mxu0  ;;  %v3367_v7 = vpop.f32.mrf.mxu1 }
 0x23c   : > { %v3233_v37 = vadd.f32 %v3204_v58, %v3052_v61 }
 0x23d   : > { %v3206_v28 = vpop.f32.mrf.mxu0  ;;  %v3369_v40 = vpop.f32.mrf.mxu1 }
 0x23e   : > { %v3396_v6 = vadd.f32 %v3367_v7, %v3233_v37 }
 0x23f   : > { %v3209_v63 = vpop.f32.mrf.mxu0  ;;  %v3372_v45 = vpop.f32.mrf.mxu1 }
 0x240   : > { %v3234_v30 = vadd.f32 %v3209_v63, %v3053_v12 }
 0x241   : > { %v3211_v57 = vpop.f32.mrf.mxu0  ;;  %v3374_v43 = vpop.f32.mrf.mxu1 }
 0x242   : > { %v3397_v18 = vadd.f32 %v3372_v45, %v3234_v30 }
 0x243   : > { %v3212_v14 = vpop.f32.mrf.mxu0  ;;  %v3375_v5 = vpop.f32.mrf.mxu1 }
 0x244   : > { %v3235_v41 = vadd.f32 %v3212_v14, %v3054_v0 }
 0x245   : > { %v3214_v23 = vpop.f32.mrf.mxu0  ;;  %v3377_v36 = vpop.f32.mrf.mxu1 }
 0x246   : > { %v3398_v35 = vadd.f32 %v3375_v5, %v3235_v41 }
 0x247   : > { %v3217_v25 = vpop.f32.mrf.mxu0  ;;  %v3380_v47 = vpop.f32.mrf.mxu1 }
 0x248   : > { %v3236_v29 = vadd.f32 %v3217_v25, %v3055_v51 }
 0x249   : > { %v3219_v61 = vpop.f32.mrf.mxu0  ;;  %v3382_v38 = vpop.f32.mrf.mxu1 }
 0x24a   : > { %v3399_v44 = vadd.f32 %v3380_v47, %v3236_v29 }
 0x24b   : > { %v3220_v1 = vpop.f32.mrf.mxu0  ;;  %v3383_v27 = vpop.f32.mrf.mxu1 }
 0x24c   : > { %v3237_v53 = vadd.f32 %v3220_v1, %v3056_v50 }
 0x24d   : > { %v3222_v12 = vpop.f32.mrf.mxu0  ;;  %v3385_v33 = vpop.f32.mrf.mxu1 }
 0x24e   : > { %v3400_v62 = vadd.f32 %v3383_v27, %v3237_v53 }
 0x24f   : > { %v3225_v4 = vpop.f32.mrf.mxu0  ;;  %v3388_v9 = vpop.f32.mrf.mxu1 }
 0x250   : > { %v3238_v48 = vadd.f32 %v3225_v4, %v3057_v22 }
 0x251   : > { %v3227_v0 = vpop.f32.mrf.mxu0  ;;  %v3390_v20 = vpop.f32.mrf.mxu1 }
 0x252   : > { %v3401_v52 = vadd.f32 %v3388_v9, %v3238_v48 }
 0x253   : > { %v3228_v11 = vpop.f32.mrf.mxu0  ;;  %v3391_v56 = vpop.f32.mrf.mxu1 }
 0x254   : > { %v3239_v31 = vadd.f32 %v3228_v11, %v3058_v32 }
 0x255   : > { %v3230_v51 = vpop.f32.mrf.mxu0  ;;  %v3393_v49 = vpop.f32.mrf.mxu1 }
 0x256   : > { %v3402_v10 = vadd.f32 %v3391_v56, %v3239_v31 }
 0x25f   : > { %v3527_v24 = vpop.f32.mrf.mxu0  ;;  %v3690_v26 = vpop.f32.mrf.mxu1 }
 0x260   : > { %v3558_v21 = vadd.f32 %v3527_v24, %v3395_v39 }
 0x261   : > { %v3529_v50 = vpop.f32.mrf.mxu0  ;;  %v3692_v42 = vpop.f32.mrf.mxu1 }
 0x262   : > { %v3721_v19 = vadd.f32 %v3690_v26, %v3558_v21 }
 0x263   : > { %v3530_v2 = vpop.f32.mrf.mxu0  ;;  %v3693_v46 = vpop.f32.mrf.mxu1 }
 0x264   : > { %v3559_v55 = vadd.f32 %v3530_v2, %v3396_v6 }
 0x265   : > { %v3532_v22 = vpop.f32.mrf.mxu0  ;;  %v3695_v3 = vpop.f32.mrf.mxu1 }
 0x266   : > { %v3722_v8 = vadd.f32 %v3693_v46, %v3559_v55 }
 0x267   : > { %v3535_v60 = vpop.f32.mrf.mxu0  ;;  %v3698_v15 = vpop.f32.mrf.mxu1 }
 0x268   : > { %v3560_v54 = vadd.f32 %v3535_v60, %v3397_v18 }
 0x269   : > { %v3537_v32 = vpop.f32.mrf.mxu0  ;;  %v3700_v16 = vpop.f32.mrf.mxu1 }
 0x26a   : > { %v3723_v13 = vadd.f32 %v3698_v15, %v3560_v54 }
 0x26b   : > { %v3538_v59 = vpop.f32.mrf.mxu0  ;;  %v3701_v34 = vpop.f32.mrf.mxu1 }
 0x26c   : > { %v3561_v17 = vadd.f32 %v3538_v59, %v3398_v35 }
 0x26d   : > { %v3540_v39 = vpop.f32.mrf.mxu0  ;;  %v3703_v37 = vpop.f32.mrf.mxu1 }
 0x26e   : > { %v3724_v58 = vadd.f32 %v3701_v34, %v3561_v17 }
 0x26f   : > { %v3543_v7 = vpop.f32.mrf.mxu0  ;;  %v3706_v40 = vpop.f32.mrf.mxu1 }
 0x270   : > { %v3562_v28 = vadd.f32 %v3543_v7, %v3399_v44 }
 0x271   : > { %v3545_v6 = vpop.f32.mrf.mxu0  ;;  %v3708_v30 = vpop.f32.mrf.mxu1 }
 0x272   : > { %v8107_v63 = vadd.f32 %v3706_v40, %v3562_v28 }
 0x273   : > { %v3546_v45 = vpop.f32.mrf.mxu0  ;;  %v3709_v18 = vpop.f32.mrf.mxu1 }
 0x274   : > { %v3563_v57 = vadd.f32 %v3546_v45, %v3400_v62 }
 0x275   : > { %v3548_v43 = vpop.f32.mrf.mxu0  ;;  %v3711_v41 = vpop.f32.mrf.mxu1 }
 0x276   : > { %v8109_v14 = vadd.f32 %v3709_v18, %v3563_v57 }
 0x277   : > { %v3551_v5 = vpop.f32.mrf.mxu0  ;;  %v3714_v35 = vpop.f32.mrf.mxu1 }
 0x278   : > { %v3564_v23 = vadd.f32 %v3551_v5, %v3401_v52 }
 0x279   : > { %v3553_v36 = vpop.f32.mrf.mxu0  ;;  %v3716_v29 = vpop.f32.mrf.mxu1 }
 0x27a   : > { %v8111_v25 = vadd.f32 %v3714_v35, %v3564_v23 }
 0x27b   : > { %v3554_v47 = vpop.f32.mrf.mxu0  ;;  %v3717_v44 = vpop.f32.mrf.mxu1 }
 0x27c   : > { %v3565_v61 = vadd.f32 %v3554_v47, %v3402_v10 }
 0x27d   : > { %v3556_v38 = vpop.f32.mrf.mxu0  ;;  %v3719_v53 = vpop.f32.mrf.mxu1 }
 0x27e   : > { %v8113_v1 = vadd.f32 %v3717_v44, %v3565_v61 }
 0x287   : > { %v3908_v27 = vpop.f32.mrf.mxu0  ;;  %v4089_v62 = vpop.f32.mrf.mxu1 }
 0x288   : > { %v3939_v12 = vadd.f32 %v3908_v27, %v3721_v19 }
 0x289   : > { %v3910_v33 = vpop.f32.mrf.mxu0  ;;  %v4091_v48 = vpop.f32.mrf.mxu1 }
 0x28a   : > { %v8115_v4 = vadd.f32 %v4089_v62, %v3939_v12 }
 0x28b   : > { %v3911_v9 = vpop.f32.mrf.mxu0  ;;  %v4092_v52 = vpop.f32.mrf.mxu1 }
 0x28c   : > { %v3940_v0 = vadd.f32 %v3911_v9, %v3722_v8 }
 0x28d   : > { %v3913_v20 = vpop.f32.mrf.mxu0  ;;  %v4094_v31 = vpop.f32.mrf.mxu1 }
 0x28e   : > { %v8117_v11 = vadd.f32 %v4092_v52, %v3940_v0 }
 0x28f   : > { %v3916_v56 = vpop.f32.mrf.mxu0  ;;  %v4097_v10 = vpop.f32.mrf.mxu1 }
 0x290   : > { %v3941_v51 = vadd.f32 %v3916_v56, %v3723_v13 }
 0x291   : > { %v3918_v49 = vpop.f32.mrf.mxu0  ;;  %v4099_v21 = vpop.f32.mrf.mxu1 }
 0x292   : > { %v8119_v24 = vadd.f32 %v4097_v10, %v3941_v51 }
 0x293   : > { %v3919_v26 = vpop.f32.mrf.mxu0  ;;  %v4100_v19 = vpop.f32.mrf.mxu1 }
 0x294   : > { %v3942_v50 = vadd.f32 %v3919_v26, %v3724_v58 }
 0x295   : > { %v3921_v42 = vpop.f32.mrf.mxu0  ;;  %v4102_v55 = vpop.f32.mrf.mxu1 }
 0x296   : > { %v8121_v2 = vadd.f32 %v4100_v19, %v3942_v50 }
 0x297   : > { %v3924_v46 = vpop.f32.mrf.mxu0  ;;  %v4105_v22 = vpop.f32.mrf.mxu1 }
 0x298   : > { %v3943_v56 = vadd.f32 %v3924_v46, %v8107_v63  ;;  %v8144_v46 = vld [vmem:[%s8200_s2] ss:$0 sm:$0xff] }
 0x299   : > { %v3926_v8 = vpop.f32.mrf.mxu0  ;;  %v4107_v3 = vpop.f32.mrf.mxu1 }
 0x29a   : > { %v4124_v49 = vadd.f32 %v4105_v22, %v3943_v56 }
 0x29b   : > { %v3927_v60 = vpop.f32.mrf.mxu0  ;;  %v4108_v54 = vpop.f32.mrf.mxu1 }
 0x29c   : > { %v3944_v21 = vadd.f32 %v3927_v60, %v8109_v14 }
 0x29d   : > { %v3929_v15 = vpop.f32.mrf.mxu0  ;;  %v4110_v32 = vpop.f32.mrf.mxu1 }
 0x29e   : > { %v4125_v19 = vadd.f32 %v4108_v54, %v3944_v21 }
 0x29f   : > { %v3932_v13 = vpop.f32.mrf.mxu0  ;;  %v4113_v16 = vpop.f32.mrf.mxu1 }
 0x2a0   : > { %v3945_v42 = vadd.f32 %v3932_v13, %v8111_v25 }
 0x2a1   : > { %v3934_v59 = vpop.f32.mrf.mxu0  ;;  %v4115_v17 = vpop.f32.mrf.mxu1 }
 0x2a2   : > { %v4126_v22 = vadd.f32 %v4113_v16, %v3945_v42 }
 0x2a3   : > { %v3935_v34 = vpop.f32.mrf.mxu0  ;;  %v8123_v39 = vpop.f32.mrf.mxu1 }
 0x2a4   : > { %v3946_v60 = vadd.f32 %v3935_v34, %v8113_v1 }
 0x2a5   : > { %v3937_v58 = vpop.f32.mrf.mxu0  ;;  %v4118_v37 = vpop.f32.mrf.mxu1 }
 0x2a6   : > { %v4127_v16 = vadd.f32 %v8123_v39, %v3946_v60 }
 0x2af   : > { %v4252_v7 = vpop.f32.mrf.mxu0  ;;  %v4415_v28 = vpop.f32.mrf.mxu1 }
 0x2b0   : > { %v4283_v26 = vadd.f32 %v4252_v7, %v8115_v4 }
 0x2b1   : > { %v4254_v40 = vpop.f32.mrf.mxu0  ;;  %v4417_v6 = vpop.f32.mrf.mxu1 }
 0x2b2   : > { %v4446_v55 = vadd.f32 %v4415_v28, %v4283_v26 }
 0x2b3   : > { %v4255_v30 = vpop.f32.mrf.mxu0  ;;  %v4418_v45 = vpop.f32.mrf.mxu1 }
 0x2b4   : > { %v4284_v8 = vadd.f32 %v4255_v30, %v8117_v11 }
 0x2b5   : > { %v4257_v57 = vpop.f32.mrf.mxu0  ;;  %v4420_v18 = vpop.f32.mrf.mxu1 }
 0x2b6   : > { %v4447_v25 = vadd.f32 %v4418_v45, %v4284_v8 }
 0x2b7   : > { %v4260_v43 = vpop.f32.mrf.mxu0  ;;  %v8125_v41 = vpop.f32.mrf.mxu1 }
 0x2b8   : > { %v4285_v13 = vadd.f32 %v4260_v43, %v8119_v24 }
 0x2b9   : > { %v4262_v5 = vpop.f32.mrf.mxu0  ;;  %v4425_v23 = vpop.f32.mrf.mxu1 }
 0x2ba   : > { %v4448_v30 = vadd.f32 %v8125_v41, %v4285_v13 }
 0x2bb   : > { %v8127_v35 = vpop.f32.mrf.mxu0  ;;  %v8129_v36 = vpop.f32.mrf.mxu1 }
 0x2bc   : > { %v4286_v45 = vadd.f32 %v8127_v35, %v8121_v2 }
 0x2bd   : > { %v4265_v29 = vpop.f32.mrf.mxu0  ;;  %v4428_v47 = vpop.f32.mrf.mxu1 }
 0x2bf   : > { %v4268_v61 = vpop.f32.mrf.mxu0  ;;  %v4431_v44 = vpop.f32.mrf.mxu1 }
 0x2c0   : > { %v4287_v50 = vadd.f32 %v4268_v61, %v4124_v49 }
 0x2c1   : > { %v4270_v38 = vpop.f32.mrf.mxu0  ;;  %v4433_v53 = vpop.f32.mrf.mxu1 }
 0x2c2   : > { %v4450_v3 = vadd.f32 %v4431_v44, %v4287_v50  ;;  %v4449_v53 = vadd.f32 %v8129_v36, %v4286_v45 }
 0x2c3   : > { %v4271_v27 = vpop.f32.mrf.mxu0  ;;  %v4434_v12 = vpop.f32.mrf.mxu1 }
 0x2c4   : > { %v4288_v15 = vadd.f32 %v4271_v27, %v4125_v19 }
 0x2c5   : > { %v4273_v62 = vpop.f32.mrf.mxu0  ;;  %v4436_v33 = vpop.f32.mrf.mxu1 }
 0x2c6   : > { %v4451_v17 = vadd.f32 %v4434_v12, %v4288_v15 }
 0x2c7   : > { %v4276_v48 = vpop.f32.mrf.mxu0  ;;  %v4439_v9 = vpop.f32.mrf.mxu1 }
 0x2c8   : > { %v4289_v58 = vadd.f32 %v4276_v48, %v4126_v22 }
 0x2c9   : > { %v4278_v0 = vpop.f32.mrf.mxu0  ;;  %v4441_v52 = vpop.f32.mrf.mxu1 }
 0x2ca   : > { %v4452_v43 = vadd.f32 %v4439_v9, %v4289_v58 }
 0x2cb   : > { %v4279_v20 = vpop.f32.mrf.mxu0  ;;  %v8131_v31 = vpop.f32.mrf.mxu1 }
 0x2cc   : > { %v4290_v5 = vadd.f32 %v4279_v20, %v4127_v16 }
 0x2cd   : > { %v4281_v51 = vpop.f32.mrf.mxu0  ;;  %v4444_v10 = vpop.f32.mrf.mxu1 }
 0x2ce   : > { %v4453_v33 = vadd.f32 %v8131_v31, %v4290_v5 }
 0x2d7   : > { %v4578_v63 = vpop.f32.mrf.mxu0  ;;  %v4594_v4 = vpop.f32.mrf.mxu1 }
 0x2d8   : > { %v4609_v14 = vadd.f32 %v4578_v63, %v4446_v55  ;;  %v4613_v54 = vadd.f32 %v4594_v4, %v4450_v3 }
 0x2d9   : > { %v4580_v32 = vpop.f32.mrf.mxu0  ;;  %v4596_v59 = vpop.f32.mrf.mxu1 }
 0x2da   : > { %v4624_v11 = vadd.f32 %v8144_v46, %v4609_v14  ;;  %v4628_v37 = vadd.f32 %v8144_v46, %v4613_v54 }
 0x2db   : > { %v4581_v7 = vpop.f32.mrf.mxu0  ;;  %v4597_v6 = vpop.f32.mrf.mxu1 }
 0x2dc   : > { %v4632_v28 = vmax.f32 %v4624_v11, 0.0  ;;  %v4610_v40 = vadd.f32 %v4581_v7, %v4447_v25  ;;  %v4636_v1 = vmax.f32 %v4628_v37, 0.0  ;;  %v4614_v24 = vadd.f32 %v4597_v6, %v4451_v17 }
 0x2dd   : > { %v4583_v34 = vpop.f32.mrf.mxu0  ;;  %v4599_v39 = vpop.f32.mrf.mxu1 }
 0x2de   : > { %v5791_v57 = vpack.c.bf16 %v4632_v28, %v4632_v28  ;;  %v4625_v18 = vadd.f32 %v8144_v46, %v4610_v40  ;;  %v5795_v23 = vpack.c.bf16 %v4636_v1, %v4636_v1  ;;  %v4629_v29 = vadd.f32 %v8144_v46, %v4614_v24 }
 0x2df   : > { %v4586_v47 = vpop.f32.mrf.mxu0  ;;  %v4602_v38 = vpop.f32.mrf.mxu1 }
 0x2e0   : > { %4673 = vst.msk [vmem:[%s8154_s8] sm:$0xf] %vm4672_vm1, %v5791_v57  ;;  %v4633_v61 = vmax.f32 %v4625_v18, 0.0  ;;  %v4611_v44 = vadd.f32 %v4586_v47, %v4448_v30  ;;  %4677 = vst.msk [vmem:[%s8154_s8 + $0x10] sm:$0xf] %vm4672_vm1, %v5795_v23  ;;  %v4637_v2 = vmax.f32 %v4629_v29, 0.0  ;;  %v4615_v41 = vadd.f32 %v4602_v38, %v4452_v43 }
 0x2e1   : > { %v4588_v35 = vpop.f32.mrf.mxu0  ;;  %v4604_v62 = vpop.f32.mrf.mxu1 }
 0x2e2   : > { %v5792_v27 = vpack.c.bf16 %v4633_v61, %v4633_v61  ;;  %v4626_v12 = vadd.f32 %v8144_v46, %v4611_v44  ;;  %v5796_v48 = vpack.c.bf16 %v4637_v2, %v4637_v2  ;;  %v4630_v9 = vadd.f32 %v8144_v46, %v4615_v41 }
 0x2e3   : > { %v4589_v0 = vpop.f32.mrf.mxu0  ;;  %v4605_v56 = vpop.f32.mrf.mxu1 }
 0x2e4   : > { %4674 = vst.msk [vmem:[%s8154_s8 + $0x4] sm:$0xf] %vm4672_vm1, %v5792_v27  ;;  %v4634_v52 = vmax.f32 %v4626_v12, 0.0  ;;  %v4612_v20 = vadd.f32 %v4589_v0, %v4449_v53  ;;  %4678 = vst.msk [vmem:[%s8154_s8 + $0x14] sm:$0xf] %vm4672_vm1, %v5796_v48  ;;  %v4638_v36 = vmax.f32 %v4630_v9, 0.0  ;;  %v4616_v51 = vadd.f32 %v4605_v56, %v4453_v33 }
 0x2e5   : > { %v4591_v10 = vpop.f32.mrf.mxu0  ;;  %v4607_v21 = vpop.f32.mrf.mxu1 }
 0x2e6   : > { %v5793_v49 = vpack.c.bf16 %v4634_v52, %v4634_v52  ;;  %v4627_v31 = vadd.f32 %v8144_v46, %v4612_v20  ;;  %v5797_v26 = vpack.c.bf16 %v4638_v36, %v4638_v36  ;;  %v4631_v50 = vadd.f32 %v8144_v46, %v4616_v51 }
 0x2e8   : > { %4675 = vst.msk [vmem:[%s8154_s8 + $0x8] sm:$0xf] %vm4672_vm1, %v5793_v49  ;;  %v4635_v19 = vmax.f32 %v4627_v31, 0.0  ;;  %4679 = vst.msk [vmem:[%s8154_s8 + $0x18] sm:$0xf] %vm4672_vm1, %v5797_v26  ;;  %v4639_v42 = vmax.f32 %v4631_v50, 0.0 }
 0x2ea   : > { %v5794_v55 = vpack.c.bf16 %v4635_v19, %v4635_v19  ;;  %v5798_v8 = vpack.c.bf16 %v4639_v42, %v4639_v42 }
 0x2ec   : > { %4676 = vst.msk [vmem:[%s8154_s8 + $0xc] sm:$0xf] %vm4672_vm1, %v5794_v55  ;;  %4680 = vst.msk [vmem:[%s8154_s8 + $0x1c] sm:$0xf] %vm4672_vm1, %v5798_v8 }
 0x2ed PF: > { %s13_s16 = sadd.s32 1, %s6259_s16   ;;  %s8202_s12 = smov %s6251_s14 }
 0x2ee   : > { %p10_p7 = scmp.ge.s32.totalorder %s13_s16, 18   ;;  %s8203_s13 = smov %s6255_s15 }
 0x2ef   : > { %s8204_s14 = smov %s8207_s17  ;;  %s8205_s15 = smov %s8211_s18 }
 0x2f0   :  { %12 = sbr.rel (!%p10_p7) target bundleno = 3 (0x3), region = 91 }

// kernel: forward.7
= control target key start
LH: loop header
LB: loop body
LE: loop exit
PB: predicated region body
PF: predicated region fallthrough
CT: control target
= control target key end

     0   :  { %s2270_s12 = smov 0   ;;  %s2272_s13 = smov 0   ;;  %s2859_s0 = inlined_call_operand.vmem [shape: bf16[2,6,24,192], index: 0, kind: input, shape index: {}]   ;;  %s2860_s1 = inlined_call_operand.vmem [shape: bf16[3,3,192,128], index: 1, kind: input, shape index: {}]   ;;  %s2861_s2 = inlined_call_operand.vmem [shape: f32[1,128], index: 2, kind: input, shape index: {}]   ;;  %s2862_s3 = inlined_call_operand.vmem [shape: bf16[2,4,16,128], index: 3, kind: output, shape index: {}]  }
   0x1   :  { %s2274_s14 = smov 0   ;;  %s2276_s15 = smov 0  }
   0x2   :  { %s2278_s16 = smov 0  }
   0x3 LB: > { %s22_s17 = sadd.s32 1, %s2239_s14  ;;  %s25_s18 = sadd.s32 1, %s2243_s15  ;;  %s2247_s16 = sphi %s2278_s16, %s13_s16   ;;  %s2243_s15 = sphi %s2276_s15, %s2866_s15   ;;  %s2239_s14 = sphi %s2274_s14, %s2865_s14   ;;  %s2235_s13 = sphi %s2272_s13, %s2864_s13   ;;  %s2231_s12 = sphi %s2270_s12, %s2863_s12  }
   0x4   : > { %p23_p0 = scmp.ge.s32.totalorder %s22_s17, 4  ;;  %p1689_p1 = scmp.ge.s32.totalorder %s2247_s16, 1 }
   0x5   : > { %p151_p2 = scmp.lt.s32.totalorder %s2247_s16, 9 }
   0x6   : > { %s2868_s17 = smov (%p23_p0, %s22_s17), 0  ;;  %s2870_s18 = smov (!%p23_p0, %s25_s18), %s2243_s15 }
   0x7   : > { %p152_p3 = pnand %p1689_p1, %p151_p2  ;;  %p27_p4 = scmp.ge.s32.totalorder %s2870_s18, 2 }
   0x8   : > { %p179_p5 = scmp.lt.s32.totalorder (!%p152_p3), %s2235_s13, 1  ;;  %s2033_s20 = smul.u32 (!%p152_p3), 24, %s2231_s12 }
   0x9   : > { %s2872_s18 = smov (%p27_p4, %s2870_s18), 0  ;;  %155 = sbr.rel (%p152_p3) target bundleno = 461 (0x1cd), region = 32 }
   0xa   : > { %p186_p6 = scmp.lt.s32.totalorder (!%p152_p3), %s2231_s12, 3 }
   0xe   : > { %v2083_v0 = vld [vmem:[%s2860_s1 + $0x98] sm:$0xff]   ;;  %v2249_v1 = vmov 0   ;;  %v2085_v3 = vld [vmem:[%s2860_s1 + $0x90] sm:$0xff]   ;;  %v2087_v5 = vld [vmem:[%s2860_s1 + $0x88] sm:$0xff]   ;;  %s2874_s13 = smov (!%p179_p5, %s2235_s13), 1  ;;  %vm342_vm0 = vcmask 523264  }
   0xf   : > { %346 = vmatprep.subr.bf16.mxu0 %v2249_v1  ;;  %463 = vmatprep.subr.bf16.mxu1 %v2249_v1  ;;  %v2084_v2 = vld [vmem:[%s2860_s1 + $0x38] sm:$0xff]   ;;  %v2086_v4 = vld [vmem:[%s2860_s1 + $0x30] sm:$0xff]   ;;  %v2088_v6 = vld [vmem:[%s2860_s1 + $0x28] sm:$0xff]   ;;  %s2041_s10 = smul.u32 144, %s2874_s13  ;;  %vm262_vm1 = vcmask 1045504   ;;  %s2876_s12 = smov (!%p186_p6, %s2231_s12), 3 }
  0x10   : > { %347 = vmatpush1.bf16.msra.mxu0 %v2083_v0  ;;  %464 = vmatpush1.bf16.msra.mxu1 %v2084_v2  ;;  %v2089_v7 = vld [vmem:[%s2860_s1 + $0x80] sm:$0xff]   ;;  %v2091_v9 = vld [vmem:[%s2860_s1 + $0x78] sm:$0xff]   ;;  %v2093_v11 = vld [vmem:[%s2860_s1 + $0x70] sm:$0xff]   ;;  %s1691_s26 = sshll.u32 %s2876_s12, 1  ;;  %s1692_s27 = sshll.u32 %s2874_s13, 3 }
  0x11   : > { %348 = vmatprep.subr.bf16.mxu0 %v2249_v1  ;;  %465 = vmatprep.subr.bf16.mxu1 %v2249_v1  ;;  %v2090_v8 = vld [vmem:[%s2860_s1 + $0x20] sm:$0xff]   ;;  %v2092_v10 = vld [vmem:[%s2860_s1 + $0x18] sm:$0xff]   ;;  %s183_s25 = scalar_lea.vmem %s2859_s0, %s2041_s10  ;;  %v2094_v12 = vld [vmem:[%s2860_s1 + $0x10] sm:$0xff]   ;;  %s190_s4 = sadd.s32 %s1692_s27, %s1691_s26 }
  0x12   : > { %s2361_s28 = scalar_lea.vmem %s183_s25, %s2033_s20  ;;  %v2095_v13 = vld [vmem:[%s2860_s1 + $0x68] sm:$0xff]   ;;  %v2097_v20 = vld [vmem:[%s2860_s1 + $0x60] sm:$0xff]   ;;  %v2099_v26 = vld [vmem:[%s2860_s1 + $0xb8] sm:$0xff]   ;;  %s1693_s5 = sshll.u32 %s190_s4, 2 }
  0x13   : > { %v2096_v14 = vld [vmem:[%s2860_s1 + $0x8] sm:$0xff]   ;;  %v197_v15 = vld [vmem:[%s2361_s28] sm:$0xff]  ;;  %v2376_v17 = vld [vmem:[%s2361_s28 + $0x10] sm:$0xff]  ;;  %s192_s12 = scalar_lea.vmem %s2862_s3, %s1693_s5 }
  0x14   : > { %349 = vmatpush1.bf16.msra.mxu0 %v2085_v3  ;;  %466 = vmatpush1.bf16.msra.mxu1 %v2086_v4  ;;  %v2373_v16 = vld [vmem:[%s2361_s28 + $0x8] sm:$0xff]  ;;  %v1722_v19 = vcombine.high %v2376_v17, %v2376_v17  ;;  %v2098_v22 = vld [vmem:[%s2860_s1] sm:$0xff]   ;;  %v2100_v27 = vld [vmem:[%s2860_s1 + $0x58] sm:$0xff]   ;;  %v1721_v32 = vcombine.low %v2376_v17, %v2376_v17 }
  0x15   : > { %350 = vmatprep.subr.bf16.mxu0 %v2249_v1  ;;  %467 = vmatprep.subr.bf16.mxu1 %v2249_v1  ;;  %v1720_v18 = vcombine.high %v197_v15, %v2373_v16  ;;  %v1773_v21 = vcombine.low %v2373_v16, %v2376_v17  ;;  %v2101_v28 = vld [vmem:[%s2860_s1 + $0xb0] sm:$0xff]   ;;  %v2103_v30 = vld [vmem:[%s2860_s1 + $0xa8] sm:$0xff]   ;;  %v1719_v31 = vcombine.low %v197_v15, %v2373_v16  ;;  %v2105_v34 = vld [vmem:[%s2860_s1 + $0xa0] sm:$0xff]  }
  0x16   : > { %v267_v24 = vrot.slane %v1722_v19, 2  ;;  %v2102_v29 = vld [vmem:[%s2860_s1 + $0x50] sm:$0xff]   ;;  %v2104_v33 = vld [vmem:[%s2860_s1 + $0x48] sm:$0xff]   ;;  %v264_v36 = vrot.slane %v1721_v32, 2  ;;  %v2106_v37 = vld [vmem:[%s2860_s1 + $0x40] sm:$0xff]   ;;  %v1774_v41 = vcombine.high %v2373_v16, %v2376_v17 }
  0x17   : > { %v266_v23 = vrot.slane %v1720_v18, 2  ;;  %1748 = vmatprep.mubr.msk.bf16.mxu1 %vm342_vm0, %v1720_v18  ;;  %v263_v35 = vrot.slane %v1719_v31, 2  ;;  %v2111_v39 = vld [vmem:[%s2860_s1 + $0xf8] sm:$0xff]   ;;  %v2113_v42 = vld [vmem:[%s2860_s1 + $0xf0] sm:$0xff]   ;;  %v2447_v44 = vld [vmem:[%s2361_s28 + $0x20] sm:$0xff] }
  0x18   : > { %351 = vmatpush1.bf16.msra.mxu0 %v2087_v5  ;;  %468 = vmatpush1.bf16.msra.mxu1 %v2088_v6  ;;  %v2112_v40 = vld [vmem:[%s2860_s1 + $0x158] sm:$0xff]   ;;  %v2114_v45 = vld [vmem:[%s2860_s1 + $0x150] sm:$0xff]   ;;  %v2115_v47 = vld [vmem:[%s2860_s1 + $0xe8] sm:$0xff]  }
  0x19   : > { %352 = vmatprep.subr.bf16.mxu0 %v2249_v1  ;;  %469 = vmatprep.subr.bf16.mxu1 %v2249_v1  ;;  %v268_v25 = vsel %vm262_vm1, %v266_v23, %v267_v24  ;;  %v265_v38 = vsel %vm262_vm1, %v263_v35, %v264_v36  ;;  %v2444_v43 = vld [vmem:[%s2361_s28 + $0x18] sm:$0xff]  ;;  %v2116_v48 = vld [vmem:[%s2860_s1 + $0x148] sm:$0xff]   ;;  %v2117_v49 = vld [vmem:[%s2860_s1 + $0xe0] sm:$0xff]  }
  0x1a   : > { %1735 = vmatprep.mubr.msk.bf16.mxu0 %vm342_vm0, %v268_v25  ;;  %v2455_v46 = vcombine.high %v2444_v43, %v2447_v44  ;;  %v2118_v50 = vld [vmem:[%s2860_s1 + $0x140] sm:$0xff]   ;;  %v2119_v51 = vld [vmem:[%s2860_s1 + $0xd8] sm:$0xff]   ;;  %v2121_v53 = vld [vmem:[%s2860_s1 + $0xd0] sm:$0xff]  }
  0x1b   : > { %v2120_v52 = vld [vmem:[%s2860_s1 + $0x138] sm:$0xff]   ;;  %v2122_v54 = vld [vmem:[%s2860_s1 + $0x130] sm:$0xff]   ;;  %v2123_v55 = vld [vmem:[%s2860_s1 + $0xc8] sm:$0xff]  }
  0x1c   : > { %353 = vmatpush1.bf16.msra.mxu0 %v2089_v7  ;;  %470 = vmatpush1.bf16.msra.mxu1 %v2090_v8  ;;  %v2124_v56 = vld [vmem:[%s2860_s1 + $0x128] sm:$0xff]   ;;  %v2125_v57 = vld [vmem:[%s2860_s1 + $0xc0] sm:$0xff]   ;;  %v2127_v59 = vld [vmem:[%s2860_s1 + $0x118] sm:$0xff]   ;;  %v842_v6 = vrot.slane %v2455_v46, 2 }
  0x1d   : > { %354 = vmatprep.subr.bf16.mxu0 %v2249_v1  ;;  %471 = vmatprep.subr.bf16.mxu1 %v2249_v1  ;;  %v2126_v58 = vld [vmem:[%s2860_s1 + $0x120] sm:$0xff]   ;;  %v2128_v60 = vld [vmem:[%s2860_s1 + $0x178] sm:$0xff]   ;;  %v2129_v61 = vld [vmem:[%s2860_s1 + $0x110] sm:$0xff]  }
  0x1e   : > { %v2130_v62 = vld [vmem:[%s2860_s1 + $0x170] sm:$0xff]   ;;  %v2131_v63 = vld [vmem:[%s2860_s1 + $0x108] sm:$0xff]   ;;  %v2133_v4 = vld [vmem:[%s2860_s1 + $0x100] sm:$0xff]  }
  0x1f   : > { %v2529_v0 = vld [vmem:[%s2361_s28 + $0x28] sm:$0xff]  ;;  %v2135_v5 = vld [vmem:[%s2860_s1 + $0x160] sm:$0xff]   ;;  %v2138_v8 = vld [vmem:[%s2860_s1 + $0x1b8] sm:$0xff]  }
  0x20   : > { %355 = vmatpush1.bf16.msra.mxu0 %v2091_v9  ;;  %472 = vmatpush1.bf16.msra.mxu1 %v2092_v10  ;;  %v2132_v2 = vld [vmem:[%s2860_s1 + $0x168] sm:$0xff]   ;;  %v1855_v3 = vcombine.high %v2529_v0, %v2529_v0  ;;  %v2552_v9 = vcombine.low %v2444_v43, %v2447_v44  ;;  %v2140_v10 = vld [vmem:[%s2860_s1 + $0x218] sm:$0xff]   ;;  %v2145_v17 = vld [vmem:[%s2860_s1 + $0x1a0] sm:$0xff]   ;;  %v1854_v35 = vcombine.low %v2529_v0, %v2529_v0 }
  0x21   : > { %356 = vmatprep.subr.bf16.mxu0 %v2249_v1  ;;  %473 = vmatprep.subr.bf16.mxu1 %v2249_v1  ;;  %v2143_v15 = vld [vmem:[%s2860_s1 + $0x1a8] sm:$0xff]   ;;  %v2146_v18 = vld [vmem:[%s2860_s1 + $0x200] sm:$0xff]   ;;  %v2147_v19 = vld [vmem:[%s2860_s1 + $0x198] sm:$0xff]  }
  0x22   : > { %v843_v7 = vrot.slane %v1855_v3, 2  ;;  %v2144_v16 = vld [vmem:[%s2860_s1 + $0x208] sm:$0xff]   ;;  %v2149_v24 = vld [vmem:[%s2860_s1 + $0x190] sm:$0xff]   ;;  %v2163_v43 = vld [vmem:[%s2860_s1 + $0x220] sm:$0xff]  }
  0x23   : > { %v2150_v25 = vld [vmem:[%s2860_s1 + $0x1f0] sm:$0xff]   ;;  %v2160_v36 = vld [vmem:[%s2860_s1 + $0x228] sm:$0xff]   ;;  %v2184_v3 = vld [vmem:[%s2860_s1 + $0x2f8] sm:$0xff]  }
  0x24   : > { %357 = vmatpush1.bf16.msra.mxu0 %v2093_v11  ;;  %474 = vmatpush1.bf16.msra.mxu1 %v2094_v12  ;;  %v844_v11 = vsel %vm262_vm1, %v842_v6, %v843_v7  ;;  %v1894_v12 = vcombine.high %v2447_v44, %v2529_v0  ;;  %v2157_v32 = vld [vmem:[%s2860_s1 + $0x1d0] sm:$0xff]   ;;  %v2187_v6 = vld [vmem:[%s2860_s1 + $0x288] sm:$0xff]  }
  0x25   : > { %358 = vmatprep.subr.bf16.mxu0 %v2249_v1  ;;  %475 = vmatprep.subr.bf16.mxu1 %v2249_v1  ;;  %v2188_v7 = vld [vmem:[%s2860_s1 + $0x2e8] sm:$0xff]  }
  0x28   : > { %359 = vmatpush1.bf16.msra.mxu0 %v2095_v13  ;;  %476 = vmatpush1.bf16.msra.mxu1 %v2096_v14  ;;  %v2141_v13 = vld [vmem:[%s2860_s1 + $0x1b0] sm:$0xff]  }
  0x29   : > { %360 = vmatprep.subr.bf16.mxu0 %v2249_v1  ;;  %477 = vmatprep.subr.bf16.mxu1 %v2249_v1  ;;  %v2142_v14 = vld [vmem:[%s2860_s1 + $0x210] sm:$0xff]  }
  0x2c   : > { %361 = vmatpush1.bf16.msra.mxu0 %v2097_v20  ;;  %478 = vmatpush1.bf16.msra.mxu1 %v2098_v22  ;;  %v2148_v20 = vld [vmem:[%s2860_s1 + $0x1f8] sm:$0xff]   ;;  %v2603_v22 = vld [vmem:[%s2361_s28 + $0x40] sm:$0xff] }
  0x2d   : > { %370 = vmatprep.subr.bf16.mxu0 %v2249_v1  ;;  %487 = vmatprep.subr.bf16.mxu1 %v2249_v1 }
  0x30   : > { %371 = vmatpush2.bf16.msra.mxu0 %v2099_v26  ;;  %488 = vmatpush2.bf16.msra.mxu1 %v2100_v27  ;;  %v2151_v26 = vld [vmem:[%s2860_s1 + $0x188] sm:$0xff]  }
  0x31   : > { %372 = vmatprep.subr.bf16.mxu0 %v2249_v1  ;;  %489 = vmatprep.subr.bf16.mxu1 %v2249_v1  ;;  %v2152_v27 = vld [vmem:[%s2860_s1 + $0x1e8] sm:$0xff]  }
  0x34   : > { %373 = vmatpush2.bf16.msra.mxu0 %v2101_v28  ;;  %490 = vmatpush2.bf16.msra.mxu1 %v2102_v29  ;;  %v2153_v28 = vld [vmem:[%s2860_s1 + $0x180] sm:$0xff]  }
  0x35   : > { %374 = vmatprep.subr.bf16.mxu0 %v2249_v1  ;;  %491 = vmatprep.subr.bf16.mxu1 %v2249_v1  ;;  %v2154_v29 = vld [vmem:[%s2860_s1 + $0x1e0] sm:$0xff]  }
  0x38   : > { %375 = vmatpush2.bf16.msra.mxu0 %v2103_v30  ;;  %492 = vmatpush2.bf16.msra.mxu1 %v2104_v33  ;;  %v2155_v30 = vld [vmem:[%s2860_s1 + $0x1d8] sm:$0xff]   ;;  %v2158_v33 = vld [vmem:[%s2860_s1 + $0x230] sm:$0xff]  }
  0x39   : > { %376 = vmatprep.subr.bf16.mxu0 %v2249_v1  ;;  %493 = vmatprep.subr.bf16.mxu1 %v2249_v1 }
  0x3c   : > { %377 = vmatpush2.bf16.msra.mxu0 %v2105_v34  ;;  %494 = vmatpush2.bf16.msra.mxu1 %v2106_v37  ;;  %v2159_v34 = vld [vmem:[%s2860_s1 + $0x1c8] sm:$0xff]   ;;  %v2658_v37 = vld [vmem:[%s2361_s28 + $0x30] sm:$0xff] }
  0x3d   : > { %607 = vmatprep.subr.bf16.mxu0 %v2249_v1  ;;  %766 = vmatprep.subr.bf16.mxu1 %v2249_v1 }
  0x3f   : > { %379 = vmatmul.mubr.bf16.vlgmr.msra.gmra.mxu0 %v265_v38  ;;  %496 = vmatmul.mubr.bf16.vlgmr.msra.gmra.mxu1 %v1719_v31  ;;  %v2156_v31 = vld [vmem:[%s2860_s1 + $0x238] sm:$0xff]   ;;  %v2161_v38 = vld [vmem:[%s2860_s1 + $0x1c0] sm:$0xff]  }
  0x40   : > { %608 = vmatpush1.bf16.msra.mxu0 %v2111_v39  ;;  %767 = vmatpush1.bf16.msra.mxu1 %v2112_v40  ;;  %v839_v39 = vrot.slane %v2552_v9, 2  ;;  %v840_v40 = vrot.slane %v1854_v35, 2 }
  0x41   : > { %609 = vmatprep.subr.bf16.mxu0 %v2249_v1  ;;  %768 = vmatprep.subr.bf16.mxu1 %v2249_v1 }
  0x42   : > { %1787 = vmatprep.mubr.msk.bf16.mxu0 %vm342_vm0, %v1774_v41  ;;  %1829 = vmatprep.mubr.msk.bf16.mxu1 %vm342_vm0, %v2455_v46  ;;  %v2166_v46 = vld [vmem:[%s2860_s1 + $0x278] sm:$0xff]  }
  0x44   : > { %610 = vmatpush1.bf16.msra.mxu0 %v2113_v42  ;;  %769 = vmatpush1.bf16.msra.mxu1 %v2114_v45  ;;  %v1975_v42 = vcombine.high %v2603_v22, %v2603_v22  ;;  %v841_v45 = vsel %vm262_vm1, %v839_v39, %v840_v40 }
  0x45   : > { %611 = vmatprep.subr.bf16.mxu0 %v2249_v1  ;;  %770 = vmatprep.subr.bf16.mxu1 %v2249_v1 }
  0x48   : > { %612 = vmatpush1.bf16.msra.mxu0 %v2115_v47  ;;  %771 = vmatpush1.bf16.msra.mxu1 %v2116_v48  ;;  %v1893_v47 = vcombine.low %v2447_v44, %v2529_v0  ;;  %v2182_v0 = vld [vmem:[%s2860_s1 + $0x2a0] sm:$0xff]  }
  0x49   : > { %613 = vmatprep.subr.bf16.mxu0 %v2249_v1  ;;  %772 = vmatprep.subr.bf16.mxu1 %v2249_v1 }
  0x4c   : > { %614 = vmatpush1.bf16.msra.mxu0 %v2117_v49  ;;  %773 = vmatpush1.bf16.msra.mxu1 %v2118_v50  ;;  %v1303_v49 = vrot.slane %v1975_v42, 2  ;;  %v2168_v50 = vld [vmem:[%s2860_s1 + $0x2d8] sm:$0xff]  }
  0x4d   : > { %615 = vmatprep.subr.bf16.mxu0 %v2249_v1  ;;  %774 = vmatprep.subr.bf16.mxu1 %v2249_v1 }
  0x50   : > { %616 = vmatpush1.bf16.msra.mxu0 %v2119_v51  ;;  %775 = vmatpush1.bf16.msra.mxu1 %v2120_v52  ;;  %v2169_v51 = vld [vmem:[%s2860_s1 + $0x270] sm:$0xff]  }
  0x51   : > { %617 = vmatprep.subr.bf16.mxu0 %v2249_v1  ;;  %776 = vmatprep.subr.bf16.mxu1 %v2249_v1  ;;  %v2170_v52 = vld [vmem:[%s2860_s1 + $0x2d0] sm:$0xff]  }
  0x54   : > { %618 = vmatpush1.bf16.msra.mxu0 %v2121_v53  ;;  %777 = vmatpush1.bf16.msra.mxu1 %v2122_v54  ;;  %v2171_v53 = vld [vmem:[%s2860_s1 + $0x268] sm:$0xff]  }
  0x55   : > { %619 = vmatprep.subr.bf16.mxu0 %v2249_v1  ;;  %778 = vmatprep.subr.bf16.mxu1 %v2249_v1  ;;  %v2172_v54 = vld [vmem:[%s2860_s1 + $0x2c8] sm:$0xff]  }
  0x58   : > { %620 = vmatpush1.bf16.msra.mxu0 %v2123_v55  ;;  %779 = vmatpush1.bf16.msra.mxu1 %v2124_v56  ;;  %v2173_v55 = vld [vmem:[%s2860_s1 + $0x260] sm:$0xff]  }
  0x59   : > { %621 = vmatprep.subr.bf16.mxu0 %v2249_v1  ;;  %780 = vmatprep.subr.bf16.mxu1 %v2249_v1  ;;  %v2174_v56 = vld [vmem:[%s2860_s1 + $0x2c0] sm:$0xff]  }
  0x5c   : > { %622 = vmatpush1.bf16.msra.mxu0 %v2125_v57  ;;  %781 = vmatpush1.bf16.msra.mxu1 %v2126_v58  ;;  %v2175_v57 = vld [vmem:[%s2860_s1 + $0x258] sm:$0xff]  }
  0x5d   : > { %631 = vmatprep.subr.bf16.mxu0 %v2249_v1  ;;  %790 = vmatprep.subr.bf16.mxu1 %v2249_v1  ;;  %v2176_v58 = vld [vmem:[%s2860_s1 + $0x2b8] sm:$0xff]  }
  0x60   : > { %632 = vmatpush2.bf16.msra.mxu0 %v2127_v59  ;;  %791 = vmatpush2.bf16.msra.mxu1 %v2128_v60  ;;  %v2177_v59 = vld [vmem:[%s2860_s1 + $0x250] sm:$0xff]  }
  0x61   : > { %633 = vmatprep.subr.bf16.mxu0 %v2249_v1  ;;  %792 = vmatprep.subr.bf16.mxu1 %v2249_v1  ;;  %v2178_v60 = vld [vmem:[%s2860_s1 + $0x2b0] sm:$0xff]  }
  0x64   : > { %634 = vmatpush2.bf16.msra.mxu0 %v2129_v61  ;;  %793 = vmatpush2.bf16.msra.mxu1 %v2130_v62  ;;  %v2179_v61 = vld [vmem:[%s2860_s1 + $0x248] sm:$0xff]  }
  0x65   : > { %635 = vmatprep.subr.bf16.mxu0 %v2249_v1  ;;  %794 = vmatprep.subr.bf16.mxu1 %v2249_v1  ;;  %v2180_v62 = vld [vmem:[%s2860_s1 + $0x2a8] sm:$0xff]  }
  0x68   : > { %636 = vmatpush2.bf16.msra.mxu0 %v2131_v63  ;;  %795 = vmatpush2.bf16.msra.mxu1 %v2132_v2  ;;  %v2181_v63 = vld [vmem:[%s2860_s1 + $0x240] sm:$0xff]   ;;  %v2183_v2 = vld [vmem:[%s2860_s1 + $0x298] sm:$0xff]  }
  0x69   : > { %637 = vmatprep.subr.bf16.mxu0 %v2249_v1  ;;  %796 = vmatprep.subr.bf16.mxu1 %v2249_v1 }
  0x6c   : > { %638 = vmatpush2.bf16.msra.mxu0 %v2133_v4  ;;  %797 = vmatpush2.bf16.msra.mxu1 %v2135_v5  ;;  %v2185_v4 = vld [vmem:[%s2860_s1 + $0x290] sm:$0xff]  }
  0x6d   : > { %921 = vmatprep.subr.bf16.mxu0 %v2249_v1  ;;  %1067 = vmatprep.subr.bf16.mxu1 %v2249_v1  ;;  %v2186_v5 = vld [vmem:[%s2860_s1 + $0x2f0] sm:$0xff]  }
  0x6f   : > { %640 = vmatmul.mubr.bf16.vlgmr.msra.gmra.mxu0 %v1773_v21  ;;  %799 = vmatmul.mubr.bf16.vlgmr.msra.gmra.mxu1 %v2552_v9  ;;  %v2599_v21 = vld [vmem:[%s2361_s28 + $0x38] sm:$0xff]  ;;  %v1974_v9 = vcombine.low %v2603_v22, %v2603_v22 }
  0x70   : > { %922 = vmatpush1.bf16.msra.mxu0 %v2138_v8  ;;  %1068 = vmatpush1.bf16.msra.mxu1 %v2140_v10  ;;  %v2013_v23 = vcombine.low %v2599_v21, %v2603_v22  ;;  %v1936_v41 = vcombine.high %v2658_v37, %v2599_v21  ;;  %v1935_v8 = vcombine.low %v2658_v37, %v2599_v21  ;;  %v2189_v10 = vld [vmem:[%s2860_s1 + $0x280] sm:$0xff]  }
  0x71   : > { %923 = vmatprep.subr.bf16.mxu0 %v2249_v1  ;;  %1069 = vmatprep.subr.bf16.mxu1 %v2249_v1 }
  0x72   : > { %1868 = vmatprep.mubr.msk.bf16.mxu0 %vm342_vm0, %v844_v11  ;;  %1907 = vmatprep.mubr.msk.bf16.mxu1 %vm342_vm0, %v1894_v12  ;;  %v1302_v48 = vrot.slane %v1936_v41, 2  ;;  %v2191_v11 = vld [vmem:[%s2860_s1 + $0x2e0] sm:$0xff]   ;;  %v1299_v12 = vrot.slane %v1935_v8, 2 }
  0x74   : > { %924 = vmatpush1.bf16.msra.mxu0 %v2141_v13  ;;  %1070 = vmatpush1.bf16.msra.mxu1 %v2142_v14  ;;  %v1304_v44 = vsel %vm262_vm1, %v1302_v48, %v1303_v49  ;;  %v1300_v13 = vrot.slane %v1974_v9, 2  ;;  %v2194_v14 = vld [vmem:[%s2860_s1 + $0x338] sm:$0xff]  }
  0x75   : > { %925 = vmatprep.subr.bf16.mxu0 %v2249_v1  ;;  %1071 = vmatprep.subr.bf16.mxu1 %v2249_v1 }
  0x78   : > { %926 = vmatpush1.bf16.msra.mxu0 %v2143_v15  ;;  %1072 = vmatpush1.bf16.msra.mxu1 %v2144_v16  ;;  %v1301_v15 = vsel %vm262_vm1, %v1299_v12, %v1300_v13  ;;  %v2014_v16 = vcombine.high %v2599_v21, %v2603_v22 }
  0x79   : > { %927 = vmatprep.subr.bf16.mxu0 %v2249_v1  ;;  %1073 = vmatprep.subr.bf16.mxu1 %v2249_v1 }
  0x7c   : > { %928 = vmatpush1.bf16.msra.mxu0 %v2145_v17  ;;  %1074 = vmatpush1.bf16.msra.mxu1 %v2146_v18  ;;  %v2196_v17 = vld [vmem:[%s2860_s1 + $0x330] sm:$0xff]   ;;  %v2197_v18 = vld [vmem:[%s2860_s1 + $0x328] sm:$0xff]  }
  0x7d   : > { %929 = vmatprep.subr.bf16.mxu0 %v2249_v1  ;;  %1075 = vmatprep.subr.bf16.mxu1 %v2249_v1 }
  0x80   : > { %930 = vmatpush1.bf16.msra.mxu0 %v2147_v19  ;;  %1076 = vmatpush1.bf16.msra.mxu1 %v2148_v20  ;;  %v2198_v19 = vld [vmem:[%s2860_s1 + $0x320] sm:$0xff]   ;;  %v2199_v20 = vld [vmem:[%s2860_s1 + $0x318] sm:$0xff]  }
  0x81   : > { %931 = vmatprep.subr.bf16.mxu0 %v2249_v1  ;;  %1077 = vmatprep.subr.bf16.mxu1 %v2249_v1 }
  0x84   : > { %932 = vmatpush1.bf16.msra.mxu0 %v2149_v24  ;;  %1078 = vmatpush1.bf16.msra.mxu1 %v2150_v25  ;;  %v2200_v24 = vld [vmem:[%s2860_s1 + $0x310] sm:$0xff]   ;;  %v2201_v25 = vld [vmem:[%s2860_s1 + $0x308] sm:$0xff]  }
  0x85   : > { %933 = vmatprep.subr.bf16.mxu0 %v2249_v1  ;;  %1079 = vmatprep.subr.bf16.mxu1 %v2249_v1 }
  0x88   : > { %934 = vmatpush1.bf16.msra.mxu0 %v2151_v26  ;;  %1080 = vmatpush1.bf16.msra.mxu1 %v2152_v27  ;;  %v2202_v26 = vld [vmem:[%s2860_s1 + $0x300] sm:$0xff]   ;;  %v2203_v27 = vld [vmem:[%s2860_s1 + $0x358] sm:$0xff]  }
  0x89   : > { %935 = vmatprep.subr.bf16.mxu0 %v2249_v1  ;;  %1081 = vmatprep.subr.bf16.mxu1 %v2249_v1 }
  0x8c   : > { %936 = vmatpush1.bf16.msra.mxu0 %v2153_v28  ;;  %1082 = vmatpush1.bf16.msra.mxu1 %v2154_v29  ;;  %v2204_v28 = vld [vmem:[%s2860_s1 + $0x350] sm:$0xff]   ;;  %v2205_v29 = vld [vmem:[%s2860_s1 + $0x348] sm:$0xff]  }
  0x8d   : > { %945 = vmatprep.subr.bf16.mxu0 %v2249_v1  ;;  %1091 = vmatprep.subr.bf16.mxu1 %v2249_v1 }
  0x90   : > { %946 = vmatpush2.bf16.msra.mxu0 %v2155_v30  ;;  %1092 = vmatpush2.bf16.msra.mxu1 %v2156_v31  ;;  %v2206_v30 = vld [vmem:[%s2860_s1 + $0x340] sm:$0xff]  }
  0x91   : > { %947 = vmatprep.subr.bf16.mxu0 %v2249_v1  ;;  %1093 = vmatprep.subr.bf16.mxu1 %v2249_v1 }
  0x94   : > { %948 = vmatpush2.bf16.msra.mxu0 %v2157_v32  ;;  %1094 = vmatpush2.bf16.msra.mxu1 %v2158_v33 }
  0x95   : > { %949 = vmatprep.subr.bf16.mxu0 %v2249_v1  ;;  %1095 = vmatprep.subr.bf16.mxu1 %v2249_v1 }
  0x98   : > { %950 = vmatpush2.bf16.msra.mxu0 %v2159_v34  ;;  %1096 = vmatpush2.bf16.msra.mxu1 %v2160_v36 }
  0x99   : > { %951 = vmatprep.subr.bf16.mxu0 %v2249_v1  ;;  %1097 = vmatprep.subr.bf16.mxu1 %v2249_v1 }
  0x9c   : > { %952 = vmatpush2.bf16.msra.mxu0 %v2161_v38  ;;  %1098 = vmatpush2.bf16.msra.mxu1 %v2163_v43 }
  0x9d   : > { %1226 = vmatprep.subr.bf16.mxu0 %v2249_v1  ;;  %1381 = vmatprep.subr.bf16.mxu1 %v2249_v1 }
  0x9f   : > { %954 = vmatmul.mubr.bf16.vlgmr.msra.gmra.mxu0 %v841_v45  ;;  %1100 = vmatmul.mubr.bf16.vlgmr.msra.gmra.mxu1 %v1893_v47 }
  0xa0   : > { %1227 = vmatpush1.bf16.msra.mxu0 %v2166_v46  ;;  %1382 = vmatpush1.bf16.msra.mxu1 %v2168_v50 }
  0xa1   : > { %1228 = vmatprep.subr.bf16.mxu0 %v2249_v1  ;;  %1383 = vmatprep.subr.bf16.mxu1 %v2249_v1 }
  0xa2   : > { %1949 = vmatprep.mubr.msk.bf16.mxu0 %vm342_vm0, %v1936_v41  ;;  %1988 = vmatprep.mubr.msk.bf16.mxu1 %vm342_vm0, %v1304_v44 }
  0xa4   : > { %1229 = vmatpush1.bf16.msra.mxu0 %v2169_v51  ;;  %1384 = vmatpush1.bf16.msra.mxu1 %v2170_v52 }
  0xa5   : > { %1230 = vmatprep.subr.bf16.mxu0 %v2249_v1  ;;  %1385 = vmatprep.subr.bf16.mxu1 %v2249_v1 }
  0xa8   : > { %1231 = vmatpush1.bf16.msra.mxu0 %v2171_v53  ;;  %1386 = vmatpush1.bf16.msra.mxu1 %v2172_v54 }
  0xa9   : > { %1232 = vmatprep.subr.bf16.mxu0 %v2249_v1  ;;  %1387 = vmatprep.subr.bf16.mxu1 %v2249_v1 }
  0xac   : > { %1233 = vmatpush1.bf16.msra.mxu0 %v2173_v55  ;;  %1388 = vmatpush1.bf16.msra.mxu1 %v2174_v56 }
  0xad   : > { %1234 = vmatprep.subr.bf16.mxu0 %v2249_v1  ;;  %1389 = vmatprep.subr.bf16.mxu1 %v2249_v1 }
  0xb0   : > { %1235 = vmatpush1.bf16.msra.mxu0 %v2175_v57  ;;  %1390 = vmatpush1.bf16.msra.mxu1 %v2176_v58 }
  0xb1   : > { %1236 = vmatprep.subr.bf16.mxu0 %v2249_v1  ;;  %1391 = vmatprep.subr.bf16.mxu1 %v2249_v1 }
  0xb4   : > { %1237 = vmatpush1.bf16.msra.mxu0 %v2177_v59  ;;  %1392 = vmatpush1.bf16.msra.mxu1 %v2178_v60 }
  0xb5   : > { %1238 = vmatprep.subr.bf16.mxu0 %v2249_v1  ;;  %1393 = vmatprep.subr.bf16.mxu1 %v2249_v1 }
  0xb8   : > { %1239 = vmatpush1.bf16.msra.mxu0 %v2179_v61  ;;  %1394 = vmatpush1.bf16.msra.mxu1 %v2180_v62 }
  0xb9   : > { %1240 = vmatprep.subr.bf16.mxu0 %v2249_v1  ;;  %1395 = vmatprep.subr.bf16.mxu1 %v2249_v1 }
  0xbc   : > { %1241 = vmatpush1.bf16.msra.mxu0 %v2181_v63  ;;  %1396 = vmatpush1.bf16.msra.mxu1 %v2182_v0 }
  0xbd   : > { %1250 = vmatprep.subr.bf16.mxu0 %v2249_v1  ;;  %1405 = vmatprep.subr.bf16.mxu1 %v2249_v1 }
  0xc0   : > { %1251 = vmatpush2.bf16.msra.mxu0 %v2183_v2  ;;  %1406 = vmatpush2.bf16.msra.mxu1 %v2184_v3 }
  0xc1   : > { %1252 = vmatprep.subr.bf16.mxu0 %v2249_v1  ;;  %1407 = vmatprep.subr.bf16.mxu1 %v2249_v1 }
  0xc4   : > { %1253 = vmatpush2.bf16.msra.mxu0 %v2185_v4  ;;  %1408 = vmatpush2.bf16.msra.mxu1 %v2186_v5 }
  0xc5   : > { %1254 = vmatprep.subr.bf16.mxu0 %v2249_v1  ;;  %1409 = vmatprep.subr.bf16.mxu1 %v2249_v1 }
  0xc8   : > { %1255 = vmatpush2.bf16.msra.mxu0 %v2187_v6  ;;  %1410 = vmatpush2.bf16.msra.mxu1 %v2188_v7 }
  0xc9   : > { %1256 = vmatprep.subr.bf16.mxu0 %v2249_v1  ;;  %1411 = vmatprep.subr.bf16.mxu1 %v2249_v1 }
  0xcc   : > { %1257 = vmatpush2.bf16.msra.mxu0 %v2189_v10  ;;  %1412 = vmatpush2.bf16.msra.mxu1 %v2191_v11  ;;  %v2028_v11 = vld [vmem:[%s2861_s2] ss:$0 sm:$0xff] }
  0xcd   : > { %1527 = vmatprep.subr.bf16.mxu0 %v2249_v1 }
  0xcf   : > { %1259 = vmatmul.mubr.bf16.vlgmr.msra.gmra.mxu0 %v1935_v8  ;;  %1414 = vmatmul.mubr.bf16.vlgmr.msra.gmra.mxu1 %v1301_v15 }
  0xd0   : > { %1528 = vmatpush1.bf16.msra.mxu0 %v2194_v14  ;;  %2027 = vmatprep.mubr.msk.bf16.mxu0 %vm342_vm0, %v2014_v16 }
  0xd1   : > { %1529 = vmatprep.subr.bf16.mxu0 %v2249_v1 }
  0xd4   : > { %1530 = vmatpush1.bf16.msra.mxu0 %v2196_v17 }
  0xd5   : > { %1531 = vmatprep.subr.bf16.mxu0 %v2249_v1 }
  0xd8   : > { %1532 = vmatpush1.bf16.msra.mxu0 %v2197_v18 }
  0xd9   : > { %1533 = vmatprep.subr.bf16.mxu0 %v2249_v1 }
  0xdc   : > { %1534 = vmatpush1.bf16.msra.mxu0 %v2198_v19 }
  0xdd   : > { %1535 = vmatprep.subr.bf16.mxu0 %v2249_v1 }
  0xe0   : > { %1536 = vmatpush1.bf16.msra.mxu0 %v2199_v20 }
  0xe1   : > { %1537 = vmatprep.subr.bf16.mxu0 %v2249_v1 }
  0xe4   : > { %1538 = vmatpush1.bf16.msra.mxu0 %v2200_v24 }
  0xe5   : > { %1539 = vmatprep.subr.bf16.mxu0 %v2249_v1 }
  0xe8   : > { %1540 = vmatpush1.bf16.msra.mxu0 %v2201_v25 }
  0xe9   : > { %1541 = vmatprep.subr.bf16.mxu0 %v2249_v1 }
  0xec   : > { %1542 = vmatpush1.bf16.msra.mxu0 %v2202_v26 }
  0xed   : > { %1551 = vmatprep.subr.bf16.mxu0 %v2249_v1 }
  0xf0   : > { %1552 = vmatpush2.bf16.msra.mxu0 %v2203_v27 }
  0xf1   : > { %1553 = vmatprep.subr.bf16.mxu0 %v2249_v1 }
  0xf4   : > { %1554 = vmatpush2.bf16.msra.mxu0 %v2204_v28 }
  0xf5   : > { %1555 = vmatprep.subr.bf16.mxu0 %v2249_v1 }
  0xf8   : > { %1556 = vmatpush2.bf16.msra.mxu0 %v2205_v29 }
  0xf9   : > { %1557 = vmatprep.subr.bf16.mxu0 %v2249_v1 }
  0xfc   : > { %1558 = vmatpush2.bf16.msra.mxu0 %v2206_v30 }
  0xff   : > { %v380_v31 = vpop.f32.mrf.mxu0  ;;  %1560 = vmatmul.mubr.bf16.vlgmr.msra.gmra.mxu0 %v2013_v23  ;;  %v497_v32 = vpop.f32.mrf.mxu1 }
 0x100   : > { %v498_v33 = vadd.f32 %v497_v32, %v380_v31 }
 0x101   : > { %v382_v34 = vpop.f32.mrf.mxu0  ;;  %v499_v35 = vpop.f32.mrf.mxu1 }
 0x103   : > { %v383_v36 = vpop.f32.mrf.mxu0  ;;  %v500_v37 = vpop.f32.mrf.mxu1 }
 0x104   : > { %v501_v38 = vadd.f32 %v500_v37, %v383_v36 }
 0x105   : > { %v385_v39 = vpop.f32.mrf.mxu0  ;;  %v502_v40 = vpop.f32.mrf.mxu1 }
 0x12f   : > { %v641_v41 = vpop.f32.mrf.mxu0  ;;  %v800_v43 = vpop.f32.mrf.mxu1 }
 0x130   : > { %v648_v42 = vadd.f32 %v641_v41, %v498_v33 }
 0x131   : > { %v643_v45 = vpop.f32.mrf.mxu0  ;;  %v802_v46 = vpop.f32.mrf.mxu1 }
 0x132   : > { %v807_v1 = vadd.f32 %v800_v43, %v648_v42 }
 0x133   : > { %v644_v47 = vpop.f32.mrf.mxu0  ;;  %v803_v49 = vpop.f32.mrf.mxu1 }
 0x134   : > { %v649_v48 = vadd.f32 %v644_v47, %v501_v38 }
 0x135   : > { %v646_v21 = vpop.f32.mrf.mxu0  ;;  %v805_v23 = vpop.f32.mrf.mxu1 }
 0x136   : > { %v808_v22 = vadd.f32 %v803_v49, %v649_v48 }
 0x15f   : > { %v955_v50 = vpop.f32.mrf.mxu0  ;;  %v1101_v44 = vpop.f32.mrf.mxu1 }
 0x160   : > { %v962_v51 = vadd.f32 %v955_v50, %v807_v1 }
 0x161   : > { %v957_v52 = vpop.f32.mrf.mxu0  ;;  %v1103_v54 = vpop.f32.mrf.mxu1 }
 0x162   : > { %v1108_v53 = vadd.f32 %v1101_v44, %v962_v51 }
 0x163   : > { %v958_v55 = vpop.f32.mrf.mxu0  ;;  %v1104_v57 = vpop.f32.mrf.mxu1 }
 0x164   : > { %v963_v56 = vadd.f32 %v958_v55, %v808_v22 }
 0x165   : > { %v960_v58 = vpop.f32.mrf.mxu0  ;;  %v1106_v60 = vpop.f32.mrf.mxu1 }
 0x166   : > { %v1109_v59 = vadd.f32 %v1104_v57, %v963_v56 }
 0x18f   : > { %v1260_v61 = vpop.f32.mrf.mxu0  ;;  %v1415_v62 = vpop.f32.mrf.mxu1 }
 0x190   : > { %v1267_v6 = vadd.f32 %v1260_v61, %v1108_v53 }
 0x191   : > { %v1262_v63 = vpop.f32.mrf.mxu0  ;;  %v1417_v0 = vpop.f32.mrf.mxu1 }
 0x192   : > { %v1422_v7 = vadd.f32 %v1415_v62, %v1267_v6 }
 0x193   : > { %v1263_v2 = vpop.f32.mrf.mxu0  ;;  %v1418_v3 = vpop.f32.mrf.mxu1 }
 0x194   : > { %v1268_v8 = vadd.f32 %v1263_v2, %v1109_v59 }
 0x195   : > { %v1265_v4 = vpop.f32.mrf.mxu0  ;;  %v1420_v5 = vpop.f32.mrf.mxu1 }
 0x196   : > { %v1423_v13 = vadd.f32 %v1418_v3, %v1268_v8 }
 0x1bf   : > { %v1561_v9 = vpop.f32.mrf.mxu0 }
 0x1c0   : > { %v1568_v10 = vadd.f32 %v1561_v9, %v1422_v7 }
 0x1c1   : > { %v1563_v12 = vpop.f32.mrf.mxu0 }
 0x1c2   : > { %v1577_v15 = vadd.f32 %v2028_v11, %v1568_v10 }
 0x1c3   : > { %v1564_v14 = vpop.f32.mrf.mxu0 }
 0x1c4   : > { %v1569_v16 = vadd.f32 %v1564_v14, %v1423_v13  ;;  %v1579_v19 = vmax.f32 %v1577_v15, 0.0 }
 0x1c5   : > { %v1566_v17 = vpop.f32.mrf.mxu0 }
 0x1c6   : > { %v1578_v18 = vadd.f32 %v2028_v11, %v1569_v16 }
 0x1c8   : > { %v1580_v20 = vmax.f32 %v1578_v18, 0.0 }
 0x1ca   : > { %v2039_v24 = vpack.c.bf16 %v1580_v20, %v1579_v19 }
 0x1cc   : > { %2040 = vst [vmem:[%s192_s12] sm:$0xff] %v2039_v24  }
 0x1cd PF: > { %s13_s16 = sadd.s32 1, %s2247_s16   ;;  %s2863_s12 = smov %s2239_s14 }
 0x1ce   : > { %p10_p7 = scmp.ge.s32.totalorder %s13_s16, 10   ;;  %s2864_s13 = smov %s2243_s15 }
 0x1cf   : > { %s2865_s14 = smov %s2868_s17  ;;  %s2866_s15 = smov %s2872_s18 }
 0x1d0   :  { %12 = sbr.rel (!%p10_p7) target bundleno = 3 (0x3), region = 73 }

// kernel: forward.9
= control target key start
LH: loop header
LB: loop body
LE: loop exit
PB: predicated region body
PF: predicated region fallthrough
CT: control target
= control target key end

     0   :  { %v550_v3 = vmov 0   ;;  %s828_s0 = inlined_call_operand.vmem [shape: f32[2,256], index: 0, kind: input, shape index: {}]   ;;  %s829_s1 = inlined_call_operand.vmem [shape: f32[2,1], index: 1, kind: input, shape index: {}]   ;;  %s830_s2 = inlined_call_operand.vmem [shape: f32[1,256], index: 2, kind: input, shape index: {}]   ;;  %s831_s3 = inlined_call_operand.vmem [shape: f32[1,256], index: 3, kind: input, shape index: {}]   ;;  %s832_s4 = inlined_call_operand.vmem [shape: f32[256,128], index: 4, kind: input, shape index: {}]   ;;  %s833_s5 = inlined_call_operand.vmem [shape: f32[1,128], index: 5, kind: input, shape index: {}]   ;;  %s834_s6 = inlined_call_operand.vmem [shape: f32[128,64], index: 6, kind: input, shape index: {}]   ;;  %s835_s7 = inlined_call_operand.vmem [shape: f32[1,64], index: 7, kind: input, shape index: {}]   ;;  %s836_s8 = inlined_call_operand.vmem [shape: f32[64,2], index: 8, kind: input, shape index: {}]   ;;  %s837_s9 = inlined_call_operand.vmem [shape: f32[1,2], index: 9, kind: input, shape index: {}]   ;;  %s838_s10 = inlined_call_operand.hbm [shape: f32[2,2], index: 10, kind: output, shape index: {}]  }
   0x1   :  { %v36_v0 = vld [vmem:[%s829_s1] sm:$0x3]  ;;  %v114_v1 = vld [vmem:[%s832_s4 + $0xf8] sm:$0xff]  ;;  %527 = vset.pattern.permute.xlu0 %v550_v3  ;;  %v113_v4 = vld [vmem:[%s832_s4 + $0xf0] sm:$0xff] }
   0x2   :  { %v98_v2 = vld [vmem:[%s832_s4 + $0x78] sm:$0xff]  ;;  %407 = vmatprep.subr.mxu0 %v114_v1  ;;  %v97_v5 = vld [vmem:[%s832_s4 + $0x70] sm:$0xff]  ;;  %40 = vperm.xlu0 %527, %v36_v0   ;;  %v112_v6 = vld [vmem:[%s832_s4 + $0xe8] sm:$0xff] }
   0x3   :  { %408 = vmatpush3.msra.mxu0 %v98_v2  ;;  %v96_v7 = vld [vmem:[%s832_s4 + $0x68] sm:$0xff]  ;;  %v111_v8 = vld [vmem:[%s832_s4 + $0xe0] sm:$0xff]  ;;  %v110_v10 = vld [vmem:[%s832_s4 + $0xd8] sm:$0xff] }
   0x4   :  { %409 = vmatprep.subr.mxu0 %v113_v4  ;;  %v95_v9 = vld [vmem:[%s832_s4 + $0x60] sm:$0xff]  ;;  %v94_v11 = vld [vmem:[%s832_s4 + $0x58] sm:$0xff]  ;;  %v109_v12 = vld [vmem:[%s832_s4 + $0xd0] sm:$0xff] }
   0x5   :  { %410 = vmatpush3.msra.mxu0 %v97_v5  ;;  %v93_v13 = vld [vmem:[%s832_s4 + $0x50] sm:$0xff]  ;;  %v108_v14 = vld [vmem:[%s832_s4 + $0xc8] sm:$0xff]  ;;  %v107_v16 = vld [vmem:[%s832_s4 + $0xc0] sm:$0xff] }
   0x6   :  { %411 = vmatprep.subr.mxu0 %v112_v6  ;;  %v92_v15 = vld [vmem:[%s832_s4 + $0x48] sm:$0xff] }
   0x7   :  { %412 = vmatpush3.msra.mxu0 %v96_v7 }
   0x8   :  { %413 = vmatprep.subr.mxu0 %v111_v8 }
   0x9   :  { %414 = vmatpush3.msra.mxu0 %v95_v9 }
   0xa   :  { %415 = vmatprep.subr.mxu0 %v110_v10 }
   0xb   :  { %416 = vmatpush3.msra.mxu0 %v94_v11 }
   0xc   :  { %417 = vmatprep.subr.mxu0 %v109_v12 }
   0xd   :  { %418 = vmatpush3.msra.mxu0 %v93_v13 }
   0xe   :  { %15 = vsyncpa [#allocation3], 0  ;;  %419 = vmatprep.subr.mxu0 %v108_v14  ;;  %v91_v17 = vld [vmem:[%s832_s4 + $0x40] sm:$0xff]  ;;  %v219_v18 = vld [vmem:[%s834_s6 + $0x78] sm:$0xff]  ;;  %v551_v20 = vmov 0.0   ;;  %v44_v46 = vlaneseq  ;;  %vm553_vm0 = vmmov 0  }
   0xf   :  { %420 = vmatpush3.msra.mxu0 %v92_v15  ;;  %v106_v19 = vld [vmem:[%s832_s4 + $0xb8] sm:$0xff]  ;;  %468 = vmatprep.subr.mxu1 %v551_v20  ;;  %v218_v21 = vld [vmem:[%s834_s6 + $0x70] sm:$0xff]  ;;  %v217_v24 = vld [vmem:[%s834_s6 + $0x68] sm:$0xff]  ;;  %v552_v51 = vmov 1983009808   ;;  %vm313_vm1 = vcmask 523264  }
  0x10   :  { %421 = vmatprep.subr.mxu0 %v107_v16  ;;  %v90_v22 = vld [vmem:[%s832_s4 + $0x38] sm:$0xff]  ;;  %469 = vmatpush3.msra.mxu1 %v219_v18  ;;  %v105_v23 = vld [vmem:[%s832_s4 + $0xb0] sm:$0xff]  ;;  %v104_v26 = vld [vmem:[%s832_s4 + $0xa8] sm:$0xff]  ;;  %v45_v47 = vshrl.u32 %v44_v46, 7  ;;  %v75_v52 = vunpack.c.l.s4 %v552_v51  ;;  %s554_s23 = smov [#allocation2]   ;;  %vm387_vm2 = vcmask 9216  }
  0x11   :  { %422 = vmatpush3.msra.mxu0 %v91_v17  ;;  %470 = vmatprep.subr.mxu1 %v551_v20  ;;  %v89_v25 = vld [vmem:[%s832_s4 + $0x30] sm:$0xff]  ;;  %v216_v27 = vld [vmem:[%s834_s6 + $0x60] sm:$0xff]  ;;  %v88_v28 = vld [vmem:[%s832_s4 + $0x28] sm:$0xff]  ;;  %s395_s24 = sshll.u32 %s554_s23, 4  ;;  %s396_s24 = int_to_ptr.vmem [resolvable:$true] %s395_s24 }
  0x12   :  { %423 = vmatprep.subr.mxu0 %v106_v19  ;;  %471 = vmatpush3.msra.mxu1 %v218_v21  ;;  %v103_v29 = vld [vmem:[%s832_s4 + $0xa0] sm:$0xff]  ;;  %v215_v30 = vld [vmem:[%s834_s6 + $0x58] sm:$0xff]  ;;  %v214_v33 = vld [vmem:[%s834_s6 + $0x50] sm:$0xff]  ;;  %v46_v48 = vsub.s32 0, %v45_v47  ;;  %v50_v49 = vsub.s32 1, %v45_v47  ;;  %v76_v58 = vunpack.c.0.s8 %v75_v52  ;;  %p533_p1 = scmp.lt.s32.totalorder %s396_s24, %s396_s24 }
  0x13   :  { %424 = vmatpush3.msra.mxu0 %v90_v22  ;;  %472 = vmatprep.subr.mxu1 %v551_v20  ;;  %v87_v31 = vld [vmem:[%s832_s4 + $0x20] sm:$0xff]  ;;  %v102_v32 = vld [vmem:[%s832_s4 + $0x98] sm:$0xff]  ;;  %v101_v35 = vld [vmem:[%s832_s4 + $0x90] sm:$0xff] }
  0x14   :  { %425 = vmatprep.subr.mxu0 %v105_v23  ;;  %473 = vmatpush3.msra.mxu1 %v217_v24  ;;  %v86_v34 = vld [vmem:[%s832_s4 + $0x18] sm:$0xff]  ;;  %v213_v36 = vld [vmem:[%s834_s6 + $0x48] sm:$0xff]  ;;  %v85_v37 = vld [vmem:[%s832_s4 + $0x10] sm:$0xff]  ;;  %v79_v0 = vsub.s32 %v76_v58, %v45_v47 }
  0x15   :  { %426 = vmatpush3.msra.mxu0 %v89_v25  ;;  %474 = vmatprep.subr.mxu1 %v551_v20  ;;  %v100_v38 = vld [vmem:[%s832_s4 + $0x88] sm:$0xff]  ;;  %v212_v39 = vld [vmem:[%s834_s6 + $0x40] sm:$0xff]  ;;  %v211_v42 = vld [vmem:[%s834_s6 + $0x38] sm:$0xff] }
  0x16   :  { %427 = vmatprep.subr.mxu0 %v104_v26  ;;  %475 = vmatpush3.msra.mxu1 %v216_v27  ;;  %v84_v40 = vld [vmem:[%s832_s4 + $0x8] sm:$0xff]  ;;  %v99_v41 = vld [vmem:[%s832_s4 + $0x80] sm:$0xff]  ;;  %v210_v44 = vld [vmem:[%s834_s6 + $0x30] sm:$0xff] }
  0x17   :  { %428 = vmatpush3.msra.mxu0 %v88_v28  ;;  %476 = vmatprep.subr.mxu1 %v551_v20  ;;  %v83_v43 = vld [vmem:[%s832_s4] sm:$0xff]  ;;  %v209_v45 = vld [vmem:[%s834_s6 + $0x28] sm:$0xff]  ;;  %v207_v8 = vld [vmem:[%s834_s6 + $0x18] sm:$0xff] }
  0x18   :  { %429 = vmatprep.subr.mxu0 %v103_v29  ;;  %477 = vmatpush3.msra.mxu1 %v215_v30  ;;  %v37_v50 = vld [vmem:[%s830_s2] sm:$0x3]  ;;  %v206_v9 = vld [vmem:[%s834_s6 + $0x10] sm:$0xff]  ;;  %v205_v10 = vld [vmem:[%s834_s6 + $0x8] sm:$0xff] }
  0x19   :  { %430 = vmatpush3.msra.mxu0 %v87_v31  ;;  %478 = vmatprep.subr.mxu1 %v551_v20  ;;  %v56_v53 = vld [vmem:[%s831_s3] sm:$0x3]  ;;  %v47_v54 = vrot.slane %v37_v50, %v46_v48  ;;  %v51_v55 = vrot.slane %v37_v50, %v50_v49  ;;  %v305_v12 = vld [vmem:[%s836_s8 + $0x38] sm:$0xff]  ;;  %v304_v13 = vld [vmem:[%s836_s8 + $0x30] sm:$0xff] }
  0x1a   :  { %431 = vmatprep.subr.mxu0 %v102_v32  ;;  %479 = vmatpush3.msra.mxu1 %v214_v33  ;;  %v61_v56 = vrot.slane %v56_v53, %v46_v48  ;;  %v65_v57 = vrot.slane %v56_v53, %v50_v49  ;;  %v70_v2 = vld [vmem:[%s828_s0] sm:$0xf]  ;;  %v303_v14 = vld [vmem:[%s836_s8 + $0x28] sm:$0xff]  ;;  %v301_v16 = vld [vmem:[%s836_s8 + $0x18] sm:$0xff] }
  0x1b   :  { %432 = vmatpush3.msra.mxu0 %v86_v34  ;;  %480 = vmatprep.subr.mxu1 %v551_v20  ;;  %v208_v7 = vld [vmem:[%s834_s6 + $0x20] sm:$0xff]  ;;  %v300_v24 = vld [vmem:[%s836_s8 + $0x10] sm:$0xff]  ;;  %v299_v25 = vld [vmem:[%s836_s8 + $0x8] sm:$0xff] }
  0x1c   :  { %433 = vmatprep.subr.mxu0 %v101_v35  ;;  %481 = vmatpush3.msra.mxu1 %v213_v36  ;;  %v204_v11 = vld [vmem:[%s834_s6] sm:$0xff] }
  0x1d   :  { %434 = vmatpush3.msra.mxu0 %v85_v37  ;;  %482 = vmatprep.subr.mxu1 %v551_v20  ;;  %v302_v15 = vld [vmem:[%s836_s8 + $0x20] sm:$0xff] }
  0x1e   :  { %435 = vmatprep.subr.mxu0 %v100_v38  ;;  %483 = vmatpush3.msra.mxu1 %v212_v39  ;;  %v403_v18 = vld [vmem:[%s833_s5] ss:$0 sm:$0xff] }
  0x1f   :  { %436 = vmatpush3.msra.mxu0 %v84_v40  ;;  %484 = vmatprep.subr.mxu1 %v551_v20  ;;  %v298_v26 = vld [vmem:[%s836_s8] sm:$0xff]  ;;  %s528_s8 = scalar_lea.vmem %s396_s24, 32 }
  0x20   :  { %437 = vmatprep.subr.mxu0 %v99_v41  ;;  %485 = vmatpush3.msra.mxu1 %v211_v42  ;;  %v404_v27 = vld [vmem:[%s835_s7] ss:$0 sm:$0xff]  ;;  %p529_p0 = scmp.ne.s32.totalorder %s396_s24, %s528_s8  ;;  %p534_p2 = scmp.lt.s32.totalorder %s528_s8, %s528_s8 }
  0x21   :  { %438 = vmatpush3.msra.mxu0 %v83_v43  ;;  %486 = vmatprep.subr.mxu1 %v551_v20  ;;  %v405_v32 = vld [vmem:[%s837_s9] ss:$0 sm:$0xff] }
  0x22   :  { %487 = vmatpush3.msra.mxu1 %v210_v44  ;;  %503 = vmatprep.subr.mxu0 %v551_v20  ;;  %p535_p3 = por %p534_p2, %p533_p1 }
  0x23   :  { %488 = vmatprep.subr.mxu1 %v551_v20  ;;  %500 = vmatprep.mubr.msk.f32.mxu1 %vm553_vm0, %v551_v20 }
  0x24   :  { %489 = vmatpush3.msra.mxu1 %v209_v45  ;;  %p536_p4 = pnand %p535_p3, %p529_p0 }
  0x25   :  { %490 = vmatprep.subr.mxu1 %v551_v20 }
  0x26   :  { %491 = vmatpush3.msra.mxu1 %v208_v7 }
  0x27   :  { %492 = vmatprep.subr.mxu1 %v551_v20 }
  0x28   :  { %493 = vmatpush3.msra.mxu1 %v207_v8 }
  0x29   :  { %494 = vmatprep.subr.mxu1 %v551_v20 }
  0x2a   :  { %495 = vmatpush3.msra.mxu1 %v206_v9 }
  0x2b   :  { %496 = vmatprep.subr.mxu1 %v551_v20 }
  0x2c   :  { %497 = vmatpush3.msra.mxu1 %v205_v10 }
  0x2d   :  { %498 = vmatprep.subr.mxu1 %v551_v20 }
  0x2e   :  { %499 = vmatpush3.msra.mxu1 %v204_v11 }
  0x7d   :  { %v41_v59 = vpop.permute.xlu0 %40 }
  0x7e   :  { %v54_v60 = vmul.f32 %v47_v54, %v41_v59  ;;  %v55_v61 = vmul.f32 %v51_v55, %v41_v59 }
  0x80   :  { %v68_v62 = vadd.f32 %v61_v56, %v54_v60  ;;  %v69_v63 = vadd.f32 %v65_v57, %v55_v61 }
  0x82   :  { %v73_v1 = vcombine.low %v68_v62, %v69_v63 }
  0x84   :  { %v80_v3 = vrot.slane %v73_v1, %v79_v0 }
  0x86   :  { %v82_v4 = vadd.f32 %v80_v3, %v70_v2 }
  0x88   :  { %v129_v5 = vrot.slane %v82_v4, %v79_v0 }
  0x8a   :  { %v130_v6 = vcombine.high %v129_v5, %v129_v5 }
  0x8c   :  { %197 = vmatprep.mubr.f32.mxu0 %v130_v6 }
  0x8d   :  { %198 = vmatmul.mubr.f32.vlgmr.msra.gmra.mxu0 %v129_v5 }
  0x8e   :  { %519 = vmatprep.mubr.msk.f32.mxu0 %vm553_vm0, %v551_v20  ;;  %504 = vmatpush3.msra.mxu0 %v305_v12 }
  0x8f   :  { %505 = vmatprep.subr.mxu0 %v551_v20 }
  0x90   :  { %506 = vmatpush3.msra.mxu0 %v304_v13 }
  0x91   :  { %507 = vmatprep.subr.mxu0 %v551_v20 }
  0x92   :  { %508 = vmatpush3.msra.mxu0 %v303_v14 }
  0x93   :  { %509 = vmatprep.subr.mxu0 %v551_v20 }
  0x94   :  { %510 = vmatpush3.msra.mxu0 %v302_v15 }
  0x95   :  { %511 = vmatprep.subr.mxu0 %v551_v20 }
  0x96   :  { %512 = vmatpush3.msra.mxu0 %v301_v16 }
  0x97   :  { %513 = vmatprep.subr.mxu0 %v551_v20 }
  0x98   :  { %514 = vmatpush3.msra.mxu0 %v300_v24 }
  0x99   :  { %515 = vmatprep.subr.mxu0 %v551_v20 }
  0x9a   :  { %516 = vmatpush3.msra.mxu0 %v299_v25 }
  0x9b   :  { %517 = vmatprep.subr.mxu0 %v551_v20 }
  0x9c   :  { %518 = vmatpush3.msra.mxu0 %v298_v26 }
 0x14d   :  { %v439_v17 = vpop.f32.mrf.mxu0 }
 0x14f   :  { %v440_v19 = vpop.f32.mrf.mxu0 }
 0x150   :  { %v441_v21 = vadd.f32 %v440_v19, %v439_v17 }
 0x152   :  { %v200_v22 = vadd.f32 %v441_v21, %v403_v18 }
 0x154   :  { %v203_v23 = vmax.f32 %v200_v22, 0.0 }
 0x156   :  { %501 = vmatmul.mubr.f32.vlgmr.msra.gmra.mxu1 %v203_v23 }
 0x216   :  { %v293_v28 = vpop.f32.mrf.mxu1 }
 0x217   :  { %v294_v29 = vadd.f32 %v404_v27, %v293_v28 }
 0x218   :  { %v502_v30 = vpop.f32.mrf.mxu1 }
 0x219   :  { %v297_v31 = vmax.f32 %v294_v29, 0.0 }
 0x21b   :  { %520 = vmatmul.mubr.msk.f32.vlgmr.msra.gmra.mxu0 %vm313_vm1, %v297_v31 }
 0x2db   :  { %v383_v20 = vpop.f32.mrf.mxu0 }
 0x2dc   :  { %v384_v33 = vadd.f32 %v405_v32, %v383_v20 }
 0x2dd   :  { %v521_v34 = vpop.f32.mrf.mxu0 }
 0x2de   :  { %388 = vst.msk [vmem:[#allocation2] sm:$0x3] %vm387_vm2, %v384_v33 }
 0x2df   :  { %539 = shalt.err (!%p536_p4)
}
 0x2e0   :  { %398 = dma.vmem_to_hbm [thread:$0]  %s396_s24, 32, %s838_s10, [#allocation3]  }
 0x2e1   :  { %548 = dma.done.wait [#allocation3], 32  }
 0x2e2   :  { %549 = vsyncadd [#allocation3], 4294967264 }
 0x2e3   :  { %402 = vsyncpa [#allocation3], 1 }

// kernel: forward.8
= control target key start
LH: loop header
LB: loop body
LE: loop exit
PB: predicated region body
PF: predicated region fallthrough
CT: control target
= control target key end

     0   :  { %s5552_s12 = smov 0   ;;  %s5554_s13 = smov 0   ;;  %s7099_s0 = inlined_call_operand.vmem [shape: bf16[2,6,24,384], index: 0, kind: input, shape index: {}]   ;;  %s7100_s1 = inlined_call_operand.vmem [shape: bf16[3,3,384,256], index: 1, kind: input, shape index: {}]   ;;  %s7101_s2 = inlined_call_operand.vmem [shape: f32[1,256], index: 2, kind: input, shape index: {}]   ;;  %s7102_s3 = inlined_call_operand.vmem [shape: f32[2,1,256], index: 3, kind: output, shape index: {}]  }
   0x1   :  { %s5556_s14 = smov 0   ;;  %s5558_s15 = smov 0  }
   0x2   :  { %s5560_s16 = smov 0  }
   0x3 LB: > { %s22_s17 = sadd.s32 1, %s5519_s14  ;;  %s25_s18 = sadd.s32 1, %s5523_s15  ;;  %s5527_s16 = sphi %s5560_s16, %s13_s16   ;;  %s5523_s15 = sphi %s5558_s15, %s7116_s15   ;;  %s5519_s14 = sphi %s5556_s14, %s7115_s14   ;;  %s5515_s13 = sphi %s5554_s13, %s7114_s13   ;;  %s5511_s12 = sphi %s5552_s12, %s7113_s12  }
   0x4   : > { %p23_p0 = scmp.ge.s32.totalorder %s22_s17, 4  ;;  %p3906_p1 = scmp.ge.s32.totalorder %s5527_s16, 1 }
   0x5   : > { %p149_p2 = scmp.lt.s32.totalorder %s5527_s16, 9 }
   0x6   : > { %s7118_s17 = smov (%p23_p0, %s22_s17), 0  ;;  %s7120_s18 = smov (!%p23_p0, %s25_s18), %s5523_s15 }
   0x7   : > { %p150_p3 = pnand %p3906_p1, %p149_p2  ;;  %p27_p4 = scmp.ge.s32.totalorder %s7120_s18, 2 }
   0x9   : > { %s7122_s18 = smov (%p27_p4, %s7120_s18), 0  ;;  %153 = sbr.rel (%p150_p3) target bundleno = 716 (0x2cc), region = 32 }
   0xe   : > { %v4814_v0 = vld [vmem:[%s7100_s1 + $0x1f4] ss:$8 sps:$4 sm:$0xff]   ;;  %p172_p5 = scmp.lt.s32.totalorder %s5515_s13, 1  ;;  %v5529_v2 = vmov 0   ;;  %v4818_v3 = vld [vmem:[%s7100_s1 + $0x1f0] ss:$8 sps:$4 sm:$0xff]  }
   0xf   : > { %v4816_v1 = vld [vmem:[%s7100_s1 + $0x2f4] ss:$8 sps:$4 sm:$0xff]   ;;  %637 = vmatprep.mubr.bf16.mxu1 %v5529_v2  ;;  %562 = vmatprep.subr.bf16.mxu0 %v4814_v0  ;;  %v4819_v4 = vld [vmem:[%s7100_s1 + $0x2f0] ss:$8 sps:$4 sm:$0xff]   ;;  %v4820_v5 = vld [vmem:[%s7100_s1 + $0x1e4] ss:$8 sps:$4 sm:$0xff]  }
  0x10   : > { %605 = vmatprep.subr.bf16.mxu1 %v4816_v1  ;;  %s7124_s13 = smov (!%p172_p5, %s5515_s13), 1  ;;  %563 = vmatpush1.bf16.msra.mxu0 %v4818_v3  ;;  %v4822_v6 = vld [vmem:[%s7100_s1 + $0x2e4] ss:$8 sps:$4 sm:$0xff]   ;;  %v4824_v7 = vld [vmem:[%s7100_s1 + $0x1e0] ss:$8 sps:$4 sm:$0xff]   ;;  %vm309_vm0 = vcmask 1045504  }
  0x11   : > { %606 = vmatpush1.bf16.msra.mxu1 %v4819_v4  ;;  %564 = vmatprep.subr.bf16.mxu0 %v4820_v5  ;;  %v4825_v8 = vld [vmem:[%s7100_s1 + $0x2e0] ss:$8 sps:$4 sm:$0xff]   ;;  %s3908_s8 = sshll.u32 %s7124_s13, 1  ;;  %v4826_v9 = vld [vmem:[%s7100_s1 + $0x1d4] ss:$8 sps:$4 sm:$0xff]   ;;  %s4770_s19 = smul.u32 216, %s7124_s13 }
  0x12   : > { %607 = vmatprep.subr.bf16.mxu1 %v4822_v6  ;;  %s5618_s20 = scalar_lea.vmem %s7102_s3, %s3908_s8  ;;  %v4828_v10 = vld [vmem:[%s7100_s1 + $0x2d4] ss:$8 sps:$4 sm:$0xff]   ;;  %v4830_v11 = vld [vmem:[%s7100_s1 + $0x1d0] ss:$8 sps:$4 sm:$0xff]   ;;  %v4832_v13 = vld [vmem:[%s7100_s1 + $0x1c4] ss:$8 sps:$4 sm:$0xff]  }
  0x13   : > { %v4831_v12 = vld [vmem:[%s7100_s1 + $0x2d0] ss:$8 sps:$4 sm:$0xff]   ;;  %v4834_v14 = vld [vmem:[%s7100_s1 + $0x2c4] ss:$8 sps:$4 sm:$0xff]   ;;  %v4836_v15 = vld [vmem:[%s7100_s1 + $0x1c0] ss:$8 sps:$4 sm:$0xff]   ;;  %s176_s4 = scalar_lea.vmem %s7099_s0, %s4770_s19 }
  0x14   : > { %565 = vmatpush1.bf16.msra.mxu0 %v4824_v7  ;;  %v4837_v16 = vld [vmem:[%s7100_s1 + $0x2c0] ss:$8 sps:$4 sm:$0xff]   ;;  %v4838_v17 = vld [vmem:[%s7100_s1 + $0x1b4] ss:$8 sps:$4 sm:$0xff]   ;;  %v4842_v19 = vld [vmem:[%s7100_s1 + $0x1b0] ss:$8 sps:$4 sm:$0xff]  }
  0x15   : > { %608 = vmatpush1.bf16.msra.mxu1 %v4825_v8  ;;  %566 = vmatprep.subr.bf16.mxu0 %v4826_v9  ;;  %v4840_v18 = vld [vmem:[%s7100_s1 + $0x2b4] ss:$8 sps:$4 sm:$0xff]   ;;  %v4843_v20 = vld [vmem:[%s7100_s1 + $0x2b0] ss:$8 sps:$4 sm:$0xff]   ;;  %v4844_v21 = vld [vmem:[%s7100_s1 + $0x1a4] ss:$8 sps:$4 sm:$0xff]  }
  0x16   : > { %609 = vmatprep.subr.bf16.mxu1 %v4828_v10  ;;  %v4846_v22 = vld [vmem:[%s7100_s1 + $0x2a4] ss:$8 sps:$4 sm:$0xff]   ;;  %s4769_s13 = smul.u32 36, %s5511_s12  ;;  %v4848_v23 = vld [vmem:[%s7100_s1 + $0x1a0] ss:$8 sps:$4 sm:$0xff]   ;;  %p4765_p6 = scmp.ne.s32.totalorder %s5511_s12, 0 }
  0x17   : > { %v4849_v24 = vld [vmem:[%s7100_s1 + $0x2a0] ss:$8 sps:$4 sm:$0xff]   ;;  %v4850_v25 = vld [vmem:[%s7100_s1 + $0x194] ss:$8 sps:$4 sm:$0xff]   ;;  %v4854_v27 = vld [vmem:[%s7100_s1 + $0x190] ss:$8 sps:$4 sm:$0xff]  }
  0x18   : > { %567 = vmatpush1.bf16.msra.mxu0 %v4830_v11  ;;  %v4852_v26 = vld [vmem:[%s7100_s1 + $0x294] ss:$8 sps:$4 sm:$0xff]   ;;  %s5676_s19 = scalar_lea.vmem %s176_s4, %s4769_s13  ;;  %v4855_v28 = vld [vmem:[%s7100_s1 + $0x290] ss:$8 sps:$4 sm:$0xff]   ;;  %v4856_v29 = vld [vmem:[%s7100_s1 + $0x184] ss:$8 sps:$4 sm:$0xff]  }
  0x19   : > { %610 = vmatpush1.bf16.msra.mxu1 %v4831_v12  ;;  %568 = vmatprep.subr.bf16.mxu0 %v4832_v13  ;;  %v186_v30 = vld [vmem:[%s5676_s19 + $0x8] sm:$0xf]  ;;  %v5689_v31 = vld [vmem:[%s5676_s19 + $0x14] sm:$0xf]  ;;  %v5692_v32 = vld [vmem:[%s5676_s19 + $0x20] sm:$0xf] }
  0x1a   : > { %611 = vmatprep.subr.bf16.mxu1 %v4834_v14  ;;  %v4858_v33 = vld [vmem:[%s7100_s1 + $0x284] ss:$8 sps:$4 sm:$0xff]   ;;  %v5698_v34 = vcombine.low %v186_v30, %v5689_v31  ;;  %v3963_v35 = vcombine.low %v5692_v32, %v5692_v32  ;;  %v4110_v36 = vcombine.low %v5689_v31, %v5692_v32  ;;  %v4860_v37 = vld [vmem:[%s7100_s1 + $0x180] ss:$8 sps:$4 sm:$0xff]   ;;  %v4862_v39 = vld [vmem:[%s7100_s1 + $0x274] ss:$8 sps:$4 sm:$0xff]  }
  0x1b   : > { %v4861_v38 = vld [vmem:[%s7100_s1 + $0x280] ss:$8 sps:$4 sm:$0xff]   ;;  %v4866_v42 = vld [vmem:[%s7100_s1 + $0x74] ss:$8 sps:$4 sm:$0xff]   ;;  %v4864_v43 = vld [vmem:[%s7100_s1 + $0x70] ss:$8 sps:$4 sm:$0xff]  }
  0x1c   : > { %569 = vmatpush1.bf16.msra.mxu0 %v4836_v15  ;;  %v316_v40 = vrot.slane %v5698_v34, 2  ;;  %v317_v41 = vrot.slane %v3963_v35, 2  ;;  %v4867_v44 = vld [vmem:[%s7100_s1 + $0x270] ss:$8 sps:$4 sm:$0xff]   ;;  %v4870_v46 = vld [vmem:[%s7100_s1 + $0x264] ss:$8 sps:$4 sm:$0xff]  }
  0x1d   : > { %612 = vmatpush1.bf16.msra.mxu1 %v4837_v16  ;;  %570 = vmatprep.subr.bf16.mxu0 %v4838_v17  ;;  %v4874_v47 = vld [vmem:[%s7100_s1 + $0x64] ss:$8 sps:$4 sm:$0xff]   ;;  %v4872_v48 = vld [vmem:[%s7100_s1 + $0x60] ss:$8 sps:$4 sm:$0xff]   ;;  %v4876_v50 = vld [vmem:[%s7100_s1 + $0x254] ss:$8 sps:$4 sm:$0xff]  }
  0x1e   : > { %613 = vmatprep.subr.bf16.mxu1 %v4840_v18  ;;  %v318_v45 = vsel %vm309_vm0, %v316_v40, %v317_v41  ;;  %v4875_v49 = vld [vmem:[%s7100_s1 + $0x260] ss:$8 sps:$4 sm:$0xff]   ;;  %v4880_v51 = vld [vmem:[%s7100_s1 + $0x54] ss:$8 sps:$4 sm:$0xff]   ;;  %v4878_v52 = vld [vmem:[%s7100_s1 + $0x50] ss:$8 sps:$4 sm:$0xff]  }
  0x1f   : > { %v4881_v53 = vld [vmem:[%s7100_s1 + $0x250] ss:$8 sps:$4 sm:$0xff]   ;;  %v4882_v54 = vld [vmem:[%s7100_s1 + $0x244] ss:$8 sps:$4 sm:$0xff]   ;;  %v4884_v56 = vld [vmem:[%s7100_s1 + $0x40] ss:$8 sps:$4 sm:$0xff]  }
  0x20   : > { %571 = vmatpush1.bf16.msra.mxu0 %v4842_v19  ;;  %v4886_v55 = vld [vmem:[%s7100_s1 + $0x44] ss:$8 sps:$4 sm:$0xff]   ;;  %v4887_v57 = vld [vmem:[%s7100_s1 + $0x240] ss:$8 sps:$4 sm:$0xff]   ;;  %v4888_v58 = vld [vmem:[%s7100_s1 + $0x234] ss:$8 sps:$4 sm:$0xff]  }
  0x21   : > { %614 = vmatpush1.bf16.msra.mxu1 %v4843_v20  ;;  %572 = vmatprep.subr.bf16.mxu0 %v4844_v21  ;;  %v185_v59 = vld [vmem:[%s5676_s19] sm:$0xff]  ;;  %v5765_v60 = vld [vmem:[%s5676_s19 + $0xc] sm:$0xff]  ;;  %v5768_v61 = vld [vmem:[%s5676_s19 + $0x18] sm:$0xff] }
  0x22   : > { %615 = vmatprep.subr.bf16.mxu1 %v4846_v22  ;;  %v4892_v62 = vld [vmem:[%s7100_s1 + $0x34] ss:$8 sps:$4 sm:$0xff]   ;;  %v3959_v63 = vcombine.high %v185_v59, %v5765_v60  ;;  %v3962_v0 = vcombine.high %v5768_v61, %v5768_v61  ;;  %v4108_v1 = vcombine.low %v5765_v60, %v5768_v61  ;;  %v4890_v3 = vld [vmem:[%s7100_s1 + $0x30] ss:$8 sps:$4 sm:$0xff]   ;;  %v4894_v7 = vld [vmem:[%s7100_s1 + $0x224] ss:$8 sps:$4 sm:$0xff]   ;;  %v5813_v17 = vcombine.low %v185_v59, %v5765_v60 }
  0x23   : > { %v4893_v6 = vld [vmem:[%s7100_s1 + $0x230] ss:$8 sps:$4 sm:$0xff]   ;;  %v4898_v8 = vld [vmem:[%s7100_s1 + $0x24] ss:$8 sps:$4 sm:$0xff]   ;;  %v4896_v10 = vld [vmem:[%s7100_s1 + $0x20] ss:$8 sps:$4 sm:$0xff]   ;;  %v3961_v18 = vcombine.low %v5768_v61, %v5768_v61 }
  0x24   : > { %573 = vmatpush1.bf16.msra.mxu0 %v4848_v23  ;;  %v313_v4 = vrot.slane %v3959_v63, 2  ;;  %v314_v5 = vrot.slane %v3962_v0, 2  ;;  %v4899_v11 = vld [vmem:[%s7100_s1 + $0x220] ss:$8 sps:$4 sm:$0xff]   ;;  %v4900_v12 = vld [vmem:[%s7100_s1 + $0x214] ss:$8 sps:$4 sm:$0xff]  }
  0x25   : > { %616 = vmatpush1.bf16.msra.mxu1 %v4849_v24  ;;  %574 = vmatprep.subr.bf16.mxu0 %v4850_v25  ;;  %v4904_v13 = vld [vmem:[%s7100_s1 + $0x14] ss:$8 sps:$4 sm:$0xff]   ;;  %v4902_v14 = vld [vmem:[%s7100_s1 + $0x10] ss:$8 sps:$4 sm:$0xff]   ;;  %v4906_v16 = vld [vmem:[%s7100_s1 + $0x204] ss:$8 sps:$4 sm:$0xff]  }
  0x26   : > { %617 = vmatprep.subr.bf16.mxu1 %v4852_v26  ;;  %v315_v9 = vsel %vm309_vm0, %v313_v4, %v314_v5  ;;  %v4905_v15 = vld [vmem:[%s7100_s1 + $0x210] ss:$8 sps:$4 sm:$0xff]   ;;  %v4910_v19 = vld [vmem:[%s7100_s1 + $0x4] ss:$8 sps:$4 sm:$0xff]   ;;  %v4908_v20 = vld [vmem:[%s7100_s1] ss:$8 sps:$4 sm:$0xff]  }
  0x27   : > { %594 = vmatprep.mubr.bf16.mxu0 %v315_v9  ;;  %v4911_v21 = vld [vmem:[%s7100_s1 + $0x200] ss:$8 sps:$4 sm:$0xff]   ;;  %v310_v22 = vrot.slane %v5813_v17, 2  ;;  %v311_v23 = vrot.slane %v3961_v18, 2  ;;  %v4918_v24 = vld [vmem:[%s7100_s1 + $0xf4] ss:$8 sps:$4 sm:$0xff]  }
  0x28   : > { %575 = vmatpush1.bf16.msra.mxu0 %v4854_v27  ;;  %v4921_v25 = vld [vmem:[%s7100_s1 + $0x174] ss:$8 sps:$4 sm:$0xff]   ;;  %v4916_v26 = vld [vmem:[%s7100_s1 + $0xf0] ss:$8 sps:$4 sm:$0xff]   ;;  %v4927_v30 = vld [vmem:[%s7100_s1 + $0x164] ss:$8 sps:$4 sm:$0xff]  }
  0x29   : > { %618 = vmatpush1.bf16.msra.mxu1 %v4855_v28  ;;  %576 = vmatprep.subr.bf16.mxu0 %v4856_v29  ;;  %v4919_v27 = vld [vmem:[%s7100_s1 + $0x170] ss:$8 sps:$4 sm:$0xff]   ;;  %v312_v28 = vsel %vm309_vm0, %v310_v22, %v311_v23  ;;  %v4924_v29 = vld [vmem:[%s7100_s1 + $0xe4] ss:$8 sps:$4 sm:$0xff]   ;;  %v4925_v35 = vld [vmem:[%s7100_s1 + $0x160] ss:$8 sps:$4 sm:$0xff]  }
  0x2a   : > { %619 = vmatprep.subr.bf16.mxu1 %v4858_v33  ;;  %v4922_v33 = vld [vmem:[%s7100_s1 + $0xe0] ss:$8 sps:$4 sm:$0xff]   ;;  %v4931_v40 = vld [vmem:[%s7100_s1 + $0x150] ss:$8 sps:$4 sm:$0xff]   ;;  %v4936_v41 = vld [vmem:[%s7100_s1 + $0xc4] ss:$8 sps:$4 sm:$0xff]  }
  0x2b   : > { %v4958_v59 = vld [vmem:[%s7100_s1 + $0x80] ss:$8 sps:$4 sm:$0xff]   ;;  %v4969_v0 = vld [vmem:[%s7100_s1 + $0x474] ss:$8 sps:$4 sm:$0xff]   ;;  %v4967_v4 = vld [vmem:[%s7100_s1 + $0x470] ss:$8 sps:$4 sm:$0xff]  }
  0x2c   : > { %577 = vmatpush1.bf16.msra.mxu0 %v4860_v37  ;;  %v4930_v37 = vld [vmem:[%s7100_s1 + $0xd4] ss:$8 sps:$4 sm:$0xff]   ;;  %v4972_v5 = vld [vmem:[%s7100_s1 + $0x364] ss:$8 sps:$4 sm:$0xff]   ;;  %v4973_v9 = vld [vmem:[%s7100_s1 + $0x460] ss:$8 sps:$4 sm:$0xff]  }
  0x2d   : > { %620 = vmatpush1.bf16.msra.mxu1 %v4861_v38  ;;  %578 = vmatprep.subr.bf16.mxu0 %v4862_v39  ;;  %v4933_v38 = vld [vmem:[%s7100_s1 + $0x154] ss:$8 sps:$4 sm:$0xff]   ;;  %v4928_v39 = vld [vmem:[%s7100_s1 + $0xd0] ss:$8 sps:$4 sm:$0xff]   ;;  %v4999_v22 = vld [vmem:[%s7100_s1 + $0x424] ss:$8 sps:$4 sm:$0xff]  }
  0x2e   : > { %891 = vmatprep.subr.bf16.mxu1 %v4866_v42  ;;  %v4939_v42 = vld [vmem:[%s7100_s1 + $0x144] ss:$8 sps:$4 sm:$0xff]   ;;  %v4993_v18 = vld [vmem:[%s7100_s1 + $0x434] ss:$8 sps:$4 sm:$0xff]   ;;  %v4994_v23 = vld [vmem:[%s7100_s1 + $0x320] ss:$8 sps:$4 sm:$0xff]  }
  0x2f   : > { %v5030_v32 = vld [vmem:[%s7100_s1 + $0x4d4] ss:$8 sps:$4 sm:$0xff]  }
  0x30   : > { %638 = vmatmul.mubr.bf16.vlgmr.msra.gmra.mxu1 %v318_v45  ;;  %579 = vmatpush2.bf16.msra.mxu0 %v4867_v44  ;;  %v4937_v44 = vld [vmem:[%s7100_s1 + $0x140] ss:$8 sps:$4 sm:$0xff]   ;;  %v4942_v45 = vld [vmem:[%s7100_s1 + $0xb4] ss:$8 sps:$4 sm:$0xff]  }
  0x31   : > { %892 = vmatpush1.bf16.msra.mxu1 %v4864_v43  ;;  %580 = vmatprep.subr.bf16.mxu0 %v4870_v46  ;;  %v4934_v43 = vld [vmem:[%s7100_s1 + $0xc0] ss:$8 sps:$4 sm:$0xff]   ;;  %v4945_v46 = vld [vmem:[%s7100_s1 + $0x134] ss:$8 sps:$4 sm:$0xff]  }
  0x32   : > { %893 = vmatprep.subr.bf16.mxu1 %v4874_v47  ;;  %923 = vmatprep.mubr.bf16.mxu1 %v3959_v63  ;;  %v4940_v47 = vld [vmem:[%s7100_s1 + $0xb0] ss:$8 sps:$4 sm:$0xff]   ;;  %v4966_v63 = vld [vmem:[%s7100_s1 + $0x374] ss:$8 sps:$4 sm:$0xff]  }
  0x34   : > { %581 = vmatpush2.bf16.msra.mxu0 %v4875_v49  ;;  %v4948_v49 = vld [vmem:[%s7100_s1 + $0xa4] ss:$8 sps:$4 sm:$0xff]  }
  0x35   : > { %894 = vmatpush1.bf16.msra.mxu1 %v4872_v48  ;;  %582 = vmatprep.subr.bf16.mxu0 %v4876_v50  ;;  %v4943_v48 = vld [vmem:[%s7100_s1 + $0x130] ss:$8 sps:$4 sm:$0xff]   ;;  %v4951_v50 = vld [vmem:[%s7100_s1 + $0x124] ss:$8 sps:$4 sm:$0xff]  }
  0x36   : > { %895 = vmatprep.subr.bf16.mxu1 %v4880_v51  ;;  %v4946_v51 = vld [vmem:[%s7100_s1 + $0xa0] ss:$8 sps:$4 sm:$0xff]  }
  0x38   : > { %583 = vmatpush2.bf16.msra.mxu0 %v4881_v53  ;;  %v4954_v53 = vld [vmem:[%s7100_s1 + $0x94] ss:$8 sps:$4 sm:$0xff]  }
  0x39   : > { %896 = vmatpush1.bf16.msra.mxu1 %v4878_v52  ;;  %584 = vmatprep.subr.bf16.mxu0 %v4882_v54  ;;  %v4949_v52 = vld [vmem:[%s7100_s1 + $0x120] ss:$8 sps:$4 sm:$0xff]   ;;  %v4957_v54 = vld [vmem:[%s7100_s1 + $0x114] ss:$8 sps:$4 sm:$0xff]  }
  0x3a   : > { %897 = vmatprep.subr.bf16.mxu1 %v4886_v55  ;;  %v4952_v55 = vld [vmem:[%s7100_s1 + $0x90] ss:$8 sps:$4 sm:$0xff]  }
  0x3c   : > { %585 = vmatpush2.bf16.msra.mxu0 %v4887_v57  ;;  %v4960_v57 = vld [vmem:[%s7100_s1 + $0x84] ss:$8 sps:$4 sm:$0xff]  }
  0x3d   : > { %898 = vmatpush1.bf16.msra.mxu1 %v4884_v56  ;;  %586 = vmatprep.subr.bf16.mxu0 %v4888_v58  ;;  %v4955_v56 = vld [vmem:[%s7100_s1 + $0x110] ss:$8 sps:$4 sm:$0xff]   ;;  %v4963_v58 = vld [vmem:[%s7100_s1 + $0x104] ss:$8 sps:$4 sm:$0xff]  }
  0x3e   : > { %899 = vmatprep.subr.bf16.mxu1 %v4892_v62  ;;  %v4961_v62 = vld [vmem:[%s7100_s1 + $0x100] ss:$8 sps:$4 sm:$0xff]  }
  0x40   : > { %587 = vmatpush2.bf16.msra.mxu0 %v4893_v6  ;;  %v4975_v6 = vld [vmem:[%s7100_s1 + $0x464] ss:$8 sps:$4 sm:$0xff]  }
  0x41   : > { %900 = vmatpush1.bf16.msra.mxu1 %v4890_v3  ;;  %588 = vmatprep.subr.bf16.mxu0 %v4894_v7  ;;  %v4964_v3 = vld [vmem:[%s7100_s1 + $0x370] ss:$8 sps:$4 sm:$0xff]   ;;  %v4109_v7 = vcombine.high %v5765_v60, %v5768_v61  ;;  %v5080_v60 = vld [vmem:[%s7100_s1 + $0x5d4] ss:$8 sps:$4 sm:$0xff]  }
  0x42   : > { %901 = vmatprep.subr.bf16.mxu1 %v4898_v8  ;;  %v4970_v8 = vld [vmem:[%s7100_s1 + $0x360] ss:$8 sps:$4 sm:$0xff]   ;;  %v5075_v61 = vld [vmem:[%s7100_s1 + $0x550] ss:$8 sps:$4 sm:$0xff]  }
  0x44   : > { %589 = vmatpush2.bf16.msra.mxu0 %v4899_v11  ;;  %v4976_v11 = vld [vmem:[%s7100_s1 + $0x350] ss:$8 sps:$4 sm:$0xff]  }
  0x45   : > { %902 = vmatpush1.bf16.msra.mxu1 %v4896_v10  ;;  %590 = vmatprep.subr.bf16.mxu0 %v4900_v12  ;;  %v4978_v10 = vld [vmem:[%s7100_s1 + $0x354] ss:$8 sps:$4 sm:$0xff]   ;;  %v4979_v12 = vld [vmem:[%s7100_s1 + $0x450] ss:$8 sps:$4 sm:$0xff]  }
  0x46   : > { %903 = vmatprep.subr.bf16.mxu1 %v4904_v13  ;;  %v4984_v13 = vld [vmem:[%s7100_s1 + $0x344] ss:$8 sps:$4 sm:$0xff]  }
  0x48   : > { %591 = vmatpush2.bf16.msra.mxu0 %v4905_v15  ;;  %v4982_v15 = vld [vmem:[%s7100_s1 + $0x340] ss:$8 sps:$4 sm:$0xff]  }
  0x49   : > { %904 = vmatpush1.bf16.msra.mxu1 %v4902_v14  ;;  %592 = vmatprep.subr.bf16.mxu0 %v4906_v16  ;;  %v4987_v14 = vld [vmem:[%s7100_s1 + $0x444] ss:$8 sps:$4 sm:$0xff]   ;;  %v4985_v16 = vld [vmem:[%s7100_s1 + $0x440] ss:$8 sps:$4 sm:$0xff]  }
  0x4a   : > { %905 = vmatprep.subr.bf16.mxu1 %v4910_v19  ;;  %v4988_v19 = vld [vmem:[%s7100_s1 + $0x330] ss:$8 sps:$4 sm:$0xff]  }
  0x4c   : > { %593 = vmatpush2.bf16.msra.mxu0 %v4911_v21  ;;  %v4996_v21 = vld [vmem:[%s7100_s1 + $0x324] ss:$8 sps:$4 sm:$0xff]  }
  0x4d   : > { %906 = vmatpush1.bf16.msra.mxu1 %v4908_v20  ;;  %934 = vmatprep.subr.bf16.mxu0 %v4921_v25  ;;  %v4991_v20 = vld [vmem:[%s7100_s1 + $0x430] ss:$8 sps:$4 sm:$0xff]   ;;  %v5002_v25 = vld [vmem:[%s7100_s1 + $0x314] ss:$8 sps:$4 sm:$0xff]  }
  0x4e   : > { %907 = vmatprep.subr.bf16.mxu1 %v4918_v24  ;;  %v4997_v24 = vld [vmem:[%s7100_s1 + $0x420] ss:$8 sps:$4 sm:$0xff]  }
  0x4f   : > { %595 = vmatmul.mubr.bf16.vlgmr.msra.gmra.mxu0 %v312_v28  ;;  %v5003_v28 = vld [vmem:[%s7100_s1 + $0x410] ss:$8 sps:$4 sm:$0xff]  }
  0x50   : > { %935 = vmatpush1.bf16.msra.mxu0 %v4919_v27  ;;  %966 = vmatprep.mubr.bf16.mxu0 %v5529_v2  ;;  %v5000_v27 = vld [vmem:[%s7100_s1 + $0x310] ss:$8 sps:$4 sm:$0xff]  }
  0x51   : > { %908 = vmatpush2.bf16.msra.mxu1 %v4916_v26  ;;  %936 = vmatprep.subr.bf16.mxu0 %v4927_v30  ;;  %v5005_v26 = vld [vmem:[%s7100_s1 + $0x414] ss:$8 sps:$4 sm:$0xff]   ;;  %v5011_v30 = vld [vmem:[%s7100_s1 + $0x404] ss:$8 sps:$4 sm:$0xff]  }
  0x52   : > { %909 = vmatprep.subr.bf16.mxu1 %v4924_v29  ;;  %v5008_v29 = vld [vmem:[%s7100_s1 + $0x304] ss:$8 sps:$4 sm:$0xff]  }
  0x54   : > { %937 = vmatpush1.bf16.msra.mxu0 %v4925_v35  ;;  %v5009_v35 = vld [vmem:[%s7100_s1 + $0x400] ss:$8 sps:$4 sm:$0xff]  }
  0x55   : > { %910 = vmatpush2.bf16.msra.mxu1 %v4922_v33  ;;  %938 = vmatprep.subr.bf16.mxu0 %v4933_v38  ;;  %v5006_v33 = vld [vmem:[%s7100_s1 + $0x300] ss:$8 sps:$4 sm:$0xff]   ;;  %v5017_v38 = vld [vmem:[%s7100_s1 + $0x4f4] ss:$8 sps:$4 sm:$0xff]  }
  0x56   : > { %911 = vmatprep.subr.bf16.mxu1 %v4930_v37  ;;  %v5014_v37 = vld [vmem:[%s7100_s1 + $0x3f4] ss:$8 sps:$4 sm:$0xff]  }
  0x58   : > { %939 = vmatpush1.bf16.msra.mxu0 %v4931_v40  ;;  %v5015_v40 = vld [vmem:[%s7100_s1 + $0x4f0] ss:$8 sps:$4 sm:$0xff]  }
  0x59   : > { %912 = vmatpush2.bf16.msra.mxu1 %v4928_v39  ;;  %940 = vmatprep.subr.bf16.mxu0 %v4939_v42  ;;  %v5012_v39 = vld [vmem:[%s7100_s1 + $0x3f0] ss:$8 sps:$4 sm:$0xff]   ;;  %v5024_v42 = vld [vmem:[%s7100_s1 + $0x4e4] ss:$8 sps:$4 sm:$0xff]  }
  0x5a   : > { %913 = vmatprep.subr.bf16.mxu1 %v4936_v41  ;;  %v5021_v41 = vld [vmem:[%s7100_s1 + $0x3e4] ss:$8 sps:$4 sm:$0xff]  }
  0x5c   : > { %941 = vmatpush1.bf16.msra.mxu0 %v4937_v44  ;;  %v5019_v44 = vld [vmem:[%s7100_s1 + $0x3e0] ss:$8 sps:$4 sm:$0xff]  }
  0x5d   : > { %914 = vmatpush2.bf16.msra.mxu1 %v4934_v43  ;;  %942 = vmatprep.subr.bf16.mxu0 %v4945_v46  ;;  %v6045_v43 = vld [vmem:[%s5676_s19 + $0x24] sm:$0xff]  ;;  %v6057_v46 = vld [vmem:[%s5676_s19 + $0x30] sm:$0xff] }
  0x5e   : > { %915 = vmatprep.subr.bf16.mxu1 %v4942_v45  ;;  %v5022_v45 = vld [vmem:[%s7100_s1 + $0x4e0] ss:$8 sps:$4 sm:$0xff]   ;;  %v6064_v31 = vcombine.high %v6045_v43, %v6057_v46 }
  0x60   : > { %943 = vmatpush1.bf16.msra.mxu0 %v4943_v48  ;;  %v5028_v48 = vld [vmem:[%s7100_s1 + $0x4d0] ss:$8 sps:$4 sm:$0xff]  }
  0x61   : > { %916 = vmatpush2.bf16.msra.mxu1 %v4940_v47  ;;  %944 = vmatprep.subr.bf16.mxu0 %v4951_v50  ;;  %v5027_v47 = vld [vmem:[%s7100_s1 + $0x3d4] ss:$8 sps:$4 sm:$0xff]   ;;  %v5036_v50 = vld [vmem:[%s7100_s1 + $0x4c4] ss:$8 sps:$4 sm:$0xff]  }
  0x62   : > { %917 = vmatprep.subr.bf16.mxu1 %v4948_v49  ;;  %v5033_v49 = vld [vmem:[%s7100_s1 + $0x3c4] ss:$8 sps:$4 sm:$0xff]  }
  0x64   : > { %945 = vmatpush1.bf16.msra.mxu0 %v4949_v52  ;;  %v5034_v52 = vld [vmem:[%s7100_s1 + $0x4c0] ss:$8 sps:$4 sm:$0xff]  }
  0x65   : > { %918 = vmatpush2.bf16.msra.mxu1 %v4946_v51  ;;  %946 = vmatprep.subr.bf16.mxu0 %v4957_v54  ;;  %v5031_v51 = vld [vmem:[%s7100_s1 + $0x3c0] ss:$8 sps:$4 sm:$0xff]   ;;  %v5042_v54 = vld [vmem:[%s7100_s1 + $0x4b4] ss:$8 sps:$4 sm:$0xff]  }
  0x66   : > { %919 = vmatprep.subr.bf16.mxu1 %v4954_v53  ;;  %v5039_v53 = vld [vmem:[%s7100_s1 + $0x3b4] ss:$8 sps:$4 sm:$0xff]  }
  0x68   : > { %947 = vmatpush1.bf16.msra.mxu0 %v4955_v56  ;;  %v5040_v56 = vld [vmem:[%s7100_s1 + $0x4b0] ss:$8 sps:$4 sm:$0xff]  }
  0x69   : > { %920 = vmatpush2.bf16.msra.mxu1 %v4952_v55  ;;  %948 = vmatprep.subr.bf16.mxu0 %v4963_v58  ;;  %v5037_v55 = vld [vmem:[%s7100_s1 + $0x3b0] ss:$8 sps:$4 sm:$0xff]   ;;  %v5048_v58 = vld [vmem:[%s7100_s1 + $0x4a4] ss:$8 sps:$4 sm:$0xff]  }
  0x6a   : > { %921 = vmatprep.subr.bf16.mxu1 %v4960_v57  ;;  %v5045_v57 = vld [vmem:[%s7100_s1 + $0x3a4] ss:$8 sps:$4 sm:$0xff]  }
  0x6c   : > { %949 = vmatpush1.bf16.msra.mxu0 %v4961_v62  ;;  %v5046_v62 = vld [vmem:[%s7100_s1 + $0x4a0] ss:$8 sps:$4 sm:$0xff]  }
  0x6d   : > { %922 = vmatpush2.bf16.msra.mxu1 %v4958_v59  ;;  %1272 = vmatprep.subr.bf16.mxu0 %v4966_v63  ;;  %v5043_v59 = vld [vmem:[%s7100_s1 + $0x3a0] ss:$8 sps:$4 sm:$0xff]   ;;  %v5051_v63 = vld [vmem:[%s7100_s1 + $0x394] ss:$8 sps:$4 sm:$0xff]  }
  0x6e   : > { %1315 = vmatprep.subr.bf16.mxu1 %v4969_v0  ;;  %v5054_v0 = vld [vmem:[%s7100_s1 + $0x494] ss:$8 sps:$4 sm:$0xff]  }
  0x6f   : > { %967 = vmatmul.mubr.bf16.vlgmr.msra.gmra.mxu0 %v5698_v34  ;;  %v4981_v34 = vld [vmem:[%s7100_s1 + $0x454] ss:$8 sps:$4 sm:$0xff]  }
  0x70   : > { %924 = vmatmul.mubr.bf16.vlgmr.msra.gmra.mxu1 %v5813_v17  ;;  %1273 = vmatpush1.bf16.msra.mxu0 %v4964_v3  ;;  %v4990_v17 = vld [vmem:[%s7100_s1 + $0x334] ss:$8 sps:$4 sm:$0xff]   ;;  %v5049_v3 = vld [vmem:[%s7100_s1 + $0x390] ss:$8 sps:$4 sm:$0xff]  }
  0x71   : > { %1316 = vmatpush1.bf16.msra.mxu1 %v4967_v4  ;;  %1274 = vmatprep.subr.bf16.mxu0 %v4972_v5  ;;  %v5052_v4 = vld [vmem:[%s7100_s1 + $0x490] ss:$8 sps:$4 sm:$0xff]   ;;  %v5057_v5 = vld [vmem:[%s7100_s1 + $0x384] ss:$8 sps:$4 sm:$0xff]  }
  0x72   : > { %1317 = vmatprep.subr.bf16.mxu1 %v4975_v6  ;;  %1347 = vmatprep.mubr.bf16.mxu1 %v5529_v2  ;;  %v5060_v6 = vld [vmem:[%s7100_s1 + $0x484] ss:$8 sps:$4 sm:$0xff]  }
  0x73   : > { %1304 = vmatprep.mubr.bf16.mxu0 %v4109_v7  ;;  %v5055_v7 = vld [vmem:[%s7100_s1 + $0x380] ss:$8 sps:$4 sm:$0xff]  }
  0x74   : > { %1275 = vmatpush1.bf16.msra.mxu0 %v4970_v8  ;;  %v5058_v8 = vld [vmem:[%s7100_s1 + $0x480] ss:$8 sps:$4 sm:$0xff]  }
  0x75   : > { %1318 = vmatpush1.bf16.msra.mxu1 %v4973_v9  ;;  %1276 = vmatprep.subr.bf16.mxu0 %v4978_v10  ;;  %v5065_v9 = vld [vmem:[%s7100_s1 + $0x574] ss:$8 sps:$4 sm:$0xff]  }
  0x76   : > { %1319 = vmatprep.subr.bf16.mxu1 %v4981_v34  ;;  %v5068_v10 = vld [vmem:[%s7100_s1 + $0x5f4] ss:$8 sps:$4 sm:$0xff]   ;;  %v5063_v34 = vld [vmem:[%s7100_s1 + $0x570] ss:$8 sps:$4 sm:$0xff]  }
  0x78   : > { %1277 = vmatpush1.bf16.msra.mxu0 %v4976_v11  ;;  %v5066_v11 = vld [vmem:[%s7100_s1 + $0x5f0] ss:$8 sps:$4 sm:$0xff]  }
  0x79   : > { %1320 = vmatpush1.bf16.msra.mxu1 %v4979_v12  ;;  %1278 = vmatprep.subr.bf16.mxu0 %v4984_v13  ;;  %v6149_v12 = vld [vmem:[%s5676_s19 + $0x38] sm:$0xf]  ;;  %v6152_v13 = vld [vmem:[%s5676_s19 + $0x44] sm:$0xf] }
  0x7a   : > { %1321 = vmatprep.subr.bf16.mxu1 %v4987_v14  ;;  %v5071_v14 = vld [vmem:[%s7100_s1 + $0x564] ss:$8 sps:$4 sm:$0xff]  }
  0x7c   : > { %1279 = vmatpush1.bf16.msra.mxu0 %v4982_v15  ;;  %v5074_v15 = vld [vmem:[%s7100_s1 + $0x5e4] ss:$8 sps:$4 sm:$0xff]  }
  0x7d   : > { %1322 = vmatpush1.bf16.msra.mxu1 %v4985_v16  ;;  %1280 = vmatprep.subr.bf16.mxu0 %v4990_v17  ;;  %v4413_v16 = vcombine.low %v6149_v12, %v6152_v13  ;;  %v5069_v17 = vld [vmem:[%s7100_s1 + $0x560] ss:$8 sps:$4 sm:$0xff]  }
  0x7e   : > { %1323 = vmatprep.subr.bf16.mxu1 %v4993_v18  ;;  %v5072_v18 = vld [vmem:[%s7100_s1 + $0x5e0] ss:$8 sps:$4 sm:$0xff]  }
  0x80   : > { %1281 = vmatpush1.bf16.msra.mxu0 %v4988_v19  ;;  %v5077_v19 = vld [vmem:[%s7100_s1 + $0x554] ss:$8 sps:$4 sm:$0xff]  }
  0x81   : > { %1324 = vmatpush1.bf16.msra.mxu1 %v4991_v20  ;;  %1282 = vmatprep.subr.bf16.mxu0 %v4996_v21  ;;  %v5083_v20 = vld [vmem:[%s7100_s1 + $0x544] ss:$8 sps:$4 sm:$0xff]  }
  0x82   : > { %1325 = vmatprep.subr.bf16.mxu1 %v4999_v22  ;;  %v5086_v21 = vld [vmem:[%s7100_s1 + $0x5c4] ss:$8 sps:$4 sm:$0xff]   ;;  %v5081_v22 = vld [vmem:[%s7100_s1 + $0x540] ss:$8 sps:$4 sm:$0xff]  }
  0x84   : > { %1283 = vmatpush1.bf16.msra.mxu0 %v4994_v23  ;;  %v5084_v23 = vld [vmem:[%s7100_s1 + $0x5c0] ss:$8 sps:$4 sm:$0xff]  }
  0x85   : > { %1326 = vmatpush1.bf16.msra.mxu1 %v4997_v24  ;;  %1284 = vmatprep.subr.bf16.mxu0 %v5002_v25  ;;  %v5089_v24 = vld [vmem:[%s7100_s1 + $0x534] ss:$8 sps:$4 sm:$0xff]  }
  0x86   : > { %1327 = vmatprep.subr.bf16.mxu1 %v5005_v26  ;;  %v5092_v25 = vld [vmem:[%s7100_s1 + $0x5b4] ss:$8 sps:$4 sm:$0xff]   ;;  %v5087_v26 = vld [vmem:[%s7100_s1 + $0x530] ss:$8 sps:$4 sm:$0xff]  }
  0x88   : > { %1285 = vmatpush1.bf16.msra.mxu0 %v5000_v27  ;;  %v5090_v27 = vld [vmem:[%s7100_s1 + $0x5b0] ss:$8 sps:$4 sm:$0xff]  }
  0x89   : > { %1328 = vmatpush1.bf16.msra.mxu1 %v5003_v28  ;;  %1286 = vmatprep.subr.bf16.mxu0 %v5008_v29  ;;  %v6209_v28 = vld [vmem:[%s5676_s19 + $0x3c] sm:$0xff]  ;;  %v5095_v29 = vld [vmem:[%s7100_s1 + $0x524] ss:$8 sps:$4 sm:$0xff]  }
  0x8a   : > { %1329 = vmatprep.subr.bf16.mxu1 %v5011_v30  ;;  %v5098_v30 = vld [vmem:[%s7100_s1 + $0x5a4] ss:$8 sps:$4 sm:$0xff]  }
  0x8c   : > { %1287 = vmatpush1.bf16.msra.mxu0 %v5006_v33  ;;  %v4411_v33 = vcombine.low %v6057_v46, %v6209_v28 }
  0x8d   : > { %1330 = vmatpush1.bf16.msra.mxu1 %v5009_v35  ;;  %1288 = vmatprep.subr.bf16.mxu0 %v5014_v37  ;;  %v5093_v35 = vld [vmem:[%s7100_s1 + $0x520] ss:$8 sps:$4 sm:$0xff]  }
  0x8e   : > { %1677 = vmatprep.subr.bf16.mxu1 %v5017_v38  ;;  %v5096_v37 = vld [vmem:[%s7100_s1 + $0x5a0] ss:$8 sps:$4 sm:$0xff]   ;;  %v5101_v38 = vld [vmem:[%s7100_s1 + $0x514] ss:$8 sps:$4 sm:$0xff]  }
  0x90   : > { %1348 = vmatmul.mubr.bf16.vlgmr.msra.gmra.mxu1 %v4110_v36  ;;  %1289 = vmatpush2.bf16.msra.mxu0 %v5012_v39  ;;  %v5025_v36 = vld [vmem:[%s7100_s1 + $0x3d0] ss:$8 sps:$4 sm:$0xff]   ;;  %v5104_v39 = vld [vmem:[%s7100_s1 + $0x594] ss:$8 sps:$4 sm:$0xff]  }
  0x91   : > { %1678 = vmatpush1.bf16.msra.mxu1 %v5015_v40  ;;  %1290 = vmatprep.subr.bf16.mxu0 %v5021_v41  ;;  %v5099_v40 = vld [vmem:[%s7100_s1 + $0x510] ss:$8 sps:$4 sm:$0xff]  }
  0x92   : > { %1679 = vmatprep.subr.bf16.mxu1 %v5024_v42  ;;  %1709 = vmatprep.mubr.bf16.mxu1 %v6064_v31  ;;  %v5102_v41 = vld [vmem:[%s7100_s1 + $0x590] ss:$8 sps:$4 sm:$0xff]   ;;  %v5107_v42 = vld [vmem:[%s7100_s1 + $0x504] ss:$8 sps:$4 sm:$0xff]  }
  0x94   : > { %1291 = vmatpush2.bf16.msra.mxu0 %v5019_v44  ;;  %v5110_v44 = vld [vmem:[%s7100_s1 + $0x584] ss:$8 sps:$4 sm:$0xff]  }
  0x95   : > { %1680 = vmatpush1.bf16.msra.mxu1 %v5022_v45  ;;  %1292 = vmatprep.subr.bf16.mxu0 %v5027_v47  ;;  %v5105_v45 = vld [vmem:[%s7100_s1 + $0x500] ss:$8 sps:$4 sm:$0xff]   ;;  %v4313_v47 = vcombine.high %v6209_v28, %v6209_v28 }
  0x96   : > { %1681 = vmatprep.subr.bf16.mxu1 %v5030_v32  ;;  %v5108_v32 = vld [vmem:[%s7100_s1 + $0x580] ss:$8 sps:$4 sm:$0xff]  }
  0x98   : > { %1293 = vmatpush2.bf16.msra.mxu0 %v5025_v36  ;;  %v4160_v36 = vld [vmem:[%s5676_s19 + $0x2c] sm:$0xf] }
  0x99   : > { %1682 = vmatpush1.bf16.msra.mxu1 %v5028_v48  ;;  %1294 = vmatprep.subr.bf16.mxu0 %v5033_v49  ;;  %v5116_v48 = vld [vmem:[%s7100_s1 + $0x674] ss:$8 sps:$4 sm:$0xff]  }
  0x9a   : > { %1683 = vmatprep.subr.bf16.mxu1 %v5036_v50  ;;  %v5119_v49 = vld [vmem:[%s7100_s1 + $0x774] ss:$8 sps:$4 sm:$0xff]   ;;  %v6260_v50 = vcombine.low %v6045_v43, %v6057_v46  ;;  %v5122_v43 = vld [vmem:[%s7100_s1 + $0x664] ss:$8 sps:$4 sm:$0xff]  }
  0x9c   : > { %1295 = vmatpush2.bf16.msra.mxu0 %v5031_v51  ;;  %v1827_v51 = vrot.slane %v6064_v31, 2  ;;  %v5125_v31 = vld [vmem:[%s7100_s1 + $0x764] ss:$8 sps:$4 sm:$0xff]  }
  0x9d   : > { %1684 = vmatpush1.bf16.msra.mxu1 %v5034_v52  ;;  %1296 = vmatprep.subr.bf16.mxu0 %v5039_v53  ;;  %v6264_v52 = vcombine.low %v4160_v36, %v6149_v12  ;;  %v1828_v53 = vrot.slane %v4313_v47, 2  ;;  %v5183_v47 = vld [vmem:[%s7100_s1 + $0x6c4] ss:$8 sps:$4 sm:$0xff]   ;;  %v5181_v36 = vld [vmem:[%s7100_s1 + $0x6c0] ss:$8 sps:$4 sm:$0xff]  }
  0x9e   : > { %1685 = vmatprep.subr.bf16.mxu1 %v5042_v54  ;;  %v5114_v54 = vld [vmem:[%s7100_s1 + $0x670] ss:$8 sps:$4 sm:$0xff]   ;;  %v5281_v12 = vld [vmem:[%s7100_s1 + $0xa54] ss:$8 sps:$4 sm:$0xff]  }
  0xa0   : > { %1297 = vmatpush2.bf16.msra.mxu0 %v5037_v55  ;;  %v5117_v55 = vld [vmem:[%s7100_s1 + $0x770] ss:$8 sps:$4 sm:$0xff]  }
  0xa1   : > { %1686 = vmatpush1.bf16.msra.mxu1 %v5040_v56  ;;  %1298 = vmatprep.subr.bf16.mxu0 %v5045_v57  ;;  %v1829_v56 = vsel %vm309_vm0, %v1827_v51, %v1828_v53  ;;  %v5120_v57 = vld [vmem:[%s7100_s1 + $0x660] ss:$8 sps:$4 sm:$0xff]   ;;  %v5192_v51 = vld [vmem:[%s7100_s1 + $0x7b4] ss:$8 sps:$4 sm:$0xff]   ;;  %v5190_v53 = vld [vmem:[%s7100_s1 + $0x7b0] ss:$8 sps:$4 sm:$0xff]  }
  0xa2   : > { %1687 = vmatprep.subr.bf16.mxu1 %v5048_v58  ;;  %v5123_v58 = vld [vmem:[%s7100_s1 + $0x760] ss:$8 sps:$4 sm:$0xff]  }
  0xa4   : > { %1299 = vmatpush2.bf16.msra.mxu0 %v5043_v59  ;;  %v5128_v59 = vld [vmem:[%s7100_s1 + $0x654] ss:$8 sps:$4 sm:$0xff]  }
  0xa5   : > { %1688 = vmatpush1.bf16.msra.mxu1 %v5046_v62  ;;  %1300 = vmatprep.subr.bf16.mxu0 %v5051_v63  ;;  %v5131_v62 = vld [vmem:[%s7100_s1 + $0x754] ss:$8 sps:$4 sm:$0xff]   ;;  %v5126_v63 = vld [vmem:[%s7100_s1 + $0x650] ss:$8 sps:$4 sm:$0xff]  }
  0xa6   : > { %1689 = vmatprep.subr.bf16.mxu1 %v5054_v0  ;;  %v5129_v0 = vld [vmem:[%s7100_s1 + $0x750] ss:$8 sps:$4 sm:$0xff]  }
  0xa8   : > { %1301 = vmatpush2.bf16.msra.mxu0 %v5049_v3  ;;  %v5134_v3 = vld [vmem:[%s7100_s1 + $0x644] ss:$8 sps:$4 sm:$0xff]  }
  0xa9   : > { %1690 = vmatpush1.bf16.msra.mxu1 %v5052_v4  ;;  %1302 = vmatprep.subr.bf16.mxu0 %v5057_v5  ;;  %v5137_v4 = vld [vmem:[%s7100_s1 + $0x744] ss:$8 sps:$4 sm:$0xff]   ;;  %v5132_v5 = vld [vmem:[%s7100_s1 + $0x640] ss:$8 sps:$4 sm:$0xff]  }
  0xaa   : > { %1691 = vmatprep.subr.bf16.mxu1 %v5060_v6  ;;  %v5135_v6 = vld [vmem:[%s7100_s1 + $0x740] ss:$8 sps:$4 sm:$0xff]  }
  0xac   : > { %1303 = vmatpush2.bf16.msra.mxu0 %v5055_v7  ;;  %v5140_v7 = vld [vmem:[%s7100_s1 + $0x634] ss:$8 sps:$4 sm:$0xff]  }
  0xad   : > { %1692 = vmatpush1.bf16.msra.mxu1 %v5058_v8  ;;  %1720 = vmatprep.subr.bf16.mxu0 %v5068_v10  ;;  %v5143_v8 = vld [vmem:[%s7100_s1 + $0x734] ss:$8 sps:$4 sm:$0xff]   ;;  %v5141_v10 = vld [vmem:[%s7100_s1 + $0x730] ss:$8 sps:$4 sm:$0xff]  }
  0xae   : > { %1693 = vmatprep.subr.bf16.mxu1 %v5065_v9  ;;  %v5138_v9 = vld [vmem:[%s7100_s1 + $0x630] ss:$8 sps:$4 sm:$0xff]  }
  0xaf   : > { %1305 = vmatmul.mubr.bf16.vlgmr.msra.gmra.mxu0 %v4108_v1  ;;  %v5078_v1 = vld [vmem:[%s7100_s1 + $0x5d0] ss:$8 sps:$4 sm:$0xff]  }
  0xb0   : > { %1721 = vmatpush1.bf16.msra.mxu0 %v5066_v11  ;;  %1752 = vmatprep.mubr.bf16.mxu0 %v5529_v2  ;;  %v5149_v11 = vld [vmem:[%s7100_s1 + $0x724] ss:$8 sps:$4 sm:$0xff]  }
  0xb1   : > { %1694 = vmatpush2.bf16.msra.mxu1 %v5063_v34  ;;  %1722 = vmatprep.subr.bf16.mxu0 %v5074_v15  ;;  %v5146_v34 = vld [vmem:[%s7100_s1 + $0x624] ss:$8 sps:$4 sm:$0xff]   ;;  %v5147_v15 = vld [vmem:[%s7100_s1 + $0x720] ss:$8 sps:$4 sm:$0xff]  }
  0xb2   : > { %1695 = vmatprep.subr.bf16.mxu1 %v5071_v14  ;;  %v5144_v14 = vld [vmem:[%s7100_s1 + $0x620] ss:$8 sps:$4 sm:$0xff]  }
  0xb4   : > { %1723 = vmatpush1.bf16.msra.mxu0 %v5072_v18  ;;  %v5155_v18 = vld [vmem:[%s7100_s1 + $0x714] ss:$8 sps:$4 sm:$0xff]  }
  0xb5   : > { %1696 = vmatpush2.bf16.msra.mxu1 %v5069_v17  ;;  %1724 = vmatprep.subr.bf16.mxu0 %v5080_v60  ;;  %v5152_v17 = vld [vmem:[%s7100_s1 + $0x614] ss:$8 sps:$4 sm:$0xff]   ;;  %v5153_v60 = vld [vmem:[%s7100_s1 + $0x710] ss:$8 sps:$4 sm:$0xff]  }
  0xb6   : > { %1697 = vmatprep.subr.bf16.mxu1 %v5077_v19  ;;  %v5150_v19 = vld [vmem:[%s7100_s1 + $0x610] ss:$8 sps:$4 sm:$0xff]  }
  0xb8   : > { %1725 = vmatpush1.bf16.msra.mxu0 %v5078_v1  ;;  %v5158_v1 = vld [vmem:[%s7100_s1 + $0x604] ss:$8 sps:$4 sm:$0xff]  }
  0xb9   : > { %1698 = vmatpush2.bf16.msra.mxu1 %v5075_v61  ;;  %1726 = vmatprep.subr.bf16.mxu0 %v5086_v21  ;;  %v4314_v61 = vcombine.low %v6152_v13, %v6152_v13  ;;  %v5156_v21 = vld [vmem:[%s7100_s1 + $0x600] ss:$8 sps:$4 sm:$0xff]   ;;  %v5276_v13 = vld [vmem:[%s7100_s1 + $0x950] ss:$8 sps:$4 sm:$0xff]  }
  0xba   : > { %1699 = vmatprep.subr.bf16.mxu1 %v5083_v20  ;;  %v5161_v20 = vld [vmem:[%s7100_s1 + $0x704] ss:$8 sps:$4 sm:$0xff]  }
  0xbc   : > { %1727 = vmatpush1.bf16.msra.mxu0 %v5084_v23  ;;  %v5164_v23 = vld [vmem:[%s7100_s1 + $0x6f4] ss:$8 sps:$4 sm:$0xff]  }
  0xbd   : > { %1700 = vmatpush2.bf16.msra.mxu1 %v5081_v22  ;;  %1728 = vmatprep.subr.bf16.mxu0 %v5092_v25  ;;  %v5159_v22 = vld [vmem:[%s7100_s1 + $0x700] ss:$8 sps:$4 sm:$0xff]   ;;  %v1831_v25 = vrot.slane %v4314_v61, 2  ;;  %v5233_v61 = vld [vmem:[%s7100_s1 + $0x844] ss:$8 sps:$4 sm:$0xff]  }
  0xbe   : > { %1701 = vmatprep.subr.bf16.mxu1 %v5089_v24  ;;  %v1830_v24 = vrot.slane %v6264_v52, 2 }
  0xc0   : > { %1729 = vmatpush1.bf16.msra.mxu0 %v5090_v27  ;;  %v5162_v27 = vld [vmem:[%s7100_s1 + $0x6f0] ss:$8 sps:$4 sm:$0xff]  }
  0xc1   : > { %1702 = vmatpush2.bf16.msra.mxu1 %v5087_v26  ;;  %1730 = vmatprep.subr.bf16.mxu0 %v5098_v30  ;;  %v5167_v26 = vld [vmem:[%s7100_s1 + $0x7f4] ss:$8 sps:$4 sm:$0xff]   ;;  %v1832_v30 = vsel %vm309_vm0, %v1830_v24, %v1831_v25  ;;  %v5237_v24 = vld [vmem:[%s7100_s1 + $0x830] ss:$8 sps:$4 sm:$0xff]  }
  0xc2   : > { %1703 = vmatprep.subr.bf16.mxu1 %v5095_v29  ;;  %v5165_v29 = vld [vmem:[%s7100_s1 + $0x7f0] ss:$8 sps:$4 sm:$0xff]  }
  0xc3   : > { %v5240_v25 = vld [vmem:[%s7100_s1 + $0x8b0] ss:$8 sps:$4 sm:$0xff]  }
  0xc4   : > { %1731 = vmatpush1.bf16.msra.mxu0 %v5096_v37  ;;  %v5174_v37 = vld [vmem:[%s7100_s1 + $0x7e4] ss:$8 sps:$4 sm:$0xff]  }
  0xc5   : > { %1704 = vmatpush2.bf16.msra.mxu1 %v5093_v35  ;;  %1732 = vmatprep.subr.bf16.mxu0 %v5104_v39  ;;  %v5171_v35 = vld [vmem:[%s7100_s1 + $0x6e4] ss:$8 sps:$4 sm:$0xff]   ;;  %v5169_v39 = vld [vmem:[%s7100_s1 + $0x6e0] ss:$8 sps:$4 sm:$0xff]  }
  0xc6   : > { %1705 = vmatprep.subr.bf16.mxu1 %v5101_v38  ;;  %v4412_v38 = vcombine.high %v6057_v46, %v6209_v28  ;;  %v5278_v46 = vld [vmem:[%s7100_s1 + $0x954] ss:$8 sps:$4 sm:$0xff]  }
  0xc8   : > { %1733 = vmatpush1.bf16.msra.mxu0 %v5102_v41  ;;  %v5177_v41 = vld [vmem:[%s7100_s1 + $0x6d4] ss:$8 sps:$4 sm:$0xff]  }
  0xc9   : > { %1706 = vmatpush2.bf16.msra.mxu1 %v5099_v40  ;;  %1734 = vmatprep.subr.bf16.mxu0 %v5110_v44  ;;  %v5172_v40 = vld [vmem:[%s7100_s1 + $0x7e0] ss:$8 sps:$4 sm:$0xff]   ;;  %v5175_v44 = vld [vmem:[%s7100_s1 + $0x6d0] ss:$8 sps:$4 sm:$0xff]  }
  0xca   : > { %1707 = vmatprep.subr.bf16.mxu1 %v5107_v42  ;;  %v5180_v42 = vld [vmem:[%s7100_s1 + $0x7d4] ss:$8 sps:$4 sm:$0xff]  }
  0xcc   : > { %1735 = vmatpush1.bf16.msra.mxu0 %v5108_v32  ;;  %v5186_v32 = vld [vmem:[%s7100_s1 + $0x7c4] ss:$8 sps:$4 sm:$0xff]  }
  0xcd   : > { %1708 = vmatpush2.bf16.msra.mxu1 %v5105_v45  ;;  %2076 = vmatprep.subr.bf16.mxu0 %v5116_v48  ;;  %v5178_v45 = vld [vmem:[%s7100_s1 + $0x7d0] ss:$8 sps:$4 sm:$0xff]   ;;  %v5184_v48 = vld [vmem:[%s7100_s1 + $0x7c0] ss:$8 sps:$4 sm:$0xff]  }
  0xce   : > { %2119 = vmatprep.subr.bf16.mxu1 %v5119_v49  ;;  %v5189_v49 = vld [vmem:[%s7100_s1 + $0x6b4] ss:$8 sps:$4 sm:$0xff]  }
  0xcf   : > { %1753 = vmatmul.mubr.bf16.vlgmr.msra.gmra.mxu0 %v6264_v52  ;;  %v5187_v52 = vld [vmem:[%s7100_s1 + $0x6b0] ss:$8 sps:$4 sm:$0xff]  }
  0xd0   : > { %1710 = vmatmul.mubr.bf16.vlgmr.msra.gmra.mxu1 %v6260_v50  ;;  %2077 = vmatpush1.bf16.msra.mxu0 %v5114_v54  ;;  %v5195_v54 = vld [vmem:[%s7100_s1 + $0x6a4] ss:$8 sps:$4 sm:$0xff]  }
  0xd1   : > { %2120 = vmatpush1.bf16.msra.mxu1 %v5117_v55  ;;  %2078 = vmatprep.subr.bf16.mxu0 %v5122_v43  ;;  %v5198_v55 = vld [vmem:[%s7100_s1 + $0x7a4] ss:$8 sps:$4 sm:$0xff]   ;;  %v5193_v43 = vld [vmem:[%s7100_s1 + $0x6a0] ss:$8 sps:$4 sm:$0xff]  }
  0xd2   : > { %2121 = vmatprep.subr.bf16.mxu1 %v5125_v31  ;;  %2151 = vmatprep.mubr.bf16.mxu1 %v5529_v2  ;;  %v5196_v31 = vld [vmem:[%s7100_s1 + $0x7a0] ss:$8 sps:$4 sm:$0xff]  }
  0xd3   : > { %2108 = vmatprep.mubr.bf16.mxu0 %v1829_v56  ;;  %v5201_v56 = vld [vmem:[%s7100_s1 + $0x694] ss:$8 sps:$4 sm:$0xff]  }
  0xd4   : > { %2079 = vmatpush1.bf16.msra.mxu0 %v5120_v57  ;;  %v5204_v57 = vld [vmem:[%s7100_s1 + $0x794] ss:$8 sps:$4 sm:$0xff]  }
  0xd5   : > { %2122 = vmatpush1.bf16.msra.mxu1 %v5123_v58  ;;  %2080 = vmatprep.subr.bf16.mxu0 %v5128_v59  ;;  %v5199_v58 = vld [vmem:[%s7100_s1 + $0x690] ss:$8 sps:$4 sm:$0xff]  }
  0xd6   : > { %2123 = vmatprep.subr.bf16.mxu1 %v5131_v62  ;;  %v5202_v59 = vld [vmem:[%s7100_s1 + $0x790] ss:$8 sps:$4 sm:$0xff]   ;;  %v4312_v62 = vcombine.low %v6209_v28, %v6209_v28  ;;  %v5284_v28 = vld [vmem:[%s7100_s1 + $0x944] ss:$8 sps:$4 sm:$0xff]  }
  0xd8   : > { %2081 = vmatpush1.bf16.msra.mxu0 %v5126_v63  ;;  %v5207_v63 = vld [vmem:[%s7100_s1 + $0x684] ss:$8 sps:$4 sm:$0xff]  }
  0xd9   : > { %2124 = vmatpush1.bf16.msra.mxu1 %v5129_v0  ;;  %2082 = vmatprep.subr.bf16.mxu0 %v5134_v3  ;;  %v5210_v0 = vld [vmem:[%s7100_s1 + $0x784] ss:$8 sps:$4 sm:$0xff]   ;;  %v1824_v3 = vrot.slane %v6260_v50, 2  ;;  %v5218_v50 = vld [vmem:[%s7100_s1 + $0x8f4] ss:$8 sps:$4 sm:$0xff]  }
  0xda   : > { %2125 = vmatprep.subr.bf16.mxu1 %v5137_v4  ;;  %v5205_v4 = vld [vmem:[%s7100_s1 + $0x680] ss:$8 sps:$4 sm:$0xff]  }
  0xdc   : > { %2083 = vmatpush1.bf16.msra.mxu0 %v5132_v5  ;;  %v5208_v5 = vld [vmem:[%s7100_s1 + $0x780] ss:$8 sps:$4 sm:$0xff]  }
  0xdd   : > { %2126 = vmatpush1.bf16.msra.mxu1 %v5135_v6  ;;  %2084 = vmatprep.subr.bf16.mxu0 %v5140_v7  ;;  %v1825_v6 = vrot.slane %v4312_v62, 2  ;;  %v5215_v7 = vld [vmem:[%s7100_s1 + $0x874] ss:$8 sps:$4 sm:$0xff]   ;;  %v5296_v62 = vld [vmem:[%s7100_s1 + $0x924] ss:$8 sps:$4 sm:$0xff]  }
  0xde   : > { %2127 = vmatprep.subr.bf16.mxu1 %v5143_v8 }
  0xdf   : > { %v1826_v8 = vsel %vm309_vm0, %v1824_v3, %v1825_v6  ;;  %v5297_v3 = vld [vmem:[%s7100_s1 + $0xa20] ss:$8 sps:$4 sm:$0xff]   ;;  %v5300_v6 = vld [vmem:[%s7100_s1 + $0x910] ss:$8 sps:$4 sm:$0xff]  }
  0xe0   : > { %2085 = vmatpush1.bf16.msra.mxu0 %v5138_v9  ;;  %v5213_v9 = vld [vmem:[%s7100_s1 + $0x870] ss:$8 sps:$4 sm:$0xff]  }
  0xe1   : > { %2128 = vmatpush1.bf16.msra.mxu1 %v5141_v10  ;;  %2086 = vmatprep.subr.bf16.mxu0 %v5146_v34  ;;  %v5216_v10 = vld [vmem:[%s7100_s1 + $0x8f0] ss:$8 sps:$4 sm:$0xff]   ;;  %v5221_v34 = vld [vmem:[%s7100_s1 + $0x864] ss:$8 sps:$4 sm:$0xff]  }
  0xe2   : > { %2129 = vmatprep.subr.bf16.mxu1 %v5149_v11  ;;  %v5224_v11 = vld [vmem:[%s7100_s1 + $0x8e4] ss:$8 sps:$4 sm:$0xff]  }
  0xe4   : > { %2087 = vmatpush1.bf16.msra.mxu0 %v5144_v14  ;;  %v5219_v14 = vld [vmem:[%s7100_s1 + $0x860] ss:$8 sps:$4 sm:$0xff]  }
  0xe5   : > { %2130 = vmatpush1.bf16.msra.mxu1 %v5147_v15  ;;  %2088 = vmatprep.subr.bf16.mxu0 %v5152_v17  ;;  %v5222_v15 = vld [vmem:[%s7100_s1 + $0x8e0] ss:$8 sps:$4 sm:$0xff]   ;;  %v5227_v17 = vld [vmem:[%s7100_s1 + $0x854] ss:$8 sps:$4 sm:$0xff]  }
  0xe6   : > { %2131 = vmatprep.subr.bf16.mxu1 %v5155_v18  ;;  %v5230_v18 = vld [vmem:[%s7100_s1 + $0x8d4] ss:$8 sps:$4 sm:$0xff]  }
  0xe8   : > { %2089 = vmatpush1.bf16.msra.mxu0 %v5150_v19  ;;  %v5225_v19 = vld [vmem:[%s7100_s1 + $0x850] ss:$8 sps:$4 sm:$0xff]  }
  0xe9   : > { %2132 = vmatpush1.bf16.msra.mxu1 %v5153_v60  ;;  %2090 = vmatprep.subr.bf16.mxu0 %v5158_v1  ;;  %v5228_v60 = vld [vmem:[%s7100_s1 + $0x8d0] ss:$8 sps:$4 sm:$0xff]   ;;  %v5236_v1 = vld [vmem:[%s7100_s1 + $0x8c4] ss:$8 sps:$4 sm:$0xff]  }
  0xea   : > { %2133 = vmatprep.subr.bf16.mxu1 %v5161_v20  ;;  %v5231_v20 = vld [vmem:[%s7100_s1 + $0x840] ss:$8 sps:$4 sm:$0xff]  }
  0xec   : > { %2091 = vmatpush1.bf16.msra.mxu0 %v5156_v21  ;;  %v5234_v21 = vld [vmem:[%s7100_s1 + $0x8c0] ss:$8 sps:$4 sm:$0xff]  }
  0xed   : > { %2134 = vmatpush1.bf16.msra.mxu1 %v5159_v22  ;;  %2092 = vmatprep.subr.bf16.mxu0 %v5164_v23  ;;  %v5239_v22 = vld [vmem:[%s7100_s1 + $0x834] ss:$8 sps:$4 sm:$0xff]  }
  0xee   : > { %2461 = vmatprep.subr.bf16.mxu1 %v5167_v26  ;;  %v5242_v23 = vld [vmem:[%s7100_s1 + $0x8b4] ss:$8 sps:$4 sm:$0xff]   ;;  %v5245_v26 = vld [vmem:[%s7100_s1 + $0x824] ss:$8 sps:$4 sm:$0xff]  }
  0xf0   : > { %2152 = vmatmul.mubr.bf16.vlgmr.msra.gmra.mxu1 %v1832_v30  ;;  %2093 = vmatpush2.bf16.msra.mxu0 %v5162_v27  ;;  %v5248_v27 = vld [vmem:[%s7100_s1 + $0x8a4] ss:$8 sps:$4 sm:$0xff]   ;;  %v5246_v30 = vld [vmem:[%s7100_s1 + $0x8a0] ss:$8 sps:$4 sm:$0xff]  }
  0xf1   : > { %2462 = vmatpush1.bf16.msra.mxu1 %v5165_v29  ;;  %2094 = vmatprep.subr.bf16.mxu0 %v5171_v35  ;;  %v5243_v29 = vld [vmem:[%s7100_s1 + $0x820] ss:$8 sps:$4 sm:$0xff]   ;;  %v5251_v35 = vld [vmem:[%s7100_s1 + $0x814] ss:$8 sps:$4 sm:$0xff]  }
  0xf2   : > { %2463 = vmatprep.subr.bf16.mxu1 %v5174_v37  ;;  %2493 = vmatprep.mubr.bf16.mxu1 %v4412_v38  ;;  %v5254_v37 = vld [vmem:[%s7100_s1 + $0x894] ss:$8 sps:$4 sm:$0xff]   ;;  %v5249_v38 = vld [vmem:[%s7100_s1 + $0x810] ss:$8 sps:$4 sm:$0xff]  }
  0xf4   : > { %2095 = vmatpush2.bf16.msra.mxu0 %v5169_v39  ;;  %v5252_v39 = vld [vmem:[%s7100_s1 + $0x890] ss:$8 sps:$4 sm:$0xff]  }
  0xf5   : > { %2464 = vmatpush1.bf16.msra.mxu1 %v5172_v40  ;;  %2096 = vmatprep.subr.bf16.mxu0 %v5177_v41  ;;  %v5257_v40 = vld [vmem:[%s7100_s1 + $0x804] ss:$8 sps:$4 sm:$0xff]  }
  0xf6   : > { %2465 = vmatprep.subr.bf16.mxu1 %v5180_v42  ;;  %v5260_v41 = vld [vmem:[%s7100_s1 + $0x884] ss:$8 sps:$4 sm:$0xff]   ;;  %v5255_v42 = vld [vmem:[%s7100_s1 + $0x800] ss:$8 sps:$4 sm:$0xff]  }
  0xf8   : > { %2097 = vmatpush2.bf16.msra.mxu0 %v5175_v44  ;;  %v5258_v44 = vld [vmem:[%s7100_s1 + $0x880] ss:$8 sps:$4 sm:$0xff]  }
  0xf9   : > { %2466 = vmatpush1.bf16.msra.mxu1 %v5178_v45  ;;  %2098 = vmatprep.subr.bf16.mxu0 %v5183_v47  ;;  %v5266_v45 = vld [vmem:[%s7100_s1 + $0x974] ss:$8 sps:$4 sm:$0xff]  }
  0xfa   : > { %2467 = vmatprep.subr.bf16.mxu1 %v5186_v32  ;;  %v5269_v47 = vld [vmem:[%s7100_s1 + $0xa74] ss:$8 sps:$4 sm:$0xff]   ;;  %v6570_v32 = vld [vmem:[%s5676_s19 + $0x48] sm:$0xff] }
  0xfc   : > { %2099 = vmatpush2.bf16.msra.mxu0 %v5181_v36  ;;  %v6573_v36 = vld [vmem:[%s5676_s19 + $0x54] sm:$0xff] }
  0xfd   : > { %2468 = vmatpush1.bf16.msra.mxu1 %v5184_v48  ;;  %2100 = vmatprep.subr.bf16.mxu0 %v5189_v49  ;;  %v5264_v48 = vld [vmem:[%s7100_s1 + $0x970] ss:$8 sps:$4 sm:$0xff]  }
  0xfe   : > { %2469 = vmatprep.subr.bf16.mxu1 %v5192_v51  ;;  %v5267_v49 = vld [vmem:[%s7100_s1 + $0xa70] ss:$8 sps:$4 sm:$0xff]   ;;  %v5272_v51 = vld [vmem:[%s7100_s1 + $0x964] ss:$8 sps:$4 sm:$0xff]  }
 0x100   : > { %2101 = vmatpush2.bf16.msra.mxu0 %v5187_v52  ;;  %v5275_v52 = vld [vmem:[%s7100_s1 + $0xa64] ss:$8 sps:$4 sm:$0xff]  }
 0x101   : > { %2470 = vmatpush1.bf16.msra.mxu1 %v5190_v53  ;;  %2102 = vmatprep.subr.bf16.mxu0 %v5195_v54  ;;  %v6589_v53 = vcombine.high %v6570_v32, %v6573_v36  ;;  %v5270_v54 = vld [vmem:[%s7100_s1 + $0x960] ss:$8 sps:$4 sm:$0xff]  }
 0x102   : > { %2471 = vmatprep.subr.bf16.mxu1 %v5198_v55  ;;  %v5273_v55 = vld [vmem:[%s7100_s1 + $0xa60] ss:$8 sps:$4 sm:$0xff]  }
 0x104   : > { %2103 = vmatpush2.bf16.msra.mxu0 %v5193_v43  ;;  %v5282_v43 = vld [vmem:[%s7100_s1 + $0x940] ss:$8 sps:$4 sm:$0xff]  }
 0x105   : > { %2472 = vmatpush1.bf16.msra.mxu1 %v5196_v31  ;;  %2104 = vmatprep.subr.bf16.mxu0 %v5201_v56  ;;  %v5285_v31 = vld [vmem:[%s7100_s1 + $0xa40] ss:$8 sps:$4 sm:$0xff]   ;;  %v5290_v56 = vld [vmem:[%s7100_s1 + $0x934] ss:$8 sps:$4 sm:$0xff]  }
 0x106   : > { %2473 = vmatprep.subr.bf16.mxu1 %v5204_v57  ;;  %v5293_v57 = vld [vmem:[%s7100_s1 + $0xa34] ss:$8 sps:$4 sm:$0xff]  }
 0x108   : > { %2105 = vmatpush2.bf16.msra.mxu0 %v5199_v58  ;;  %v5288_v58 = vld [vmem:[%s7100_s1 + $0x930] ss:$8 sps:$4 sm:$0xff]  }
 0x109   : > { %2474 = vmatpush1.bf16.msra.mxu1 %v5202_v59  ;;  %2106 = vmatprep.subr.bf16.mxu0 %v5207_v63  ;;  %v5291_v59 = vld [vmem:[%s7100_s1 + $0xa30] ss:$8 sps:$4 sm:$0xff]   ;;  %v5299_v63 = vld [vmem:[%s7100_s1 + $0xa24] ss:$8 sps:$4 sm:$0xff]  }
 0x10a   : > { %2475 = vmatprep.subr.bf16.mxu1 %v5210_v0  ;;  %v5294_v0 = vld [vmem:[%s7100_s1 + $0x920] ss:$8 sps:$4 sm:$0xff]  }
 0x10c   : > { %2107 = vmatpush2.bf16.msra.mxu0 %v5205_v4  ;;  %v5302_v4 = vld [vmem:[%s7100_s1 + $0x914] ss:$8 sps:$4 sm:$0xff]  }
 0x10d   : > { %2476 = vmatpush1.bf16.msra.mxu1 %v5208_v5  ;;  %2504 = vmatprep.subr.bf16.mxu0 %v5218_v50  ;;  %v5305_v5 = vld [vmem:[%s7100_s1 + $0xa14] ss:$8 sps:$4 sm:$0xff]   ;;  %v6666_v50 = vld [vmem:[%s5676_s19 + $0x60] sm:$0xff] }
 0x10e   : > { %2477 = vmatprep.subr.bf16.mxu1 %v5215_v7  ;;  %v5303_v7 = vld [vmem:[%s7100_s1 + $0xa10] ss:$8 sps:$4 sm:$0xff]  }
 0x10f   : > { %2109 = vmatmul.mubr.bf16.vlgmr.msra.gmra.mxu0 %v1826_v8  ;;  %v5308_v8 = vld [vmem:[%s7100_s1 + $0x904] ss:$8 sps:$4 sm:$0xff]  }
 0x110   : > { %2505 = vmatpush1.bf16.msra.mxu0 %v5216_v10  ;;  %2536 = vmatprep.mubr.bf16.mxu0 %v5529_v2  ;;  %v5306_v10 = vld [vmem:[%s7100_s1 + $0x900] ss:$8 sps:$4 sm:$0xff]  }
 0x111   : > { %2478 = vmatpush2.bf16.msra.mxu1 %v5213_v9  ;;  %2506 = vmatprep.subr.bf16.mxu0 %v5224_v11  ;;  %v5311_v9 = vld [vmem:[%s7100_s1 + $0xa04] ss:$8 sps:$4 sm:$0xff]   ;;  %v5309_v11 = vld [vmem:[%s7100_s1 + $0xa00] ss:$8 sps:$4 sm:$0xff]  }
 0x112   : > { %2479 = vmatprep.subr.bf16.mxu1 %v5221_v34  ;;  %v4616_v34 = vcombine.high %v6666_v50, %v6666_v50 }
 0x114   : > { %2507 = vmatpush1.bf16.msra.mxu0 %v5222_v15  ;;  %v6684_v15 = vld [vmem:[%s5676_s19 + $0x5c] sm:$0xf] }
 0x115   : > { %2480 = vmatpush2.bf16.msra.mxu1 %v5219_v14  ;;  %2508 = vmatprep.subr.bf16.mxu0 %v5230_v18  ;;  %v4463_v14 = vld [vmem:[%s5676_s19 + $0x50] sm:$0xf]  ;;  %v5317_v18 = vld [vmem:[%s7100_s1 + $0xaf4] ss:$8 sps:$4 sm:$0xff]  }
 0x116   : > { %2481 = vmatprep.subr.bf16.mxu1 %v5227_v17  ;;  %v5314_v17 = vld [vmem:[%s7100_s1 + $0x9f4] ss:$8 sps:$4 sm:$0xff]  }
 0x118   : > { %2509 = vmatpush1.bf16.msra.mxu0 %v5228_v60  ;;  %v3016_v60 = vrot.slane %v6589_v53, 2 }
 0x119   : > { %2482 = vmatpush2.bf16.msra.mxu1 %v5225_v19  ;;  %2510 = vmatprep.subr.bf16.mxu0 %v5236_v1  ;;  %v6693_v19 = vcombine.low %v4463_v14, %v6684_v15  ;;  %v5312_v1 = vld [vmem:[%s7100_s1 + $0x9f0] ss:$8 sps:$4 sm:$0xff]   ;;  %v5393_v14 = vld [vmem:[%s7100_s1 + $0xb20] ss:$8 sps:$4 sm:$0xff]  }
 0x11a   : > { %2483 = vmatprep.subr.bf16.mxu1 %v5233_v61  ;;  %v3017_v61 = vrot.slane %v4616_v34, 2  ;;  %v5395_v34 = vld [vmem:[%s7100_s1 + $0xb24] ss:$8 sps:$4 sm:$0xff]  }
 0x11c   : > { %2511 = vmatpush1.bf16.msra.mxu0 %v5234_v21  ;;  %v5321_v21 = vld [vmem:[%s7100_s1 + $0x9e4] ss:$8 sps:$4 sm:$0xff]  }
 0x11d   : > { %2484 = vmatpush2.bf16.msra.mxu1 %v5231_v20  ;;  %2512 = vmatprep.subr.bf16.mxu0 %v5242_v23  ;;  %v5315_v20 = vld [vmem:[%s7100_s1 + $0xaf0] ss:$8 sps:$4 sm:$0xff]   ;;  %v3018_v23 = vsel %vm309_vm0, %v3016_v60, %v3017_v61  ;;  %v5404_v60 = vld [vmem:[%s7100_s1 + $0xb94] ss:$8 sps:$4 sm:$0xff]   ;;  %v6873_v61 = vld [vmem:[%s5676_s19 + $0x68] sm:$0xf] }
 0x11e   : > { %2485 = vmatprep.subr.bf16.mxu1 %v5239_v22  ;;  %v5324_v22 = vld [vmem:[%s7100_s1 + $0xae4] ss:$8 sps:$4 sm:$0xff]  }
 0x120   : > { %2513 = vmatpush1.bf16.msra.mxu0 %v5240_v25  ;;  %v5322_v25 = vld [vmem:[%s7100_s1 + $0xae0] ss:$8 sps:$4 sm:$0xff]  }
 0x121   : > { %2486 = vmatpush2.bf16.msra.mxu1 %v5237_v24  ;;  %2514 = vmatprep.subr.bf16.mxu0 %v5248_v27  ;;  %v5319_v24 = vld [vmem:[%s7100_s1 + $0x9e0] ss:$8 sps:$4 sm:$0xff]   ;;  %v5330_v27 = vld [vmem:[%s7100_s1 + $0xad4] ss:$8 sps:$4 sm:$0xff]  }
 0x122   : > { %2487 = vmatprep.subr.bf16.mxu1 %v5245_v26  ;;  %v5327_v26 = vld [vmem:[%s7100_s1 + $0x9d4] ss:$8 sps:$4 sm:$0xff]  }
 0x124   : > { %2515 = vmatpush1.bf16.msra.mxu0 %v5246_v30  ;;  %v5328_v30 = vld [vmem:[%s7100_s1 + $0xad0] ss:$8 sps:$4 sm:$0xff]  }
 0x125   : > { %2488 = vmatpush2.bf16.msra.mxu1 %v5243_v29  ;;  %2516 = vmatprep.subr.bf16.mxu0 %v5254_v37  ;;  %v5325_v29 = vld [vmem:[%s7100_s1 + $0x9d0] ss:$8 sps:$4 sm:$0xff]   ;;  %v5336_v37 = vld [vmem:[%s7100_s1 + $0xac4] ss:$8 sps:$4 sm:$0xff]  }
 0x126   : > { %2489 = vmatprep.subr.bf16.mxu1 %v5251_v35  ;;  %v5333_v35 = vld [vmem:[%s7100_s1 + $0x9c4] ss:$8 sps:$4 sm:$0xff]  }
 0x128   : > { %2517 = vmatpush1.bf16.msra.mxu0 %v5252_v39  ;;  %v5334_v39 = vld [vmem:[%s7100_s1 + $0xac0] ss:$8 sps:$4 sm:$0xff]  }
 0x129   : > { %2490 = vmatpush2.bf16.msra.mxu1 %v5249_v38  ;;  %2518 = vmatprep.subr.bf16.mxu0 %v5260_v41  ;;  %v5331_v38 = vld [vmem:[%s7100_s1 + $0x9c0] ss:$8 sps:$4 sm:$0xff]   ;;  %v5342_v41 = vld [vmem:[%s7100_s1 + $0xab4] ss:$8 sps:$4 sm:$0xff]  }
 0x12a   : > { %2491 = vmatprep.subr.bf16.mxu1 %v5257_v40  ;;  %v5339_v40 = vld [vmem:[%s7100_s1 + $0x9b4] ss:$8 sps:$4 sm:$0xff]  }
 0x12c   : > { %2519 = vmatpush1.bf16.msra.mxu0 %v5258_v44  ;;  %v5340_v44 = vld [vmem:[%s7100_s1 + $0xab0] ss:$8 sps:$4 sm:$0xff]  }
 0x12d   : > { %2492 = vmatpush2.bf16.msra.mxu1 %v5255_v42  ;;  %2866 = vmatprep.subr.bf16.mxu0 %v5266_v45  ;;  %v5337_v42 = vld [vmem:[%s7100_s1 + $0x9b0] ss:$8 sps:$4 sm:$0xff]   ;;  %v5345_v45 = vld [vmem:[%s7100_s1 + $0x9a4] ss:$8 sps:$4 sm:$0xff]  }
 0x12e   : > { %2909 = vmatprep.subr.bf16.mxu1 %v5269_v47  ;;  %v5348_v47 = vld [vmem:[%s7100_s1 + $0xaa4] ss:$8 sps:$4 sm:$0xff]  }
 0x12f   : > { %2537 = vmatmul.mubr.bf16.vlgmr.msra.gmra.mxu0 %v4413_v16  ;;  %v5279_v16 = vld [vmem:[%s7100_s1 + $0xa50] ss:$8 sps:$4 sm:$0xff]  }
 0x130   : > { %2494 = vmatmul.mubr.bf16.vlgmr.msra.gmra.mxu1 %v4411_v33  ;;  %2867 = vmatpush1.bf16.msra.mxu0 %v5264_v48  ;;  %v5287_v33 = vld [vmem:[%s7100_s1 + $0xa44] ss:$8 sps:$4 sm:$0xff]   ;;  %v5343_v48 = vld [vmem:[%s7100_s1 + $0x9a0] ss:$8 sps:$4 sm:$0xff]  }
 0x131   : > { %2910 = vmatpush1.bf16.msra.mxu1 %v5267_v49  ;;  %2868 = vmatprep.subr.bf16.mxu0 %v5272_v51  ;;  %v5346_v49 = vld [vmem:[%s7100_s1 + $0xaa0] ss:$8 sps:$4 sm:$0xff]   ;;  %v5351_v51 = vld [vmem:[%s7100_s1 + $0x994] ss:$8 sps:$4 sm:$0xff]  }
 0x132   : > { %2911 = vmatprep.subr.bf16.mxu1 %v5275_v52  ;;  %2941 = vmatprep.mubr.bf16.mxu1 %v5529_v2  ;;  %v5354_v52 = vld [vmem:[%s7100_s1 + $0xa94] ss:$8 sps:$4 sm:$0xff]  }
 0x133   : > { %2898 = vmatprep.mubr.bf16.mxu0 %v6589_v53  ;;  %v5349_v53 = vld [vmem:[%s7100_s1 + $0x990] ss:$8 sps:$4 sm:$0xff]  }
 0x134   : > { %2869 = vmatpush1.bf16.msra.mxu0 %v5270_v54  ;;  %v5352_v54 = vld [vmem:[%s7100_s1 + $0xa90] ss:$8 sps:$4 sm:$0xff]  }
 0x135   : > { %2912 = vmatpush1.bf16.msra.mxu1 %v5273_v55  ;;  %2870 = vmatprep.subr.bf16.mxu0 %v5278_v46  ;;  %v5357_v55 = vld [vmem:[%s7100_s1 + $0x984] ss:$8 sps:$4 sm:$0xff]  }
 0x136   : > { %2913 = vmatprep.subr.bf16.mxu1 %v5281_v12  ;;  %v5360_v46 = vld [vmem:[%s7100_s1 + $0xa84] ss:$8 sps:$4 sm:$0xff]   ;;  %v5355_v12 = vld [vmem:[%s7100_s1 + $0x980] ss:$8 sps:$4 sm:$0xff]  }
 0x138   : > { %2871 = vmatpush1.bf16.msra.mxu0 %v5276_v13  ;;  %v5358_v13 = vld [vmem:[%s7100_s1 + $0xa80] ss:$8 sps:$4 sm:$0xff]  }
 0x139   : > { %2914 = vmatpush1.bf16.msra.mxu1 %v5279_v16  ;;  %2872 = vmatprep.subr.bf16.mxu0 %v5284_v28  ;;  %v5365_v16 = vld [vmem:[%s7100_s1 + $0xb74] ss:$8 sps:$4 sm:$0xff]  }
 0x13a   : > { %2915 = vmatprep.subr.bf16.mxu1 %v5287_v33  ;;  %v5368_v28 = vld [vmem:[%s7100_s1 + $0xbf4] ss:$8 sps:$4 sm:$0xff]   ;;  %v6796_v33 = vcombine.low %v6570_v32, %v6573_v36  ;;  %v5374_v32 = vld [vmem:[%s7100_s1 + $0xbe4] ss:$8 sps:$4 sm:$0xff]  }
 0x13c   : > { %2873 = vmatpush1.bf16.msra.mxu0 %v5282_v43  ;;  %v5363_v43 = vld [vmem:[%s7100_s1 + $0xb70] ss:$8 sps:$4 sm:$0xff]  }
 0x13d   : > { %2916 = vmatpush1.bf16.msra.mxu1 %v5285_v31  ;;  %2874 = vmatprep.subr.bf16.mxu0 %v5290_v56  ;;  %v5366_v31 = vld [vmem:[%s7100_s1 + $0xbf0] ss:$8 sps:$4 sm:$0xff]   ;;  %v5371_v56 = vld [vmem:[%s7100_s1 + $0xb64] ss:$8 sps:$4 sm:$0xff]  }
 0x13e   : > { %2917 = vmatprep.subr.bf16.mxu1 %v5293_v57  ;;  %v5369_v57 = vld [vmem:[%s7100_s1 + $0xb60] ss:$8 sps:$4 sm:$0xff]  }
 0x140   : > { %2875 = vmatpush1.bf16.msra.mxu0 %v5288_v58  ;;  %v5372_v58 = vld [vmem:[%s7100_s1 + $0xbe0] ss:$8 sps:$4 sm:$0xff]  }
 0x141   : > { %2918 = vmatpush1.bf16.msra.mxu1 %v5291_v59  ;;  %2876 = vmatprep.subr.bf16.mxu0 %v5296_v62  ;;  %v5377_v59 = vld [vmem:[%s7100_s1 + $0xb54] ss:$8 sps:$4 sm:$0xff]  }
 0x142   : > { %2919 = vmatprep.subr.bf16.mxu1 %v5299_v63  ;;  %v5380_v62 = vld [vmem:[%s7100_s1 + $0xbd4] ss:$8 sps:$4 sm:$0xff]   ;;  %v5375_v63 = vld [vmem:[%s7100_s1 + $0xb50] ss:$8 sps:$4 sm:$0xff]  }
 0x144   : > { %2877 = vmatpush1.bf16.msra.mxu0 %v5294_v0  ;;  %v5378_v0 = vld [vmem:[%s7100_s1 + $0xbd0] ss:$8 sps:$4 sm:$0xff]  }
 0x145   : > { %2920 = vmatpush1.bf16.msra.mxu1 %v5297_v3  ;;  %2878 = vmatprep.subr.bf16.mxu0 %v5302_v4  ;;  %v5383_v3 = vld [vmem:[%s7100_s1 + $0xb44] ss:$8 sps:$4 sm:$0xff]  }
 0x146   : > { %2921 = vmatprep.subr.bf16.mxu1 %v5305_v5  ;;  %v5386_v4 = vld [vmem:[%s7100_s1 + $0xbc4] ss:$8 sps:$4 sm:$0xff]   ;;  %v5381_v5 = vld [vmem:[%s7100_s1 + $0xb40] ss:$8 sps:$4 sm:$0xff]  }
 0x148   : > { %2879 = vmatpush1.bf16.msra.mxu0 %v5300_v6  ;;  %v5384_v6 = vld [vmem:[%s7100_s1 + $0xbc0] ss:$8 sps:$4 sm:$0xff]  }
 0x149   : > { %2922 = vmatpush1.bf16.msra.mxu1 %v5303_v7  ;;  %2880 = vmatprep.subr.bf16.mxu0 %v5308_v8  ;;  %v5389_v7 = vld [vmem:[%s7100_s1 + $0xb34] ss:$8 sps:$4 sm:$0xff]  }
 0x14a   : > { %2923 = vmatprep.subr.bf16.mxu1 %v5311_v9  ;;  %v5392_v8 = vld [vmem:[%s7100_s1 + $0xbb4] ss:$8 sps:$4 sm:$0xff]   ;;  %v5387_v9 = vld [vmem:[%s7100_s1 + $0xb30] ss:$8 sps:$4 sm:$0xff]  }
 0x14c   : > { %2881 = vmatpush1.bf16.msra.mxu0 %v5306_v10  ;;  %v5390_v10 = vld [vmem:[%s7100_s1 + $0xbb0] ss:$8 sps:$4 sm:$0xff]  }
 0x14d   : > { %2924 = vmatpush1.bf16.msra.mxu1 %v5309_v11  ;;  %2882 = vmatprep.subr.bf16.mxu0 %v5314_v17  ;;  %v5398_v11 = vld [vmem:[%s7100_s1 + $0xba4] ss:$8 sps:$4 sm:$0xff]   ;;  %v5396_v17 = vld [vmem:[%s7100_s1 + $0xba0] ss:$8 sps:$4 sm:$0xff]  }
 0x14e   : > { %3265 = vmatprep.subr.bf16.mxu1 %v5317_v18  ;;  %v5401_v18 = vld [vmem:[%s7100_s1 + $0xb14] ss:$8 sps:$4 sm:$0xff]  }
 0x150   : > { %2942 = vmatmul.mubr.bf16.vlgmr.msra.gmra.mxu1 %v6693_v19  ;;  %2883 = vmatpush2.bf16.msra.mxu0 %v5312_v1  ;;  %v5399_v1 = vld [vmem:[%s7100_s1 + $0xb10] ss:$8 sps:$4 sm:$0xff]  }
 0x151   : > { %3266 = vmatpush1.bf16.msra.mxu1 %v5315_v20  ;;  %2884 = vmatprep.subr.bf16.mxu0 %v5321_v21  ;;  %v5402_v20 = vld [vmem:[%s7100_s1 + $0xb90] ss:$8 sps:$4 sm:$0xff]   ;;  %v4615_v21 = vcombine.low %v6666_v50, %v6666_v50 }
 0x152   : > { %3267 = vmatprep.subr.bf16.mxu1 %v5324_v22  ;;  %3297 = vmatprep.mubr.bf16.mxu1 %v3018_v23  ;;  %v4617_v22 = vcombine.low %v6873_v61, %v6873_v61  ;;  %v5407_v23 = vld [vmem:[%s7100_s1 + $0xb04] ss:$8 sps:$4 sm:$0xff]  }
 0x154   : > { %2885 = vmatpush2.bf16.msra.mxu0 %v5319_v24  ;;  %v5410_v24 = vld [vmem:[%s7100_s1 + $0xb84] ss:$8 sps:$4 sm:$0xff]  }
 0x155   : > { %3268 = vmatpush1.bf16.msra.mxu1 %v5322_v25  ;;  %2886 = vmatprep.subr.bf16.mxu0 %v5327_v26  ;;  %v3013_v25 = vrot.slane %v6796_v33, 2  ;;  %v3019_v26 = vrot.slane %v6693_v19, 2  ;;  %v5437_v19 = vld [vmem:[%s7100_s1 + $0xd74] ss:$8 sps:$4 sm:$0xff]  }
 0x156   : > { %3269 = vmatprep.subr.bf16.mxu1 %v5330_v27  ;;  %v5405_v27 = vld [vmem:[%s7100_s1 + $0xb00] ss:$8 sps:$4 sm:$0xff]  }
 0x158   : > { %2887 = vmatpush2.bf16.msra.mxu0 %v5325_v29  ;;  %v5408_v29 = vld [vmem:[%s7100_s1 + $0xb80] ss:$8 sps:$4 sm:$0xff]  }
 0x159   : > { %3270 = vmatpush1.bf16.msra.mxu1 %v5328_v30  ;;  %2888 = vmatprep.subr.bf16.mxu0 %v5333_v35  ;;  %v3014_v30 = vrot.slane %v4615_v21, 2  ;;  %v3020_v35 = vrot.slane %v4617_v22, 2  ;;  %v4714_v21 = vcombine.low %v6573_v36, %v6666_v50  ;;  %v639_v22 = vpop.f32.mrf.mxu1 }
 0x15a   : > { %3271 = vmatprep.subr.bf16.mxu1 %v5336_v37  ;;  %v5416_v37 = vld [vmem:[%s7100_s1 + $0xc74] ss:$8 sps:$4 sm:$0xff]  }
 0x15c   : > { %2889 = vmatpush2.bf16.msra.mxu0 %v5331_v38  ;;  %v3015_v38 = vsel %vm309_vm0, %v3013_v25, %v3014_v30 }
 0x15d   : > { %3272 = vmatpush1.bf16.msra.mxu1 %v5334_v39  ;;  %2890 = vmatprep.subr.bf16.mxu0 %v5339_v40  ;;  %v3021_v39 = vsel %vm309_vm0, %v3019_v26, %v3020_v35  ;;  %v5414_v40 = vld [vmem:[%s7100_s1 + $0xc70] ss:$8 sps:$4 sm:$0xff]  }
 0x15e   : > { %3273 = vmatprep.subr.bf16.mxu1 %v5342_v41  ;;  %v5435_v41 = vld [vmem:[%s7100_s1 + $0xd70] ss:$8 sps:$4 sm:$0xff]  }
 0x160   : > { %2891 = vmatpush2.bf16.msra.mxu0 %v5337_v42  ;;  %v5419_v42 = vld [vmem:[%s7100_s1 + $0xc64] ss:$8 sps:$4 sm:$0xff]  }
 0x161   : > { %3274 = vmatpush1.bf16.msra.mxu1 %v5340_v44  ;;  %2892 = vmatprep.subr.bf16.mxu0 %v5345_v45  ;;  %v5443_v44 = vld [vmem:[%s7100_s1 + $0xd64] ss:$8 sps:$4 sm:$0xff]   ;;  %v4715_v45 = vcombine.high %v6573_v36, %v6666_v50 }
 0x162   : > { %3275 = vmatprep.subr.bf16.mxu1 %v5348_v47  ;;  %v5417_v47 = vld [vmem:[%s7100_s1 + $0xc60] ss:$8 sps:$4 sm:$0xff]  }
 0x164   : > { %2893 = vmatpush2.bf16.msra.mxu0 %v5343_v48  ;;  %v5441_v48 = vld [vmem:[%s7100_s1 + $0xd60] ss:$8 sps:$4 sm:$0xff]  }
 0x165   : > { %3276 = vmatpush1.bf16.msra.mxu1 %v5346_v49  ;;  %2894 = vmatprep.subr.bf16.mxu0 %v5351_v51  ;;  %v5422_v49 = vld [vmem:[%s7100_s1 + $0xc54] ss:$8 sps:$4 sm:$0xff]  }
 0x166   : > { %3277 = vmatprep.subr.bf16.mxu1 %v5354_v52  ;;  %v5449_v51 = vld [vmem:[%s7100_s1 + $0xd54] ss:$8 sps:$4 sm:$0xff]   ;;  %v5420_v52 = vld [vmem:[%s7100_s1 + $0xc50] ss:$8 sps:$4 sm:$0xff]  }
 0x168   : > { %2895 = vmatpush2.bf16.msra.mxu0 %v5349_v53  ;;  %v5447_v53 = vld [vmem:[%s7100_s1 + $0xd50] ss:$8 sps:$4 sm:$0xff]  }
 0x169   : > { %3278 = vmatpush1.bf16.msra.mxu1 %v5352_v54  ;;  %2896 = vmatprep.subr.bf16.mxu0 %v5357_v55  ;;  %v5425_v54 = vld [vmem:[%s7100_s1 + $0xc44] ss:$8 sps:$4 sm:$0xff]   ;;  %v5423_v55 = vld [vmem:[%s7100_s1 + $0xc40] ss:$8 sps:$4 sm:$0xff]  }
 0x16a   : > { %3279 = vmatprep.subr.bf16.mxu1 %v5360_v46  ;;  %v5453_v46 = vld [vmem:[%s7100_s1 + $0xd40] ss:$8 sps:$4 sm:$0xff]  }
 0x16c   : > { %2897 = vmatpush2.bf16.msra.mxu0 %v5355_v12  ;;  %v5428_v12 = vld [vmem:[%s7100_s1 + $0xc34] ss:$8 sps:$4 sm:$0xff]  }
 0x16d   : > { %3280 = vmatpush1.bf16.msra.mxu1 %v5358_v13  ;;  %3308 = vmatprep.subr.bf16.mxu0 %v5368_v28  ;;  %v5461_v13 = vld [vmem:[%s7100_s1 + $0xd34] ss:$8 sps:$4 sm:$0xff]   ;;  %v5459_v28 = vld [vmem:[%s7100_s1 + $0xd30] ss:$8 sps:$4 sm:$0xff]  }
 0x16e   : > { %3281 = vmatprep.subr.bf16.mxu1 %v5365_v16  ;;  %v5426_v16 = vld [vmem:[%s7100_s1 + $0xc30] ss:$8 sps:$4 sm:$0xff]  }
 0x16f   : > { %2899 = vmatmul.mubr.bf16.vlgmr.msra.gmra.mxu0 %v6796_v33  ;;  %v5431_v33 = vld [vmem:[%s7100_s1 + $0xc24] ss:$8 sps:$4 sm:$0xff]  }
 0x170   : > { %3309 = vmatpush1.bf16.msra.mxu0 %v5366_v31  ;;  %3340 = vmatprep.mubr.bf16.mxu0 %v5529_v2  ;;  %v5429_v31 = vld [vmem:[%s7100_s1 + $0xc20] ss:$8 sps:$4 sm:$0xff]  }
 0x171   : > { %3282 = vmatpush2.bf16.msra.mxu1 %v5363_v43  ;;  %3310 = vmatprep.subr.bf16.mxu0 %v5374_v32  ;;  %v5467_v43 = vld [vmem:[%s7100_s1 + $0xd24] ss:$8 sps:$4 sm:$0xff]   ;;  %v5434_v32 = vld [vmem:[%s7100_s1 + $0xc14] ss:$8 sps:$4 sm:$0xff]  }
 0x172   : > { %3283 = vmatprep.subr.bf16.mxu1 %v5371_v56  ;;  %v5465_v56 = vld [vmem:[%s7100_s1 + $0xd20] ss:$8 sps:$4 sm:$0xff]  }
 0x174   : > { %3311 = vmatpush1.bf16.msra.mxu0 %v5372_v58  ;;  %v5432_v58 = vld [vmem:[%s7100_s1 + $0xc10] ss:$8 sps:$4 sm:$0xff]  }
 0x175   : > { %3284 = vmatpush2.bf16.msra.mxu1 %v5369_v57  ;;  %3312 = vmatprep.subr.bf16.mxu0 %v5380_v62  ;;  %v5473_v57 = vld [vmem:[%s7100_s1 + $0xd14] ss:$8 sps:$4 sm:$0xff]   ;;  %v5440_v62 = vld [vmem:[%s7100_s1 + $0xc04] ss:$8 sps:$4 sm:$0xff]  }
 0x176   : > { %3285 = vmatprep.subr.bf16.mxu1 %v5377_v59  ;;  %v5471_v59 = vld [vmem:[%s7100_s1 + $0xd10] ss:$8 sps:$4 sm:$0xff]  }
 0x178   : > { %3313 = vmatpush1.bf16.msra.mxu0 %v5378_v0  ;;  %v5438_v0 = vld [vmem:[%s7100_s1 + $0xc00] ss:$8 sps:$4 sm:$0xff]  }
 0x179   : > { %3286 = vmatpush2.bf16.msra.mxu1 %v5375_v63  ;;  %3314 = vmatprep.subr.bf16.mxu0 %v5386_v4  ;;  %v5479_v63 = vld [vmem:[%s7100_s1 + $0xd04] ss:$8 sps:$4 sm:$0xff]   ;;  %v5446_v4 = vld [vmem:[%s7100_s1 + $0xcf4] ss:$8 sps:$4 sm:$0xff]  }
 0x17a   : > { %3287 = vmatprep.subr.bf16.mxu1 %v5383_v3  ;;  %v5477_v3 = vld [vmem:[%s7100_s1 + $0xd00] ss:$8 sps:$4 sm:$0xff]  }
 0x17c   : > { %3315 = vmatpush1.bf16.msra.mxu0 %v5384_v6  ;;  %v5444_v6 = vld [vmem:[%s7100_s1 + $0xcf0] ss:$8 sps:$4 sm:$0xff]  }
 0x17d   : > { %3288 = vmatpush2.bf16.msra.mxu1 %v5381_v5  ;;  %3316 = vmatprep.subr.bf16.mxu0 %v5392_v8  ;;  %v4716_v5 = vcombine.low %v6684_v15, %v6873_v61  ;;  %v5450_v8 = vld [vmem:[%s7100_s1 + $0xce0] ss:$8 sps:$4 sm:$0xff]   ;;  %v5458_v15 = vld [vmem:[%s7100_s1 + $0xcd4] ss:$8 sps:$4 sm:$0xff]   ;;  %v5480_v61 = vld [vmem:[%s7100_s1 + $0xc90] ss:$8 sps:$4 sm:$0xff]  }
 0x17e   : > { %3289 = vmatprep.subr.bf16.mxu1 %v5389_v7  ;;  %v5452_v7 = vld [vmem:[%s7100_s1 + $0xce4] ss:$8 sps:$4 sm:$0xff]  }
 0x180   : > { %3317 = vmatpush1.bf16.msra.mxu0 %v5390_v10  ;;  %v5464_v10 = vld [vmem:[%s7100_s1 + $0xcc4] ss:$8 sps:$4 sm:$0xff]  }
 0x181   : > { %3290 = vmatpush2.bf16.msra.mxu1 %v5387_v9  ;;  %3318 = vmatprep.subr.bf16.mxu0 %v5398_v11  ;;  %v5456_v9 = vld [vmem:[%s7100_s1 + $0xcd0] ss:$8 sps:$4 sm:$0xff]   ;;  %v5470_v11 = vld [vmem:[%s7100_s1 + $0xcb4] ss:$8 sps:$4 sm:$0xff]  }
 0x182   : > { %3291 = vmatprep.subr.bf16.mxu1 %v5395_v34  ;;  %v5462_v34 = vld [vmem:[%s7100_s1 + $0xcc0] ss:$8 sps:$4 sm:$0xff]  }
 0x184   : > { %3319 = vmatpush1.bf16.msra.mxu0 %v5396_v17  ;;  %v5476_v17 = vld [vmem:[%s7100_s1 + $0xca4] ss:$8 sps:$4 sm:$0xff]  }
 0x185   : > { %3292 = vmatpush2.bf16.msra.mxu1 %v5393_v14  ;;  %3320 = vmatprep.subr.bf16.mxu0 %v5404_v60  ;;  %v5468_v14 = vld [vmem:[%s7100_s1 + $0xcb0] ss:$8 sps:$4 sm:$0xff]   ;;  %v5482_v60 = vld [vmem:[%s7100_s1 + $0xc94] ss:$8 sps:$4 sm:$0xff]  }
 0x186   : > { %3293 = vmatprep.subr.bf16.mxu1 %v5401_v18  ;;  %v5474_v18 = vld [vmem:[%s7100_s1 + $0xca0] ss:$8 sps:$4 sm:$0xff]  }
 0x188   : > { %3321 = vmatpush1.bf16.msra.mxu0 %v5402_v20  ;;  %v5484_v20 = vld [vmem:[%s7100_s1 + $0xc80] ss:$8 sps:$4 sm:$0xff]  }
 0x189   : > { %3294 = vmatpush2.bf16.msra.mxu1 %v5399_v1  ;;  %3322 = vmatprep.subr.bf16.mxu0 %v5410_v24  ;;  %v5486_v1 = vld [vmem:[%s7100_s1 + $0xc84] ss:$8 sps:$4 sm:$0xff]   ;;  %v596_v24 = vpop.f32.mrf.mxu0 }
 0x18a   : > { %3295 = vmatprep.subr.bf16.mxu1 %v5407_v23  ;;  %v641_v23 = vpop.f32.mrf.mxu1 }
 0x18b   : > { %v598_v26 = vpop.f32.mrf.mxu0 }
 0x18c   : > { %3323 = vmatpush1.bf16.msra.mxu0 %v5408_v29  ;;  %v643_v25 = vpop.f32.mrf.mxu1 }
 0x18d   : > { %3296 = vmatpush2.bf16.msra.mxu1 %v5405_v27  ;;  %3650 = vmatprep.subr.bf16.mxu0 %v5416_v37  ;;  %v600_v29 = vpop.f32.mrf.mxu0 }
 0x18e   : > { %3693 = vmatprep.subr.bf16.mxu1 %v5437_v19  ;;  %v645_v27 = vpop.f32.mrf.mxu1 }
 0x18f   : > { %3341 = vmatmul.mubr.bf16.vlgmr.msra.gmra.mxu0 %v3021_v39  ;;  %v602_v35 = vpop.f32.mrf.mxu0 }
 0x190   : > { %3298 = vmatmul.mubr.bf16.vlgmr.msra.gmra.mxu1 %v3015_v38  ;;  %3651 = vmatpush1.bf16.msra.mxu0 %v5414_v40  ;;  %v925_v30 = vpop.f32.mrf.mxu1 }
 0x191   : > { %3694 = vmatpush1.bf16.msra.mxu1 %v5435_v41  ;;  %3652 = vmatprep.subr.bf16.mxu0 %v5419_v42  ;;  %v968_v19 = vpop.f32.mrf.mxu0 }
 0x192   : > { %3695 = vmatprep.subr.bf16.mxu1 %v5443_v44  ;;  %3725 = vmatprep.mubr.bf16.mxu1 %v5529_v2  ;;  %v5455_v2 = vld [vmem:[%s7100_s1 + $0xd44] ss:$8 sps:$4 sm:$0xff]   ;;  %v927_v37 = vpop.f32.mrf.mxu1 }
 0x193   : > { %3682 = vmatprep.mubr.bf16.mxu0 %v4715_v45  ;;  %v970_v39 = vpop.f32.mrf.mxu0 }
 0x194   : > { %3653 = vmatpush1.bf16.msra.mxu0 %v5417_v47  ;;  %v929_v38 = vpop.f32.mrf.mxu1 }
 0x195   : > { %3696 = vmatpush1.bf16.msra.mxu1 %v5441_v48  ;;  %3654 = vmatprep.subr.bf16.mxu0 %v5422_v49  ;;  %v972_v41 = vpop.f32.mrf.mxu0 }
 0x196   : > { %3697 = vmatprep.subr.bf16.mxu1 %v5449_v51  ;;  %v931_v40 = vpop.f32.mrf.mxu1 }
 0x197   : > { %v7052_v44 = vpop.f32.mrf.mxu0 }
 0x198   : > { %3655 = vmatpush1.bf16.msra.mxu0 %v5420_v52  ;;  %v1349_v42 = vpop.f32.mrf.mxu1  ;;  %7103 = vst [vmem:[#allocation2_spill] sm:$0xff] %v7052_v44 }
 0x199   : > { %3698 = vmatpush1.bf16.msra.mxu1 %v5447_v53  ;;  %3656 = vmatprep.subr.bf16.mxu0 %v5425_v54  ;;  %v1306_v50 = vpop.f32.mrf.mxu0 }
 0x19a   : > { %3699 = vmatprep.subr.bf16.mxu1 %v5455_v2  ;;  %v1351_v36 = vpop.f32.mrf.mxu1  ;;  %v1350_v44 = vadd.f32 %v1349_v42, %v1306_v50 }
 0x19b   : > { %v1308_v47 = vpop.f32.mrf.mxu0 }
 0x19c   : > { %3657 = vmatpush1.bf16.msra.mxu0 %v5423_v55  ;;  %v1353_v45 = vpop.f32.mrf.mxu1 }
 0x19d   : > { %3700 = vmatpush1.bf16.msra.mxu1 %v5453_v46  ;;  %3658 = vmatprep.subr.bf16.mxu0 %v5428_v12  ;;  %v1310_v49 = vpop.f32.mrf.mxu0 }
 0x19e   : > { %3701 = vmatprep.subr.bf16.mxu1 %v5461_v13  ;;  %v1355_v48 = vpop.f32.mrf.mxu1 }
 0x19f   : > { %v1312_v52 = vpop.f32.mrf.mxu0 }
 0x1a0   : > { %3659 = vmatpush1.bf16.msra.mxu0 %v5426_v16  ;;  %v1711_v51 = vpop.f32.mrf.mxu1 }
 0x1a1   : > { %3702 = vmatpush1.bf16.msra.mxu1 %v5459_v28  ;;  %3660 = vmatprep.subr.bf16.mxu0 %v5431_v33  ;;  %v1754_v54 = vpop.f32.mrf.mxu0 }
 0x1a2   : > { %3703 = vmatprep.subr.bf16.mxu1 %v5467_v43  ;;  %v1713_v53 = vpop.f32.mrf.mxu1 }
 0x1a3   : > { %v1756_v55 = vpop.f32.mrf.mxu0 }
 0x1a4   : > { %3661 = vmatpush1.bf16.msra.mxu0 %v5429_v31  ;;  %v1715_v2 = vpop.f32.mrf.mxu1 }
 0x1a5   : > { %3704 = vmatpush1.bf16.msra.mxu1 %v5465_v56  ;;  %3662 = vmatprep.subr.bf16.mxu0 %v5434_v32  ;;  %v1758_v12 = vpop.f32.mrf.mxu0 }
 0x1a6   : > { %3705 = vmatprep.subr.bf16.mxu1 %v5473_v57  ;;  %v1717_v46 = vpop.f32.mrf.mxu1 }
 0x1a7   : > { %v1760_v16 = vpop.f32.mrf.mxu0 }
 0x1a8   : > { %3663 = vmatpush1.bf16.msra.mxu0 %v5432_v58 }
 0x1a9   : > { %3706 = vmatpush1.bf16.msra.mxu1 %v5471_v59  ;;  %3664 = vmatprep.subr.bf16.mxu0 %v5440_v62 }
 0x1aa   : > { %3707 = vmatprep.subr.bf16.mxu1 %v5479_v63 }
 0x1ac   : > { %3665 = vmatpush1.bf16.msra.mxu0 %v5438_v0 }
 0x1ad   : > { %3708 = vmatpush1.bf16.msra.mxu1 %v5477_v3  ;;  %3666 = vmatprep.subr.bf16.mxu0 %v5446_v4 }
 0x1b0   : > { %3726 = vmatmul.mubr.bf16.vlgmr.msra.gmra.mxu1 %v4716_v5  ;;  %3667 = vmatpush2.bf16.msra.mxu0 %v5444_v6  ;;  %v2153_v13 = vpop.f32.mrf.mxu1 }
 0x1b1   : > { %3668 = vmatprep.subr.bf16.mxu0 %v5452_v7 }
 0x1b2   : > { %v2155_v28 = vpop.f32.mrf.mxu1 }
 0x1b4   : > { %3669 = vmatpush2.bf16.msra.mxu0 %v5450_v8  ;;  %v2157_v43 = vpop.f32.mrf.mxu1 }
 0x1b5   : > { %3670 = vmatprep.subr.bf16.mxu0 %v5458_v15 }
 0x1b6   : > { %v7054_v56 = vpop.f32.mrf.mxu1 }
 0x1b7   : > { %7104 = vst [vmem:[#allocation3_spill] sm:$0xff] %v7054_v56 }
 0x1b8   : > { %3671 = vmatpush2.bf16.msra.mxu0 %v5456_v9 }
 0x1b9   : > { %3672 = vmatprep.subr.bf16.mxu0 %v5464_v10 }
 0x1bc   : > { %3673 = vmatpush2.bf16.msra.mxu0 %v5462_v34 }
 0x1bd   : > { %3674 = vmatprep.subr.bf16.mxu0 %v5470_v11 }
 0x1c0   : > { %3675 = vmatpush2.bf16.msra.mxu0 %v5468_v14  ;;  %v640_v14 = vadd.f32 %v639_v22, %v596_v24  ;;  %v1352_v22 = vadd.f32 %v1351_v36, %v1308_v47  ;;  %v1354_v24 = vadd.f32 %v1353_v45, %v1310_v49  ;;  %v1761_v45 = vadd.f32 %v1760_v16, %v1717_v46 }
 0x1c1   : > { %3676 = vmatprep.subr.bf16.mxu0 %v5476_v17  ;;  %v642_v17 = vadd.f32 %v641_v23, %v598_v26 }
 0x1c4   : > { %3677 = vmatpush2.bf16.msra.mxu0 %v5474_v18  ;;  %v644_v18 = vadd.f32 %v643_v25, %v600_v29  ;;  %v1755_v25 = vadd.f32 %v1754_v54, %v1711_v51 }
 0x1c5   : > { %3678 = vmatprep.subr.bf16.mxu0 %v5482_v60 }
 0x1c8   : > { %3679 = vmatpush2.bf16.msra.mxu0 %v5480_v61 }
 0x1c9   : > { %3680 = vmatprep.subr.bf16.mxu0 %v5486_v1  ;;  %v926_v1 = vadd.f32 %v925_v30, %v640_v14  ;;  %v1757_v14 = vadd.f32 %v1756_v55, %v1713_v53 }
 0x1cb   : > { %v969_v26 = vadd.f32 %v968_v19, %v926_v1 }
 0x1cc   : > { %3681 = vmatpush2.bf16.msra.mxu0 %v5484_v20  ;;  %v646_v20 = vadd.f32 %v645_v27, %v602_v35  ;;  %v3742_v27 = vlaneseq }
 0x1cd   : > { %v1358_v35 = vadd.f32 %v1350_v44, %v969_v26 }
 0x1ce   : > { %v7064_v54 = vshrl.u32 %v3742_v27, 7 }
 0x1cf   : > { %3683 = vmatmul.mubr.bf16.vlgmr.msra.gmra.mxu0 %v4714_v21  ;;  %v2110_v33 = vpop.f32.mrf.mxu0  ;;  %v928_v21 = vadd.f32 %v927_v37, %v642_v17  ;;  %v1356_v17 = vadd.f32 %v1355_v48, %v1312_v52  ;;  %v1759_v37 = vadd.f32 %v1758_v12, %v1715_v2  ;;  %v1763_v47 = vadd.f32 %v1755_v25, %v1358_v35  ;;  %v7109_v12 = vld [vmem:[#allocation3_spill] sm:$0xff] }
 0x1d1   : > { %v2112_v31 = vpop.f32.mrf.mxu0  ;;  %v971_v29 = vadd.f32 %v970_v39, %v928_v21 }
 0x1d3   : > { %v2114_v32 = vpop.f32.mrf.mxu0  ;;  %v1359_v50 = vadd.f32 %v1352_v22, %v971_v29 }
 0x1d4   : > { %v2158_v49 = vadd.f32 %v2157_v43, %v2114_v32 }
 0x1d5   : > { %v2116_v58 = vpop.f32.mrf.mxu0  ;;  %v1764_v51 = vadd.f32 %v1757_v14, %v1359_v50 }
 0x1ef   : > { %v2538_v62 = vpop.f32.mrf.mxu0 }
 0x1f0   : > { %v2495_v57 = vpop.f32.mrf.mxu1 }
 0x1f1   : > { %v2540_v0 = vpop.f32.mrf.mxu0  ;;  %v2539_v19 = vadd.f32 %v2538_v62, %v2495_v57 }
 0x1f2   : > { %v2497_v59 = vpop.f32.mrf.mxu1 }
 0x1f3   : > { %v2542_v4 = vpop.f32.mrf.mxu0  ;;  %v2541_v39 = vadd.f32 %v2540_v0, %v2497_v59 }
 0x1f4   : > { %v2499_v63 = vpop.f32.mrf.mxu1 }
 0x1f5   : > { %v2544_v6 = vpop.f32.mrf.mxu0 }
 0x1f6   : > { %v7056_v3 = vpop.f32.mrf.mxu1 }
 0x1f7   : > { %7105 = vst [vmem:[#allocation4_spill] sm:$0xff] %v7056_v3  ;;  %v930_v3 = vadd.f32 %v929_v38, %v644_v18  ;;  %v2154_v18 = vadd.f32 %v2153_v13, %v2110_v33  ;;  %v7108_v38 = vld [vmem:[#allocation2_spill] sm:$0xff]  ;;  %v2160_v13 = vadd.f32 %v7109_v12, %v2116_v58 }
 0x1f8   : > { %v3740_v58 = vld [vmem:[%s7101_s2] sm:$0x3] }
 0x1f9   : > { %v2162_v52 = vadd.f32 %v2154_v18, %v1763_v47 }
 0x1fb   : > { %v2547_v16 = vadd.f32 %v2539_v19, %v2162_v52 }
 0x1fe   : > { %v7110_v57 = vld [vmem:[#allocation4_spill] sm:$0xff] }
 0x1ff   : > { %v2545_v59 = vadd.f32 %v2544_v6, %v7110_v57 }
 0x210   : > { %v2943_v5 = vpop.f32.mrf.mxu1 }
 0x212   : > { %v2945_v7 = vpop.f32.mrf.mxu1 }
 0x214   : > { %v2947_v15 = vpop.f32.mrf.mxu1 }
 0x216   : > { %v7058_v10 = vpop.f32.mrf.mxu1 }
 0x217   : > { %7106 = vst [vmem:[#allocation5_spill] sm:$0xff] %v7058_v10  ;;  %v932_v10 = vadd.f32 %v931_v40, %v646_v20  ;;  %v2156_v40 = vadd.f32 %v2155_v28, %v2112_v31  ;;  %v2543_v28 = vadd.f32 %v2542_v4, %v2499_v63 }
 0x219   : > { %v975_v42 = vadd.f32 %v7108_v38, %v932_v10  ;;  %v2163_v55 = vadd.f32 %v2156_v40, %v1764_v51  ;;  %v3744_v10 = vsub.s32 0, %v7064_v54 }
 0x21b   : > { %v1361_v44 = vadd.f32 %v1356_v17, %v975_v42  ;;  %v2548_v32 = vadd.f32 %v2541_v39, %v2163_v55 }
 0x21d   : > { %v1766_v31 = vadd.f32 %v1761_v45, %v1361_v44 }
 0x21f   : > { %v2165_v63 = vadd.f32 %v2160_v13, %v1766_v31 }
 0x221   : > { %v2550_v21 = vadd.f32 %v2545_v59, %v2165_v63 }
 0x22f   : > { %v2900_v8 = vpop.f32.mrf.mxu0 }
 0x230   : > { %v2944_v2 = vadd.f32 %v2943_v5, %v2900_v8 }
 0x231   : > { %v2902_v9 = vpop.f32.mrf.mxu0 }
 0x232   : > { %v2946_v33 = vadd.f32 %v2945_v7, %v2902_v9  ;;  %v7112_v9 = vld [vmem:[#allocation5_spill] sm:$0xff] }
 0x233   : > { %v2904_v34 = vpop.f32.mrf.mxu0 }
 0x234   : > { %v2948_v62 = vadd.f32 %v2947_v15, %v2904_v34  ;;  %v2953_v5 = vadd.f32 %v2946_v33, %v2548_v32 }
 0x235   : > { %v7060_v60 = vpop.f32.mrf.mxu0 }
 0x236   : > { %7107 = vst [vmem:[#allocation6_spill] sm:$0xff] %v7060_v60  ;;  %v973_v60 = vadd.f32 %v972_v41, %v930_v3 }
 0x238   : > { %v1360_v20 = vadd.f32 %v1354_v24, %v973_v60  ;;  %v2952_v60 = vadd.f32 %v2944_v2, %v2547_v16 }
 0x23a   : > { %v1765_v48 = vadd.f32 %v1759_v37, %v1360_v20 }
 0x23c   : > { %v2164_v46 = vadd.f32 %v2158_v49, %v1765_v48 }
 0x23d   : > { %v7111_v8 = vld [vmem:[#allocation6_spill] sm:$0xff] }
 0x23e   : > { %v2549_v4 = vadd.f32 %v2543_v28, %v2164_v46  ;;  %v2950_v6 = vadd.f32 %v7112_v9, %v7111_v8 }
 0x240   : > { %v2954_v22 = vadd.f32 %v2948_v62, %v2549_v4  ;;  %v2955_v37 = vadd.f32 %v2950_v6, %v2550_v21 }
 0x24f   : > { %v3342_v56 = vpop.f32.mrf.mxu0 }
 0x250   : > { %v3299_v11 = vpop.f32.mrf.mxu1 }
 0x251   : > { %v3344_v30 = vpop.f32.mrf.mxu0  ;;  %v3343_v43 = vadd.f32 %v3342_v56, %v3299_v11  ;;  %v3748_v56 = vsub.s32 1, %v7064_v54 }
 0x252   : > { %v3301_v61 = vpop.f32.mrf.mxu1 }
 0x253   : > { %v3346_v41 = vpop.f32.mrf.mxu0  ;;  %v3345_v1 = vadd.f32 %v3344_v30, %v3301_v61  ;;  %v3351_v15 = vadd.f32 %v3343_v43, %v2952_v60  ;;  %v3745_v61 = vrot.slane %v3740_v58, %v3744_v10  ;;  %v3749_v35 = vrot.slane %v3740_v58, %v3748_v56 }
 0x254   : > { %v3303_v23 = vpop.f32.mrf.mxu1 }
 0x255   : > { %v3348_v0 = vpop.f32.mrf.mxu0  ;;  %v3347_v34 = vadd.f32 %v3346_v41, %v3303_v23  ;;  %v3352_v25 = vadd.f32 %v3345_v1, %v2953_v5 }
 0x256   : > { %v3305_v36 = vpop.f32.mrf.mxu1 }
 0x257   : > { %v3349_v29 = vadd.f32 %v3348_v0, %v3305_v36  ;;  %v3353_v18 = vadd.f32 %v3347_v34, %v2954_v22 }
 0x259   : > { %v3354_v40 = vadd.f32 %v3349_v29, %v2955_v37 }
 0x270   : > { %v3727_v53 = vpop.f32.mrf.mxu1 }
 0x272   : > { %v3729_v3 = vpop.f32.mrf.mxu1 }
 0x274   : > { %v3731_v24 = vpop.f32.mrf.mxu1 }
 0x276   : > { %v3733_v50 = vpop.f32.mrf.mxu1 }
 0x28f   : > { %v3684_v7 = vpop.f32.mrf.mxu0 }
 0x290   : > { %v3728_v11 = vadd.f32 %v3727_v53, %v3684_v7 }
 0x291   : > { %v3686_v26 = vpop.f32.mrf.mxu0 }
 0x292   : > { %v3736_v14 = vadd.f32 %v3728_v11, %v3351_v15  ;;  %v3730_v30 = vadd.f32 %v3729_v3, %v3686_v26 }
 0x293   : > { %v3688_v17 = vpop.f32.mrf.mxu0 }
 0x294   : > { %v3737_v38 = vadd.f32 %v3730_v30, %v3352_v25  ;;  %v3732_v42 = vadd.f32 %v3731_v24, %v3688_v17  ;;  %v3752_v23 = vadd.f32 %v3745_v61, %v3736_v14 }
 0x295   : > { %v3690_v20 = vpop.f32.mrf.mxu0 }
 0x296   : > { %v3738_v47 = vadd.f32 %v3732_v42, %v3353_v18  ;;  %v3734_v45 = vadd.f32 %v3733_v50, %v3690_v20  ;;  %v3753_v49 = vadd.f32 %v3749_v35, %v3737_v38  ;;  %v3756_v39 = vmax.f32 %v3752_v23, 0.0 }
 0x298   : > { %v3754_v19 = vadd.f32 %v3745_v61, %v3738_v47  ;;  %v3739_v51 = vadd.f32 %v3734_v45, %v3354_v40  ;;  %v3757_v53 = vmax.f32 %v3753_v49, 0.0 }
 0x29a   : > { %v3758_v41 = vmax.f32 %v3754_v19, 0.0  ;;  %v3755_v36 = vadd.f32 %v3749_v35, %v3739_v51 }
 0x29c   : > { %v3760_v44 = vmax.f32 %v3756_v39, %v3758_v41  ;;  %v3759_v48 = vmax.f32 %v3755_v36, 0.0 }
 0x29e   : > { %v3761_v52 = vrot.slane %v3760_v44, 4  ;;  %v3767_v2 = vmax.f32 %v3757_v53, %v3759_v48 }
 0x2a0   : > { %v3762_v55 = vmax.f32 %v3760_v44, %v3761_v52  ;;  %v3768_v12 = vrot.slane %v3767_v2, 4 }
 0x2a2   : > { %v3763_v13 = vrot.slane %v3762_v55, 2  ;;  %v3769_v28 = vmax.f32 %v3767_v2, %v3768_v12 }
 0x2a4   : > { %v3764_v33 = vmax.f32 %v3762_v55, %v3763_v13  ;;  %v3770_v31 = vrot.slane %v3769_v28, 2 }
 0x2a6   : > { %v3765_v46 = vrot.slane %v3764_v33, 1  ;;  %v3771_v16 = vmax.f32 %v3769_v28, %v3770_v31  ;;  %3777 = sbr.rel (%p4765_p6) target bundleno = 695 (0x2b7), region = 36 }
 0x2a8   : > { %v3766_v43 = vmax.f32 %v3764_v33, %v3765_v46  ;;  %v3772_v32 = vrot.slane %v3771_v16, 1 }
 0x2aa   : > { %v3773_v57 = vmax.f32 %v3771_v16, %v3772_v32 }
 0x2ab   : > { %v5530_v59 = vmov 1966171168   ;;  %vm3798_vm1 = vcmp.lt.s32.totalorder %v3742_v27, 256 }
 0x2ac   : > { %v3782_v62 = vunpack.c.l.s4 %v5530_v59  ;;  %v3780_v0 = vcombine.low %v3766_v43, %v3773_v57 }
 0x2ae   : > { %v3783_v3 = vunpack.c.0.s8 %v3782_v62 }
 0x2b0   : > { %v3786_v10 = vsub.s32 %v3783_v3, %v7064_v54 }
 0x2b2   : > { %v3787_v60 = vrot.slane %v3780_v0, %v3786_v10 }
 0x2b4   : > { %v3794_v1 = vrot.slane %v3787_v60, %v3786_v10 }
 0x2b6   : > { %3800 = vst.msk [vmem:[%s5618_s20] sm:$0x3] %vm3798_vm1, %v3794_v1 }
 0x2b7 PF: > { %p4766_p7 = scmp.le.s32.totalorder %s5511_s12, 0 }
 0x2b9   : > { %3804 = sbr.rel (%p4766_p7) target bundleno = 716 (0x2cc), region = 40 }
 0x2be   : > { %v5531_v58 = vmov 1966171168   ;;  %v3808_v4 = vcombine.low %v3766_v43, %v3773_v57  ;;  %v3805_v8 = vld [vmem:[%s5618_s20] sm:$0x3]  ;;  %vm3827_vm2 = vcmp.lt.s32.totalorder %v3742_v27, 256 }
 0x2bf   : > { %v3810_v63 = vunpack.c.l.s4 %v5531_v58 }
 0x2c1   : > { %v3811_v5 = vunpack.c.0.s8 %v3810_v63 }
 0x2c3   : > { %v3814_v7 = vsub.s32 %v3811_v5, %v7064_v54 }
 0x2c5   : > { %v3815_v56 = vrot.slane %v3808_v4, %v3814_v7 }
 0x2c7   : > { %v3822_v9 = vrot.slane %v3815_v56, %v3814_v7 }
 0x2c9   : > { %v3824_v6 = vmax.f32 %v3805_v8, %v3822_v9 }
 0x2cb   : > { %3829 = vst.msk [vmem:[%s5618_s20] sm:$0x3] %vm3827_vm2, %v3824_v6 }
 0x2cc PF: > { %s13_s16 = sadd.s32 1, %s5527_s16   ;;  %s7113_s12 = smov %s5519_s14 }
 0x2cd   : > { %p10_p8 = scmp.ge.s32.totalorder %s13_s16, 10   ;;  %s7114_s13 = smov %s5523_s15 }
 0x2ce   : > { %s7115_s14 = smov %s7118_s17  ;;  %s7116_s15 = smov %s7122_s18 }
 0x2cf   :  { %12 = sbr.rel (!%p10_p8) target bundleno = 3 (0x3), region = 81 }

</bundles_post_ra>
